<compile_context>
chip_gen: v6e
topology: v6e:2x2x1
jax: 0.10.0
libtpu: 0.0.40
codegen_flags: <defaults>
</compile_context>

<pallas_src>
import functools

import jax
import jax.numpy as jnp
from jax.experimental import pallas as pl
from jax.experimental.pallas import tpu as pltpu

BN_EPS = 1e-5
DW_PAD = 2          # DSConv: 5x5 depthwise conv, padding=2 ('same')


# --------------------------------------------------------------------- kernel helpers

def _depthwise(pad_ref, x, w_ref, b_ref, H, W, pad=DW_PAD):
    """Depthwise (2*pad+1)^2 'same' conv + bias + ReLU, channels-first flat.

    x:(C, H*W)   pad_ref:(C, (H+2*pad)*W + 2*pad) VMEM scratch
    w_ref:(C, k*k) per-channel taps   b_ref:(C, 1)
    Taps are static lane-offset slices of the zero-padded flat row; the W
    boundary is handled with an iota mask (out-of-range rows read zeros).
    """
    C, HW = x.shape
    k = 2 * pad + 1
    pad_ref[...] = jnp.zeros(pad_ref.shape, pad_ref.dtype)
    center = pad * W + pad
    pad_ref[:, center:center + HW] = x
    col = jax.lax.broadcasted_iota(jnp.int32, (1, HW), 1) % W
    acc = jnp.zeros((C, HW), jnp.float32)
    for ky in range(k):
        dy = ky - pad
        if abs(dy) >= H:          # whole tap row lies in the zero padding
            continue
        for kx in range(k):
            dx = kx - pad
            if abs(dx) >= W:      # whole tap column is masked out
                continue
            t = ky * k + kx
            off = pad + (pad + dy) * W + dx
            tap = pad_ref[:, off:off + HW]
            if dx != 0:
                valid = (col >= -dx) & (col < W - dx)
                tap = jnp.where(valid, tap, 0.0)
            acc = acc + tap * w_ref[:, t:t + 1]
    return jnp.maximum(acc + b_ref[...], 0.0)


def _atrous3x3(pad_ref, x, w_r, b_r, rate, H, W):
    """3x3 atrous conv (dilation=rate, padding=rate) + bias + ReLU.

    x:(Cin, H*W)   w_r:(9, Cout, Cin) value   b_r:(Cout, 1) value
    Returns (Cout, H*W).  Taps whose contribution is exactly zero (offset
    beyond the feature map for this rate) are skipped statically.
    """
    Cin, HW = x.shape
    Cout = w_r.shape[1]
    pad_ref[...] = jnp.zeros(pad_ref.shape, pad_ref.dtype)
    center = rate * W + rate
    pad_ref[:, center:center + HW] = x
    col = jax.lax.broadcasted_iota(jnp.int32, (1, HW), 1) % W
    acc = jnp.zeros((Cout, HW), jnp.float32)
    for ky in range(3):
        dy = (ky - 1) * rate
        if dy != 0 and rate >= H:
            continue
        for kx in range(3):
            dx = (kx - 1) * rate
            if dx != 0 and rate >= W:
                continue
            t = ky * 3 + kx
            off = rate + (rate + dy) * W + dx
            tap = pad_ref[:, off:off + HW]
            if dx != 0:
                valid = (col >= -dx) & (col < W - dx)
                tap = jnp.where(valid, tap, 0.0)
            acc = acc + jnp.dot(w_r[t], tap, preferred_element_type=jnp.float32)
    return jnp.maximum(acc + b_r, 0.0)


# --------------------------------------------------------------------- fused kernel

def _encoder_kernel(*refs, hi_hw, low_hw, rates, n_low):
    it = iter(refs)
    x_hi_ref = next(it)
    low_refs = [next(it) for _ in range(n_low)]
    up_refs = [next(it) for _ in range(n_low)]
    (w_b0, b_b0, w_atr, b_atr, w_pool, b_pool, w_proj, b_proj) = [next(it) for _ in range(8)]
    stage_w = [[next(it) for _ in range(9)] for _ in range(n_low)]
    o_ref = next(it)
    aspp_pad = next(it)
    stage_pads = [(next(it), next(it)) for _ in range(n_low)]
    assert next(it, None) is None, "ref unpacking mismatch"

    H5, W5 = hi_hw
    x5 = x_hi_ref[0]                                                # (C5, H5*W5)

    # ---------------- ASPP ----------------
    branches = [jnp.maximum(                                        # 1x1 Conv-BN-ReLU
        jnp.dot(w_b0[...], x5, preferred_element_type=jnp.float32) + b_b0[...], 0.0)]
    for r_i, rate in enumerate(rates):                              # atrous 3x3 branches
        branches.append(_atrous3x3(aspp_pad, x5, w_atr[r_i], b_atr[r_i], rate, H5, W5))
    pooled = jnp.mean(x5, axis=1, keepdims=True)                    # (C5, 1) global pool
    pool_out = jnp.maximum(
        jnp.dot(w_pool[...], pooled, preferred_element_type=jnp.float32) + b_pool[...], 0.0)

    # projection 1x1 Conv-BN-ReLU over the (virtual) channel concat: the proj
    # weight is pre-split per branch, so no concat is ever materialised.
    proj = b_proj[...]
    for b_i, br in enumerate(branches):
        proj = proj + jnp.dot(w_proj[b_i], br, preferred_element_type=jnp.float32)
    proj = proj + jnp.dot(w_proj[len(branches)], pool_out,
                          preferred_element_type=jnp.float32)       # broadcasts over H*W
    x = jnp.maximum(proj, 0.0)                                      # (A, H5*W5)

    # ---------------- decoder stages ----------------
    for i in range(n_low):
        H, W = low_hw[i]
        (w_fp, b_fp, w_dwx, b_dwx, w_dwf, b_dwf, w_pwx, w_pwf, b_pw) = stage_w[i]
        pad_x, pad_f = stage_pads[i]

        f = low_refs[i][0]                                          # (Cll, H*W) native NCHW
        f = jnp.maximum(                                            # 1x1 Conv-BN-ReLU proj
            jnp.dot(w_fp[...], f, preferred_element_type=jnp.float32) + b_fp[...], 0.0)

        # bilinear upsample (align_corners=True) as a single matmul, H*W on lanes
        x = jnp.dot(x, up_refs[i][...], preferred_element_type=jnp.float32)

        # DSConv on the (virtual) concat([x, f]): the depthwise 5x5 + BN + ReLU is
        # per-channel so it is applied per group; the pointwise 1x1 + BN + ReLU is
        # the sum of the two group matmuls.
        dwx = _depthwise(pad_x, x, w_dwx, b_dwx, H, W)
        dwf = _depthwise(pad_f, f, w_dwf, b_dwf, H, W)
        x = (jnp.dot(w_pwx[...], dwx, preferred_element_type=jnp.float32)
             + jnp.dot(w_pwf[...], dwf, preferred_element_type=jnp.float32)
             + b_pw[...])
        x = jnp.maximum(x, 0.0)                                     # (D, H*W)

    o_ref[...] = x[None]                                            # lane-dense (1, D, H*W)


# --------------------------------------------------------------------- JAX-side setup

def _interp_matrix(out_size, in_size):
    """Bilinear interpolation matrix, align_corners=True. (out_size, in_size)."""
    idx = jnp.arange(out_size, dtype=jnp.float32)
    if out_size > 1:
        src = idx * (in_size - 1) / (out_size - 1)
    else:
        src = jnp.zeros((out_size,), jnp.float32)
    lo = jnp.clip(jnp.floor(src).astype(jnp.int32), 0, in_size - 1)
    hi = jnp.minimum(lo + 1, in_size - 1)
    frac = src - lo.astype(jnp.float32)
    return (jax.nn.one_hot(lo, in_size, dtype=jnp.float32) * (1.0 - frac)[:, None]
            + jax.nn.one_hot(hi, in_size, dtype=jnp.float32) * frac[:, None])


def _upsample_matrix(h1, w1, h2, w2):
    """Combined (h1*w1, h2*w2) bilinear upsample matrix (align_corners=True)."""
    ah = _interp_matrix(h2, h1)                                     # (h2, h1)
    aw = _interp_matrix(w2, w1)                                     # (w2, w1)
    m = ah.T[:, None, :, None] * aw.T[None, :, None, :]             # (h1, w1, h2, w2)
    return m.reshape(h1 * w1, h2 * w2)


def _bn_params(key, c):
    k1, k2, k3, k4 = jax.random.split(key, 4)
    gamma = 1.0 + 0.1 * jax.random.normal(k1, (c,), jnp.float32)
    beta = 0.1 * jax.random.normal(k2, (c,), jnp.float32)
    mean = 0.1 * jax.random.normal(k3, (c,), jnp.float32)
    var = 1.0 + 0.1 * jax.random.uniform(k4, (c,), jnp.float32)
    return gamma, beta, mean, var


def _fold_bn(w, bn):
    """Fold inference-mode BatchNorm into the conv weight (out channels last)."""
    gamma, beta, mean, var = bn
    scale = gamma / jnp.sqrt(var + BN_EPS)
    return w * scale, beta - mean * scale


def make_params(key, cfg):
    keys = iter(jax.random.split(key, 64))
    nk = lambda: next(keys)
    conv = lambda shape: 0.1 * jax.random.normal(nk(), shape, jnp.float32)

    Cin = cfg["fpn_feature_channels"]
    A = cfg["aspp_channels"]
    D = cfg["decoder_channels"]
    rates = tuple(cfg["atrous_rates"])
    R = len(rates)

    # ASPP --------------------------------------------------------------
    w_b0, b_b0 = _fold_bn(conv((Cin, A)), _bn_params(nk(), A))
    atr_w, atr_b = [], []
    for _ in rates:
        w, b = _fold_bn(conv((9, Cin, A)), _bn_params(nk(), A))
        atr_w.append(jnp.transpose(w, (0, 2, 1)))                   # (9, A, Cin)
        atr_b.append(b.reshape(A, 1))
    w_pool, b_pool = _fold_bn(conv((Cin, A)), _bn_params(nk(), A))
    w_proj, b_proj = _fold_bn(conv(((2 + R) * A, A)), _bn_params(nk(), A))
    # split the projection weight per concatenated branch ([1x1, atrous..., pool])
    w_proj_split = jnp.stack([w_proj[i * A:(i + 1) * A].T for i in range(2 + R)], axis=0)

    aspp = dict(
        w_b0=w_b0.T, b_b0=b_b0.reshape(A, 1),
        w_atr=jnp.stack(atr_w, axis=0), b_atr=jnp.stack(atr_b, axis=0),
        w_pool=w_pool.T, b_pool=b_pool.reshape(A, 1),
        w_proj=w_proj_split, b_proj=b_proj.reshape(A, 1),
    )

    # decoder stages ------------------------------------------------------
    stages = []
    for i, (cll, pc) in enumerate(zip(cfg["low_level_channels"],
                                      cfg["low_level_project_channels"])):
        w_fp, b_fp = _fold_bn(conv((cll, pc)), _bn_params(nk(), pc))
        xc = A if i == 0 else D                     # channels arriving from the x path
        merged = xc + pc
        w_dw, b_dw = _fold_bn(conv((25, 1, merged)), _bn_params(nk(), merged))
        w_dw = w_dw.reshape(25, merged).T                           # (merged, 25)
        w_pw, b_pw = _fold_bn(conv((merged, D)), _bn_params(nk(), D))
        stages.append(dict(
            w_fp=w_fp.T, b_fp=b_fp.reshape(pc, 1),
            w_dwx=w_dw[:xc], b_dwx=b_dw[:xc].reshape(xc, 1),
            w_dwf=w_dw[xc:], b_dwf=b_dw[xc:].reshape(pc, 1),
            w_pwx=w_pw[:xc].T, w_pwf=w_pw[xc:].T, b_pw=b_pw.reshape(D, 1),
        ))
    return dict(aspp=aspp, stages=stages)


def deeplab_encoder_forward(features_nchw, params, cfg):
    hi = features_nchw[cfg["fpn_feature_key"]]
    N, C5, H5, W5 = hi.shape
    low = [features_nchw[k] for k in cfg["fpn_low_level_feature_keys"]]
    n_low = len(low)
    rates = tuple(cfg["atrous_rates"])
    A = cfg["aspp_channels"]
    D = cfg["decoder_channels"]

    # flatten spatial (free reshape) -- channels stay major, exactly the kernel layout
    x_hi = hi.reshape(N, C5, H5 * W5)
    low_flat, low_hw = [], []
    for f in low:
        _, Cf, Hf, Wf = f.shape
        low_flat.append(f.reshape(N, Cf, Hf * Wf))
        low_hw.append((Hf, Wf))

    # precomputed bilinear upsample matrices (align_corners=True)
    ups, prev = [], (H5, W5)
    for (Hf, Wf) in low_hw:
        ups.append(_upsample_matrix(prev[0], prev[1], Hf, Wf))
        prev = (Hf, Wf)

    inputs = [x_hi] + low_flat + ups
    inputs += [params["aspp"][k] for k in
               ("w_b0", "b_b0", "w_atr", "b_atr", "w_pool", "b_pool", "w_proj", "b_proj")]
    for st in params["stages"]:
        inputs += [st[k] for k in
                   ("w_fp", "b_fp", "w_dwx", "b_dwx", "w_dwf", "b_dwf",
                    "w_pwx", "w_pwf", "b_pw")]

    H_out, W_out = low_hw[-1]
    out_shape = jax.ShapeDtypeStruct((N, D, H_out * W_out), jnp.float32)

    def batch_spec(a):
        nd = a.ndim
        return pl.BlockSpec((1,) + a.shape[1:],
                            lambda i, _nd=nd: (i,) + (0,) * (_nd - 1))

    def full_spec(a):
        nd = a.ndim
        return pl.BlockSpec(a.shape, lambda i, _nd=nd: (0,) * _nd)

    in_specs = ([batch_spec(x_hi)] + [batch_spec(f) for f in low_flat]
                + [full_spec(a) for a in inputs[1 + n_low:]])
    out_spec = pl.BlockSpec((1, D, H_out * W_out), lambda i: (i, 0, 0))

    # VMEM scratch: zero-padded flat rows for in-kernel conv tap gathering
    rmax = max(rates)
    scratch = [pltpu.VMEM((C5, (H5 + 2 * rmax) * W5 + 2 * rmax), jnp.float32)]
    xc = A
    for i, (Hf, Wf) in enumerate(low_hw):
        L = (Hf + 2 * DW_PAD) * Wf + 2 * DW_PAD
        P = cfg["low_level_project_channels"][i]
        scratch.append(pltpu.VMEM((xc, L), jnp.float32))
        scratch.append(pltpu.VMEM((P, L), jnp.float32))
        xc = D

    kernel = functools.partial(_encoder_kernel, hi_hw=(H5, W5),
                               low_hw=tuple(low_hw), rates=rates, n_low=n_low)

    out = pl.pallas_call(
        kernel,
        out_shape=out_shape,
        grid=(N,),
        in_specs=in_specs,
        out_specs=out_spec,
        scratch_shapes=scratch,
        compiler_params=pltpu.CompilerParams(dimension_semantics=("parallel",)),
    )(*inputs)
    return out.reshape(N, D, H_out, W_out)                          # already NCHW


# --------------------------------------------------------------------- main

if __name__ == "__main__":
    cfg = dict(
        fpn_feature_key="p5",
        fpn_feature_channels=8,
        fpn_low_level_feature_keys=["p3", "p2"],
        low_level_channels=[6, 4],
        low_level_project_channels=[8, 4],
        decoder_channels=16,
        aspp_channels=16,
        atrous_rates=(6, 12, 18),
    )

    key = jax.random.PRNGKey(0)
    kp, k5, k3, k2 = jax.random.split(key, 4)
    params = make_params(kp, cfg)

    features = {
        "p5": jax.random.normal(k5, (2, 8, 4, 4), jnp.float32),     # NCHW
        "p3": jax.random.normal(k3, (2, 6, 8, 8), jnp.float32),
        "p2": jax.random.normal(k2, (2, 4, 16, 16), jnp.float32),
    }

    out = deeplab_encoder_forward(features, params, cfg)
    out = jax.block_until_ready(out)
    assert out.shape == (2, cfg["decoder_channels"], 16, 16), out.shape
    print("KERNEL_OK")
</pallas_src>

<mosaic_0001>
module attributes {stable_mosaic.version = 11 : i64} {
  func.func @_encoder_kernel(%arg0: i32, %arg1: memref<1x8x16xf32, #tpu.memory_space<vmem>>, %arg2: memref<1x6x64xf32, #tpu.memory_space<vmem>>, %arg3: memref<1x4x256xf32, #tpu.memory_space<vmem>>, %arg4: memref<16x64xf32, #tpu.memory_space<vmem>>, %arg5: memref<64x256xf32, #tpu.memory_space<vmem>>, %arg6: memref<16x8xf32, #tpu.memory_space<vmem>>, %arg7: memref<16x1xf32, #tpu.memory_space<vmem>>, %arg8: memref<3x9x16x8xf32, #tpu.memory_space<vmem>>, %arg9: memref<3x16x1xf32, #tpu.memory_space<vmem>>, %arg10: memref<16x8xf32, #tpu.memory_space<vmem>>, %arg11: memref<16x1xf32, #tpu.memory_space<vmem>>, %arg12: memref<5x16x16xf32, #tpu.memory_space<vmem>>, %arg13: memref<16x1xf32, #tpu.memory_space<vmem>>, %arg14: memref<8x6xf32, #tpu.memory_space<vmem>>, %arg15: memref<8x1xf32, #tpu.memory_space<vmem>>, %arg16: memref<16x25xf32, #tpu.memory_space<vmem>>, %arg17: memref<16x1xf32, #tpu.memory_space<vmem>>, %arg18: memref<8x25xf32, #tpu.memory_space<vmem>>, %arg19: memref<8x1xf32, #tpu.memory_space<vmem>>, %arg20: memref<16x16xf32, #tpu.memory_space<vmem>>, %arg21: memref<16x8xf32, #tpu.memory_space<vmem>>, %arg22: memref<16x1xf32, #tpu.memory_space<vmem>>, %arg23: memref<4x4xf32, #tpu.memory_space<vmem>>, %arg24: memref<4x1xf32, #tpu.memory_space<vmem>>, %arg25: memref<16x25xf32, #tpu.memory_space<vmem>>, %arg26: memref<16x1xf32, #tpu.memory_space<vmem>>, %arg27: memref<4x25xf32, #tpu.memory_space<vmem>>, %arg28: memref<4x1xf32, #tpu.memory_space<vmem>>, %arg29: memref<16x16xf32, #tpu.memory_space<vmem>>, %arg30: memref<16x4xf32, #tpu.memory_space<vmem>>, %arg31: memref<16x1xf32, #tpu.memory_space<vmem>>, %arg32: memref<1x16x256xf32, #tpu.memory_space<vmem>>, %arg33: memref<8x196xf32, #tpu.memory_space<vmem>>, %arg34: memref<16x100xf32, #tpu.memory_space<vmem>>, %arg35: memref<8x100xf32, #tpu.memory_space<vmem>>, %arg36: memref<16x324xf32, #tpu.memory_space<vmem>>, %arg37: memref<4x324xf32, #tpu.memory_space<vmem>>) attributes {dimension_semantics = [#tpu.dimension_semantics<parallel>], iteration_bounds = array<i64: 2>, scalar_prefetch = 0 : i64, scratch_operands = 5 : i64, tpu.core_type = #tpu.core_type<tc>, window_params = [{transform_indices = @transform_0, window_bounds = array<i64: 1, 8, 16>}, {transform_indices = @transform_1, window_bounds = array<i64: 1, 6, 64>}, {transform_indices = @transform_2, window_bounds = array<i64: 1, 4, 256>}, {pipeline_mode = #tpu.pipeline_mode<synchronous>, transform_indices = @transform_3, window_bounds = array<i64: 16, 64>}, {pipeline_mode = #tpu.pipeline_mode<synchronous>, transform_indices = @transform_4, window_bounds = array<i64: 64, 256>}, {pipeline_mode = #tpu.pipeline_mode<synchronous>, transform_indices = @transform_5, window_bounds = array<i64: 16, 8>}, {pipeline_mode = #tpu.pipeline_mode<synchronous>, transform_indices = @transform_6, window_bounds = array<i64: 16, 1>}, {pipeline_mode = #tpu.pipeline_mode<synchronous>, transform_indices = @transform_7, window_bounds = array<i64: 3, 9, 16, 8>}, {pipeline_mode = #tpu.pipeline_mode<synchronous>, transform_indices = @transform_8, window_bounds = array<i64: 3, 16, 1>}, {pipeline_mode = #tpu.pipeline_mode<synchronous>, transform_indices = @transform_9, window_bounds = array<i64: 16, 8>}, {pipeline_mode = #tpu.pipeline_mode<synchronous>, transform_indices = @transform_10, window_bounds = array<i64: 16, 1>}, {pipeline_mode = #tpu.pipeline_mode<synchronous>, transform_indices = @transform_11, window_bounds = array<i64: 5, 16, 16>}, {pipeline_mode = #tpu.pipeline_mode<synchronous>, transform_indices = @transform_12, window_bounds = array<i64: 16, 1>}, {pipeline_mode = #tpu.pipeline_mode<synchronous>, transform_indices = @transform_13, window_bounds = array<i64: 8, 6>}, {pipeline_mode = #tpu.pipeline_mode<synchronous>, transform_indices = @transform_14, window_bounds = array<i64: 8, 1>}, {pipeline_mode = #tpu.pipeline_mode<synchronous>, transform_indices = @transform_15, window_bounds = array<i64: 16, 25>}, {pipeline_mode = #tpu.pipeline_mode<synchronous>, transform_indices = @transform_16, window_bounds = array<i64: 16, 1>}, {pipeline_mode = #tpu.pipeline_mode<synchronous>, transform_indices = @transform_17, window_bounds = array<i64: 8, 25>}, {pipeline_mode = #tpu.pipeline_mode<synchronous>, transform_indices = @transform_18, window_bounds = array<i64: 8, 1>}, {pipeline_mode = #tpu.pipeline_mode<synchronous>, transform_indices = @transform_19, window_bounds = array<i64: 16, 16>}, {pipeline_mode = #tpu.pipeline_mode<synchronous>, transform_indices = @transform_20, window_bounds = array<i64: 16, 8>}, {pipeline_mode = #tpu.pipeline_mode<synchronous>, transform_indices = @transform_21, window_bounds = array<i64: 16, 1>}, {pipeline_mode = #tpu.pipeline_mode<synchronous>, transform_indices = @transform_22, window_bounds = array<i64: 4, 4>}, {pipeline_mode = #tpu.pipeline_mode<synchronous>, transform_indices = @transform_23, window_bounds = array<i64: 4, 1>}, {pipeline_mode = #tpu.pipeline_mode<synchronous>, transform_indices = @transform_24, window_bounds = array<i64: 16, 25>}, {pipeline_mode = #tpu.pipeline_mode<synchronous>, transform_indices = @transform_25, window_bounds = array<i64: 16, 1>}, {pipeline_mode = #tpu.pipeline_mode<synchronous>, transform_indices = @transform_26, window_bounds = array<i64: 4, 25>}, {pipeline_mode = #tpu.pipeline_mode<synchronous>, transform_indices = @transform_27, window_bounds = array<i64: 4, 1>}, {pipeline_mode = #tpu.pipeline_mode<synchronous>, transform_indices = @transform_28, window_bounds = array<i64: 16, 16>}, {pipeline_mode = #tpu.pipeline_mode<synchronous>, transform_indices = @transform_29, window_bounds = array<i64: 16, 4>}, {pipeline_mode = #tpu.pipeline_mode<synchronous>, transform_indices = @transform_30, window_bounds = array<i64: 16, 1>}, {transform_indices = @transform_31, window_bounds = array<i64: 1, 16, 256>}]} {
    %c0 = arith.constant 0 : index
    %c0_0 = arith.constant 0 : index
    %c0_1 = arith.constant 0 : index
    %0 = vector.load %arg1[%c0, %c0_0, %c0_1] : memref<1x8x16xf32, #tpu.memory_space<vmem>>, vector<1x8x16xf32>
    %1 = vector.shape_cast %0 : vector<1x8x16xf32> to vector<8x16xf32>
    %c0_2 = arith.constant 0 : index
    %c0_3 = arith.constant 0 : index
    %2 = vector.load %arg6[%c0_2, %c0_3] : memref<16x8xf32, #tpu.memory_space<vmem>>, vector<16x8xf32>
    %cst = arith.constant dense<0.000000e+00> : vector<16x16xf32>
    %3 = tpu.matmul %2, %1, %cst {dimension_numbers = #tpu.dot_dimension_numbers<[1], [0], [0], [1], [0, 0, 1, 1], [], []>} : vector<16x8xf32>, vector<8x16xf32>, vector<16x16xf32> -> vector<16x16xf32>
    %c0_4 = arith.constant 0 : index
    %c0_5 = arith.constant 0 : index
    %4 = vector.load %arg7[%c0_4, %c0_5] : memref<16x1xf32, #tpu.memory_space<vmem>>, vector<16x1xf32>
    %5 = vector.broadcast %4 : vector<16x1xf32> to vector<16x16xf32>
    %6 = arith.addf %3, %5 : vector<16x16xf32>
    %cst_6 = arith.constant 0.000000e+00 : f32
    %7 = vector.broadcast %cst_6 : f32 to vector<16x16xf32>
    %8 = arith.maximumf %6, %7 : vector<16x16xf32>
    %c0_7 = arith.constant 0 : index
    %c0_8 = arith.constant 0 : index
    %c0_9 = arith.constant 0 : index
    %c0_10 = arith.constant 0 : index
    %9 = vector.load %arg8[%c0_7, %c0_8, %c0_9, %c0_10] : memref<3x9x16x8xf32, #tpu.memory_space<vmem>>, vector<1x9x16x8xf32>
    %10 = vector.shape_cast %9 : vector<1x9x16x8xf32> to vector<9x16x8xf32>
    %c0_11 = arith.constant 0 : index
    %c0_12 = arith.constant 0 : index
    %c0_13 = arith.constant 0 : index
    %11 = vector.load %arg9[%c0_11, %c0_12, %c0_13] : memref<3x16x1xf32, #tpu.memory_space<vmem>>, vector<1x16x1xf32>
    %12 = vector.shape_cast %11 : vector<1x16x1xf32> to vector<16x1xf32>
    %cst_14 = arith.constant 0.000000e+00 : f32
    %13 = vector.broadcast %cst_14 : f32 to vector<8x196xf32>
    %c0_15 = arith.constant 0 : index
    %c0_16 = arith.constant 0 : index
    %14 = vector.load %arg33[%c0_15, %c0_16] : memref<8x196xf32, #tpu.memory_space<vmem>>, vector<8x196xf32>
    tpu.vector_store %arg33[%c0_15, %c0_16], %13 {strides = array<i32>} : memref<8x196xf32, #tpu.memory_space<vmem>>, vector<8x196xf32>,
    %c0_17 = arith.constant 0 : index
    %c30 = arith.constant 30 : index
    %15 = vector.load %arg33[%c0_17, %c30] : memref<8x196xf32, #tpu.memory_space<vmem>>, vector<8x16xf32>
    tpu.vector_store %arg33[%c0_17, %c30], %1 {strides = array<i32>} : memref<8x196xf32, #tpu.memory_space<vmem>>, vector<8x16xf32>,
    %cst_18 = arith.constant 0.000000e+00 : f32
    %16 = vector.broadcast %cst_18 : f32 to vector<16x16xf32>
    %c0_19 = arith.constant 0 : index
    %c30_20 = arith.constant 30 : index
    %17 = vector.load %arg33[%c0_19, %c30_20] : memref<8x196xf32, #tpu.memory_space<vmem>>, vector<8x16xf32>
    %18 = vector.extract_strided_slice %10 {offsets = [4, 0, 0], sizes = [1, 16, 8], strides = [1, 1, 1]} : vector<9x16x8xf32> to vector<1x16x8xf32>
    %19 = vector.shape_cast %18 : vector<1x16x8xf32> to vector<16x8xf32>
    %cst_21 = arith.constant dense<0.000000e+00> : vector<16x16xf32>
    %20 = tpu.matmul %19, %17, %cst_21 {dimension_numbers = #tpu.dot_dimension_numbers<[1], [0], [0], [1], [0, 0, 1, 1], [], []>} : vector<16x8xf32>, vector<8x16xf32>, vector<16x16xf32> -> vector<16x16xf32>
    %21 = arith.addf %16, %20 : vector<16x16xf32>
    %22 = vector.broadcast %12 : vector<16x1xf32> to vector<16x16xf32>
    %23 = arith.addf %21, %22 : vector<16x16xf32>
    %cst_22 = arith.constant 0.000000e+00 : f32
    %24 = vector.broadcast %cst_22 : f32 to vector<16x16xf32>
    %25 = arith.maximumf %23, %24 : vector<16x16xf32>
    %c1 = arith.constant 1 : index
    %c0_23 = arith.constant 0 : index
    %c0_24 = arith.constant 0 : index
    %c0_25 = arith.constant 0 : index
    %26 = vector.load %arg8[%c1, %c0_23, %c0_24, %c0_25] : memref<3x9x16x8xf32, #tpu.memory_space<vmem>>, vector<1x9x16x8xf32>
    %27 = vector.shape_cast %26 : vector<1x9x16x8xf32> to vector<9x16x8xf32>
    %c1_26 = arith.constant 1 : index
    %c0_27 = arith.constant 0 : index
    %c0_28 = arith.constant 0 : index
    %28 = vector.load %arg9[%c1_26, %c0_27, %c0_28] : memref<3x16x1xf32, #tpu.memory_space<vmem>>, vector<1x16x1xf32>
    %29 = vector.shape_cast %28 : vector<1x16x1xf32> to vector<16x1xf32>
    %cst_29 = arith.constant 0.000000e+00 : f32
    %30 = vector.broadcast %cst_29 : f32 to vector<8x196xf32>
    %c0_30 = arith.constant 0 : index
    %c0_31 = arith.constant 0 : index
    %31 = vector.load %arg33[%c0_30, %c0_31] : memref<8x196xf32, #tpu.memory_space<vmem>>, vector<8x196xf32>
    tpu.vector_store %arg33[%c0_30, %c0_31], %30 {strides = array<i32>} : memref<8x196xf32, #tpu.memory_space<vmem>>, vector<8x196xf32>,
    %c0_32 = arith.constant 0 : index
    %c60 = arith.constant 60 : index
    %32 = vector.load %arg33[%c0_32, %c60] : memref<8x196xf32, #tpu.memory_space<vmem>>, vector<8x16xf32>
    tpu.vector_store %arg33[%c0_32, %c60], %1 {strides = array<i32>} : memref<8x196xf32, #tpu.memory_space<vmem>>, vector<8x16xf32>,
    %cst_33 = arith.constant 0.000000e+00 : f32
    %33 = vector.broadcast %cst_33 : f32 to vector<16x16xf32>
    %c0_34 = arith.constant 0 : index
    %c60_35 = arith.constant 60 : index
    %34 = vector.load %arg33[%c0_34, %c60_35] : memref<8x196xf32, #tpu.memory_space<vmem>>, vector<8x16xf32>
    %35 = vector.extract_strided_slice %27 {offsets = [4, 0, 0], sizes = [1, 16, 8], strides = [1, 1, 1]} : vector<9x16x8xf32> to vector<1x16x8xf32>
    %36 = vector.shape_cast %35 : vector<1x16x8xf32> to vector<16x8xf32>
    %cst_36 = arith.constant dense<0.000000e+00> : vector<16x16xf32>
    %37 = tpu.matmul %36, %34, %cst_36 {dimension_numbers = #tpu.dot_dimension_numbers<[1], [0], [0], [1], [0, 0, 1, 1], [], []>} : vector<16x8xf32>, vector<8x16xf32>, vector<16x16xf32> -> vector<16x16xf32>
    %38 = arith.addf %33, %37 : vector<16x16xf32>
    %39 = vector.broadcast %29 : vector<16x1xf32> to vector<16x16xf32>
    %40 = arith.addf %38, %39 : vector<16x16xf32>
    %cst_37 = arith.constant 0.000000e+00 : f32
    %41 = vector.broadcast %cst_37 : f32 to vector<16x16xf32>
    %42 = arith.maximumf %40, %41 : vector<16x16xf32>
    %c2 = arith.constant 2 : index
    %c0_38 = arith.constant 0 : index
    %c0_39 = arith.constant 0 : index
    %c0_40 = arith.constant 0 : index
    %43 = vector.load %arg8[%c2, %c0_38, %c0_39, %c0_40] : memref<3x9x16x8xf32, #tpu.memory_space<vmem>>, vector<1x9x16x8xf32>
    %44 = vector.shape_cast %43 : vector<1x9x16x8xf32> to vector<9x16x8xf32>
    %c2_41 = arith.constant 2 : index
    %c0_42 = arith.constant 0 : index
    %c0_43 = arith.constant 0 : index
    %45 = vector.load %arg9[%c2_41, %c0_42, %c0_43] : memref<3x16x1xf32, #tpu.memory_space<vmem>>, vector<1x16x1xf32>
    %46 = vector.shape_cast %45 : vector<1x16x1xf32> to vector<16x1xf32>
    %cst_44 = arith.constant 0.000000e+00 : f32
    %47 = vector.broadcast %cst_44 : f32 to vector<8x196xf32>
    %c0_45 = arith.constant 0 : index
    %c0_46 = arith.constant 0 : index
    %48 = vector.load %arg33[%c0_45, %c0_46] : memref<8x196xf32, #tpu.memory_space<vmem>>, vector<8x196xf32>
    tpu.vector_store %arg33[%c0_45, %c0_46], %47 {strides = array<i32>} : memref<8x196xf32, #tpu.memory_space<vmem>>, vector<8x196xf32>,
    %c0_47 = arith.constant 0 : index
    %c90 = arith.constant 90 : index
    %49 = vector.load %arg33[%c0_47, %c90] : memref<8x196xf32, #tpu.memory_space<vmem>>, vector<8x16xf32>
    tpu.vector_store %arg33[%c0_47, %c90], %1 {strides = array<i32>} : memref<8x196xf32, #tpu.memory_space<vmem>>, vector<8x16xf32>,
    %cst_48 = arith.constant 0.000000e+00 : f32
    %50 = vector.broadcast %cst_48 : f32 to vector<16x16xf32>
    %c0_49 = arith.constant 0 : index
    %c90_50 = arith.constant 90 : index
    %51 = vector.load %arg33[%c0_49, %c90_50] : memref<8x196xf32, #tpu.memory_space<vmem>>, vector<8x16xf32>
    %52 = vector.extract_strided_slice %44 {offsets = [4, 0, 0], sizes = [1, 16, 8], strides = [1, 1, 1]} : vector<9x16x8xf32> to vector<1x16x8xf32>
    %53 = vector.shape_cast %52 : vector<1x16x8xf32> to vector<16x8xf32>
    %cst_51 = arith.constant dense<0.000000e+00> : vector<16x16xf32>
    %54 = tpu.matmul %53, %51, %cst_51 {dimension_numbers = #tpu.dot_dimension_numbers<[1], [0], [0], [1], [0, 0, 1, 1], [], []>} : vector<16x8xf32>, vector<8x16xf32>, vector<16x16xf32> -> vector<16x16xf32>
    %55 = arith.addf %50, %54 : vector<16x16xf32>
    %56 = vector.broadcast %46 : vector<16x1xf32> to vector<16x16xf32>
    %57 = arith.addf %55, %56 : vector<16x16xf32>
    %cst_52 = arith.constant 0.000000e+00 : f32
    %58 = vector.broadcast %cst_52 : f32 to vector<16x16xf32>
    %59 = arith.maximumf %57, %58 : vector<16x16xf32>
    %cst_53 = arith.constant dense<0.000000e+00> : vector<8xf32>
    %60 = vector.multi_reduction <add>, %1, %cst_53 [1] : vector<8x16xf32> to vector<8xf32>
    %61 = vector.shape_cast %60 : vector<8xf32> to vector<8x1xf32>
    %cst_54 = arith.constant 1.600000e+01 : f32
    %62 = vector.broadcast %cst_54 : f32 to vector<8x1xf32>
    %63 = arith.divf %61, %62 : vector<8x1xf32>
    %c0_55 = arith.constant 0 : index
    %c0_56 = arith.constant 0 : index
    %64 = vector.load %arg10[%c0_55, %c0_56] : memref<16x8xf32, #tpu.memory_space<vmem>>, vector<16x8xf32>
    %cst_57 = arith.constant dense<0.000000e+00> : vector<16x1xf32>
    %65 = tpu.matmul %64, %63, %cst_57 {dimension_numbers = #tpu.dot_dimension_numbers<[1], [0], [0], [1], [0, 0, 1, 1], [], []>} : vector<16x8xf32>, vector<8x1xf32>, vector<16x1xf32> -> vector<16x1xf32>
    %c0_58 = arith.constant 0 : index
    %c0_59 = arith.constant 0 : index
    %66 = vector.load %arg11[%c0_58, %c0_59] : memref<16x1xf32, #tpu.memory_space<vmem>>, vector<16x1xf32>
    %67 = arith.addf %65, %66 : vector<16x1xf32>
    %cst_60 = arith.constant 0.000000e+00 : f32
    %68 = vector.broadcast %cst_60 : f32 to vector<16x1xf32>
    %69 = arith.maximumf %67, %68 : vector<16x1xf32>
    %c0_61 = arith.constant 0 : index
    %c0_62 = arith.constant 0 : index
    %70 = vector.load %arg13[%c0_61, %c0_62] : memref<16x1xf32, #tpu.memory_space<vmem>>, vector<16x1xf32>
    %c0_63 = arith.constant 0 : index
    %c0_64 = arith.constant 0 : index
    %c0_65 = arith.constant 0 : index
    %71 = vector.load %arg12[%c0_63, %c0_64, %c0_65] : memref<5x16x16xf32, #tpu.memory_space<vmem>>, vector<1x16x16xf32>
    %72 = vector.shape_cast %71 : vector<1x16x16xf32> to vector<16x16xf32>
    %cst_66 = arith.constant dense<0.000000e+00> : vector<16x16xf32>
    %73 = tpu.matmul %72, %8, %cst_66 {dimension_numbers = #tpu.dot_dimension_numbers<[1], [0], [0], [1], [0, 0, 1, 1], [], []>} : vector<16x16xf32>, vector<16x16xf32>, vector<16x16xf32> -> vector<16x16xf32>
    %74 = vector.broadcast %70 : vector<16x1xf32> to vector<16x16xf32>
    %75 = arith.addf %74, %73 : vector<16x16xf32>
    %c1_67 = arith.constant 1 : index
    %c0_68 = arith.constant 0 : index
    %c0_69 = arith.constant 0 : index
    %76 = vector.load %arg12[%c1_67, %c0_68, %c0_69] : memref<5x16x16xf32, #tpu.memory_space<vmem>>, vector<1x16x16xf32>
    %77 = vector.shape_cast %76 : vector<1x16x16xf32> to vector<16x16xf32>
    %cst_70 = arith.constant dense<0.000000e+00> : vector<16x16xf32>
    %78 = tpu.matmul %77, %25, %cst_70 {dimension_numbers = #tpu.dot_dimension_numbers<[1], [0], [0], [1], [0, 0, 1, 1], [], []>} : vector<16x16xf32>, vector<16x16xf32>, vector<16x16xf32> -> vector<16x16xf32>
    %79 = arith.addf %75, %78 : vector<16x16xf32>
    %c2_71 = arith.constant 2 : index
    %c0_72 = arith.constant 0 : index
    %c0_73 = arith.constant 0 : index
    %80 = vector.load %arg12[%c2_71, %c0_72, %c0_73] : memref<5x16x16xf32, #tpu.memory_space<vmem>>, vector<1x16x16xf32>
    %81 = vector.shape_cast %80 : vector<1x16x16xf32> to vector<16x16xf32>
    %cst_74 = arith.constant dense<0.000000e+00> : vector<16x16xf32>
    %82 = tpu.matmul %81, %42, %cst_74 {dimension_numbers = #tpu.dot_dimension_numbers<[1], [0], [0], [1], [0, 0, 1, 1], [], []>} : vector<16x16xf32>, vector<16x16xf32>, vector<16x16xf32> -> vector<16x16xf32>
    %83 = arith.addf %79, %82 : vector<16x16xf32>
    %c3 = arith.constant 3 : index
    %c0_75 = arith.constant 0 : index
    %c0_76 = arith.constant 0 : index
    %84 = vector.load %arg12[%c3, %c0_75, %c0_76] : memref<5x16x16xf32, #tpu.memory_space<vmem>>, vector<1x16x16xf32>
    %85 = vector.shape_cast %84 : vector<1x16x16xf32> to vector<16x16xf32>
    %cst_77 = arith.constant dense<0.000000e+00> : vector<16x16xf32>
    %86 = tpu.matmul %85, %59, %cst_77 {dimension_numbers = #tpu.dot_dimension_numbers<[1], [0], [0], [1], [0, 0, 1, 1], [], []>} : vector<16x16xf32>, vector<16x16xf32>, vector<16x16xf32> -> vector<16x16xf32>
    %87 = arith.addf %83, %86 : vector<16x16xf32>
    %c4 = arith.constant 4 : index
    %c0_78 = arith.constant 0 : index
    %c0_79 = arith.constant 0 : index
    %88 = vector.load %arg12[%c4, %c0_78, %c0_79] : memref<5x16x16xf32, #tpu.memory_space<vmem>>, vector<1x16x16xf32>
    %89 = vector.shape_cast %88 : vector<1x16x16xf32> to vector<16x16xf32>
    %cst_80 = arith.constant dense<0.000000e+00> : vector<16x1xf32>
    %90 = tpu.matmul %89, %69, %cst_80 {dimension_numbers = #tpu.dot_dimension_numbers<[1], [0], [0], [1], [0, 0, 1, 1], [], []>} : vector<16x16xf32>, vector<16x1xf32>, vector<16x1xf32> -> vector<16x1xf32>
    %91 = vector.broadcast %90 : vector<16x1xf32> to vector<16x16xf32>
    %92 = arith.addf %87, %91 : vector<16x16xf32>
    %cst_81 = arith.constant 0.000000e+00 : f32
    %93 = vector.broadcast %cst_81 : f32 to vector<16x16xf32>
    %94 = arith.maximumf %92, %93 : vector<16x16xf32>
    %c0_82 = arith.constant 0 : index
    %c0_83 = arith.constant 0 : index
    %c0_84 = arith.constant 0 : index
    %95 = vector.load %arg2[%c0_82, %c0_83, %c0_84] : memref<1x6x64xf32, #tpu.memory_space<vmem>>, vector<1x6x64xf32>
    %96 = vector.shape_cast %95 : vector<1x6x64xf32> to vector<6x64xf32>
    %c0_85 = arith.constant 0 : index
    %c0_86 = arith.constant 0 : index
    %97 = vector.load %arg14[%c0_85, %c0_86] : memref<8x6xf32, #tpu.memory_space<vmem>>, vector<8x6xf32>
    %cst_87 = arith.constant dense<0.000000e+00> : vector<8x64xf32>
    %98 = tpu.matmul %97, %96, %cst_87 {dimension_numbers = #tpu.dot_dimension_numbers<[1], [0], [0], [1], [0, 0, 1, 1], [], []>} : vector<8x6xf32>, vector<6x64xf32>, vector<8x64xf32> -> vector<8x64xf32>
    %c0_88 = arith.constant 0 : index
    %c0_89 = arith.constant 0 : index
    %99 = vector.load %arg15[%c0_88, %c0_89] : memref<8x1xf32, #tpu.memory_space<vmem>>, vector<8x1xf32>
    %100 = vector.broadcast %99 : vector<8x1xf32> to vector<8x64xf32>
    %101 = arith.addf %98, %100 : vector<8x64xf32>
    %cst_90 = arith.constant 0.000000e+00 : f32
    %102 = vector.broadcast %cst_90 : f32 to vector<8x64xf32>
    %103 = arith.maximumf %101, %102 : vector<8x64xf32>
    %c0_91 = arith.constant 0 : index
    %c0_92 = arith.constant 0 : index
    %104 = vector.load %arg4[%c0_91, %c0_92] : memref<16x64xf32, #tpu.memory_space<vmem>>, vector<16x64xf32>
    %cst_93 = arith.constant dense<0.000000e+00> : vector<16x64xf32>
    %105 = tpu.matmul %94, %104, %cst_93 {dimension_numbers = #tpu.dot_dimension_numbers<[1], [0], [0], [1], [0, 0, 1, 1], [], []>} : vector<16x16xf32>, vector<16x64xf32>, vector<16x64xf32> -> vector<16x64xf32>
    %cst_94 = arith.constant 0.000000e+00 : f32
    %106 = vector.broadcast %cst_94 : f32 to vector<16x100xf32>
    %c0_95 = arith.constant 0 : index
    %c0_96 = arith.constant 0 : index
    %107 = vector.load %arg34[%c0_95, %c0_96] : memref<16x100xf32, #tpu.memory_space<vmem>>, vector<16x100xf32>
    tpu.vector_store %arg34[%c0_95, %c0_96], %106 {strides = array<i32>} : memref<16x100xf32, #tpu.memory_space<vmem>>, vector<16x100xf32>,
    %c0_97 = arith.constant 0 : index
    %c18 = arith.constant 18 : index
    %108 = vector.load %arg34[%c0_97, %c18] : memref<16x100xf32, #tpu.memory_space<vmem>>, vector<16x64xf32>
    tpu.vector_store %arg34[%c0_97, %c18], %105 {strides = array<i32>} : memref<16x100xf32, #tpu.memory_space<vmem>>, vector<16x64xf32>,
    %109 = tpu.iota {dimensions = array<i32: 1>} : vector<1x64xi32>
    %c8_i32 = arith.constant 8 : i32
    %c0_i32 = arith.constant 0 : i32
    %110 = arith.cmpi eq, %c8_i32, %c0_i32 : i32
    %c1_i32 = arith.constant 1 : i32
    %111 = arith.select %110, %c1_i32, %c8_i32 : i32
    %112 = vector.broadcast %111 : i32 to vector<1x64xi32>
    %113 = arith.remsi %109, %112 : vector<1x64xi32>
    %c0_i32_98 = arith.constant 0 : i32
    %114 = vector.broadcast %c0_i32_98 : i32 to vector<1x64xi32>
    %115 = arith.cmpi ne, %113, %114 : vector<1x64xi32>
    %c0_i32_99 = arith.constant 0 : i32
    %116 = vector.broadcast %c0_i32_99 : i32 to vector<1x64xi32>
    %117 = arith.cmpi slt, %113, %116 : vector<1x64xi32>
    %c0_i32_100 = arith.constant 0 : i32
    %118 = arith.cmpi slt, %111, %c0_i32_100 : i32
    %119 = vector.broadcast %118 : i1 to vector<1x64xi1>
    %120 = vector.broadcast %119 : vector<1x64xi1> to vector<1x64xi1>
    %121 = arith.xori %117, %120 : vector<1x64xi1>
    %122 = arith.andi %121, %115 : vector<1x64xi1>
    %123 = vector.broadcast %111 : i32 to vector<1x64xi32>
    %124 = arith.addi %113, %123 : vector<1x64xi32>
    %125 = arith.select %122, %124, %113 : vector<1x64xi1>, vector<1x64xi32>
    %cst_101 = arith.constant 0.000000e+00 : f32
    %126 = vector.broadcast %cst_101 : f32 to vector<16x64xf32>
    %c0_102 = arith.constant 0 : index
    %c0_103 = arith.constant 0 : index
    %127 = vector.load %arg34[%c0_102, %c0_103] : memref<16x100xf32, #tpu.memory_space<vmem>>, vector<16x64xf32>
    %c2_i32 = arith.constant 2 : i32
    %128 = vector.broadcast %c2_i32 : i32 to vector<1x64xi32>
    %129 = arith.cmpi sge, %125, %128 : vector<1x64xi32>
    %c10_i32 = arith.constant 10 : i32
    %130 = vector.broadcast %c10_i32 : i32 to vector<1x64xi32>
    %131 = arith.cmpi slt, %125, %130 : vector<1x64xi32>
    %132 = arith.andi %129, %131 : vector<1x64xi1>
    %cst_104 = arith.constant 0.000000e+00 : f32
    %133 = vector.shape_cast %132 : vector<1x64xi1> to vector<1x64xi1>
    %134 = vector.broadcast %133 : vector<1x64xi1> to vector<16x64xi1>
    %135 = vector.broadcast %cst_104 : f32 to vector<16x64xf32>
    %136 = arith.select %134, %127, %135 : vector<16x64xi1>, vector<16x64xf32>
    %c0_105 = arith.constant 0 : index
    %c0_106 = arith.constant 0 : index
    %137 = vector.load %arg16[%c0_105, %c0_106] : memref<16x25xf32, #tpu.memory_space<vmem>>, vector<16x1xf32>
    %138 = vector.broadcast %137 : vector<16x1xf32> to vector<16x64xf32>
    %139 = arith.mulf %136, %138 : vector<16x64xf32>
    %140 = arith.addf %126, %139 : vector<16x64xf32>
    %c0_107 = arith.constant 0 : index
    %c1_108 = arith.constant 1 : index
    %141 = vector.load %arg34[%c0_107, %c1_108] : memref<16x100xf32, #tpu.memory_space<vmem>>, vector<16x64xf32>
    %c1_i32_109 = arith.constant 1 : i32
    %142 = vector.broadcast %c1_i32_109 : i32 to vector<1x64xi32>
    %143 = arith.cmpi sge, %125, %142 : vector<1x64xi32>
    %c9_i32 = arith.constant 9 : i32
    %144 = vector.broadcast %c9_i32 : i32 to vector<1x64xi32>
    %145 = arith.cmpi slt, %125, %144 : vector<1x64xi32>
    %146 = arith.andi %143, %145 : vector<1x64xi1>
    %cst_110 = arith.constant 0.000000e+00 : f32
    %147 = vector.shape_cast %146 : vector<1x64xi1> to vector<1x64xi1>
    %148 = vector.broadcast %147 : vector<1x64xi1> to vector<16x64xi1>
    %149 = vector.broadcast %cst_110 : f32 to vector<16x64xf32>
    %150 = arith.select %148, %141, %149 : vector<16x64xi1>, vector<16x64xf32>
    %c0_111 = arith.constant 0 : index
    %c1_112 = arith.constant 1 : index
    %151 = vector.load %arg16[%c0_111, %c1_112] : memref<16x25xf32, #tpu.memory_space<vmem>>, vector<16x1xf32>
    %152 = vector.broadcast %151 : vector<16x1xf32> to vector<16x64xf32>
    %153 = arith.mulf %150, %152 : vector<16x64xf32>
    %154 = arith.addf %140, %153 : vector<16x64xf32>
    %c0_113 = arith.constant 0 : index
    %c2_114 = arith.constant 2 : index
    %155 = vector.load %arg34[%c0_113, %c2_114] : memref<16x100xf32, #tpu.memory_space<vmem>>, vector<16x64xf32>
    %c0_115 = arith.constant 0 : index
    %c2_116 = arith.constant 2 : index
    %156 = vector.load %arg16[%c0_115, %c2_116] : memref<16x25xf32, #tpu.memory_space<vmem>>, vector<16x1xf32>
    %157 = vector.broadcast %156 : vector<16x1xf32> to vector<16x64xf32>
    %158 = arith.mulf %155, %157 : vector<16x64xf32>
    %159 = arith.addf %154, %158 : vector<16x64xf32>
    %c0_117 = arith.constant 0 : index
    %c3_118 = arith.constant 3 : index
    %160 = vector.load %arg34[%c0_117, %c3_118] : memref<16x100xf32, #tpu.memory_space<vmem>>, vector<16x64xf32>
    %c-1_i32 = arith.constant -1 : i32
    %161 = vector.broadcast %c-1_i32 : i32 to vector<1x64xi32>
    %162 = arith.cmpi sge, %125, %161 : vector<1x64xi32>
    %c7_i32 = arith.constant 7 : i32
    %163 = vector.broadcast %c7_i32 : i32 to vector<1x64xi32>
    %164 = arith.cmpi slt, %125, %163 : vector<1x64xi32>
    %165 = arith.andi %162, %164 : vector<1x64xi1>
    %cst_119 = arith.constant 0.000000e+00 : f32
    %166 = vector.shape_cast %165 : vector<1x64xi1> to vector<1x64xi1>
    %167 = vector.broadcast %166 : vector<1x64xi1> to vector<16x64xi1>
    %168 = vector.broadcast %cst_119 : f32 to vector<16x64xf32>
    %169 = arith.select %167, %160, %168 : vector<16x64xi1>, vector<16x64xf32>
    %c0_120 = arith.constant 0 : index
    %c3_121 = arith.constant 3 : index
    %170 = vector.load %arg16[%c0_120, %c3_121] : memref<16x25xf32, #tpu.memory_space<vmem>>, vector<16x1xf32>
    %171 = vector.broadcast %170 : vector<16x1xf32> to vector<16x64xf32>
    %172 = arith.mulf %169, %171 : vector<16x64xf32>
    %173 = arith.addf %159, %172 : vector<16x64xf32>
    %c0_122 = arith.constant 0 : index
    %c4_123 = arith.constant 4 : index
    %174 = vector.load %arg34[%c0_122, %c4_123] : memref<16x100xf32, #tpu.memory_space<vmem>>, vector<16x64xf32>
    %c-2_i32 = arith.constant -2 : i32
    %175 = vector.broadcast %c-2_i32 : i32 to vector<1x64xi32>
    %176 = arith.cmpi sge, %125, %175 : vector<1x64xi32>
    %c6_i32 = arith.constant 6 : i32
    %177 = vector.broadcast %c6_i32 : i32 to vector<1x64xi32>
    %178 = arith.cmpi slt, %125, %177 : vector<1x64xi32>
    %179 = arith.andi %176, %178 : vector<1x64xi1>
    %cst_124 = arith.constant 0.000000e+00 : f32
    %180 = vector.shape_cast %179 : vector<1x64xi1> to vector<1x64xi1>
    %181 = vector.broadcast %180 : vector<1x64xi1> to vector<16x64xi1>
    %182 = vector.broadcast %cst_124 : f32 to vector<16x64xf32>
    %183 = arith.select %181, %174, %182 : vector<16x64xi1>, vector<16x64xf32>
    %c0_125 = arith.constant 0 : index
    %c4_126 = arith.constant 4 : index
    %184 = vector.load %arg16[%c0_125, %c4_126] : memref<16x25xf32, #tpu.memory_space<vmem>>, vector<16x1xf32>
    %185 = vector.broadcast %184 : vector<16x1xf32> to vector<16x64xf32>
    %186 = arith.mulf %183, %185 : vector<16x64xf32>
    %187 = arith.addf %173, %186 : vector<16x64xf32>
    %c0_127 = arith.constant 0 : index
    %c8 = arith.constant 8 : index
    %188 = vector.load %arg34[%c0_127, %c8] : memref<16x100xf32, #tpu.memory_space<vmem>>, vector<16x64xf32>
    %c2_i32_128 = arith.constant 2 : i32
    %189 = vector.broadcast %c2_i32_128 : i32 to vector<1x64xi32>
    %190 = arith.cmpi sge, %125, %189 : vector<1x64xi32>
    %c10_i32_129 = arith.constant 10 : i32
    %191 = vector.broadcast %c10_i32_129 : i32 to vector<1x64xi32>
    %192 = arith.cmpi slt, %125, %191 : vector<1x64xi32>
    %193 = arith.andi %190, %192 : vector<1x64xi1>
    %cst_130 = arith.constant 0.000000e+00 : f32
    %194 = vector.shape_cast %193 : vector<1x64xi1> to vector<1x64xi1>
    %195 = vector.broadcast %194 : vector<1x64xi1> to vector<16x64xi1>
    %196 = vector.broadcast %cst_130 : f32 to vector<16x64xf32>
    %197 = arith.select %195, %188, %196 : vector<16x64xi1>, vector<16x64xf32>
    %c0_131 = arith.constant 0 : index
    %c5 = arith.constant 5 : index
    %198 = vector.load %arg16[%c0_131, %c5] : memref<16x25xf32, #tpu.memory_space<vmem>>, vector<16x1xf32>
    %199 = vector.broadcast %198 : vector<16x1xf32> to vector<16x64xf32>
    %200 = arith.mulf %197, %199 : vector<16x64xf32>
    %201 = arith.addf %187, %200 : vector<16x64xf32>
    %c0_132 = arith.constant 0 : index
    %c9 = arith.constant 9 : index
    %202 = vector.load %arg34[%c0_132, %c9] : memref<16x100xf32, #tpu.memory_space<vmem>>, vector<16x64xf32>
    %c1_i32_133 = arith.constant 1 : i32
    %203 = vector.broadcast %c1_i32_133 : i32 to vector<1x64xi32>
    %204 = arith.cmpi sge, %125, %203 : vector<1x64xi32>
    %c9_i32_134 = arith.constant 9 : i32
    %205 = vector.broadcast %c9_i32_134 : i32 to vector<1x64xi32>
    %206 = arith.cmpi slt, %125, %205 : vector<1x64xi32>
    %207 = arith.andi %204, %206 : vector<1x64xi1>
    %cst_135 = arith.constant 0.000000e+00 : f32
    %208 = vector.shape_cast %207 : vector<1x64xi1> to vector<1x64xi1>
    %209 = vector.broadcast %208 : vector<1x64xi1> to vector<16x64xi1>
    %210 = vector.broadcast %cst_135 : f32 to vector<16x64xf32>
    %211 = arith.select %209, %202, %210 : vector<16x64xi1>, vector<16x64xf32>
    %c0_136 = arith.constant 0 : index
    %c6 = arith.constant 6 : index
    %212 = vector.load %arg16[%c0_136, %c6] : memref<16x25xf32, #tpu.memory_space<vmem>>, vector<16x1xf32>
    %213 = vector.broadcast %212 : vector<16x1xf32> to vector<16x64xf32>
    %214 = arith.mulf %211, %213 : vector<16x64xf32>
    %215 = arith.addf %201, %214 : vector<16x64xf32>
    %c0_137 = arith.constant 0 : index
    %c10 = arith.constant 10 : index
    %216 = vector.load %arg34[%c0_137, %c10] : memref<16x100xf32, #tpu.memory_space<vmem>>, vector<16x64xf32>
    %c0_138 = arith.constant 0 : index
    %c7 = arith.constant 7 : index
    %217 = vector.load %arg16[%c0_138, %c7] : memref<16x25xf32, #tpu.memory_space<vmem>>, vector<16x1xf32>
    %218 = vector.broadcast %217 : vector<16x1xf32> to vector<16x64xf32>
    %219 = arith.mulf %216, %218 : vector<16x64xf32>
    %220 = arith.addf %215, %219 : vector<16x64xf32>
    %c0_139 = arith.constant 0 : index
    %c11 = arith.constant 11 : index
    %221 = vector.load %arg34[%c0_139, %c11] : memref<16x100xf32, #tpu.memory_space<vmem>>, vector<16x64xf32>
    %c-1_i32_140 = arith.constant -1 : i32
    %222 = vector.broadcast %c-1_i32_140 : i32 to vector<1x64xi32>
    %223 = arith.cmpi sge, %125, %222 : vector<1x64xi32>
    %c7_i32_141 = arith.constant 7 : i32
    %224 = vector.broadcast %c7_i32_141 : i32 to vector<1x64xi32>
    %225 = arith.cmpi slt, %125, %224 : vector<1x64xi32>
    %226 = arith.andi %223, %225 : vector<1x64xi1>
    %cst_142 = arith.constant 0.000000e+00 : f32
    %227 = vector.shape_cast %226 : vector<1x64xi1> to vector<1x64xi1>
    %228 = vector.broadcast %227 : vector<1x64xi1> to vector<16x64xi1>
    %229 = vector.broadcast %cst_142 : f32 to vector<16x64xf32>
    %230 = arith.select %228, %221, %229 : vector<16x64xi1>, vector<16x64xf32>
    %c0_143 = arith.constant 0 : index
    %c8_144 = arith.constant 8 : index
    %231 = vector.load %arg16[%c0_143, %c8_144] : memref<16x25xf32, #tpu.memory_space<vmem>>, vector<16x1xf32>
    %232 = vector.broadcast %231 : vector<16x1xf32> to vector<16x64xf32>
    %233 = arith.mulf %230, %232 : vector<16x64xf32>
    %234 = arith.addf %220, %233 : vector<16x64xf32>
    %c0_145 = arith.constant 0 : index
    %c12 = arith.constant 12 : index
    %235 = vector.load %arg34[%c0_145, %c12] : memref<16x100xf32, #tpu.memory_space<vmem>>, vector<16x64xf32>
    %c-2_i32_146 = arith.constant -2 : i32
    %236 = vector.broadcast %c-2_i32_146 : i32 to vector<1x64xi32>
    %237 = arith.cmpi sge, %125, %236 : vector<1x64xi32>
    %c6_i32_147 = arith.constant 6 : i32
    %238 = vector.broadcast %c6_i32_147 : i32 to vector<1x64xi32>
    %239 = arith.cmpi slt, %125, %238 : vector<1x64xi32>
    %240 = arith.andi %237, %239 : vector<1x64xi1>
    %cst_148 = arith.constant 0.000000e+00 : f32
    %241 = vector.shape_cast %240 : vector<1x64xi1> to vector<1x64xi1>
    %242 = vector.broadcast %241 : vector<1x64xi1> to vector<16x64xi1>
    %243 = vector.broadcast %cst_148 : f32 to vector<16x64xf32>
    %244 = arith.select %242, %235, %243 : vector<16x64xi1>, vector<16x64xf32>
    %c0_149 = arith.constant 0 : index
    %c9_150 = arith.constant 9 : index
    %245 = vector.load %arg16[%c0_149, %c9_150] : memref<16x25xf32, #tpu.memory_space<vmem>>, vector<16x1xf32>
    %246 = vector.broadcast %245 : vector<16x1xf32> to vector<16x64xf32>
    %247 = arith.mulf %244, %246 : vector<16x64xf32>
    %248 = arith.addf %234, %247 : vector<16x64xf32>
    %c0_151 = arith.constant 0 : index
    %c16 = arith.constant 16 : index
    %249 = vector.load %arg34[%c0_151, %c16] : memref<16x100xf32, #tpu.memory_space<vmem>>, vector<16x64xf32>
    %c2_i32_152 = arith.constant 2 : i32
    %250 = vector.broadcast %c2_i32_152 : i32 to vector<1x64xi32>
    %251 = arith.cmpi sge, %125, %250 : vector<1x64xi32>
    %c10_i32_153 = arith.constant 10 : i32
    %252 = vector.broadcast %c10_i32_153 : i32 to vector<1x64xi32>
    %253 = arith.cmpi slt, %125, %252 : vector<1x64xi32>
    %254 = arith.andi %251, %253 : vector<1x64xi1>
    %cst_154 = arith.constant 0.000000e+00 : f32
    %255 = vector.shape_cast %254 : vector<1x64xi1> to vector<1x64xi1>
    %256 = vector.broadcast %255 : vector<1x64xi1> to vector<16x64xi1>
    %257 = vector.broadcast %cst_154 : f32 to vector<16x64xf32>
    %258 = arith.select %256, %249, %257 : vector<16x64xi1>, vector<16x64xf32>
    %c0_155 = arith.constant 0 : index
    %c10_156 = arith.constant 10 : index
    %259 = vector.load %arg16[%c0_155, %c10_156] : memref<16x25xf32, #tpu.memory_space<vmem>>, vector<16x1xf32>
    %260 = vector.broadcast %259 : vector<16x1xf32> to vector<16x64xf32>
    %261 = arith.mulf %258, %260 : vector<16x64xf32>
    %262 = arith.addf %248, %261 : vector<16x64xf32>
    %c0_157 = arith.constant 0 : index
    %c17 = arith.constant 17 : index
    %263 = vector.load %arg34[%c0_157, %c17] : memref<16x100xf32, #tpu.memory_space<vmem>>, vector<16x64xf32>
    %c1_i32_158 = arith.constant 1 : i32
    %264 = vector.broadcast %c1_i32_158 : i32 to vector<1x64xi32>
    %265 = arith.cmpi sge, %125, %264 : vector<1x64xi32>
    %c9_i32_159 = arith.constant 9 : i32
    %266 = vector.broadcast %c9_i32_159 : i32 to vector<1x64xi32>
    %267 = arith.cmpi slt, %125, %266 : vector<1x64xi32>
    %268 = arith.andi %265, %267 : vector<1x64xi1>
    %cst_160 = arith.constant 0.000000e+00 : f32
    %269 = vector.shape_cast %268 : vector<1x64xi1> to vector<1x64xi1>
    %270 = vector.broadcast %269 : vector<1x64xi1> to vector<16x64xi1>
    %271 = vector.broadcast %cst_160 : f32 to vector<16x64xf32>
    %272 = arith.select %270, %263, %271 : vector<16x64xi1>, vector<16x64xf32>
    %c0_161 = arith.constant 0 : index
    %c11_162 = arith.constant 11 : index
    %273 = vector.load %arg16[%c0_161, %c11_162] : memref<16x25xf32, #tpu.memory_space<vmem>>, vector<16x1xf32>
    %274 = vector.broadcast %273 : vector<16x1xf32> to vector<16x64xf32>
    %275 = arith.mulf %272, %274 : vector<16x64xf32>
    %276 = arith.addf %262, %275 : vector<16x64xf32>
    %c0_163 = arith.constant 0 : index
    %c18_164 = arith.constant 18 : index
    %277 = vector.load %arg34[%c0_163, %c18_164] : memref<16x100xf32, #tpu.memory_space<vmem>>, vector<16x64xf32>
    %c0_165 = arith.constant 0 : index
    %c12_166 = arith.constant 12 : index
    %278 = vector.load %arg16[%c0_165, %c12_166] : memref<16x25xf32, #tpu.memory_space<vmem>>, vector<16x1xf32>
    %279 = vector.broadcast %278 : vector<16x1xf32> to vector<16x64xf32>
    %280 = arith.mulf %277, %279 : vector<16x64xf32>
    %281 = arith.addf %276, %280 : vector<16x64xf32>
    %c0_167 = arith.constant 0 : index
    %c19 = arith.constant 19 : index
    %282 = vector.load %arg34[%c0_167, %c19] : memref<16x100xf32, #tpu.memory_space<vmem>>, vector<16x64xf32>
    %c-1_i32_168 = arith.constant -1 : i32
    %283 = vector.broadcast %c-1_i32_168 : i32 to vector<1x64xi32>
    %284 = arith.cmpi sge, %125, %283 : vector<1x64xi32>
    %c7_i32_169 = arith.constant 7 : i32
    %285 = vector.broadcast %c7_i32_169 : i32 to vector<1x64xi32>
    %286 = arith.cmpi slt, %125, %285 : vector<1x64xi32>
    %287 = arith.andi %284, %286 : vector<1x64xi1>
    %cst_170 = arith.constant 0.000000e+00 : f32
    %288 = vector.shape_cast %287 : vector<1x64xi1> to vector<1x64xi1>
    %289 = vector.broadcast %288 : vector<1x64xi1> to vector<16x64xi1>
    %290 = vector.broadcast %cst_170 : f32 to vector<16x64xf32>
    %291 = arith.select %289, %282, %290 : vector<16x64xi1>, vector<16x64xf32>
    %c0_171 = arith.constant 0 : index
    %c13 = arith.constant 13 : index
    %292 = vector.load %arg16[%c0_171, %c13] : memref<16x25xf32, #tpu.memory_space<vmem>>, vector<16x1xf32>
    %293 = vector.broadcast %292 : vector<16x1xf32> to vector<16x64xf32>
    %294 = arith.mulf %291, %293 : vector<16x64xf32>
    %295 = arith.addf %281, %294 : vector<16x64xf32>
    %c0_172 = arith.constant 0 : index
    %c20 = arith.constant 20 : index
    %296 = vector.load %arg34[%c0_172, %c20] : memref<16x100xf32, #tpu.memory_space<vmem>>, vector<16x64xf32>
    %c-2_i32_173 = arith.constant -2 : i32
    %297 = vector.broadcast %c-2_i32_173 : i32 to vector<1x64xi32>
    %298 = arith.cmpi sge, %125, %297 : vector<1x64xi32>
    %c6_i32_174 = arith.constant 6 : i32
    %299 = vector.broadcast %c6_i32_174 : i32 to vector<1x64xi32>
    %300 = arith.cmpi slt, %125, %299 : vector<1x64xi32>
    %301 = arith.andi %298, %300 : vector<1x64xi1>
    %cst_175 = arith.constant 0.000000e+00 : f32
    %302 = vector.shape_cast %301 : vector<1x64xi1> to vector<1x64xi1>
    %303 = vector.broadcast %302 : vector<1x64xi1> to vector<16x64xi1>
    %304 = vector.broadcast %cst_175 : f32 to vector<16x64xf32>
    %305 = arith.select %303, %296, %304 : vector<16x64xi1>, vector<16x64xf32>
    %c0_176 = arith.constant 0 : index
    %c14 = arith.constant 14 : index
    %306 = vector.load %arg16[%c0_176, %c14] : memref<16x25xf32, #tpu.memory_space<vmem>>, vector<16x1xf32>
    %307 = vector.broadcast %306 : vector<16x1xf32> to vector<16x64xf32>
    %308 = arith.mulf %305, %307 : vector<16x64xf32>
    %309 = arith.addf %295, %308 : vector<16x64xf32>
    %c0_177 = arith.constant 0 : index
    %c24 = arith.constant 24 : index
    %310 = vector.load %arg34[%c0_177, %c24] : memref<16x100xf32, #tpu.memory_space<vmem>>, vector<16x64xf32>
    %c2_i32_178 = arith.constant 2 : i32
    %311 = vector.broadcast %c2_i32_178 : i32 to vector<1x64xi32>
    %312 = arith.cmpi sge, %125, %311 : vector<1x64xi32>
    %c10_i32_179 = arith.constant 10 : i32
    %313 = vector.broadcast %c10_i32_179 : i32 to vector<1x64xi32>
    %314 = arith.cmpi slt, %125, %313 : vector<1x64xi32>
    %315 = arith.andi %312, %314 : vector<1x64xi1>
    %cst_180 = arith.constant 0.000000e+00 : f32
    %316 = vector.shape_cast %315 : vector<1x64xi1> to vector<1x64xi1>
    %317 = vector.broadcast %316 : vector<1x64xi1> to vector<16x64xi1>
    %318 = vector.broadcast %cst_180 : f32 to vector<16x64xf32>
    %319 = arith.select %317, %310, %318 : vector<16x64xi1>, vector<16x64xf32>
    %c0_181 = arith.constant 0 : index
    %c15 = arith.constant 15 : index
    %320 = vector.load %arg16[%c0_181, %c15] : memref<16x25xf32, #tpu.memory_space<vmem>>, vector<16x1xf32>
    %321 = vector.broadcast %320 : vector<16x1xf32> to vector<16x64xf32>
    %322 = arith.mulf %319, %321 : vector<16x64xf32>
    %323 = arith.addf %309, %322 : vector<16x64xf32>
    %c0_182 = arith.constant 0 : index
    %c25 = arith.constant 25 : index
    %324 = vector.load %arg34[%c0_182, %c25] : memref<16x100xf32, #tpu.memory_space<vmem>>, vector<16x64xf32>
    %c1_i32_183 = arith.constant 1 : i32
    %325 = vector.broadcast %c1_i32_183 : i32 to vector<1x64xi32>
    %326 = arith.cmpi sge, %125, %325 : vector<1x64xi32>
    %c9_i32_184 = arith.constant 9 : i32
    %327 = vector.broadcast %c9_i32_184 : i32 to vector<1x64xi32>
    %328 = arith.cmpi slt, %125, %327 : vector<1x64xi32>
    %329 = arith.andi %326, %328 : vector<1x64xi1>
    %cst_185 = arith.constant 0.000000e+00 : f32
    %330 = vector.shape_cast %329 : vector<1x64xi1> to vector<1x64xi1>
    %331 = vector.broadcast %330 : vector<1x64xi1> to vector<16x64xi1>
    %332 = vector.broadcast %cst_185 : f32 to vector<16x64xf32>
    %333 = arith.select %331, %324, %332 : vector<16x64xi1>, vector<16x64xf32>
    %c0_186 = arith.constant 0 : index
    %c16_187 = arith.constant 16 : index
    %334 = vector.load %arg16[%c0_186, %c16_187] : memref<16x25xf32, #tpu.memory_space<vmem>>, vector<16x1xf32>
    %335 = vector.broadcast %334 : vector<16x1xf32> to vector<16x64xf32>
    %336 = arith.mulf %333, %335 : vector<16x64xf32>
    %337 = arith.addf %323, %336 : vector<16x64xf32>
    %c0_188 = arith.constant 0 : index
    %c26 = arith.constant 26 : index
    %338 = vector.load %arg34[%c0_188, %c26] : memref<16x100xf32, #tpu.memory_space<vmem>>, vector<16x64xf32>
    %c0_189 = arith.constant 0 : index
    %c17_190 = arith.constant 17 : index
    %339 = vector.load %arg16[%c0_189, %c17_190] : memref<16x25xf32, #tpu.memory_space<vmem>>, vector<16x1xf32>
    %340 = vector.broadcast %339 : vector<16x1xf32> to vector<16x64xf32>
    %341 = arith.mulf %338, %340 : vector<16x64xf32>
    %342 = arith.addf %337, %341 : vector<16x64xf32>
    %c0_191 = arith.constant 0 : index
    %c27 = arith.constant 27 : index
    %343 = vector.load %arg34[%c0_191, %c27] : memref<16x100xf32, #tpu.memory_space<vmem>>, vector<16x64xf32>
    %c-1_i32_192 = arith.constant -1 : i32
    %344 = vector.broadcast %c-1_i32_192 : i32 to vector<1x64xi32>
    %345 = arith.cmpi sge, %125, %344 : vector<1x64xi32>
    %c7_i32_193 = arith.constant 7 : i32
    %346 = vector.broadcast %c7_i32_193 : i32 to vector<1x64xi32>
    %347 = arith.cmpi slt, %125, %346 : vector<1x64xi32>
    %348 = arith.andi %345, %347 : vector<1x64xi1>
    %cst_194 = arith.constant 0.000000e+00 : f32
    %349 = vector.shape_cast %348 : vector<1x64xi1> to vector<1x64xi1>
    %350 = vector.broadcast %349 : vector<1x64xi1> to vector<16x64xi1>
    %351 = vector.broadcast %cst_194 : f32 to vector<16x64xf32>
    %352 = arith.select %350, %343, %351 : vector<16x64xi1>, vector<16x64xf32>
    %c0_195 = arith.constant 0 : index
    %c18_196 = arith.constant 18 : index
    %353 = vector.load %arg16[%c0_195, %c18_196] : memref<16x25xf32, #tpu.memory_space<vmem>>, vector<16x1xf32>
    %354 = vector.broadcast %353 : vector<16x1xf32> to vector<16x64xf32>
    %355 = arith.mulf %352, %354 : vector<16x64xf32>
    %356 = arith.addf %342, %355 : vector<16x64xf32>
    %c0_197 = arith.constant 0 : index
    %c28 = arith.constant 28 : index
    %357 = vector.load %arg34[%c0_197, %c28] : memref<16x100xf32, #tpu.memory_space<vmem>>, vector<16x64xf32>
    %c-2_i32_198 = arith.constant -2 : i32
    %358 = vector.broadcast %c-2_i32_198 : i32 to vector<1x64xi32>
    %359 = arith.cmpi sge, %125, %358 : vector<1x64xi32>
    %c6_i32_199 = arith.constant 6 : i32
    %360 = vector.broadcast %c6_i32_199 : i32 to vector<1x64xi32>
    %361 = arith.cmpi slt, %125, %360 : vector<1x64xi32>
    %362 = arith.andi %359, %361 : vector<1x64xi1>
    %cst_200 = arith.constant 0.000000e+00 : f32
    %363 = vector.shape_cast %362 : vector<1x64xi1> to vector<1x64xi1>
    %364 = vector.broadcast %363 : vector<1x64xi1> to vector<16x64xi1>
    %365 = vector.broadcast %cst_200 : f32 to vector<16x64xf32>
    %366 = arith.select %364, %357, %365 : vector<16x64xi1>, vector<16x64xf32>
    %c0_201 = arith.constant 0 : index
    %c19_202 = arith.constant 19 : index
    %367 = vector.load %arg16[%c0_201, %c19_202] : memref<16x25xf32, #tpu.memory_space<vmem>>, vector<16x1xf32>
    %368 = vector.broadcast %367 : vector<16x1xf32> to vector<16x64xf32>
    %369 = arith.mulf %366, %368 : vector<16x64xf32>
    %370 = arith.addf %356, %369 : vector<16x64xf32>
    %c0_203 = arith.constant 0 : index
    %c32 = arith.constant 32 : index
    %371 = vector.load %arg34[%c0_203, %c32] : memref<16x100xf32, #tpu.memory_space<vmem>>, vector<16x64xf32>
    %c2_i32_204 = arith.constant 2 : i32
    %372 = vector.broadcast %c2_i32_204 : i32 to vector<1x64xi32>
    %373 = arith.cmpi sge, %125, %372 : vector<1x64xi32>
    %c10_i32_205 = arith.constant 10 : i32
    %374 = vector.broadcast %c10_i32_205 : i32 to vector<1x64xi32>
    %375 = arith.cmpi slt, %125, %374 : vector<1x64xi32>
    %376 = arith.andi %373, %375 : vector<1x64xi1>
    %cst_206 = arith.constant 0.000000e+00 : f32
    %377 = vector.shape_cast %376 : vector<1x64xi1> to vector<1x64xi1>
    %378 = vector.broadcast %377 : vector<1x64xi1> to vector<16x64xi1>
    %379 = vector.broadcast %cst_206 : f32 to vector<16x64xf32>
    %380 = arith.select %378, %371, %379 : vector<16x64xi1>, vector<16x64xf32>
    %c0_207 = arith.constant 0 : index
    %c20_208 = arith.constant 20 : index
    %381 = vector.load %arg16[%c0_207, %c20_208] : memref<16x25xf32, #tpu.memory_space<vmem>>, vector<16x1xf32>
    %382 = vector.broadcast %381 : vector<16x1xf32> to vector<16x64xf32>
    %383 = arith.mulf %380, %382 : vector<16x64xf32>
    %384 = arith.addf %370, %383 : vector<16x64xf32>
    %c0_209 = arith.constant 0 : index
    %c33 = arith.constant 33 : index
    %385 = vector.load %arg34[%c0_209, %c33] : memref<16x100xf32, #tpu.memory_space<vmem>>, vector<16x64xf32>
    %c1_i32_210 = arith.constant 1 : i32
    %386 = vector.broadcast %c1_i32_210 : i32 to vector<1x64xi32>
    %387 = arith.cmpi sge, %125, %386 : vector<1x64xi32>
    %c9_i32_211 = arith.constant 9 : i32
    %388 = vector.broadcast %c9_i32_211 : i32 to vector<1x64xi32>
    %389 = arith.cmpi slt, %125, %388 : vector<1x64xi32>
    %390 = arith.andi %387, %389 : vector<1x64xi1>
    %cst_212 = arith.constant 0.000000e+00 : f32
    %391 = vector.shape_cast %390 : vector<1x64xi1> to vector<1x64xi1>
    %392 = vector.broadcast %391 : vector<1x64xi1> to vector<16x64xi1>
    %393 = vector.broadcast %cst_212 : f32 to vector<16x64xf32>
    %394 = arith.select %392, %385, %393 : vector<16x64xi1>, vector<16x64xf32>
    %c0_213 = arith.constant 0 : index
    %c21 = arith.constant 21 : index
    %395 = vector.load %arg16[%c0_213, %c21] : memref<16x25xf32, #tpu.memory_space<vmem>>, vector<16x1xf32>
    %396 = vector.broadcast %395 : vector<16x1xf32> to vector<16x64xf32>
    %397 = arith.mulf %394, %396 : vector<16x64xf32>
    %398 = arith.addf %384, %397 : vector<16x64xf32>
    %c0_214 = arith.constant 0 : index
    %c34 = arith.constant 34 : index
    %399 = vector.load %arg34[%c0_214, %c34] : memref<16x100xf32, #tpu.memory_space<vmem>>, vector<16x64xf32>
    %c0_215 = arith.constant 0 : index
    %c22 = arith.constant 22 : index
    %400 = vector.load %arg16[%c0_215, %c22] : memref<16x25xf32, #tpu.memory_space<vmem>>, vector<16x1xf32>
    %401 = vector.broadcast %400 : vector<16x1xf32> to vector<16x64xf32>
    %402 = arith.mulf %399, %401 : vector<16x64xf32>
    %403 = arith.addf %398, %402 : vector<16x64xf32>
    %c0_216 = arith.constant 0 : index
    %c35 = arith.constant 35 : index
    %404 = vector.load %arg34[%c0_216, %c35] : memref<16x100xf32, #tpu.memory_space<vmem>>, vector<16x64xf32>
    %c-1_i32_217 = arith.constant -1 : i32
    %405 = vector.broadcast %c-1_i32_217 : i32 to vector<1x64xi32>
    %406 = arith.cmpi sge, %125, %405 : vector<1x64xi32>
    %c7_i32_218 = arith.constant 7 : i32
    %407 = vector.broadcast %c7_i32_218 : i32 to vector<1x64xi32>
    %408 = arith.cmpi slt, %125, %407 : vector<1x64xi32>
    %409 = arith.andi %406, %408 : vector<1x64xi1>
    %cst_219 = arith.constant 0.000000e+00 : f32
    %410 = vector.shape_cast %409 : vector<1x64xi1> to vector<1x64xi1>
    %411 = vector.broadcast %410 : vector<1x64xi1> to vector<16x64xi1>
    %412 = vector.broadcast %cst_219 : f32 to vector<16x64xf32>
    %413 = arith.select %411, %404, %412 : vector<16x64xi1>, vector<16x64xf32>
    %c0_220 = arith.constant 0 : index
    %c23 = arith.constant 23 : index
    %414 = vector.load %arg16[%c0_220, %c23] : memref<16x25xf32, #tpu.memory_space<vmem>>, vector<16x1xf32>
    %415 = vector.broadcast %414 : vector<16x1xf32> to vector<16x64xf32>
    %416 = arith.mulf %413, %415 : vector<16x64xf32>
    %417 = arith.addf %403, %416 : vector<16x64xf32>
    %c0_221 = arith.constant 0 : index
    %c36 = arith.constant 36 : index
    %418 = vector.load %arg34[%c0_221, %c36] : memref<16x100xf32, #tpu.memory_space<vmem>>, vector<16x64xf32>
    %c-2_i32_222 = arith.constant -2 : i32
    %419 = vector.broadcast %c-2_i32_222 : i32 to vector<1x64xi32>
    %420 = arith.cmpi sge, %125, %419 : vector<1x64xi32>
    %c6_i32_223 = arith.constant 6 : i32
    %421 = vector.broadcast %c6_i32_223 : i32 to vector<1x64xi32>
    %422 = arith.cmpi slt, %125, %421 : vector<1x64xi32>
    %423 = arith.andi %420, %422 : vector<1x64xi1>
    %cst_224 = arith.constant 0.000000e+00 : f32
    %424 = vector.shape_cast %423 : vector<1x64xi1> to vector<1x64xi1>
    %425 = vector.broadcast %424 : vector<1x64xi1> to vector<16x64xi1>
    %426 = vector.broadcast %cst_224 : f32 to vector<16x64xf32>
    %427 = arith.select %425, %418, %426 : vector<16x64xi1>, vector<16x64xf32>
    %c0_225 = arith.constant 0 : index
    %c24_226 = arith.constant 24 : index
    %428 = vector.load %arg16[%c0_225, %c24_226] : memref<16x25xf32, #tpu.memory_space<vmem>>, vector<16x1xf32>
    %429 = vector.broadcast %428 : vector<16x1xf32> to vector<16x64xf32>
    %430 = arith.mulf %427, %429 : vector<16x64xf32>
    %431 = arith.addf %417, %430 : vector<16x64xf32>
    %c0_227 = arith.constant 0 : index
    %c0_228 = arith.constant 0 : index
    %432 = vector.load %arg17[%c0_227, %c0_228] : memref<16x1xf32, #tpu.memory_space<vmem>>, vector<16x1xf32>
    %433 = vector.broadcast %432 : vector<16x1xf32> to vector<16x64xf32>
    %434 = arith.addf %431, %433 : vector<16x64xf32>
    %cst_229 = arith.constant 0.000000e+00 : f32
    %435 = vector.broadcast %cst_229 : f32 to vector<16x64xf32>
    %436 = arith.maximumf %434, %435 : vector<16x64xf32>
    %cst_230 = arith.constant 0.000000e+00 : f32
    %437 = vector.broadcast %cst_230 : f32 to vector<8x100xf32>
    %c0_231 = arith.constant 0 : index
    %c0_232 = arith.constant 0 : index
    %438 = vector.load %arg35[%c0_231, %c0_232] : memref<8x100xf32, #tpu.memory_space<vmem>>, vector<8x100xf32>
    tpu.vector_store %arg35[%c0_231, %c0_232], %437 {strides = array<i32>} : memref<8x100xf32, #tpu.memory_space<vmem>>, vector<8x100xf32>,
    %c0_233 = arith.constant 0 : index
    %c18_234 = arith.constant 18 : index
    %439 = vector.load %arg35[%c0_233, %c18_234] : memref<8x100xf32, #tpu.memory_space<vmem>>, vector<8x64xf32>
    tpu.vector_store %arg35[%c0_233, %c18_234], %103 {strides = array<i32>} : memref<8x100xf32, #tpu.memory_space<vmem>>, vector<8x64xf32>,
    %440 = tpu.iota {dimensions = array<i32: 1>} : vector<1x64xi32>
    %c8_i32_235 = arith.constant 8 : i32
    %c0_i32_236 = arith.constant 0 : i32
    %441 = arith.cmpi eq, %c8_i32_235, %c0_i32_236 : i32
    %c1_i32_237 = arith.constant 1 : i32
    %442 = arith.select %441, %c1_i32_237, %c8_i32_235 : i32
    %443 = vector.broadcast %442 : i32 to vector<1x64xi32>
    %444 = arith.remsi %440, %443 : vector<1x64xi32>
    %c0_i32_238 = arith.constant 0 : i32
    %445 = vector.broadcast %c0_i32_238 : i32 to vector<1x64xi32>
    %446 = arith.cmpi ne, %444, %445 : vector<1x64xi32>
    %c0_i32_239 = arith.constant 0 : i32
    %447 = vector.broadcast %c0_i32_239 : i32 to vector<1x64xi32>
    %448 = arith.cmpi slt, %444, %447 : vector<1x64xi32>
    %c0_i32_240 = arith.constant 0 : i32
    %449 = arith.cmpi slt, %442, %c0_i32_240 : i32
    %450 = vector.broadcast %449 : i1 to vector<1x64xi1>
    %451 = vector.broadcast %450 : vector<1x64xi1> to vector<1x64xi1>
    %452 = arith.xori %448, %451 : vector<1x64xi1>
    %453 = arith.andi %452, %446 : vector<1x64xi1>
    %454 = vector.broadcast %442 : i32 to vector<1x64xi32>
    %455 = arith.addi %444, %454 : vector<1x64xi32>
    %456 = arith.select %453, %455, %444 : vector<1x64xi1>, vector<1x64xi32>
    %cst_241 = arith.constant 0.000000e+00 : f32
    %457 = vector.broadcast %cst_241 : f32 to vector<8x64xf32>
    %c0_242 = arith.constant 0 : index
    %c0_243 = arith.constant 0 : index
    %458 = vector.load %arg35[%c0_242, %c0_243] : memref<8x100xf32, #tpu.memory_space<vmem>>, vector<8x64xf32>
    %c2_i32_244 = arith.constant 2 : i32
    %459 = vector.broadcast %c2_i32_244 : i32 to vector<1x64xi32>
    %460 = arith.cmpi sge, %456, %459 : vector<1x64xi32>
    %c10_i32_245 = arith.constant 10 : i32
    %461 = vector.broadcast %c10_i32_245 : i32 to vector<1x64xi32>
    %462 = arith.cmpi slt, %456, %461 : vector<1x64xi32>
    %463 = arith.andi %460, %462 : vector<1x64xi1>
    %cst_246 = arith.constant 0.000000e+00 : f32
    %464 = vector.shape_cast %463 : vector<1x64xi1> to vector<1x64xi1>
    %465 = vector.broadcast %464 : vector<1x64xi1> to vector<8x64xi1>
    %466 = vector.broadcast %cst_246 : f32 to vector<8x64xf32>
    %467 = arith.select %465, %458, %466 : vector<8x64xi1>, vector<8x64xf32>
    %c0_247 = arith.constant 0 : index
    %c0_248 = arith.constant 0 : index
    %468 = vector.load %arg18[%c0_247, %c0_248] : memref<8x25xf32, #tpu.memory_space<vmem>>, vector<8x1xf32>
    %469 = vector.broadcast %468 : vector<8x1xf32> to vector<8x64xf32>
    %470 = arith.mulf %467, %469 : vector<8x64xf32>
    %471 = arith.addf %457, %470 : vector<8x64xf32>
    %c0_249 = arith.constant 0 : index
    %c1_250 = arith.constant 1 : index
    %472 = vector.load %arg35[%c0_249, %c1_250] : memref<8x100xf32, #tpu.memory_space<vmem>>, vector<8x64xf32>
    %c1_i32_251 = arith.constant 1 : i32
    %473 = vector.broadcast %c1_i32_251 : i32 to vector<1x64xi32>
    %474 = arith.cmpi sge, %456, %473 : vector<1x64xi32>
    %c9_i32_252 = arith.constant 9 : i32
    %475 = vector.broadcast %c9_i32_252 : i32 to vector<1x64xi32>
    %476 = arith.cmpi slt, %456, %475 : vector<1x64xi32>
    %477 = arith.andi %474, %476 : vector<1x64xi1>
    %cst_253 = arith.constant 0.000000e+00 : f32
    %478 = vector.shape_cast %477 : vector<1x64xi1> to vector<1x64xi1>
    %479 = vector.broadcast %478 : vector<1x64xi1> to vector<8x64xi1>
    %480 = vector.broadcast %cst_253 : f32 to vector<8x64xf32>
    %481 = arith.select %479, %472, %480 : vector<8x64xi1>, vector<8x64xf32>
    %c0_254 = arith.constant 0 : index
    %c1_255 = arith.constant 1 : index
    %482 = vector.load %arg18[%c0_254, %c1_255] : memref<8x25xf32, #tpu.memory_space<vmem>>, vector<8x1xf32>
    %483 = vector.broadcast %482 : vector<8x1xf32> to vector<8x64xf32>
    %484 = arith.mulf %481, %483 : vector<8x64xf32>
    %485 = arith.addf %471, %484 : vector<8x64xf32>
    %c0_256 = arith.constant 0 : index
    %c2_257 = arith.constant 2 : index
    %486 = vector.load %arg35[%c0_256, %c2_257] : memref<8x100xf32, #tpu.memory_space<vmem>>, vector<8x64xf32>
    %c0_258 = arith.constant 0 : index
    %c2_259 = arith.constant 2 : index
    %487 = vector.load %arg18[%c0_258, %c2_259] : memref<8x25xf32, #tpu.memory_space<vmem>>, vector<8x1xf32>
    %488 = vector.broadcast %487 : vector<8x1xf32> to vector<8x64xf32>
    %489 = arith.mulf %486, %488 : vector<8x64xf32>
    %490 = arith.addf %485, %489 : vector<8x64xf32>
    %c0_260 = arith.constant 0 : index
    %c3_261 = arith.constant 3 : index
    %491 = vector.load %arg35[%c0_260, %c3_261] : memref<8x100xf32, #tpu.memory_space<vmem>>, vector<8x64xf32>
    %c-1_i32_262 = arith.constant -1 : i32
    %492 = vector.broadcast %c-1_i32_262 : i32 to vector<1x64xi32>
    %493 = arith.cmpi sge, %456, %492 : vector<1x64xi32>
    %c7_i32_263 = arith.constant 7 : i32
    %494 = vector.broadcast %c7_i32_263 : i32 to vector<1x64xi32>
    %495 = arith.cmpi slt, %456, %494 : vector<1x64xi32>
    %496 = arith.andi %493, %495 : vector<1x64xi1>
    %cst_264 = arith.constant 0.000000e+00 : f32
    %497 = vector.shape_cast %496 : vector<1x64xi1> to vector<1x64xi1>
    %498 = vector.broadcast %497 : vector<1x64xi1> to vector<8x64xi1>
    %499 = vector.broadcast %cst_264 : f32 to vector<8x64xf32>
    %500 = arith.select %498, %491, %499 : vector<8x64xi1>, vector<8x64xf32>
    %c0_265 = arith.constant 0 : index
    %c3_266 = arith.constant 3 : index
    %501 = vector.load %arg18[%c0_265, %c3_266] : memref<8x25xf32, #tpu.memory_space<vmem>>, vector<8x1xf32>
    %502 = vector.broadcast %501 : vector<8x1xf32> to vector<8x64xf32>
    %503 = arith.mulf %500, %502 : vector<8x64xf32>
    %504 = arith.addf %490, %503 : vector<8x64xf32>
    %c0_267 = arith.constant 0 : index
    %c4_268 = arith.constant 4 : index
    %505 = vector.load %arg35[%c0_267, %c4_268] : memref<8x100xf32, #tpu.memory_space<vmem>>, vector<8x64xf32>
    %c-2_i32_269 = arith.constant -2 : i32
    %506 = vector.broadcast %c-2_i32_269 : i32 to vector<1x64xi32>
    %507 = arith.cmpi sge, %456, %506 : vector<1x64xi32>
    %c6_i32_270 = arith.constant 6 : i32
    %508 = vector.broadcast %c6_i32_270 : i32 to vector<1x64xi32>
    %509 = arith.cmpi slt, %456, %508 : vector<1x64xi32>
    %510 = arith.andi %507, %509 : vector<1x64xi1>
    %cst_271 = arith.constant 0.000000e+00 : f32
    %511 = vector.shape_cast %510 : vector<1x64xi1> to vector<1x64xi1>
    %512 = vector.broadcast %511 : vector<1x64xi1> to vector<8x64xi1>
    %513 = vector.broadcast %cst_271 : f32 to vector<8x64xf32>
    %514 = arith.select %512, %505, %513 : vector<8x64xi1>, vector<8x64xf32>
    %c0_272 = arith.constant 0 : index
    %c4_273 = arith.constant 4 : index
    %515 = vector.load %arg18[%c0_272, %c4_273] : memref<8x25xf32, #tpu.memory_space<vmem>>, vector<8x1xf32>
    %516 = vector.broadcast %515 : vector<8x1xf32> to vector<8x64xf32>
    %517 = arith.mulf %514, %516 : vector<8x64xf32>
    %518 = arith.addf %504, %517 : vector<8x64xf32>
    %c0_274 = arith.constant 0 : index
    %c8_275 = arith.constant 8 : index
    %519 = vector.load %arg35[%c0_274, %c8_275] : memref<8x100xf32, #tpu.memory_space<vmem>>, vector<8x64xf32>
    %c2_i32_276 = arith.constant 2 : i32
    %520 = vector.broadcast %c2_i32_276 : i32 to vector<1x64xi32>
    %521 = arith.cmpi sge, %456, %520 : vector<1x64xi32>
    %c10_i32_277 = arith.constant 10 : i32
    %522 = vector.broadcast %c10_i32_277 : i32 to vector<1x64xi32>
    %523 = arith.cmpi slt, %456, %522 : vector<1x64xi32>
    %524 = arith.andi %521, %523 : vector<1x64xi1>
    %cst_278 = arith.constant 0.000000e+00 : f32
    %525 = vector.shape_cast %524 : vector<1x64xi1> to vector<1x64xi1>
    %526 = vector.broadcast %525 : vector<1x64xi1> to vector<8x64xi1>
    %527 = vector.broadcast %cst_278 : f32 to vector<8x64xf32>
    %528 = arith.select %526, %519, %527 : vector<8x64xi1>, vector<8x64xf32>
    %c0_279 = arith.constant 0 : index
    %c5_280 = arith.constant 5 : index
    %529 = vector.load %arg18[%c0_279, %c5_280] : memref<8x25xf32, #tpu.memory_space<vmem>>, vector<8x1xf32>
    %530 = vector.broadcast %529 : vector<8x1xf32> to vector<8x64xf32>
    %531 = arith.mulf %528, %530 : vector<8x64xf32>
    %532 = arith.addf %518, %531 : vector<8x64xf32>
    %c0_281 = arith.constant 0 : index
    %c9_282 = arith.constant 9 : index
    %533 = vector.load %arg35[%c0_281, %c9_282] : memref<8x100xf32, #tpu.memory_space<vmem>>, vector<8x64xf32>
    %c1_i32_283 = arith.constant 1 : i32
    %534 = vector.broadcast %c1_i32_283 : i32 to vector<1x64xi32>
    %535 = arith.cmpi sge, %456, %534 : vector<1x64xi32>
    %c9_i32_284 = arith.constant 9 : i32
    %536 = vector.broadcast %c9_i32_284 : i32 to vector<1x64xi32>
    %537 = arith.cmpi slt, %456, %536 : vector<1x64xi32>
    %538 = arith.andi %535, %537 : vector<1x64xi1>
    %cst_285 = arith.constant 0.000000e+00 : f32
    %539 = vector.shape_cast %538 : vector<1x64xi1> to vector<1x64xi1>
    %540 = vector.broadcast %539 : vector<1x64xi1> to vector<8x64xi1>
    %541 = vector.broadcast %cst_285 : f32 to vector<8x64xf32>
    %542 = arith.select %540, %533, %541 : vector<8x64xi1>, vector<8x64xf32>
    %c0_286 = arith.constant 0 : index
    %c6_287 = arith.constant 6 : index
    %543 = vector.load %arg18[%c0_286, %c6_287] : memref<8x25xf32, #tpu.memory_space<vmem>>, vector<8x1xf32>
    %544 = vector.broadcast %543 : vector<8x1xf32> to vector<8x64xf32>
    %545 = arith.mulf %542, %544 : vector<8x64xf32>
    %546 = arith.addf %532, %545 : vector<8x64xf32>
    %c0_288 = arith.constant 0 : index
    %c10_289 = arith.constant 10 : index
    %547 = vector.load %arg35[%c0_288, %c10_289] : memref<8x100xf32, #tpu.memory_space<vmem>>, vector<8x64xf32>
    %c0_290 = arith.constant 0 : index
    %c7_291 = arith.constant 7 : index
    %548 = vector.load %arg18[%c0_290, %c7_291] : memref<8x25xf32, #tpu.memory_space<vmem>>, vector<8x1xf32>
    %549 = vector.broadcast %548 : vector<8x1xf32> to vector<8x64xf32>
    %550 = arith.mulf %547, %549 : vector<8x64xf32>
    %551 = arith.addf %546, %550 : vector<8x64xf32>
    %c0_292 = arith.constant 0 : index
    %c11_293 = arith.constant 11 : index
    %552 = vector.load %arg35[%c0_292, %c11_293] : memref<8x100xf32, #tpu.memory_space<vmem>>, vector<8x64xf32>
    %c-1_i32_294 = arith.constant -1 : i32
    %553 = vector.broadcast %c-1_i32_294 : i32 to vector<1x64xi32>
    %554 = arith.cmpi sge, %456, %553 : vector<1x64xi32>
    %c7_i32_295 = arith.constant 7 : i32
    %555 = vector.broadcast %c7_i32_295 : i32 to vector<1x64xi32>
    %556 = arith.cmpi slt, %456, %555 : vector<1x64xi32>
    %557 = arith.andi %554, %556 : vector<1x64xi1>
    %cst_296 = arith.constant 0.000000e+00 : f32
    %558 = vector.shape_cast %557 : vector<1x64xi1> to vector<1x64xi1>
    %559 = vector.broadcast %558 : vector<1x64xi1> to vector<8x64xi1>
    %560 = vector.broadcast %cst_296 : f32 to vector<8x64xf32>
    %561 = arith.select %559, %552, %560 : vector<8x64xi1>, vector<8x64xf32>
    %c0_297 = arith.constant 0 : index
    %c8_298 = arith.constant 8 : index
    %562 = vector.load %arg18[%c0_297, %c8_298] : memref<8x25xf32, #tpu.memory_space<vmem>>, vector<8x1xf32>
    %563 = vector.broadcast %562 : vector<8x1xf32> to vector<8x64xf32>
    %564 = arith.mulf %561, %563 : vector<8x64xf32>
    %565 = arith.addf %551, %564 : vector<8x64xf32>
    %c0_299 = arith.constant 0 : index
    %c12_300 = arith.constant 12 : index
    %566 = vector.load %arg35[%c0_299, %c12_300] : memref<8x100xf32, #tpu.memory_space<vmem>>, vector<8x64xf32>
    %c-2_i32_301 = arith.constant -2 : i32
    %567 = vector.broadcast %c-2_i32_301 : i32 to vector<1x64xi32>
    %568 = arith.cmpi sge, %456, %567 : vector<1x64xi32>
    %c6_i32_302 = arith.constant 6 : i32
    %569 = vector.broadcast %c6_i32_302 : i32 to vector<1x64xi32>
    %570 = arith.cmpi slt, %456, %569 : vector<1x64xi32>
    %571 = arith.andi %568, %570 : vector<1x64xi1>
    %cst_303 = arith.constant 0.000000e+00 : f32
    %572 = vector.shape_cast %571 : vector<1x64xi1> to vector<1x64xi1>
    %573 = vector.broadcast %572 : vector<1x64xi1> to vector<8x64xi1>
    %574 = vector.broadcast %cst_303 : f32 to vector<8x64xf32>
    %575 = arith.select %573, %566, %574 : vector<8x64xi1>, vector<8x64xf32>
    %c0_304 = arith.constant 0 : index
    %c9_305 = arith.constant 9 : index
    %576 = vector.load %arg18[%c0_304, %c9_305] : memref<8x25xf32, #tpu.memory_space<vmem>>, vector<8x1xf32>
    %577 = vector.broadcast %576 : vector<8x1xf32> to vector<8x64xf32>
    %578 = arith.mulf %575, %577 : vector<8x64xf32>
    %579 = arith.addf %565, %578 : vector<8x64xf32>
    %c0_306 = arith.constant 0 : index
    %c16_307 = arith.constant 16 : index
    %580 = vector.load %arg35[%c0_306, %c16_307] : memref<8x100xf32, #tpu.memory_space<vmem>>, vector<8x64xf32>
    %c2_i32_308 = arith.constant 2 : i32
    %581 = vector.broadcast %c2_i32_308 : i32 to vector<1x64xi32>
    %582 = arith.cmpi sge, %456, %581 : vector<1x64xi32>
    %c10_i32_309 = arith.constant 10 : i32
    %583 = vector.broadcast %c10_i32_309 : i32 to vector<1x64xi32>
    %584 = arith.cmpi slt, %456, %583 : vector<1x64xi32>
    %585 = arith.andi %582, %584 : vector<1x64xi1>
    %cst_310 = arith.constant 0.000000e+00 : f32
    %586 = vector.shape_cast %585 : vector<1x64xi1> to vector<1x64xi1>
    %587 = vector.broadcast %586 : vector<1x64xi1> to vector<8x64xi1>
    %588 = vector.broadcast %cst_310 : f32 to vector<8x64xf32>
    %589 = arith.select %587, %580, %588 : vector<8x64xi1>, vector<8x64xf32>
    %c0_311 = arith.constant 0 : index
    %c10_312 = arith.constant 10 : index
    %590 = vector.load %arg18[%c0_311, %c10_312] : memref<8x25xf32, #tpu.memory_space<vmem>>, vector<8x1xf32>
    %591 = vector.broadcast %590 : vector<8x1xf32> to vector<8x64xf32>
    %592 = arith.mulf %589, %591 : vector<8x64xf32>
    %593 = arith.addf %579, %592 : vector<8x64xf32>
    %c0_313 = arith.constant 0 : index
    %c17_314 = arith.constant 17 : index
    %594 = vector.load %arg35[%c0_313, %c17_314] : memref<8x100xf32, #tpu.memory_space<vmem>>, vector<8x64xf32>
    %c1_i32_315 = arith.constant 1 : i32
    %595 = vector.broadcast %c1_i32_315 : i32 to vector<1x64xi32>
    %596 = arith.cmpi sge, %456, %595 : vector<1x64xi32>
    %c9_i32_316 = arith.constant 9 : i32
    %597 = vector.broadcast %c9_i32_316 : i32 to vector<1x64xi32>
    %598 = arith.cmpi slt, %456, %597 : vector<1x64xi32>
    %599 = arith.andi %596, %598 : vector<1x64xi1>
    %cst_317 = arith.constant 0.000000e+00 : f32
    %600 = vector.shape_cast %599 : vector<1x64xi1> to vector<1x64xi1>
    %601 = vector.broadcast %600 : vector<1x64xi1> to vector<8x64xi1>
    %602 = vector.broadcast %cst_317 : f32 to vector<8x64xf32>
    %603 = arith.select %601, %594, %602 : vector<8x64xi1>, vector<8x64xf32>
    %c0_318 = arith.constant 0 : index
    %c11_319 = arith.constant 11 : index
    %604 = vector.load %arg18[%c0_318, %c11_319] : memref<8x25xf32, #tpu.memory_space<vmem>>, vector<8x1xf32>
    %605 = vector.broadcast %604 : vector<8x1xf32> to vector<8x64xf32>
    %606 = arith.mulf %603, %605 : vector<8x64xf32>
    %607 = arith.addf %593, %606 : vector<8x64xf32>
    %c0_320 = arith.constant 0 : index
    %c18_321 = arith.constant 18 : index
    %608 = vector.load %arg35[%c0_320, %c18_321] : memref<8x100xf32, #tpu.memory_space<vmem>>, vector<8x64xf32>
    %c0_322 = arith.constant 0 : index
    %c12_323 = arith.constant 12 : index
    %609 = vector.load %arg18[%c0_322, %c12_323] : memref<8x25xf32, #tpu.memory_space<vmem>>, vector<8x1xf32>
    %610 = vector.broadcast %609 : vector<8x1xf32> to vector<8x64xf32>
    %611 = arith.mulf %608, %610 : vector<8x64xf32>
    %612 = arith.addf %607, %611 : vector<8x64xf32>
    %c0_324 = arith.constant 0 : index
    %c19_325 = arith.constant 19 : index
    %613 = vector.load %arg35[%c0_324, %c19_325] : memref<8x100xf32, #tpu.memory_space<vmem>>, vector<8x64xf32>
    %c-1_i32_326 = arith.constant -1 : i32
    %614 = vector.broadcast %c-1_i32_326 : i32 to vector<1x64xi32>
    %615 = arith.cmpi sge, %456, %614 : vector<1x64xi32>
    %c7_i32_327 = arith.constant 7 : i32
    %616 = vector.broadcast %c7_i32_327 : i32 to vector<1x64xi32>
    %617 = arith.cmpi slt, %456, %616 : vector<1x64xi32>
    %618 = arith.andi %615, %617 : vector<1x64xi1>
    %cst_328 = arith.constant 0.000000e+00 : f32
    %619 = vector.shape_cast %618 : vector<1x64xi1> to vector<1x64xi1>
    %620 = vector.broadcast %619 : vector<1x64xi1> to vector<8x64xi1>
    %621 = vector.broadcast %cst_328 : f32 to vector<8x64xf32>
    %622 = arith.select %620, %613, %621 : vector<8x64xi1>, vector<8x64xf32>
    %c0_329 = arith.constant 0 : index
    %c13_330 = arith.constant 13 : index
    %623 = vector.load %arg18[%c0_329, %c13_330] : memref<8x25xf32, #tpu.memory_space<vmem>>, vector<8x1xf32>
    %624 = vector.broadcast %623 : vector<8x1xf32> to vector<8x64xf32>
    %625 = arith.mulf %622, %624 : vector<8x64xf32>
    %626 = arith.addf %612, %625 : vector<8x64xf32>
    %c0_331 = arith.constant 0 : index
    %c20_332 = arith.constant 20 : index
    %627 = vector.load %arg35[%c0_331, %c20_332] : memref<8x100xf32, #tpu.memory_space<vmem>>, vector<8x64xf32>
    %c-2_i32_333 = arith.constant -2 : i32
    %628 = vector.broadcast %c-2_i32_333 : i32 to vector<1x64xi32>
    %629 = arith.cmpi sge, %456, %628 : vector<1x64xi32>
    %c6_i32_334 = arith.constant 6 : i32
    %630 = vector.broadcast %c6_i32_334 : i32 to vector<1x64xi32>
    %631 = arith.cmpi slt, %456, %630 : vector<1x64xi32>
    %632 = arith.andi %629, %631 : vector<1x64xi1>
    %cst_335 = arith.constant 0.000000e+00 : f32
    %633 = vector.shape_cast %632 : vector<1x64xi1> to vector<1x64xi1>
    %634 = vector.broadcast %633 : vector<1x64xi1> to vector<8x64xi1>
    %635 = vector.broadcast %cst_335 : f32 to vector<8x64xf32>
    %636 = arith.select %634, %627, %635 : vector<8x64xi1>, vector<8x64xf32>
    %c0_336 = arith.constant 0 : index
    %c14_337 = arith.constant 14 : index
    %637 = vector.load %arg18[%c0_336, %c14_337] : memref<8x25xf32, #tpu.memory_space<vmem>>, vector<8x1xf32>
    %638 = vector.broadcast %637 : vector<8x1xf32> to vector<8x64xf32>
    %639 = arith.mulf %636, %638 : vector<8x64xf32>
    %640 = arith.addf %626, %639 : vector<8x64xf32>
    %c0_338 = arith.constant 0 : index
    %c24_339 = arith.constant 24 : index
    %641 = vector.load %arg35[%c0_338, %c24_339] : memref<8x100xf32, #tpu.memory_space<vmem>>, vector<8x64xf32>
    %c2_i32_340 = arith.constant 2 : i32
    %642 = vector.broadcast %c2_i32_340 : i32 to vector<1x64xi32>
    %643 = arith.cmpi sge, %456, %642 : vector<1x64xi32>
    %c10_i32_341 = arith.constant 10 : i32
    %644 = vector.broadcast %c10_i32_341 : i32 to vector<1x64xi32>
    %645 = arith.cmpi slt, %456, %644 : vector<1x64xi32>
    %646 = arith.andi %643, %645 : vector<1x64xi1>
    %cst_342 = arith.constant 0.000000e+00 : f32
    %647 = vector.shape_cast %646 : vector<1x64xi1> to vector<1x64xi1>
    %648 = vector.broadcast %647 : vector<1x64xi1> to vector<8x64xi1>
    %649 = vector.broadcast %cst_342 : f32 to vector<8x64xf32>
    %650 = arith.select %648, %641, %649 : vector<8x64xi1>, vector<8x64xf32>
    %c0_343 = arith.constant 0 : index
    %c15_344 = arith.constant 15 : index
    %651 = vector.load %arg18[%c0_343, %c15_344] : memref<8x25xf32, #tpu.memory_space<vmem>>, vector<8x1xf32>
    %652 = vector.broadcast %651 : vector<8x1xf32> to vector<8x64xf32>
    %653 = arith.mulf %650, %652 : vector<8x64xf32>
    %654 = arith.addf %640, %653 : vector<8x64xf32>
    %c0_345 = arith.constant 0 : index
    %c25_346 = arith.constant 25 : index
    %655 = vector.load %arg35[%c0_345, %c25_346] : memref<8x100xf32, #tpu.memory_space<vmem>>, vector<8x64xf32>
    %c1_i32_347 = arith.constant 1 : i32
    %656 = vector.broadcast %c1_i32_347 : i32 to vector<1x64xi32>
    %657 = arith.cmpi sge, %456, %656 : vector<1x64xi32>
    %c9_i32_348 = arith.constant 9 : i32
    %658 = vector.broadcast %c9_i32_348 : i32 to vector<1x64xi32>
    %659 = arith.cmpi slt, %456, %658 : vector<1x64xi32>
    %660 = arith.andi %657, %659 : vector<1x64xi1>
    %cst_349 = arith.constant 0.000000e+00 : f32
    %661 = vector.shape_cast %660 : vector<1x64xi1> to vector<1x64xi1>
    %662 = vector.broadcast %661 : vector<1x64xi1> to vector<8x64xi1>
    %663 = vector.broadcast %cst_349 : f32 to vector<8x64xf32>
    %664 = arith.select %662, %655, %663 : vector<8x64xi1>, vector<8x64xf32>
    %c0_350 = arith.constant 0 : index
    %c16_351 = arith.constant 16 : index
    %665 = vector.load %arg18[%c0_350, %c16_351] : memref<8x25xf32, #tpu.memory_space<vmem>>, vector<8x1xf32>
    %666 = vector.broadcast %665 : vector<8x1xf32> to vector<8x64xf32>
    %667 = arith.mulf %664, %666 : vector<8x64xf32>
    %668 = arith.addf %654, %667 : vector<8x64xf32>
    %c0_352 = arith.constant 0 : index
    %c26_353 = arith.constant 26 : index
    %669 = vector.load %arg35[%c0_352, %c26_353] : memref<8x100xf32, #tpu.memory_space<vmem>>, vector<8x64xf32>
    %c0_354 = arith.constant 0 : index
    %c17_355 = arith.constant 17 : index
    %670 = vector.load %arg18[%c0_354, %c17_355] : memref<8x25xf32, #tpu.memory_space<vmem>>, vector<8x1xf32>
    %671 = vector.broadcast %670 : vector<8x1xf32> to vector<8x64xf32>
    %672 = arith.mulf %669, %671 : vector<8x64xf32>
    %673 = arith.addf %668, %672 : vector<8x64xf32>
    %c0_356 = arith.constant 0 : index
    %c27_357 = arith.constant 27 : index
    %674 = vector.load %arg35[%c0_356, %c27_357] : memref<8x100xf32, #tpu.memory_space<vmem>>, vector<8x64xf32>
    %c-1_i32_358 = arith.constant -1 : i32
    %675 = vector.broadcast %c-1_i32_358 : i32 to vector<1x64xi32>
    %676 = arith.cmpi sge, %456, %675 : vector<1x64xi32>
    %c7_i32_359 = arith.constant 7 : i32
    %677 = vector.broadcast %c7_i32_359 : i32 to vector<1x64xi32>
    %678 = arith.cmpi slt, %456, %677 : vector<1x64xi32>
    %679 = arith.andi %676, %678 : vector<1x64xi1>
    %cst_360 = arith.constant 0.000000e+00 : f32
    %680 = vector.shape_cast %679 : vector<1x64xi1> to vector<1x64xi1>
    %681 = vector.broadcast %680 : vector<1x64xi1> to vector<8x64xi1>
    %682 = vector.broadcast %cst_360 : f32 to vector<8x64xf32>
    %683 = arith.select %681, %674, %682 : vector<8x64xi1>, vector<8x64xf32>
    %c0_361 = arith.constant 0 : index
    %c18_362 = arith.constant 18 : index
    %684 = vector.load %arg18[%c0_361, %c18_362] : memref<8x25xf32, #tpu.memory_space<vmem>>, vector<8x1xf32>
    %685 = vector.broadcast %684 : vector<8x1xf32> to vector<8x64xf32>
    %686 = arith.mulf %683, %685 : vector<8x64xf32>
    %687 = arith.addf %673, %686 : vector<8x64xf32>
    %c0_363 = arith.constant 0 : index
    %c28_364 = arith.constant 28 : index
    %688 = vector.load %arg35[%c0_363, %c28_364] : memref<8x100xf32, #tpu.memory_space<vmem>>, vector<8x64xf32>
    %c-2_i32_365 = arith.constant -2 : i32
    %689 = vector.broadcast %c-2_i32_365 : i32 to vector<1x64xi32>
    %690 = arith.cmpi sge, %456, %689 : vector<1x64xi32>
    %c6_i32_366 = arith.constant 6 : i32
    %691 = vector.broadcast %c6_i32_366 : i32 to vector<1x64xi32>
    %692 = arith.cmpi slt, %456, %691 : vector<1x64xi32>
    %693 = arith.andi %690, %692 : vector<1x64xi1>
    %cst_367 = arith.constant 0.000000e+00 : f32
    %694 = vector.shape_cast %693 : vector<1x64xi1> to vector<1x64xi1>
    %695 = vector.broadcast %694 : vector<1x64xi1> to vector<8x64xi1>
    %696 = vector.broadcast %cst_367 : f32 to vector<8x64xf32>
    %697 = arith.select %695, %688, %696 : vector<8x64xi1>, vector<8x64xf32>
    %c0_368 = arith.constant 0 : index
    %c19_369 = arith.constant 19 : index
    %698 = vector.load %arg18[%c0_368, %c19_369] : memref<8x25xf32, #tpu.memory_space<vmem>>, vector<8x1xf32>
    %699 = vector.broadcast %698 : vector<8x1xf32> to vector<8x64xf32>
    %700 = arith.mulf %697, %699 : vector<8x64xf32>
    %701 = arith.addf %687, %700 : vector<8x64xf32>
    %c0_370 = arith.constant 0 : index
    %c32_371 = arith.constant 32 : index
    %702 = vector.load %arg35[%c0_370, %c32_371] : memref<8x100xf32, #tpu.memory_space<vmem>>, vector<8x64xf32>
    %c2_i32_372 = arith.constant 2 : i32
    %703 = vector.broadcast %c2_i32_372 : i32 to vector<1x64xi32>
    %704 = arith.cmpi sge, %456, %703 : vector<1x64xi32>
    %c10_i32_373 = arith.constant 10 : i32
    %705 = vector.broadcast %c10_i32_373 : i32 to vector<1x64xi32>
    %706 = arith.cmpi slt, %456, %705 : vector<1x64xi32>
    %707 = arith.andi %704, %706 : vector<1x64xi1>
    %cst_374 = arith.constant 0.000000e+00 : f32
    %708 = vector.shape_cast %707 : vector<1x64xi1> to vector<1x64xi1>
    %709 = vector.broadcast %708 : vector<1x64xi1> to vector<8x64xi1>
    %710 = vector.broadcast %cst_374 : f32 to vector<8x64xf32>
    %711 = arith.select %709, %702, %710 : vector<8x64xi1>, vector<8x64xf32>
    %c0_375 = arith.constant 0 : index
    %c20_376 = arith.constant 20 : index
    %712 = vector.load %arg18[%c0_375, %c20_376] : memref<8x25xf32, #tpu.memory_space<vmem>>, vector<8x1xf32>
    %713 = vector.broadcast %712 : vector<8x1xf32> to vector<8x64xf32>
    %714 = arith.mulf %711, %713 : vector<8x64xf32>
    %715 = arith.addf %701, %714 : vector<8x64xf32>
    %c0_377 = arith.constant 0 : index
    %c33_378 = arith.constant 33 : index
    %716 = vector.load %arg35[%c0_377, %c33_378] : memref<8x100xf32, #tpu.memory_space<vmem>>, vector<8x64xf32>
    %c1_i32_379 = arith.constant 1 : i32
    %717 = vector.broadcast %c1_i32_379 : i32 to vector<1x64xi32>
    %718 = arith.cmpi sge, %456, %717 : vector<1x64xi32>
    %c9_i32_380 = arith.constant 9 : i32
    %719 = vector.broadcast %c9_i32_380 : i32 to vector<1x64xi32>
    %720 = arith.cmpi slt, %456, %719 : vector<1x64xi32>
    %721 = arith.andi %718, %720 : vector<1x64xi1>
    %cst_381 = arith.constant 0.000000e+00 : f32
    %722 = vector.shape_cast %721 : vector<1x64xi1> to vector<1x64xi1>
    %723 = vector.broadcast %722 : vector<1x64xi1> to vector<8x64xi1>
    %724 = vector.broadcast %cst_381 : f32 to vector<8x64xf32>
    %725 = arith.select %723, %716, %724 : vector<8x64xi1>, vector<8x64xf32>
    %c0_382 = arith.constant 0 : index
    %c21_383 = arith.constant 21 : index
    %726 = vector.load %arg18[%c0_382, %c21_383] : memref<8x25xf32, #tpu.memory_space<vmem>>, vector<8x1xf32>
    %727 = vector.broadcast %726 : vector<8x1xf32> to vector<8x64xf32>
    %728 = arith.mulf %725, %727 : vector<8x64xf32>
    %729 = arith.addf %715, %728 : vector<8x64xf32>
    %c0_384 = arith.constant 0 : index
    %c34_385 = arith.constant 34 : index
    %730 = vector.load %arg35[%c0_384, %c34_385] : memref<8x100xf32, #tpu.memory_space<vmem>>, vector<8x64xf32>
    %c0_386 = arith.constant 0 : index
    %c22_387 = arith.constant 22 : index
    %731 = vector.load %arg18[%c0_386, %c22_387] : memref<8x25xf32, #tpu.memory_space<vmem>>, vector<8x1xf32>
    %732 = vector.broadcast %731 : vector<8x1xf32> to vector<8x64xf32>
    %733 = arith.mulf %730, %732 : vector<8x64xf32>
    %734 = arith.addf %729, %733 : vector<8x64xf32>
    %c0_388 = arith.constant 0 : index
    %c35_389 = arith.constant 35 : index
    %735 = vector.load %arg35[%c0_388, %c35_389] : memref<8x100xf32, #tpu.memory_space<vmem>>, vector<8x64xf32>
    %c-1_i32_390 = arith.constant -1 : i32
    %736 = vector.broadcast %c-1_i32_390 : i32 to vector<1x64xi32>
    %737 = arith.cmpi sge, %456, %736 : vector<1x64xi32>
    %c7_i32_391 = arith.constant 7 : i32
    %738 = vector.broadcast %c7_i32_391 : i32 to vector<1x64xi32>
    %739 = arith.cmpi slt, %456, %738 : vector<1x64xi32>
    %740 = arith.andi %737, %739 : vector<1x64xi1>
    %cst_392 = arith.constant 0.000000e+00 : f32
    %741 = vector.shape_cast %740 : vector<1x64xi1> to vector<1x64xi1>
    %742 = vector.broadcast %741 : vector<1x64xi1> to vector<8x64xi1>
    %743 = vector.broadcast %cst_392 : f32 to vector<8x64xf32>
    %744 = arith.select %742, %735, %743 : vector<8x64xi1>, vector<8x64xf32>
    %c0_393 = arith.constant 0 : index
    %c23_394 = arith.constant 23 : index
    %745 = vector.load %arg18[%c0_393, %c23_394] : memref<8x25xf32, #tpu.memory_space<vmem>>, vector<8x1xf32>
    %746 = vector.broadcast %745 : vector<8x1xf32> to vector<8x64xf32>
    %747 = arith.mulf %744, %746 : vector<8x64xf32>
    %748 = arith.addf %734, %747 : vector<8x64xf32>
    %c0_395 = arith.constant 0 : index
    %c36_396 = arith.constant 36 : index
    %749 = vector.load %arg35[%c0_395, %c36_396] : memref<8x100xf32, #tpu.memory_space<vmem>>, vector<8x64xf32>
    %c-2_i32_397 = arith.constant -2 : i32
    %750 = vector.broadcast %c-2_i32_397 : i32 to vector<1x64xi32>
    %751 = arith.cmpi sge, %456, %750 : vector<1x64xi32>
    %c6_i32_398 = arith.constant 6 : i32
    %752 = vector.broadcast %c6_i32_398 : i32 to vector<1x64xi32>
    %753 = arith.cmpi slt, %456, %752 : vector<1x64xi32>
    %754 = arith.andi %751, %753 : vector<1x64xi1>
    %cst_399 = arith.constant 0.000000e+00 : f32
    %755 = vector.shape_cast %754 : vector<1x64xi1> to vector<1x64xi1>
    %756 = vector.broadcast %755 : vector<1x64xi1> to vector<8x64xi1>
    %757 = vector.broadcast %cst_399 : f32 to vector<8x64xf32>
    %758 = arith.select %756, %749, %757 : vector<8x64xi1>, vector<8x64xf32>
    %c0_400 = arith.constant 0 : index
    %c24_401 = arith.constant 24 : index
    %759 = vector.load %arg18[%c0_400, %c24_401] : memref<8x25xf32, #tpu.memory_space<vmem>>, vector<8x1xf32>
    %760 = vector.broadcast %759 : vector<8x1xf32> to vector<8x64xf32>
    %761 = arith.mulf %758, %760 : vector<8x64xf32>
    %762 = arith.addf %748, %761 : vector<8x64xf32>
    %c0_402 = arith.constant 0 : index
    %c0_403 = arith.constant 0 : index
    %763 = vector.load %arg19[%c0_402, %c0_403] : memref<8x1xf32, #tpu.memory_space<vmem>>, vector<8x1xf32>
    %764 = vector.broadcast %763 : vector<8x1xf32> to vector<8x64xf32>
    %765 = arith.addf %762, %764 : vector<8x64xf32>
    %cst_404 = arith.constant 0.000000e+00 : f32
    %766 = vector.broadcast %cst_404 : f32 to vector<8x64xf32>
    %767 = arith.maximumf %765, %766 : vector<8x64xf32>
    %c0_405 = arith.constant 0 : index
    %c0_406 = arith.constant 0 : index
    %768 = vector.load %arg20[%c0_405, %c0_406] : memref<16x16xf32, #tpu.memory_space<vmem>>, vector<16x16xf32>
    %cst_407 = arith.constant dense<0.000000e+00> : vector<16x64xf32>
    %769 = tpu.matmul %768, %436, %cst_407 {dimension_numbers = #tpu.dot_dimension_numbers<[1], [0], [0], [1], [0, 0, 1, 1], [], []>} : vector<16x16xf32>, vector<16x64xf32>, vector<16x64xf32> -> vector<16x64xf32>
    %c0_408 = arith.constant 0 : index
    %c0_409 = arith.constant 0 : index
    %770 = vector.load %arg21[%c0_408, %c0_409] : memref<16x8xf32, #tpu.memory_space<vmem>>, vector<16x8xf32>
    %cst_410 = arith.constant dense<0.000000e+00> : vector<16x64xf32>
    %771 = tpu.matmul %770, %767, %cst_410 {dimension_numbers = #tpu.dot_dimension_numbers<[1], [0], [0], [1], [0, 0, 1, 1], [], []>} : vector<16x8xf32>, vector<8x64xf32>, vector<16x64xf32> -> vector<16x64xf32>
    %772 = arith.addf %769, %771 : vector<16x64xf32>
    %c0_411 = arith.constant 0 : index
    %c0_412 = arith.constant 0 : index
    %773 = vector.load %arg22[%c0_411, %c0_412] : memref<16x1xf32, #tpu.memory_space<vmem>>, vector<16x1xf32>
    %774 = vector.broadcast %773 : vector<16x1xf32> to vector<16x64xf32>
    %775 = arith.addf %772, %774 : vector<16x64xf32>
    %cst_413 = arith.constant 0.000000e+00 : f32
    %776 = vector.broadcast %cst_413 : f32 to vector<16x64xf32>
    %777 = arith.maximumf %775, %776 : vector<16x64xf32>
    %c0_414 = arith.constant 0 : index
    %c0_415 = arith.constant 0 : index
    %c0_416 = arith.constant 0 : index
    %778 = vector.load %arg3[%c0_414, %c0_415, %c0_416] : memref<1x4x256xf32, #tpu.memory_space<vmem>>, vector<1x4x256xf32>
    %779 = vector.shape_cast %778 : vector<1x4x256xf32> to vector<4x256xf32>
    %c0_417 = arith.constant 0 : index
    %c0_418 = arith.constant 0 : index
    %780 = vector.load %arg23[%c0_417, %c0_418] : memref<4x4xf32, #tpu.memory_space<vmem>>, vector<4x4xf32>
    %cst_419 = arith.constant dense<0.000000e+00> : vector<4x256xf32>
    %781 = tpu.matmul %780, %779, %cst_419 {dimension_numbers = #tpu.dot_dimension_numbers<[1], [0], [0], [1], [0, 0, 1, 1], [], []>} : vector<4x4xf32>, vector<4x256xf32>, vector<4x256xf32> -> vector<4x256xf32>
    %c0_420 = arith.constant 0 : index
    %c0_421 = arith.constant 0 : index
    %782 = vector.load %arg24[%c0_420, %c0_421] : memref<4x1xf32, #tpu.memory_space<vmem>>, vector<4x1xf32>
    %783 = vector.broadcast %782 : vector<4x1xf32> to vector<4x256xf32>
    %784 = arith.addf %781, %783 : vector<4x256xf32>
    %cst_422 = arith.constant 0.000000e+00 : f32
    %785 = vector.broadcast %cst_422 : f32 to vector<4x256xf32>
    %786 = arith.maximumf %784, %785 : vector<4x256xf32>
    %c0_423 = arith.constant 0 : index
    %c0_424 = arith.constant 0 : index
    %787 = vector.load %arg5[%c0_423, %c0_424] : memref<64x256xf32, #tpu.memory_space<vmem>>, vector<64x256xf32>
    %cst_425 = arith.constant dense<0.000000e+00> : vector<16x256xf32>
    %788 = tpu.matmul %777, %787, %cst_425 {dimension_numbers = #tpu.dot_dimension_numbers<[1], [0], [0], [1], [0, 0, 1, 1], [], []>} : vector<16x64xf32>, vector<64x256xf32>, vector<16x256xf32> -> vector<16x256xf32>
    %cst_426 = arith.constant 0.000000e+00 : f32
    %789 = vector.broadcast %cst_426 : f32 to vector<16x324xf32>
    %c0_427 = arith.constant 0 : index
    %c0_428 = arith.constant 0 : index
    %790 = vector.load %arg36[%c0_427, %c0_428] : memref<16x324xf32, #tpu.memory_space<vmem>>, vector<16x324xf32>
    tpu.vector_store %arg36[%c0_427, %c0_428], %789 {strides = array<i32>} : memref<16x324xf32, #tpu.memory_space<vmem>>, vector<16x324xf32>,
    %c0_429 = arith.constant 0 : index
    %c34_430 = arith.constant 34 : index
    %791 = vector.load %arg36[%c0_429, %c34_430] : memref<16x324xf32, #tpu.memory_space<vmem>>, vector<16x256xf32>
    tpu.vector_store %arg36[%c0_429, %c34_430], %788 {strides = array<i32>} : memref<16x324xf32, #tpu.memory_space<vmem>>, vector<16x256xf32>,
    %792 = tpu.iota {dimensions = array<i32: 1>} : vector<1x256xi32>
    %c16_i32 = arith.constant 16 : i32
    %c0_i32_431 = arith.constant 0 : i32
    %793 = arith.cmpi eq, %c16_i32, %c0_i32_431 : i32
    %c1_i32_432 = arith.constant 1 : i32
    %794 = arith.select %793, %c1_i32_432, %c16_i32 : i32
    %795 = vector.broadcast %794 : i32 to vector<1x256xi32>
    %796 = arith.remsi %792, %795 : vector<1x256xi32>
    %c0_i32_433 = arith.constant 0 : i32
    %797 = vector.broadcast %c0_i32_433 : i32 to vector<1x256xi32>
    %798 = arith.cmpi ne, %796, %797 : vector<1x256xi32>
    %c0_i32_434 = arith.constant 0 : i32
    %799 = vector.broadcast %c0_i32_434 : i32 to vector<1x256xi32>
    %800 = arith.cmpi slt, %796, %799 : vector<1x256xi32>
    %c0_i32_435 = arith.constant 0 : i32
    %801 = arith.cmpi slt, %794, %c0_i32_435 : i32
    %802 = vector.broadcast %801 : i1 to vector<1x256xi1>
    %803 = vector.broadcast %802 : vector<1x256xi1> to vector<1x256xi1>
    %804 = arith.xori %800, %803 : vector<1x256xi1>
    %805 = arith.andi %804, %798 : vector<1x256xi1>
    %806 = vector.broadcast %794 : i32 to vector<1x256xi32>
    %807 = arith.addi %796, %806 : vector<1x256xi32>
    %808 = arith.select %805, %807, %796 : vector<1x256xi1>, vector<1x256xi32>
    %cst_436 = arith.constant 0.000000e+00 : f32
    %809 = vector.broadcast %cst_436 : f32 to vector<16x256xf32>
    %c0_437 = arith.constant 0 : index
    %c0_438 = arith.constant 0 : index
    %810 = vector.load %arg36[%c0_437, %c0_438] : memref<16x324xf32, #tpu.memory_space<vmem>>, vector<16x256xf32>
    %c2_i32_439 = arith.constant 2 : i32
    %811 = vector.broadcast %c2_i32_439 : i32 to vector<1x256xi32>
    %812 = arith.cmpi sge, %808, %811 : vector<1x256xi32>
    %c18_i32 = arith.constant 18 : i32
    %813 = vector.broadcast %c18_i32 : i32 to vector<1x256xi32>
    %814 = arith.cmpi slt, %808, %813 : vector<1x256xi32>
    %815 = arith.andi %812, %814 : vector<1x256xi1>
    %cst_440 = arith.constant 0.000000e+00 : f32
    %816 = vector.shape_cast %815 : vector<1x256xi1> to vector<1x256xi1>
    %817 = vector.broadcast %816 : vector<1x256xi1> to vector<16x256xi1>
    %818 = vector.broadcast %cst_440 : f32 to vector<16x256xf32>
    %819 = arith.select %817, %810, %818 : vector<16x256xi1>, vector<16x256xf32>
    %c0_441 = arith.constant 0 : index
    %c0_442 = arith.constant 0 : index
    %820 = vector.load %arg25[%c0_441, %c0_442] : memref<16x25xf32, #tpu.memory_space<vmem>>, vector<16x1xf32>
    %821 = vector.broadcast %820 : vector<16x1xf32> to vector<16x256xf32>
    %822 = arith.mulf %819, %821 : vector<16x256xf32>
    %823 = arith.addf %809, %822 : vector<16x256xf32>
    %c0_443 = arith.constant 0 : index
    %c1_444 = arith.constant 1 : index
    %824 = vector.load %arg36[%c0_443, %c1_444] : memref<16x324xf32, #tpu.memory_space<vmem>>, vector<16x256xf32>
    %c1_i32_445 = arith.constant 1 : i32
    %825 = vector.broadcast %c1_i32_445 : i32 to vector<1x256xi32>
    %826 = arith.cmpi sge, %808, %825 : vector<1x256xi32>
    %c17_i32 = arith.constant 17 : i32
    %827 = vector.broadcast %c17_i32 : i32 to vector<1x256xi32>
    %828 = arith.cmpi slt, %808, %827 : vector<1x256xi32>
    %829 = arith.andi %826, %828 : vector<1x256xi1>
    %cst_446 = arith.constant 0.000000e+00 : f32
    %830 = vector.shape_cast %829 : vector<1x256xi1> to vector<1x256xi1>
    %831 = vector.broadcast %830 : vector<1x256xi1> to vector<16x256xi1>
    %832 = vector.broadcast %cst_446 : f32 to vector<16x256xf32>
    %833 = arith.select %831, %824, %832 : vector<16x256xi1>, vector<16x256xf32>
    %c0_447 = arith.constant 0 : index
    %c1_448 = arith.constant 1 : index
    %834 = vector.load %arg25[%c0_447, %c1_448] : memref<16x25xf32, #tpu.memory_space<vmem>>, vector<16x1xf32>
    %835 = vector.broadcast %834 : vector<16x1xf32> to vector<16x256xf32>
    %836 = arith.mulf %833, %835 : vector<16x256xf32>
    %837 = arith.addf %823, %836 : vector<16x256xf32>
    %c0_449 = arith.constant 0 : index
    %c2_450 = arith.constant 2 : index
    %838 = vector.load %arg36[%c0_449, %c2_450] : memref<16x324xf32, #tpu.memory_space<vmem>>, vector<16x256xf32>
    %c0_451 = arith.constant 0 : index
    %c2_452 = arith.constant 2 : index
    %839 = vector.load %arg25[%c0_451, %c2_452] : memref<16x25xf32, #tpu.memory_space<vmem>>, vector<16x1xf32>
    %840 = vector.broadcast %839 : vector<16x1xf32> to vector<16x256xf32>
    %841 = arith.mulf %838, %840 : vector<16x256xf32>
    %842 = arith.addf %837, %841 : vector<16x256xf32>
    %c0_453 = arith.constant 0 : index
    %c3_454 = arith.constant 3 : index
    %843 = vector.load %arg36[%c0_453, %c3_454] : memref<16x324xf32, #tpu.memory_space<vmem>>, vector<16x256xf32>
    %c-1_i32_455 = arith.constant -1 : i32
    %844 = vector.broadcast %c-1_i32_455 : i32 to vector<1x256xi32>
    %845 = arith.cmpi sge, %808, %844 : vector<1x256xi32>
    %c15_i32 = arith.constant 15 : i32
    %846 = vector.broadcast %c15_i32 : i32 to vector<1x256xi32>
    %847 = arith.cmpi slt, %808, %846 : vector<1x256xi32>
    %848 = arith.andi %845, %847 : vector<1x256xi1>
    %cst_456 = arith.constant 0.000000e+00 : f32
    %849 = vector.shape_cast %848 : vector<1x256xi1> to vector<1x256xi1>
    %850 = vector.broadcast %849 : vector<1x256xi1> to vector<16x256xi1>
    %851 = vector.broadcast %cst_456 : f32 to vector<16x256xf32>
    %852 = arith.select %850, %843, %851 : vector<16x256xi1>, vector<16x256xf32>
    %c0_457 = arith.constant 0 : index
    %c3_458 = arith.constant 3 : index
    %853 = vector.load %arg25[%c0_457, %c3_458] : memref<16x25xf32, #tpu.memory_space<vmem>>, vector<16x1xf32>
    %854 = vector.broadcast %853 : vector<16x1xf32> to vector<16x256xf32>
    %855 = arith.mulf %852, %854 : vector<16x256xf32>
    %856 = arith.addf %842, %855 : vector<16x256xf32>
    %c0_459 = arith.constant 0 : index
    %c4_460 = arith.constant 4 : index
    %857 = vector.load %arg36[%c0_459, %c4_460] : memref<16x324xf32, #tpu.memory_space<vmem>>, vector<16x256xf32>
    %c-2_i32_461 = arith.constant -2 : i32
    %858 = vector.broadcast %c-2_i32_461 : i32 to vector<1x256xi32>
    %859 = arith.cmpi sge, %808, %858 : vector<1x256xi32>
    %c14_i32 = arith.constant 14 : i32
    %860 = vector.broadcast %c14_i32 : i32 to vector<1x256xi32>
    %861 = arith.cmpi slt, %808, %860 : vector<1x256xi32>
    %862 = arith.andi %859, %861 : vector<1x256xi1>
    %cst_462 = arith.constant 0.000000e+00 : f32
    %863 = vector.shape_cast %862 : vector<1x256xi1> to vector<1x256xi1>
    %864 = vector.broadcast %863 : vector<1x256xi1> to vector<16x256xi1>
    %865 = vector.broadcast %cst_462 : f32 to vector<16x256xf32>
    %866 = arith.select %864, %857, %865 : vector<16x256xi1>, vector<16x256xf32>
    %c0_463 = arith.constant 0 : index
    %c4_464 = arith.constant 4 : index
    %867 = vector.load %arg25[%c0_463, %c4_464] : memref<16x25xf32, #tpu.memory_space<vmem>>, vector<16x1xf32>
    %868 = vector.broadcast %867 : vector<16x1xf32> to vector<16x256xf32>
    %869 = arith.mulf %866, %868 : vector<16x256xf32>
    %870 = arith.addf %856, %869 : vector<16x256xf32>
    %c0_465 = arith.constant 0 : index
    %c16_466 = arith.constant 16 : index
    %871 = vector.load %arg36[%c0_465, %c16_466] : memref<16x324xf32, #tpu.memory_space<vmem>>, vector<16x256xf32>
    %c2_i32_467 = arith.constant 2 : i32
    %872 = vector.broadcast %c2_i32_467 : i32 to vector<1x256xi32>
    %873 = arith.cmpi sge, %808, %872 : vector<1x256xi32>
    %c18_i32_468 = arith.constant 18 : i32
    %874 = vector.broadcast %c18_i32_468 : i32 to vector<1x256xi32>
    %875 = arith.cmpi slt, %808, %874 : vector<1x256xi32>
    %876 = arith.andi %873, %875 : vector<1x256xi1>
    %cst_469 = arith.constant 0.000000e+00 : f32
    %877 = vector.shape_cast %876 : vector<1x256xi1> to vector<1x256xi1>
    %878 = vector.broadcast %877 : vector<1x256xi1> to vector<16x256xi1>
    %879 = vector.broadcast %cst_469 : f32 to vector<16x256xf32>
    %880 = arith.select %878, %871, %879 : vector<16x256xi1>, vector<16x256xf32>
    %c0_470 = arith.constant 0 : index
    %c5_471 = arith.constant 5 : index
    %881 = vector.load %arg25[%c0_470, %c5_471] : memref<16x25xf32, #tpu.memory_space<vmem>>, vector<16x1xf32>
    %882 = vector.broadcast %881 : vector<16x1xf32> to vector<16x256xf32>
    %883 = arith.mulf %880, %882 : vector<16x256xf32>
    %884 = arith.addf %870, %883 : vector<16x256xf32>
    %c0_472 = arith.constant 0 : index
    %c17_473 = arith.constant 17 : index
    %885 = vector.load %arg36[%c0_472, %c17_473] : memref<16x324xf32, #tpu.memory_space<vmem>>, vector<16x256xf32>
    %c1_i32_474 = arith.constant 1 : i32
    %886 = vector.broadcast %c1_i32_474 : i32 to vector<1x256xi32>
    %887 = arith.cmpi sge, %808, %886 : vector<1x256xi32>
    %c17_i32_475 = arith.constant 17 : i32
    %888 = vector.broadcast %c17_i32_475 : i32 to vector<1x256xi32>
    %889 = arith.cmpi slt, %808, %888 : vector<1x256xi32>
    %890 = arith.andi %887, %889 : vector<1x256xi1>
    %cst_476 = arith.constant 0.000000e+00 : f32
    %891 = vector.shape_cast %890 : vector<1x256xi1> to vector<1x256xi1>
    %892 = vector.broadcast %891 : vector<1x256xi1> to vector<16x256xi1>
    %893 = vector.broadcast %cst_476 : f32 to vector<16x256xf32>
    %894 = arith.select %892, %885, %893 : vector<16x256xi1>, vector<16x256xf32>
    %c0_477 = arith.constant 0 : index
    %c6_478 = arith.constant 6 : index
    %895 = vector.load %arg25[%c0_477, %c6_478] : memref<16x25xf32, #tpu.memory_space<vmem>>, vector<16x1xf32>
    %896 = vector.broadcast %895 : vector<16x1xf32> to vector<16x256xf32>
    %897 = arith.mulf %894, %896 : vector<16x256xf32>
    %898 = arith.addf %884, %897 : vector<16x256xf32>
    %c0_479 = arith.constant 0 : index
    %c18_480 = arith.constant 18 : index
    %899 = vector.load %arg36[%c0_479, %c18_480] : memref<16x324xf32, #tpu.memory_space<vmem>>, vector<16x256xf32>
    %c0_481 = arith.constant 0 : index
    %c7_482 = arith.constant 7 : index
    %900 = vector.load %arg25[%c0_481, %c7_482] : memref<16x25xf32, #tpu.memory_space<vmem>>, vector<16x1xf32>
    %901 = vector.broadcast %900 : vector<16x1xf32> to vector<16x256xf32>
    %902 = arith.mulf %899, %901 : vector<16x256xf32>
    %903 = arith.addf %898, %902 : vector<16x256xf32>
    %c0_483 = arith.constant 0 : index
    %c19_484 = arith.constant 19 : index
    %904 = vector.load %arg36[%c0_483, %c19_484] : memref<16x324xf32, #tpu.memory_space<vmem>>, vector<16x256xf32>
    %c-1_i32_485 = arith.constant -1 : i32
    %905 = vector.broadcast %c-1_i32_485 : i32 to vector<1x256xi32>
    %906 = arith.cmpi sge, %808, %905 : vector<1x256xi32>
    %c15_i32_486 = arith.constant 15 : i32
    %907 = vector.broadcast %c15_i32_486 : i32 to vector<1x256xi32>
    %908 = arith.cmpi slt, %808, %907 : vector<1x256xi32>
    %909 = arith.andi %906, %908 : vector<1x256xi1>
    %cst_487 = arith.constant 0.000000e+00 : f32
    %910 = vector.shape_cast %909 : vector<1x256xi1> to vector<1x256xi1>
    %911 = vector.broadcast %910 : vector<1x256xi1> to vector<16x256xi1>
    %912 = vector.broadcast %cst_487 : f32 to vector<16x256xf32>
    %913 = arith.select %911, %904, %912 : vector<16x256xi1>, vector<16x256xf32>
    %c0_488 = arith.constant 0 : index
    %c8_489 = arith.constant 8 : index
    %914 = vector.load %arg25[%c0_488, %c8_489] : memref<16x25xf32, #tpu.memory_space<vmem>>, vector<16x1xf32>
    %915 = vector.broadcast %914 : vector<16x1xf32> to vector<16x256xf32>
    %916 = arith.mulf %913, %915 : vector<16x256xf32>
    %917 = arith.addf %903, %916 : vector<16x256xf32>
    %c0_490 = arith.constant 0 : index
    %c20_491 = arith.constant 20 : index
    %918 = vector.load %arg36[%c0_490, %c20_491] : memref<16x324xf32, #tpu.memory_space<vmem>>, vector<16x256xf32>
    %c-2_i32_492 = arith.constant -2 : i32
    %919 = vector.broadcast %c-2_i32_492 : i32 to vector<1x256xi32>
    %920 = arith.cmpi sge, %808, %919 : vector<1x256xi32>
    %c14_i32_493 = arith.constant 14 : i32
    %921 = vector.broadcast %c14_i32_493 : i32 to vector<1x256xi32>
    %922 = arith.cmpi slt, %808, %921 : vector<1x256xi32>
    %923 = arith.andi %920, %922 : vector<1x256xi1>
    %cst_494 = arith.constant 0.000000e+00 : f32
    %924 = vector.shape_cast %923 : vector<1x256xi1> to vector<1x256xi1>
    %925 = vector.broadcast %924 : vector<1x256xi1> to vector<16x256xi1>
    %926 = vector.broadcast %cst_494 : f32 to vector<16x256xf32>
    %927 = arith.select %925, %918, %926 : vector<16x256xi1>, vector<16x256xf32>
    %c0_495 = arith.constant 0 : index
    %c9_496 = arith.constant 9 : index
    %928 = vector.load %arg25[%c0_495, %c9_496] : memref<16x25xf32, #tpu.memory_space<vmem>>, vector<16x1xf32>
    %929 = vector.broadcast %928 : vector<16x1xf32> to vector<16x256xf32>
    %930 = arith.mulf %927, %929 : vector<16x256xf32>
    %931 = arith.addf %917, %930 : vector<16x256xf32>
    %c0_497 = arith.constant 0 : index
    %c32_498 = arith.constant 32 : index
    %932 = vector.load %arg36[%c0_497, %c32_498] : memref<16x324xf32, #tpu.memory_space<vmem>>, vector<16x256xf32>
    %c2_i32_499 = arith.constant 2 : i32
    %933 = vector.broadcast %c2_i32_499 : i32 to vector<1x256xi32>
    %934 = arith.cmpi sge, %808, %933 : vector<1x256xi32>
    %c18_i32_500 = arith.constant 18 : i32
    %935 = vector.broadcast %c18_i32_500 : i32 to vector<1x256xi32>
    %936 = arith.cmpi slt, %808, %935 : vector<1x256xi32>
    %937 = arith.andi %934, %936 : vector<1x256xi1>
    %cst_501 = arith.constant 0.000000e+00 : f32
    %938 = vector.shape_cast %937 : vector<1x256xi1> to vector<1x256xi1>
    %939 = vector.broadcast %938 : vector<1x256xi1> to vector<16x256xi1>
    %940 = vector.broadcast %cst_501 : f32 to vector<16x256xf32>
    %941 = arith.select %939, %932, %940 : vector<16x256xi1>, vector<16x256xf32>
    %c0_502 = arith.constant 0 : index
    %c10_503 = arith.constant 10 : index
    %942 = vector.load %arg25[%c0_502, %c10_503] : memref<16x25xf32, #tpu.memory_space<vmem>>, vector<16x1xf32>
    %943 = vector.broadcast %942 : vector<16x1xf32> to vector<16x256xf32>
    %944 = arith.mulf %941, %943 : vector<16x256xf32>
    %945 = arith.addf %931, %944 : vector<16x256xf32>
    %c0_504 = arith.constant 0 : index
    %c33_505 = arith.constant 33 : index
    %946 = vector.load %arg36[%c0_504, %c33_505] : memref<16x324xf32, #tpu.memory_space<vmem>>, vector<16x256xf32>
    %c1_i32_506 = arith.constant 1 : i32
    %947 = vector.broadcast %c1_i32_506 : i32 to vector<1x256xi32>
    %948 = arith.cmpi sge, %808, %947 : vector<1x256xi32>
    %c17_i32_507 = arith.constant 17 : i32
    %949 = vector.broadcast %c17_i32_507 : i32 to vector<1x256xi32>
    %950 = arith.cmpi slt, %808, %949 : vector<1x256xi32>
    %951 = arith.andi %948, %950 : vector<1x256xi1>
    %cst_508 = arith.constant 0.000000e+00 : f32
    %952 = vector.shape_cast %951 : vector<1x256xi1> to vector<1x256xi1>
    %953 = vector.broadcast %952 : vector<1x256xi1> to vector<16x256xi1>
    %954 = vector.broadcast %cst_508 : f32 to vector<16x256xf32>
    %955 = arith.select %953, %946, %954 : vector<16x256xi1>, vector<16x256xf32>
    %c0_509 = arith.constant 0 : index
    %c11_510 = arith.constant 11 : index
    %956 = vector.load %arg25[%c0_509, %c11_510] : memref<16x25xf32, #tpu.memory_space<vmem>>, vector<16x1xf32>
    %957 = vector.broadcast %956 : vector<16x1xf32> to vector<16x256xf32>
    %958 = arith.mulf %955, %957 : vector<16x256xf32>
    %959 = arith.addf %945, %958 : vector<16x256xf32>
    %c0_511 = arith.constant 0 : index
    %c34_512 = arith.constant 34 : index
    %960 = vector.load %arg36[%c0_511, %c34_512] : memref<16x324xf32, #tpu.memory_space<vmem>>, vector<16x256xf32>
    %c0_513 = arith.constant 0 : index
    %c12_514 = arith.constant 12 : index
    %961 = vector.load %arg25[%c0_513, %c12_514] : memref<16x25xf32, #tpu.memory_space<vmem>>, vector<16x1xf32>
    %962 = vector.broadcast %961 : vector<16x1xf32> to vector<16x256xf32>
    %963 = arith.mulf %960, %962 : vector<16x256xf32>
    %964 = arith.addf %959, %963 : vector<16x256xf32>
    %c0_515 = arith.constant 0 : index
    %c35_516 = arith.constant 35 : index
    %965 = vector.load %arg36[%c0_515, %c35_516] : memref<16x324xf32, #tpu.memory_space<vmem>>, vector<16x256xf32>
    %c-1_i32_517 = arith.constant -1 : i32
    %966 = vector.broadcast %c-1_i32_517 : i32 to vector<1x256xi32>
    %967 = arith.cmpi sge, %808, %966 : vector<1x256xi32>
    %c15_i32_518 = arith.constant 15 : i32
    %968 = vector.broadcast %c15_i32_518 : i32 to vector<1x256xi32>
    %969 = arith.cmpi slt, %808, %968 : vector<1x256xi32>
    %970 = arith.andi %967, %969 : vector<1x256xi1>
    %cst_519 = arith.constant 0.000000e+00 : f32
    %971 = vector.shape_cast %970 : vector<1x256xi1> to vector<1x256xi1>
    %972 = vector.broadcast %971 : vector<1x256xi1> to vector<16x256xi1>
    %973 = vector.broadcast %cst_519 : f32 to vector<16x256xf32>
    %974 = arith.select %972, %965, %973 : vector<16x256xi1>, vector<16x256xf32>
    %c0_520 = arith.constant 0 : index
    %c13_521 = arith.constant 13 : index
    %975 = vector.load %arg25[%c0_520, %c13_521] : memref<16x25xf32, #tpu.memory_space<vmem>>, vector<16x1xf32>
    %976 = vector.broadcast %975 : vector<16x1xf32> to vector<16x256xf32>
    %977 = arith.mulf %974, %976 : vector<16x256xf32>
    %978 = arith.addf %964, %977 : vector<16x256xf32>
    %c0_522 = arith.constant 0 : index
    %c36_523 = arith.constant 36 : index
    %979 = vector.load %arg36[%c0_522, %c36_523] : memref<16x324xf32, #tpu.memory_space<vmem>>, vector<16x256xf32>
    %c-2_i32_524 = arith.constant -2 : i32
    %980 = vector.broadcast %c-2_i32_524 : i32 to vector<1x256xi32>
    %981 = arith.cmpi sge, %808, %980 : vector<1x256xi32>
    %c14_i32_525 = arith.constant 14 : i32
    %982 = vector.broadcast %c14_i32_525 : i32 to vector<1x256xi32>
    %983 = arith.cmpi slt, %808, %982 : vector<1x256xi32>
    %984 = arith.andi %981, %983 : vector<1x256xi1>
    %cst_526 = arith.constant 0.000000e+00 : f32
    %985 = vector.shape_cast %984 : vector<1x256xi1> to vector<1x256xi1>
    %986 = vector.broadcast %985 : vector<1x256xi1> to vector<16x256xi1>
    %987 = vector.broadcast %cst_526 : f32 to vector<16x256xf32>
    %988 = arith.select %986, %979, %987 : vector<16x256xi1>, vector<16x256xf32>
    %c0_527 = arith.constant 0 : index
    %c14_528 = arith.constant 14 : index
    %989 = vector.load %arg25[%c0_527, %c14_528] : memref<16x25xf32, #tpu.memory_space<vmem>>, vector<16x1xf32>
    %990 = vector.broadcast %989 : vector<16x1xf32> to vector<16x256xf32>
    %991 = arith.mulf %988, %990 : vector<16x256xf32>
    %992 = arith.addf %978, %991 : vector<16x256xf32>
    %c0_529 = arith.constant 0 : index
    %c48 = arith.constant 48 : index
    %993 = vector.load %arg36[%c0_529, %c48] : memref<16x324xf32, #tpu.memory_space<vmem>>, vector<16x256xf32>
    %c2_i32_530 = arith.constant 2 : i32
    %994 = vector.broadcast %c2_i32_530 : i32 to vector<1x256xi32>
    %995 = arith.cmpi sge, %808, %994 : vector<1x256xi32>
    %c18_i32_531 = arith.constant 18 : i32
    %996 = vector.broadcast %c18_i32_531 : i32 to vector<1x256xi32>
    %997 = arith.cmpi slt, %808, %996 : vector<1x256xi32>
    %998 = arith.andi %995, %997 : vector<1x256xi1>
    %cst_532 = arith.constant 0.000000e+00 : f32
    %999 = vector.shape_cast %998 : vector<1x256xi1> to vector<1x256xi1>
    %1000 = vector.broadcast %999 : vector<1x256xi1> to vector<16x256xi1>
    %1001 = vector.broadcast %cst_532 : f32 to vector<16x256xf32>
    %1002 = arith.select %1000, %993, %1001 : vector<16x256xi1>, vector<16x256xf32>
    %c0_533 = arith.constant 0 : index
    %c15_534 = arith.constant 15 : index
    %1003 = vector.load %arg25[%c0_533, %c15_534] : memref<16x25xf32, #tpu.memory_space<vmem>>, vector<16x1xf32>
    %1004 = vector.broadcast %1003 : vector<16x1xf32> to vector<16x256xf32>
    %1005 = arith.mulf %1002, %1004 : vector<16x256xf32>
    %1006 = arith.addf %992, %1005 : vector<16x256xf32>
    %c0_535 = arith.constant 0 : index
    %c49 = arith.constant 49 : index
    %1007 = vector.load %arg36[%c0_535, %c49] : memref<16x324xf32, #tpu.memory_space<vmem>>, vector<16x256xf32>
    %c1_i32_536 = arith.constant 1 : i32
    %1008 = vector.broadcast %c1_i32_536 : i32 to vector<1x256xi32>
    %1009 = arith.cmpi sge, %808, %1008 : vector<1x256xi32>
    %c17_i32_537 = arith.constant 17 : i32
    %1010 = vector.broadcast %c17_i32_537 : i32 to vector<1x256xi32>
    %1011 = arith.cmpi slt, %808, %1010 : vector<1x256xi32>
    %1012 = arith.andi %1009, %1011 : vector<1x256xi1>
    %cst_538 = arith.constant 0.000000e+00 : f32
    %1013 = vector.shape_cast %1012 : vector<1x256xi1> to vector<1x256xi1>
    %1014 = vector.broadcast %1013 : vector<1x256xi1> to vector<16x256xi1>
    %1015 = vector.broadcast %cst_538 : f32 to vector<16x256xf32>
    %1016 = arith.select %1014, %1007, %1015 : vector<16x256xi1>, vector<16x256xf32>
    %c0_539 = arith.constant 0 : index
    %c16_540 = arith.constant 16 : index
    %1017 = vector.load %arg25[%c0_539, %c16_540] : memref<16x25xf32, #tpu.memory_space<vmem>>, vector<16x1xf32>
    %1018 = vector.broadcast %1017 : vector<16x1xf32> to vector<16x256xf32>
    %1019 = arith.mulf %1016, %1018 : vector<16x256xf32>
    %1020 = arith.addf %1006, %1019 : vector<16x256xf32>
    %c0_541 = arith.constant 0 : index
    %c50 = arith.constant 50 : index
    %1021 = vector.load %arg36[%c0_541, %c50] : memref<16x324xf32, #tpu.memory_space<vmem>>, vector<16x256xf32>
    %c0_542 = arith.constant 0 : index
    %c17_543 = arith.constant 17 : index
    %1022 = vector.load %arg25[%c0_542, %c17_543] : memref<16x25xf32, #tpu.memory_space<vmem>>, vector<16x1xf32>
    %1023 = vector.broadcast %1022 : vector<16x1xf32> to vector<16x256xf32>
    %1024 = arith.mulf %1021, %1023 : vector<16x256xf32>
    %1025 = arith.addf %1020, %1024 : vector<16x256xf32>
    %c0_544 = arith.constant 0 : index
    %c51 = arith.constant 51 : index
    %1026 = vector.load %arg36[%c0_544, %c51] : memref<16x324xf32, #tpu.memory_space<vmem>>, vector<16x256xf32>
    %c-1_i32_545 = arith.constant -1 : i32
    %1027 = vector.broadcast %c-1_i32_545 : i32 to vector<1x256xi32>
    %1028 = arith.cmpi sge, %808, %1027 : vector<1x256xi32>
    %c15_i32_546 = arith.constant 15 : i32
    %1029 = vector.broadcast %c15_i32_546 : i32 to vector<1x256xi32>
    %1030 = arith.cmpi slt, %808, %1029 : vector<1x256xi32>
    %1031 = arith.andi %1028, %1030 : vector<1x256xi1>
    %cst_547 = arith.constant 0.000000e+00 : f32
    %1032 = vector.shape_cast %1031 : vector<1x256xi1> to vector<1x256xi1>
    %1033 = vector.broadcast %1032 : vector<1x256xi1> to vector<16x256xi1>
    %1034 = vector.broadcast %cst_547 : f32 to vector<16x256xf32>
    %1035 = arith.select %1033, %1026, %1034 : vector<16x256xi1>, vector<16x256xf32>
    %c0_548 = arith.constant 0 : index
    %c18_549 = arith.constant 18 : index
    %1036 = vector.load %arg25[%c0_548, %c18_549] : memref<16x25xf32, #tpu.memory_space<vmem>>, vector<16x1xf32>
    %1037 = vector.broadcast %1036 : vector<16x1xf32> to vector<16x256xf32>
    %1038 = arith.mulf %1035, %1037 : vector<16x256xf32>
    %1039 = arith.addf %1025, %1038 : vector<16x256xf32>
    %c0_550 = arith.constant 0 : index
    %c52 = arith.constant 52 : index
    %1040 = vector.load %arg36[%c0_550, %c52] : memref<16x324xf32, #tpu.memory_space<vmem>>, vector<16x256xf32>
    %c-2_i32_551 = arith.constant -2 : i32
    %1041 = vector.broadcast %c-2_i32_551 : i32 to vector<1x256xi32>
    %1042 = arith.cmpi sge, %808, %1041 : vector<1x256xi32>
    %c14_i32_552 = arith.constant 14 : i32
    %1043 = vector.broadcast %c14_i32_552 : i32 to vector<1x256xi32>
    %1044 = arith.cmpi slt, %808, %1043 : vector<1x256xi32>
    %1045 = arith.andi %1042, %1044 : vector<1x256xi1>
    %cst_553 = arith.constant 0.000000e+00 : f32
    %1046 = vector.shape_cast %1045 : vector<1x256xi1> to vector<1x256xi1>
    %1047 = vector.broadcast %1046 : vector<1x256xi1> to vector<16x256xi1>
    %1048 = vector.broadcast %cst_553 : f32 to vector<16x256xf32>
    %1049 = arith.select %1047, %1040, %1048 : vector<16x256xi1>, vector<16x256xf32>
    %c0_554 = arith.constant 0 : index
    %c19_555 = arith.constant 19 : index
    %1050 = vector.load %arg25[%c0_554, %c19_555] : memref<16x25xf32, #tpu.memory_space<vmem>>, vector<16x1xf32>
    %1051 = vector.broadcast %1050 : vector<16x1xf32> to vector<16x256xf32>
    %1052 = arith.mulf %1049, %1051 : vector<16x256xf32>
    %1053 = arith.addf %1039, %1052 : vector<16x256xf32>
    %c0_556 = arith.constant 0 : index
    %c64 = arith.constant 64 : index
    %1054 = vector.load %arg36[%c0_556, %c64] : memref<16x324xf32, #tpu.memory_space<vmem>>, vector<16x256xf32>
    %c2_i32_557 = arith.constant 2 : i32
    %1055 = vector.broadcast %c2_i32_557 : i32 to vector<1x256xi32>
    %1056 = arith.cmpi sge, %808, %1055 : vector<1x256xi32>
    %c18_i32_558 = arith.constant 18 : i32
    %1057 = vector.broadcast %c18_i32_558 : i32 to vector<1x256xi32>
    %1058 = arith.cmpi slt, %808, %1057 : vector<1x256xi32>
    %1059 = arith.andi %1056, %1058 : vector<1x256xi1>
    %cst_559 = arith.constant 0.000000e+00 : f32
    %1060 = vector.shape_cast %1059 : vector<1x256xi1> to vector<1x256xi1>
    %1061 = vector.broadcast %1060 : vector<1x256xi1> to vector<16x256xi1>
    %1062 = vector.broadcast %cst_559 : f32 to vector<16x256xf32>
    %1063 = arith.select %1061, %1054, %1062 : vector<16x256xi1>, vector<16x256xf32>
    %c0_560 = arith.constant 0 : index
    %c20_561 = arith.constant 20 : index
    %1064 = vector.load %arg25[%c0_560, %c20_561] : memref<16x25xf32, #tpu.memory_space<vmem>>, vector<16x1xf32>
    %1065 = vector.broadcast %1064 : vector<16x1xf32> to vector<16x256xf32>
    %1066 = arith.mulf %1063, %1065 : vector<16x256xf32>
    %1067 = arith.addf %1053, %1066 : vector<16x256xf32>
    %c0_562 = arith.constant 0 : index
    %c65 = arith.constant 65 : index
    %1068 = vector.load %arg36[%c0_562, %c65] : memref<16x324xf32, #tpu.memory_space<vmem>>, vector<16x256xf32>
    %c1_i32_563 = arith.constant 1 : i32
    %1069 = vector.broadcast %c1_i32_563 : i32 to vector<1x256xi32>
    %1070 = arith.cmpi sge, %808, %1069 : vector<1x256xi32>
    %c17_i32_564 = arith.constant 17 : i32
    %1071 = vector.broadcast %c17_i32_564 : i32 to vector<1x256xi32>
    %1072 = arith.cmpi slt, %808, %1071 : vector<1x256xi32>
    %1073 = arith.andi %1070, %1072 : vector<1x256xi1>
    %cst_565 = arith.constant 0.000000e+00 : f32
    %1074 = vector.shape_cast %1073 : vector<1x256xi1> to vector<1x256xi1>
    %1075 = vector.broadcast %1074 : vector<1x256xi1> to vector<16x256xi1>
    %1076 = vector.broadcast %cst_565 : f32 to vector<16x256xf32>
    %1077 = arith.select %1075, %1068, %1076 : vector<16x256xi1>, vector<16x256xf32>
    %c0_566 = arith.constant 0 : index
    %c21_567 = arith.constant 21 : index
    %1078 = vector.load %arg25[%c0_566, %c21_567] : memref<16x25xf32, #tpu.memory_space<vmem>>, vector<16x1xf32>
    %1079 = vector.broadcast %1078 : vector<16x1xf32> to vector<16x256xf32>
    %1080 = arith.mulf %1077, %1079 : vector<16x256xf32>
    %1081 = arith.addf %1067, %1080 : vector<16x256xf32>
    %c0_568 = arith.constant 0 : index
    %c66 = arith.constant 66 : index
    %1082 = vector.load %arg36[%c0_568, %c66] : memref<16x324xf32, #tpu.memory_space<vmem>>, vector<16x256xf32>
    %c0_569 = arith.constant 0 : index
    %c22_570 = arith.constant 22 : index
    %1083 = vector.load %arg25[%c0_569, %c22_570] : memref<16x25xf32, #tpu.memory_space<vmem>>, vector<16x1xf32>
    %1084 = vector.broadcast %1083 : vector<16x1xf32> to vector<16x256xf32>
    %1085 = arith.mulf %1082, %1084 : vector<16x256xf32>
    %1086 = arith.addf %1081, %1085 : vector<16x256xf32>
    %c0_571 = arith.constant 0 : index
    %c67 = arith.constant 67 : index
    %1087 = vector.load %arg36[%c0_571, %c67] : memref<16x324xf32, #tpu.memory_space<vmem>>, vector<16x256xf32>
    %c-1_i32_572 = arith.constant -1 : i32
    %1088 = vector.broadcast %c-1_i32_572 : i32 to vector<1x256xi32>
    %1089 = arith.cmpi sge, %808, %1088 : vector<1x256xi32>
    %c15_i32_573 = arith.constant 15 : i32
    %1090 = vector.broadcast %c15_i32_573 : i32 to vector<1x256xi32>
    %1091 = arith.cmpi slt, %808, %1090 : vector<1x256xi32>
    %1092 = arith.andi %1089, %1091 : vector<1x256xi1>
    %cst_574 = arith.constant 0.000000e+00 : f32
    %1093 = vector.shape_cast %1092 : vector<1x256xi1> to vector<1x256xi1>
    %1094 = vector.broadcast %1093 : vector<1x256xi1> to vector<16x256xi1>
    %1095 = vector.broadcast %cst_574 : f32 to vector<16x256xf32>
    %1096 = arith.select %1094, %1087, %1095 : vector<16x256xi1>, vector<16x256xf32>
    %c0_575 = arith.constant 0 : index
    %c23_576 = arith.constant 23 : index
    %1097 = vector.load %arg25[%c0_575, %c23_576] : memref<16x25xf32, #tpu.memory_space<vmem>>, vector<16x1xf32>
    %1098 = vector.broadcast %1097 : vector<16x1xf32> to vector<16x256xf32>
    %1099 = arith.mulf %1096, %1098 : vector<16x256xf32>
    %1100 = arith.addf %1086, %1099 : vector<16x256xf32>
    %c0_577 = arith.constant 0 : index
    %c68 = arith.constant 68 : index
    %1101 = vector.load %arg36[%c0_577, %c68] : memref<16x324xf32, #tpu.memory_space<vmem>>, vector<16x256xf32>
    %c-2_i32_578 = arith.constant -2 : i32
    %1102 = vector.broadcast %c-2_i32_578 : i32 to vector<1x256xi32>
    %1103 = arith.cmpi sge, %808, %1102 : vector<1x256xi32>
    %c14_i32_579 = arith.constant 14 : i32
    %1104 = vector.broadcast %c14_i32_579 : i32 to vector<1x256xi32>
    %1105 = arith.cmpi slt, %808, %1104 : vector<1x256xi32>
    %1106 = arith.andi %1103, %1105 : vector<1x256xi1>
    %cst_580 = arith.constant 0.000000e+00 : f32
    %1107 = vector.shape_cast %1106 : vector<1x256xi1> to vector<1x256xi1>
    %1108 = vector.broadcast %1107 : vector<1x256xi1> to vector<16x256xi1>
    %1109 = vector.broadcast %cst_580 : f32 to vector<16x256xf32>
    %1110 = arith.select %1108, %1101, %1109 : vector<16x256xi1>, vector<16x256xf32>
    %c0_581 = arith.constant 0 : index
    %c24_582 = arith.constant 24 : index
    %1111 = vector.load %arg25[%c0_581, %c24_582] : memref<16x25xf32, #tpu.memory_space<vmem>>, vector<16x1xf32>
    %1112 = vector.broadcast %1111 : vector<16x1xf32> to vector<16x256xf32>
    %1113 = arith.mulf %1110, %1112 : vector<16x256xf32>
    %1114 = arith.addf %1100, %1113 : vector<16x256xf32>
    %c0_583 = arith.constant 0 : index
    %c0_584 = arith.constant 0 : index
    %1115 = vector.load %arg26[%c0_583, %c0_584] : memref<16x1xf32, #tpu.memory_space<vmem>>, vector<16x1xf32>
    %1116 = vector.broadcast %1115 : vector<16x1xf32> to vector<16x256xf32>
    %1117 = arith.addf %1114, %1116 : vector<16x256xf32>
    %cst_585 = arith.constant 0.000000e+00 : f32
    %1118 = vector.broadcast %cst_585 : f32 to vector<16x256xf32>
    %1119 = arith.maximumf %1117, %1118 : vector<16x256xf32>
    %cst_586 = arith.constant 0.000000e+00 : f32
    %1120 = vector.broadcast %cst_586 : f32 to vector<4x324xf32>
    %c0_587 = arith.constant 0 : index
    %c0_588 = arith.constant 0 : index
    %1121 = vector.load %arg37[%c0_587, %c0_588] : memref<4x324xf32, #tpu.memory_space<vmem>>, vector<4x324xf32>
    tpu.vector_store %arg37[%c0_587, %c0_588], %1120 {strides = array<i32>} : memref<4x324xf32, #tpu.memory_space<vmem>>, vector<4x324xf32>,
    %c0_589 = arith.constant 0 : index
    %c34_590 = arith.constant 34 : index
    %1122 = vector.load %arg37[%c0_589, %c34_590] : memref<4x324xf32, #tpu.memory_space<vmem>>, vector<4x256xf32>
    tpu.vector_store %arg37[%c0_589, %c34_590], %786 {strides = array<i32>} : memref<4x324xf32, #tpu.memory_space<vmem>>, vector<4x256xf32>,
    %1123 = tpu.iota {dimensions = array<i32: 1>} : vector<1x256xi32>
    %c16_i32_591 = arith.constant 16 : i32
    %c0_i32_592 = arith.constant 0 : i32
    %1124 = arith.cmpi eq, %c16_i32_591, %c0_i32_592 : i32
    %c1_i32_593 = arith.constant 1 : i32
    %1125 = arith.select %1124, %c1_i32_593, %c16_i32_591 : i32
    %1126 = vector.broadcast %1125 : i32 to vector<1x256xi32>
    %1127 = arith.remsi %1123, %1126 : vector<1x256xi32>
    %c0_i32_594 = arith.constant 0 : i32
    %1128 = vector.broadcast %c0_i32_594 : i32 to vector<1x256xi32>
    %1129 = arith.cmpi ne, %1127, %1128 : vector<1x256xi32>
    %c0_i32_595 = arith.constant 0 : i32
    %1130 = vector.broadcast %c0_i32_595 : i32 to vector<1x256xi32>
    %1131 = arith.cmpi slt, %1127, %1130 : vector<1x256xi32>
    %c0_i32_596 = arith.constant 0 : i32
    %1132 = arith.cmpi slt, %1125, %c0_i32_596 : i32
    %1133 = vector.broadcast %1132 : i1 to vector<1x256xi1>
    %1134 = vector.broadcast %1133 : vector<1x256xi1> to vector<1x256xi1>
    %1135 = arith.xori %1131, %1134 : vector<1x256xi1>
    %1136 = arith.andi %1135, %1129 : vector<1x256xi1>
    %1137 = vector.broadcast %1125 : i32 to vector<1x256xi32>
    %1138 = arith.addi %1127, %1137 : vector<1x256xi32>
    %1139 = arith.select %1136, %1138, %1127 : vector<1x256xi1>, vector<1x256xi32>
    %cst_597 = arith.constant 0.000000e+00 : f32
    %1140 = vector.broadcast %cst_597 : f32 to vector<4x256xf32>
    %c0_598 = arith.constant 0 : index
    %c0_599 = arith.constant 0 : index
    %1141 = vector.load %arg37[%c0_598, %c0_599] : memref<4x324xf32, #tpu.memory_space<vmem>>, vector<4x256xf32>
    %c2_i32_600 = arith.constant 2 : i32
    %1142 = vector.broadcast %c2_i32_600 : i32 to vector<1x256xi32>
    %1143 = arith.cmpi sge, %1139, %1142 : vector<1x256xi32>
    %c18_i32_601 = arith.constant 18 : i32
    %1144 = vector.broadcast %c18_i32_601 : i32 to vector<1x256xi32>
    %1145 = arith.cmpi slt, %1139, %1144 : vector<1x256xi32>
    %1146 = arith.andi %1143, %1145 : vector<1x256xi1>
    %cst_602 = arith.constant 0.000000e+00 : f32
    %1147 = vector.shape_cast %1146 : vector<1x256xi1> to vector<1x256xi1>
    %1148 = vector.broadcast %1147 : vector<1x256xi1> to vector<4x256xi1>
    %1149 = vector.broadcast %cst_602 : f32 to vector<4x256xf32>
    %1150 = arith.select %1148, %1141, %1149 : vector<4x256xi1>, vector<4x256xf32>
    %c0_603 = arith.constant 0 : index
    %c0_604 = arith.constant 0 : index
    %1151 = vector.load %arg27[%c0_603, %c0_604] : memref<4x25xf32, #tpu.memory_space<vmem>>, vector<4x1xf32>
    %1152 = vector.broadcast %1151 : vector<4x1xf32> to vector<4x256xf32>
    %1153 = arith.mulf %1150, %1152 : vector<4x256xf32>
    %1154 = arith.addf %1140, %1153 : vector<4x256xf32>
    %c0_605 = arith.constant 0 : index
    %c1_606 = arith.constant 1 : index
    %1155 = vector.load %arg37[%c0_605, %c1_606] : memref<4x324xf32, #tpu.memory_space<vmem>>, vector<4x256xf32>
    %c1_i32_607 = arith.constant 1 : i32
    %1156 = vector.broadcast %c1_i32_607 : i32 to vector<1x256xi32>
    %1157 = arith.cmpi sge, %1139, %1156 : vector<1x256xi32>
    %c17_i32_608 = arith.constant 17 : i32
    %1158 = vector.broadcast %c17_i32_608 : i32 to vector<1x256xi32>
    %1159 = arith.cmpi slt, %1139, %1158 : vector<1x256xi32>
    %1160 = arith.andi %1157, %1159 : vector<1x256xi1>
    %cst_609 = arith.constant 0.000000e+00 : f32
    %1161 = vector.shape_cast %1160 : vector<1x256xi1> to vector<1x256xi1>
    %1162 = vector.broadcast %1161 : vector<1x256xi1> to vector<4x256xi1>
    %1163 = vector.broadcast %cst_609 : f32 to vector<4x256xf32>
    %1164 = arith.select %1162, %1155, %1163 : vector<4x256xi1>, vector<4x256xf32>
    %c0_610 = arith.constant 0 : index
    %c1_611 = arith.constant 1 : index
    %1165 = vector.load %arg27[%c0_610, %c1_611] : memref<4x25xf32, #tpu.memory_space<vmem>>, vector<4x1xf32>
    %1166 = vector.broadcast %1165 : vector<4x1xf32> to vector<4x256xf32>
    %1167 = arith.mulf %1164, %1166 : vector<4x256xf32>
    %1168 = arith.addf %1154, %1167 : vector<4x256xf32>
    %c0_612 = arith.constant 0 : index
    %c2_613 = arith.constant 2 : index
    %1169 = vector.load %arg37[%c0_612, %c2_613] : memref<4x324xf32, #tpu.memory_space<vmem>>, vector<4x256xf32>
    %c0_614 = arith.constant 0 : index
    %c2_615 = arith.constant 2 : index
    %1170 = vector.load %arg27[%c0_614, %c2_615] : memref<4x25xf32, #tpu.memory_space<vmem>>, vector<4x1xf32>
    %1171 = vector.broadcast %1170 : vector<4x1xf32> to vector<4x256xf32>
    %1172 = arith.mulf %1169, %1171 : vector<4x256xf32>
    %1173 = arith.addf %1168, %1172 : vector<4x256xf32>
    %c0_616 = arith.constant 0 : index
    %c3_617 = arith.constant 3 : index
    %1174 = vector.load %arg37[%c0_616, %c3_617] : memref<4x324xf32, #tpu.memory_space<vmem>>, vector<4x256xf32>
    %c-1_i32_618 = arith.constant -1 : i32
    %1175 = vector.broadcast %c-1_i32_618 : i32 to vector<1x256xi32>
    %1176 = arith.cmpi sge, %1139, %1175 : vector<1x256xi32>
    %c15_i32_619 = arith.constant 15 : i32
    %1177 = vector.broadcast %c15_i32_619 : i32 to vector<1x256xi32>
    %1178 = arith.cmpi slt, %1139, %1177 : vector<1x256xi32>
    %1179 = arith.andi %1176, %1178 : vector<1x256xi1>
    %cst_620 = arith.constant 0.000000e+00 : f32
    %1180 = vector.shape_cast %1179 : vector<1x256xi1> to vector<1x256xi1>
    %1181 = vector.broadcast %1180 : vector<1x256xi1> to vector<4x256xi1>
    %1182 = vector.broadcast %cst_620 : f32 to vector<4x256xf32>
    %1183 = arith.select %1181, %1174, %1182 : vector<4x256xi1>, vector<4x256xf32>
    %c0_621 = arith.constant 0 : index
    %c3_622 = arith.constant 3 : index
    %1184 = vector.load %arg27[%c0_621, %c3_622] : memref<4x25xf32, #tpu.memory_space<vmem>>, vector<4x1xf32>
    %1185 = vector.broadcast %1184 : vector<4x1xf32> to vector<4x256xf32>
    %1186 = arith.mulf %1183, %1185 : vector<4x256xf32>
    %1187 = arith.addf %1173, %1186 : vector<4x256xf32>
    %c0_623 = arith.constant 0 : index
    %c4_624 = arith.constant 4 : index
    %1188 = vector.load %arg37[%c0_623, %c4_624] : memref<4x324xf32, #tpu.memory_space<vmem>>, vector<4x256xf32>
    %c-2_i32_625 = arith.constant -2 : i32
    %1189 = vector.broadcast %c-2_i32_625 : i32 to vector<1x256xi32>
    %1190 = arith.cmpi sge, %1139, %1189 : vector<1x256xi32>
    %c14_i32_626 = arith.constant 14 : i32
    %1191 = vector.broadcast %c14_i32_626 : i32 to vector<1x256xi32>
    %1192 = arith.cmpi slt, %1139, %1191 : vector<1x256xi32>
    %1193 = arith.andi %1190, %1192 : vector<1x256xi1>
    %cst_627 = arith.constant 0.000000e+00 : f32
    %1194 = vector.shape_cast %1193 : vector<1x256xi1> to vector<1x256xi1>
    %1195 = vector.broadcast %1194 : vector<1x256xi1> to vector<4x256xi1>
    %1196 = vector.broadcast %cst_627 : f32 to vector<4x256xf32>
    %1197 = arith.select %1195, %1188, %1196 : vector<4x256xi1>, vector<4x256xf32>
    %c0_628 = arith.constant 0 : index
    %c4_629 = arith.constant 4 : index
    %1198 = vector.load %arg27[%c0_628, %c4_629] : memref<4x25xf32, #tpu.memory_space<vmem>>, vector<4x1xf32>
    %1199 = vector.broadcast %1198 : vector<4x1xf32> to vector<4x256xf32>
    %1200 = arith.mulf %1197, %1199 : vector<4x256xf32>
    %1201 = arith.addf %1187, %1200 : vector<4x256xf32>
    %c0_630 = arith.constant 0 : index
    %c16_631 = arith.constant 16 : index
    %1202 = vector.load %arg37[%c0_630, %c16_631] : memref<4x324xf32, #tpu.memory_space<vmem>>, vector<4x256xf32>
    %c2_i32_632 = arith.constant 2 : i32
    %1203 = vector.broadcast %c2_i32_632 : i32 to vector<1x256xi32>
    %1204 = arith.cmpi sge, %1139, %1203 : vector<1x256xi32>
    %c18_i32_633 = arith.constant 18 : i32
    %1205 = vector.broadcast %c18_i32_633 : i32 to vector<1x256xi32>
    %1206 = arith.cmpi slt, %1139, %1205 : vector<1x256xi32>
    %1207 = arith.andi %1204, %1206 : vector<1x256xi1>
    %cst_634 = arith.constant 0.000000e+00 : f32
    %1208 = vector.shape_cast %1207 : vector<1x256xi1> to vector<1x256xi1>
    %1209 = vector.broadcast %1208 : vector<1x256xi1> to vector<4x256xi1>
    %1210 = vector.broadcast %cst_634 : f32 to vector<4x256xf32>
    %1211 = arith.select %1209, %1202, %1210 : vector<4x256xi1>, vector<4x256xf32>
    %c0_635 = arith.constant 0 : index
    %c5_636 = arith.constant 5 : index
    %1212 = vector.load %arg27[%c0_635, %c5_636] : memref<4x25xf32, #tpu.memory_space<vmem>>, vector<4x1xf32>
    %1213 = vector.broadcast %1212 : vector<4x1xf32> to vector<4x256xf32>
    %1214 = arith.mulf %1211, %1213 : vector<4x256xf32>
    %1215 = arith.addf %1201, %1214 : vector<4x256xf32>
    %c0_637 = arith.constant 0 : index
    %c17_638 = arith.constant 17 : index
    %1216 = vector.load %arg37[%c0_637, %c17_638] : memref<4x324xf32, #tpu.memory_space<vmem>>, vector<4x256xf32>
    %c1_i32_639 = arith.constant 1 : i32
    %1217 = vector.broadcast %c1_i32_639 : i32 to vector<1x256xi32>
    %1218 = arith.cmpi sge, %1139, %1217 : vector<1x256xi32>
    %c17_i32_640 = arith.constant 17 : i32
    %1219 = vector.broadcast %c17_i32_640 : i32 to vector<1x256xi32>
    %1220 = arith.cmpi slt, %1139, %1219 : vector<1x256xi32>
    %1221 = arith.andi %1218, %1220 : vector<1x256xi1>
    %cst_641 = arith.constant 0.000000e+00 : f32
    %1222 = vector.shape_cast %1221 : vector<1x256xi1> to vector<1x256xi1>
    %1223 = vector.broadcast %1222 : vector<1x256xi1> to vector<4x256xi1>
    %1224 = vector.broadcast %cst_641 : f32 to vector<4x256xf32>
    %1225 = arith.select %1223, %1216, %1224 : vector<4x256xi1>, vector<4x256xf32>
    %c0_642 = arith.constant 0 : index
    %c6_643 = arith.constant 6 : index
    %1226 = vector.load %arg27[%c0_642, %c6_643] : memref<4x25xf32, #tpu.memory_space<vmem>>, vector<4x1xf32>
    %1227 = vector.broadcast %1226 : vector<4x1xf32> to vector<4x256xf32>
    %1228 = arith.mulf %1225, %1227 : vector<4x256xf32>
    %1229 = arith.addf %1215, %1228 : vector<4x256xf32>
    %c0_644 = arith.constant 0 : index
    %c18_645 = arith.constant 18 : index
    %1230 = vector.load %arg37[%c0_644, %c18_645] : memref<4x324xf32, #tpu.memory_space<vmem>>, vector<4x256xf32>
    %c0_646 = arith.constant 0 : index
    %c7_647 = arith.constant 7 : index
    %1231 = vector.load %arg27[%c0_646, %c7_647] : memref<4x25xf32, #tpu.memory_space<vmem>>, vector<4x1xf32>
    %1232 = vector.broadcast %1231 : vector<4x1xf32> to vector<4x256xf32>
    %1233 = arith.mulf %1230, %1232 : vector<4x256xf32>
    %1234 = arith.addf %1229, %1233 : vector<4x256xf32>
    %c0_648 = arith.constant 0 : index
    %c19_649 = arith.constant 19 : index
    %1235 = vector.load %arg37[%c0_648, %c19_649] : memref<4x324xf32, #tpu.memory_space<vmem>>, vector<4x256xf32>
    %c-1_i32_650 = arith.constant -1 : i32
    %1236 = vector.broadcast %c-1_i32_650 : i32 to vector<1x256xi32>
    %1237 = arith.cmpi sge, %1139, %1236 : vector<1x256xi32>
    %c15_i32_651 = arith.constant 15 : i32
    %1238 = vector.broadcast %c15_i32_651 : i32 to vector<1x256xi32>
    %1239 = arith.cmpi slt, %1139, %1238 : vector<1x256xi32>
    %1240 = arith.andi %1237, %1239 : vector<1x256xi1>
    %cst_652 = arith.constant 0.000000e+00 : f32
    %1241 = vector.shape_cast %1240 : vector<1x256xi1> to vector<1x256xi1>
    %1242 = vector.broadcast %1241 : vector<1x256xi1> to vector<4x256xi1>
    %1243 = vector.broadcast %cst_652 : f32 to vector<4x256xf32>
    %1244 = arith.select %1242, %1235, %1243 : vector<4x256xi1>, vector<4x256xf32>
    %c0_653 = arith.constant 0 : index
    %c8_654 = arith.constant 8 : index
    %1245 = vector.load %arg27[%c0_653, %c8_654] : memref<4x25xf32, #tpu.memory_space<vmem>>, vector<4x1xf32>
    %1246 = vector.broadcast %1245 : vector<4x1xf32> to vector<4x256xf32>
    %1247 = arith.mulf %1244, %1246 : vector<4x256xf32>
    %1248 = arith.addf %1234, %1247 : vector<4x256xf32>
    %c0_655 = arith.constant 0 : index
    %c20_656 = arith.constant 20 : index
    %1249 = vector.load %arg37[%c0_655, %c20_656] : memref<4x324xf32, #tpu.memory_space<vmem>>, vector<4x256xf32>
    %c-2_i32_657 = arith.constant -2 : i32
    %1250 = vector.broadcast %c-2_i32_657 : i32 to vector<1x256xi32>
    %1251 = arith.cmpi sge, %1139, %1250 : vector<1x256xi32>
    %c14_i32_658 = arith.constant 14 : i32
    %1252 = vector.broadcast %c14_i32_658 : i32 to vector<1x256xi32>
    %1253 = arith.cmpi slt, %1139, %1252 : vector<1x256xi32>
    %1254 = arith.andi %1251, %1253 : vector<1x256xi1>
    %cst_659 = arith.constant 0.000000e+00 : f32
    %1255 = vector.shape_cast %1254 : vector<1x256xi1> to vector<1x256xi1>
    %1256 = vector.broadcast %1255 : vector<1x256xi1> to vector<4x256xi1>
    %1257 = vector.broadcast %cst_659 : f32 to vector<4x256xf32>
    %1258 = arith.select %1256, %1249, %1257 : vector<4x256xi1>, vector<4x256xf32>
    %c0_660 = arith.constant 0 : index
    %c9_661 = arith.constant 9 : index
    %1259 = vector.load %arg27[%c0_660, %c9_661] : memref<4x25xf32, #tpu.memory_space<vmem>>, vector<4x1xf32>
    %1260 = vector.broadcast %1259 : vector<4x1xf32> to vector<4x256xf32>
    %1261 = arith.mulf %1258, %1260 : vector<4x256xf32>
    %1262 = arith.addf %1248, %1261 : vector<4x256xf32>
    %c0_662 = arith.constant 0 : index
    %c32_663 = arith.constant 32 : index
    %1263 = vector.load %arg37[%c0_662, %c32_663] : memref<4x324xf32, #tpu.memory_space<vmem>>, vector<4x256xf32>
    %c2_i32_664 = arith.constant 2 : i32
    %1264 = vector.broadcast %c2_i32_664 : i32 to vector<1x256xi32>
    %1265 = arith.cmpi sge, %1139, %1264 : vector<1x256xi32>
    %c18_i32_665 = arith.constant 18 : i32
    %1266 = vector.broadcast %c18_i32_665 : i32 to vector<1x256xi32>
    %1267 = arith.cmpi slt, %1139, %1266 : vector<1x256xi32>
    %1268 = arith.andi %1265, %1267 : vector<1x256xi1>
    %cst_666 = arith.constant 0.000000e+00 : f32
    %1269 = vector.shape_cast %1268 : vector<1x256xi1> to vector<1x256xi1>
    %1270 = vector.broadcast %1269 : vector<1x256xi1> to vector<4x256xi1>
    %1271 = vector.broadcast %cst_666 : f32 to vector<4x256xf32>
    %1272 = arith.select %1270, %1263, %1271 : vector<4x256xi1>, vector<4x256xf32>
    %c0_667 = arith.constant 0 : index
    %c10_668 = arith.constant 10 : index
    %1273 = vector.load %arg27[%c0_667, %c10_668] : memref<4x25xf32, #tpu.memory_space<vmem>>, vector<4x1xf32>
    %1274 = vector.broadcast %1273 : vector<4x1xf32> to vector<4x256xf32>
    %1275 = arith.mulf %1272, %1274 : vector<4x256xf32>
    %1276 = arith.addf %1262, %1275 : vector<4x256xf32>
    %c0_669 = arith.constant 0 : index
    %c33_670 = arith.constant 33 : index
    %1277 = vector.load %arg37[%c0_669, %c33_670] : memref<4x324xf32, #tpu.memory_space<vmem>>, vector<4x256xf32>
    %c1_i32_671 = arith.constant 1 : i32
    %1278 = vector.broadcast %c1_i32_671 : i32 to vector<1x256xi32>
    %1279 = arith.cmpi sge, %1139, %1278 : vector<1x256xi32>
    %c17_i32_672 = arith.constant 17 : i32
    %1280 = vector.broadcast %c17_i32_672 : i32 to vector<1x256xi32>
    %1281 = arith.cmpi slt, %1139, %1280 : vector<1x256xi32>
    %1282 = arith.andi %1279, %1281 : vector<1x256xi1>
    %cst_673 = arith.constant 0.000000e+00 : f32
    %1283 = vector.shape_cast %1282 : vector<1x256xi1> to vector<1x256xi1>
    %1284 = vector.broadcast %1283 : vector<1x256xi1> to vector<4x256xi1>
    %1285 = vector.broadcast %cst_673 : f32 to vector<4x256xf32>
    %1286 = arith.select %1284, %1277, %1285 : vector<4x256xi1>, vector<4x256xf32>
    %c0_674 = arith.constant 0 : index
    %c11_675 = arith.constant 11 : index
    %1287 = vector.load %arg27[%c0_674, %c11_675] : memref<4x25xf32, #tpu.memory_space<vmem>>, vector<4x1xf32>
    %1288 = vector.broadcast %1287 : vector<4x1xf32> to vector<4x256xf32>
    %1289 = arith.mulf %1286, %1288 : vector<4x256xf32>
    %1290 = arith.addf %1276, %1289 : vector<4x256xf32>
    %c0_676 = arith.constant 0 : index
    %c34_677 = arith.constant 34 : index
    %1291 = vector.load %arg37[%c0_676, %c34_677] : memref<4x324xf32, #tpu.memory_space<vmem>>, vector<4x256xf32>
    %c0_678 = arith.constant 0 : index
    %c12_679 = arith.constant 12 : index
    %1292 = vector.load %arg27[%c0_678, %c12_679] : memref<4x25xf32, #tpu.memory_space<vmem>>, vector<4x1xf32>
    %1293 = vector.broadcast %1292 : vector<4x1xf32> to vector<4x256xf32>
    %1294 = arith.mulf %1291, %1293 : vector<4x256xf32>
    %1295 = arith.addf %1290, %1294 : vector<4x256xf32>
    %c0_680 = arith.constant 0 : index
    %c35_681 = arith.constant 35 : index
    %1296 = vector.load %arg37[%c0_680, %c35_681] : memref<4x324xf32, #tpu.memory_space<vmem>>, vector<4x256xf32>
    %c-1_i32_682 = arith.constant -1 : i32
    %1297 = vector.broadcast %c-1_i32_682 : i32 to vector<1x256xi32>
    %1298 = arith.cmpi sge, %1139, %1297 : vector<1x256xi32>
    %c15_i32_683 = arith.constant 15 : i32
    %1299 = vector.broadcast %c15_i32_683 : i32 to vector<1x256xi32>
    %1300 = arith.cmpi slt, %1139, %1299 : vector<1x256xi32>
    %1301 = arith.andi %1298, %1300 : vector<1x256xi1>
    %cst_684 = arith.constant 0.000000e+00 : f32
    %1302 = vector.shape_cast %1301 : vector<1x256xi1> to vector<1x256xi1>
    %1303 = vector.broadcast %1302 : vector<1x256xi1> to vector<4x256xi1>
    %1304 = vector.broadcast %cst_684 : f32 to vector<4x256xf32>
    %1305 = arith.select %1303, %1296, %1304 : vector<4x256xi1>, vector<4x256xf32>
    %c0_685 = arith.constant 0 : index
    %c13_686 = arith.constant 13 : index
    %1306 = vector.load %arg27[%c0_685, %c13_686] : memref<4x25xf32, #tpu.memory_space<vmem>>, vector<4x1xf32>
    %1307 = vector.broadcast %1306 : vector<4x1xf32> to vector<4x256xf32>
    %1308 = arith.mulf %1305, %1307 : vector<4x256xf32>
    %1309 = arith.addf %1295, %1308 : vector<4x256xf32>
    %c0_687 = arith.constant 0 : index
    %c36_688 = arith.constant 36 : index
    %1310 = vector.load %arg37[%c0_687, %c36_688] : memref<4x324xf32, #tpu.memory_space<vmem>>, vector<4x256xf32>
    %c-2_i32_689 = arith.constant -2 : i32
    %1311 = vector.broadcast %c-2_i32_689 : i32 to vector<1x256xi32>
    %1312 = arith.cmpi sge, %1139, %1311 : vector<1x256xi32>
    %c14_i32_690 = arith.constant 14 : i32
    %1313 = vector.broadcast %c14_i32_690 : i32 to vector<1x256xi32>
    %1314 = arith.cmpi slt, %1139, %1313 : vector<1x256xi32>
    %1315 = arith.andi %1312, %1314 : vector<1x256xi1>
    %cst_691 = arith.constant 0.000000e+00 : f32
    %1316 = vector.shape_cast %1315 : vector<1x256xi1> to vector<1x256xi1>
    %1317 = vector.broadcast %1316 : vector<1x256xi1> to vector<4x256xi1>
    %1318 = vector.broadcast %cst_691 : f32 to vector<4x256xf32>
    %1319 = arith.select %1317, %1310, %1318 : vector<4x256xi1>, vector<4x256xf32>
    %c0_692 = arith.constant 0 : index
    %c14_693 = arith.constant 14 : index
    %1320 = vector.load %arg27[%c0_692, %c14_693] : memref<4x25xf32, #tpu.memory_space<vmem>>, vector<4x1xf32>
    %1321 = vector.broadcast %1320 : vector<4x1xf32> to vector<4x256xf32>
    %1322 = arith.mulf %1319, %1321 : vector<4x256xf32>
    %1323 = arith.addf %1309, %1322 : vector<4x256xf32>
    %c0_694 = arith.constant 0 : index
    %c48_695 = arith.constant 48 : index
    %1324 = vector.load %arg37[%c0_694, %c48_695] : memref<4x324xf32, #tpu.memory_space<vmem>>, vector<4x256xf32>
    %c2_i32_696 = arith.constant 2 : i32
    %1325 = vector.broadcast %c2_i32_696 : i32 to vector<1x256xi32>
    %1326 = arith.cmpi sge, %1139, %1325 : vector<1x256xi32>
    %c18_i32_697 = arith.constant 18 : i32
    %1327 = vector.broadcast %c18_i32_697 : i32 to vector<1x256xi32>
    %1328 = arith.cmpi slt, %1139, %1327 : vector<1x256xi32>
    %1329 = arith.andi %1326, %1328 : vector<1x256xi1>
    %cst_698 = arith.constant 0.000000e+00 : f32
    %1330 = vector.shape_cast %1329 : vector<1x256xi1> to vector<1x256xi1>
    %1331 = vector.broadcast %1330 : vector<1x256xi1> to vector<4x256xi1>
    %1332 = vector.broadcast %cst_698 : f32 to vector<4x256xf32>
    %1333 = arith.select %1331, %1324, %1332 : vector<4x256xi1>, vector<4x256xf32>
    %c0_699 = arith.constant 0 : index
    %c15_700 = arith.constant 15 : index
    %1334 = vector.load %arg27[%c0_699, %c15_700] : memref<4x25xf32, #tpu.memory_space<vmem>>, vector<4x1xf32>
    %1335 = vector.broadcast %1334 : vector<4x1xf32> to vector<4x256xf32>
    %1336 = arith.mulf %1333, %1335 : vector<4x256xf32>
    %1337 = arith.addf %1323, %1336 : vector<4x256xf32>
    %c0_701 = arith.constant 0 : index
    %c49_702 = arith.constant 49 : index
    %1338 = vector.load %arg37[%c0_701, %c49_702] : memref<4x324xf32, #tpu.memory_space<vmem>>, vector<4x256xf32>
    %c1_i32_703 = arith.constant 1 : i32
    %1339 = vector.broadcast %c1_i32_703 : i32 to vector<1x256xi32>
    %1340 = arith.cmpi sge, %1139, %1339 : vector<1x256xi32>
    %c17_i32_704 = arith.constant 17 : i32
    %1341 = vector.broadcast %c17_i32_704 : i32 to vector<1x256xi32>
    %1342 = arith.cmpi slt, %1139, %1341 : vector<1x256xi32>
    %1343 = arith.andi %1340, %1342 : vector<1x256xi1>
    %cst_705 = arith.constant 0.000000e+00 : f32
    %1344 = vector.shape_cast %1343 : vector<1x256xi1> to vector<1x256xi1>
    %1345 = vector.broadcast %1344 : vector<1x256xi1> to vector<4x256xi1>
    %1346 = vector.broadcast %cst_705 : f32 to vector<4x256xf32>
    %1347 = arith.select %1345, %1338, %1346 : vector<4x256xi1>, vector<4x256xf32>
    %c0_706 = arith.constant 0 : index
    %c16_707 = arith.constant 16 : index
    %1348 = vector.load %arg27[%c0_706, %c16_707] : memref<4x25xf32, #tpu.memory_space<vmem>>, vector<4x1xf32>
    %1349 = vector.broadcast %1348 : vector<4x1xf32> to vector<4x256xf32>
    %1350 = arith.mulf %1347, %1349 : vector<4x256xf32>
    %1351 = arith.addf %1337, %1350 : vector<4x256xf32>
    %c0_708 = arith.constant 0 : index
    %c50_709 = arith.constant 50 : index
    %1352 = vector.load %arg37[%c0_708, %c50_709] : memref<4x324xf32, #tpu.memory_space<vmem>>, vector<4x256xf32>
    %c0_710 = arith.constant 0 : index
    %c17_711 = arith.constant 17 : index
    %1353 = vector.load %arg27[%c0_710, %c17_711] : memref<4x25xf32, #tpu.memory_space<vmem>>, vector<4x1xf32>
    %1354 = vector.broadcast %1353 : vector<4x1xf32> to vector<4x256xf32>
    %1355 = arith.mulf %1352, %1354 : vector<4x256xf32>
    %1356 = arith.addf %1351, %1355 : vector<4x256xf32>
    %c0_712 = arith.constant 0 : index
    %c51_713 = arith.constant 51 : index
    %1357 = vector.load %arg37[%c0_712, %c51_713] : memref<4x324xf32, #tpu.memory_space<vmem>>, vector<4x256xf32>
    %c-1_i32_714 = arith.constant -1 : i32
    %1358 = vector.broadcast %c-1_i32_714 : i32 to vector<1x256xi32>
    %1359 = arith.cmpi sge, %1139, %1358 : vector<1x256xi32>
    %c15_i32_715 = arith.constant 15 : i32
    %1360 = vector.broadcast %c15_i32_715 : i32 to vector<1x256xi32>
    %1361 = arith.cmpi slt, %1139, %1360 : vector<1x256xi32>
    %1362 = arith.andi %1359, %1361 : vector<1x256xi1>
    %cst_716 = arith.constant 0.000000e+00 : f32
    %1363 = vector.shape_cast %1362 : vector<1x256xi1> to vector<1x256xi1>
    %1364 = vector.broadcast %1363 : vector<1x256xi1> to vector<4x256xi1>
    %1365 = vector.broadcast %cst_716 : f32 to vector<4x256xf32>
    %1366 = arith.select %1364, %1357, %1365 : vector<4x256xi1>, vector<4x256xf32>
    %c0_717 = arith.constant 0 : index
    %c18_718 = arith.constant 18 : index
    %1367 = vector.load %arg27[%c0_717, %c18_718] : memref<4x25xf32, #tpu.memory_space<vmem>>, vector<4x1xf32>
    %1368 = vector.broadcast %1367 : vector<4x1xf32> to vector<4x256xf32>
    %1369 = arith.mulf %1366, %1368 : vector<4x256xf32>
    %1370 = arith.addf %1356, %1369 : vector<4x256xf32>
    %c0_719 = arith.constant 0 : index
    %c52_720 = arith.constant 52 : index
    %1371 = vector.load %arg37[%c0_719, %c52_720] : memref<4x324xf32, #tpu.memory_space<vmem>>, vector<4x256xf32>
    %c-2_i32_721 = arith.constant -2 : i32
    %1372 = vector.broadcast %c-2_i32_721 : i32 to vector<1x256xi32>
    %1373 = arith.cmpi sge, %1139, %1372 : vector<1x256xi32>
    %c14_i32_722 = arith.constant 14 : i32
    %1374 = vector.broadcast %c14_i32_722 : i32 to vector<1x256xi32>
    %1375 = arith.cmpi slt, %1139, %1374 : vector<1x256xi32>
    %1376 = arith.andi %1373, %1375 : vector<1x256xi1>
    %cst_723 = arith.constant 0.000000e+00 : f32
    %1377 = vector.shape_cast %1376 : vector<1x256xi1> to vector<1x256xi1>
    %1378 = vector.broadcast %1377 : vector<1x256xi1> to vector<4x256xi1>
    %1379 = vector.broadcast %cst_723 : f32 to vector<4x256xf32>
    %1380 = arith.select %1378, %1371, %1379 : vector<4x256xi1>, vector<4x256xf32>
    %c0_724 = arith.constant 0 : index
    %c19_725 = arith.constant 19 : index
    %1381 = vector.load %arg27[%c0_724, %c19_725] : memref<4x25xf32, #tpu.memory_space<vmem>>, vector<4x1xf32>
    %1382 = vector.broadcast %1381 : vector<4x1xf32> to vector<4x256xf32>
    %1383 = arith.mulf %1380, %1382 : vector<4x256xf32>
    %1384 = arith.addf %1370, %1383 : vector<4x256xf32>
    %c0_726 = arith.constant 0 : index
    %c64_727 = arith.constant 64 : index
    %1385 = vector.load %arg37[%c0_726, %c64_727] : memref<4x324xf32, #tpu.memory_space<vmem>>, vector<4x256xf32>
    %c2_i32_728 = arith.constant 2 : i32
    %1386 = vector.broadcast %c2_i32_728 : i32 to vector<1x256xi32>
    %1387 = arith.cmpi sge, %1139, %1386 : vector<1x256xi32>
    %c18_i32_729 = arith.constant 18 : i32
    %1388 = vector.broadcast %c18_i32_729 : i32 to vector<1x256xi32>
    %1389 = arith.cmpi slt, %1139, %1388 : vector<1x256xi32>
    %1390 = arith.andi %1387, %1389 : vector<1x256xi1>
    %cst_730 = arith.constant 0.000000e+00 : f32
    %1391 = vector.shape_cast %1390 : vector<1x256xi1> to vector<1x256xi1>
    %1392 = vector.broadcast %1391 : vector<1x256xi1> to vector<4x256xi1>
    %1393 = vector.broadcast %cst_730 : f32 to vector<4x256xf32>
    %1394 = arith.select %1392, %1385, %1393 : vector<4x256xi1>, vector<4x256xf32>
    %c0_731 = arith.constant 0 : index
    %c20_732 = arith.constant 20 : index
    %1395 = vector.load %arg27[%c0_731, %c20_732] : memref<4x25xf32, #tpu.memory_space<vmem>>, vector<4x1xf32>
    %1396 = vector.broadcast %1395 : vector<4x1xf32> to vector<4x256xf32>
    %1397 = arith.mulf %1394, %1396 : vector<4x256xf32>
    %1398 = arith.addf %1384, %1397 : vector<4x256xf32>
    %c0_733 = arith.constant 0 : index
    %c65_734 = arith.constant 65 : index
    %1399 = vector.load %arg37[%c0_733, %c65_734] : memref<4x324xf32, #tpu.memory_space<vmem>>, vector<4x256xf32>
    %c1_i32_735 = arith.constant 1 : i32
    %1400 = vector.broadcast %c1_i32_735 : i32 to vector<1x256xi32>
    %1401 = arith.cmpi sge, %1139, %1400 : vector<1x256xi32>
    %c17_i32_736 = arith.constant 17 : i32
    %1402 = vector.broadcast %c17_i32_736 : i32 to vector<1x256xi32>
    %1403 = arith.cmpi slt, %1139, %1402 : vector<1x256xi32>
    %1404 = arith.andi %1401, %1403 : vector<1x256xi1>
    %cst_737 = arith.constant 0.000000e+00 : f32
    %1405 = vector.shape_cast %1404 : vector<1x256xi1> to vector<1x256xi1>
    %1406 = vector.broadcast %1405 : vector<1x256xi1> to vector<4x256xi1>
    %1407 = vector.broadcast %cst_737 : f32 to vector<4x256xf32>
    %1408 = arith.select %1406, %1399, %1407 : vector<4x256xi1>, vector<4x256xf32>
    %c0_738 = arith.constant 0 : index
    %c21_739 = arith.constant 21 : index
    %1409 = vector.load %arg27[%c0_738, %c21_739] : memref<4x25xf32, #tpu.memory_space<vmem>>, vector<4x1xf32>
    %1410 = vector.broadcast %1409 : vector<4x1xf32> to vector<4x256xf32>
    %1411 = arith.mulf %1408, %1410 : vector<4x256xf32>
    %1412 = arith.addf %1398, %1411 : vector<4x256xf32>
    %c0_740 = arith.constant 0 : index
    %c66_741 = arith.constant 66 : index
    %1413 = vector.load %arg37[%c0_740, %c66_741] : memref<4x324xf32, #tpu.memory_space<vmem>>, vector<4x256xf32>
    %c0_742 = arith.constant 0 : index
    %c22_743 = arith.constant 22 : index
    %1414 = vector.load %arg27[%c0_742, %c22_743] : memref<4x25xf32, #tpu.memory_space<vmem>>, vector<4x1xf32>
    %1415 = vector.broadcast %1414 : vector<4x1xf32> to vector<4x256xf32>
    %1416 = arith.mulf %1413, %1415 : vector<4x256xf32>
    %1417 = arith.addf %1412, %1416 : vector<4x256xf32>
    %c0_744 = arith.constant 0 : index
    %c67_745 = arith.constant 67 : index
    %1418 = vector.load %arg37[%c0_744, %c67_745] : memref<4x324xf32, #tpu.memory_space<vmem>>, vector<4x256xf32>
    %c-1_i32_746 = arith.constant -1 : i32
    %1419 = vector.broadcast %c-1_i32_746 : i32 to vector<1x256xi32>
    %1420 = arith.cmpi sge, %1139, %1419 : vector<1x256xi32>
    %c15_i32_747 = arith.constant 15 : i32
    %1421 = vector.broadcast %c15_i32_747 : i32 to vector<1x256xi32>
    %1422 = arith.cmpi slt, %1139, %1421 : vector<1x256xi32>
    %1423 = arith.andi %1420, %1422 : vector<1x256xi1>
    %cst_748 = arith.constant 0.000000e+00 : f32
    %1424 = vector.shape_cast %1423 : vector<1x256xi1> to vector<1x256xi1>
    %1425 = vector.broadcast %1424 : vector<1x256xi1> to vector<4x256xi1>
    %1426 = vector.broadcast %cst_748 : f32 to vector<4x256xf32>
    %1427 = arith.select %1425, %1418, %1426 : vector<4x256xi1>, vector<4x256xf32>
    %c0_749 = arith.constant 0 : index
    %c23_750 = arith.constant 23 : index
    %1428 = vector.load %arg27[%c0_749, %c23_750] : memref<4x25xf32, #tpu.memory_space<vmem>>, vector<4x1xf32>
    %1429 = vector.broadcast %1428 : vector<4x1xf32> to vector<4x256xf32>
    %1430 = arith.mulf %1427, %1429 : vector<4x256xf32>
    %1431 = arith.addf %1417, %1430 : vector<4x256xf32>
    %c0_751 = arith.constant 0 : index
    %c68_752 = arith.constant 68 : index
    %1432 = vector.load %arg37[%c0_751, %c68_752] : memref<4x324xf32, #tpu.memory_space<vmem>>, vector<4x256xf32>
    %c-2_i32_753 = arith.constant -2 : i32
    %1433 = vector.broadcast %c-2_i32_753 : i32 to vector<1x256xi32>
    %1434 = arith.cmpi sge, %1139, %1433 : vector<1x256xi32>
    %c14_i32_754 = arith.constant 14 : i32
    %1435 = vector.broadcast %c14_i32_754 : i32 to vector<1x256xi32>
    %1436 = arith.cmpi slt, %1139, %1435 : vector<1x256xi32>
    %1437 = arith.andi %1434, %1436 : vector<1x256xi1>
    %cst_755 = arith.constant 0.000000e+00 : f32
    %1438 = vector.shape_cast %1437 : vector<1x256xi1> to vector<1x256xi1>
    %1439 = vector.broadcast %1438 : vector<1x256xi1> to vector<4x256xi1>
    %1440 = vector.broadcast %cst_755 : f32 to vector<4x256xf32>
    %1441 = arith.select %1439, %1432, %1440 : vector<4x256xi1>, vector<4x256xf32>
    %c0_756 = arith.constant 0 : index
    %c24_757 = arith.constant 24 : index
    %1442 = vector.load %arg27[%c0_756, %c24_757] : memref<4x25xf32, #tpu.memory_space<vmem>>, vector<4x1xf32>
    %1443 = vector.broadcast %1442 : vector<4x1xf32> to vector<4x256xf32>
    %1444 = arith.mulf %1441, %1443 : vector<4x256xf32>
    %1445 = arith.addf %1431, %1444 : vector<4x256xf32>
    %c0_758 = arith.constant 0 : index
    %c0_759 = arith.constant 0 : index
    %1446 = vector.load %arg28[%c0_758, %c0_759] : memref<4x1xf32, #tpu.memory_space<vmem>>, vector<4x1xf32>
    %1447 = vector.broadcast %1446 : vector<4x1xf32> to vector<4x256xf32>
    %1448 = arith.addf %1445, %1447 : vector<4x256xf32>
    %cst_760 = arith.constant 0.000000e+00 : f32
    %1449 = vector.broadcast %cst_760 : f32 to vector<4x256xf32>
    %1450 = arith.maximumf %1448, %1449 : vector<4x256xf32>
    %c0_761 = arith.constant 0 : index
    %c0_762 = arith.constant 0 : index
    %1451 = vector.load %arg29[%c0_761, %c0_762] : memref<16x16xf32, #tpu.memory_space<vmem>>, vector<16x16xf32>
    %cst_763 = arith.constant dense<0.000000e+00> : vector<16x256xf32>
    %1452 = tpu.matmul %1451, %1119, %cst_763 {dimension_numbers = #tpu.dot_dimension_numbers<[1], [0], [0], [1], [0, 0, 1, 1], [], []>} : vector<16x16xf32>, vector<16x256xf32>, vector<16x256xf32> -> vector<16x256xf32>
    %c0_764 = arith.constant 0 : index
    %c0_765 = arith.constant 0 : index
    %1453 = vector.load %arg30[%c0_764, %c0_765] : memref<16x4xf32, #tpu.memory_space<vmem>>, vector<16x4xf32>
    %cst_766 = arith.constant dense<0.000000e+00> : vector<16x256xf32>
    %1454 = tpu.matmul %1453, %1450, %cst_766 {dimension_numbers = #tpu.dot_dimension_numbers<[1], [0], [0], [1], [0, 0, 1, 1], [], []>} : vector<16x4xf32>, vector<4x256xf32>, vector<16x256xf32> -> vector<16x256xf32>
    %1455 = arith.addf %1452, %1454 : vector<16x256xf32>
    %c0_767 = arith.constant 0 : index
    %c0_768 = arith.constant 0 : index
    %1456 = vector.load %arg31[%c0_767, %c0_768] : memref<16x1xf32, #tpu.memory_space<vmem>>, vector<16x1xf32>
    %1457 = vector.broadcast %1456 : vector<16x1xf32> to vector<16x256xf32>
    %1458 = arith.addf %1455, %1457 : vector<16x256xf32>
    %cst_769 = arith.constant 0.000000e+00 : f32
    %1459 = vector.broadcast %cst_769 : f32 to vector<16x256xf32>
    %1460 = arith.maximumf %1458, %1459 : vector<16x256xf32>
    %1461 = vector.shape_cast %1460 : vector<16x256xf32> to vector<1x16x256xf32>
    %c0_770 = arith.constant 0 : index
    %c0_771 = arith.constant 0 : index
    %c0_772 = arith.constant 0 : index
    %1462 = vector.load %arg32[%c0_770, %c0_771, %c0_772] : memref<1x16x256xf32, #tpu.memory_space<vmem>>, vector<1x16x256xf32>
    tpu.vector_store %arg32[%c0_770, %c0_771, %c0_772], %1461 {strides = array<i32>} : memref<1x16x256xf32, #tpu.memory_space<vmem>>, vector<1x16x256xf32>,
    return
  }
  func.func @transform_0(%arg0: i32) -> (i32, i32, i32) {
    %c0_i32 = arith.constant 0 : i32
    %c0_i32_0 = arith.constant 0 : i32
    %c0_i32_1 = arith.constant 0 : i32
    return %arg0, %c0_i32, %c0_i32_0 : i32, i32, i32
  }
  func.func @transform_1(%arg0: i32) -> (i32, i32, i32) {
    %c0_i32 = arith.constant 0 : i32
    %c0_i32_0 = arith.constant 0 : i32
    %c0_i32_1 = arith.constant 0 : i32
    return %arg0, %c0_i32, %c0_i32_0 : i32, i32, i32
  }
  func.func @transform_2(%arg0: i32) -> (i32, i32, i32) {
    %c0_i32 = arith.constant 0 : i32
    %c0_i32_0 = arith.constant 0 : i32
    %c0_i32_1 = arith.constant 0 : i32
    return %arg0, %c0_i32, %c0_i32_0 : i32, i32, i32
  }
  func.func @transform_3(%arg0: i32) -> (i32, i32) {
    %c0_i32 = arith.constant 0 : i32
    %c0_i32_0 = arith.constant 0 : i32
    %c0_i32_1 = arith.constant 0 : i32
    return %c0_i32, %c0_i32_0 : i32, i32
  }
  func.func @transform_4(%arg0: i32) -> (i32, i32) {
    %c0_i32 = arith.constant 0 : i32
    %c0_i32_0 = arith.constant 0 : i32
    %c0_i32_1 = arith.constant 0 : i32
    return %c0_i32, %c0_i32_0 : i32, i32
  }
  func.func @transform_5(%arg0: i32) -> (i32, i32) {
    %c0_i32 = arith.constant 0 : i32
    %c0_i32_0 = arith.constant 0 : i32
    %c0_i32_1 = arith.constant 0 : i32
    return %c0_i32, %c0_i32_0 : i32, i32
  }
  func.func @transform_6(%arg0: i32) -> (i32, i32) {
    %c0_i32 = arith.constant 0 : i32
    %c0_i32_0 = arith.constant 0 : i32
    %c0_i32_1 = arith.constant 0 : i32
    return %c0_i32, %c0_i32_0 : i32, i32
  }
  func.func @transform_7(%arg0: i32) -> (i32, i32, i32, i32) {
    %c0_i32 = arith.constant 0 : i32
    %c0_i32_0 = arith.constant 0 : i32
    %c0_i32_1 = arith.constant 0 : i32
    %c0_i32_2 = arith.constant 0 : i32
    %c0_i32_3 = arith.constant 0 : i32
    return %c0_i32, %c0_i32_0, %c0_i32_1, %c0_i32_2 : i32, i32, i32, i32
  }
  func.func @transform_8(%arg0: i32) -> (i32, i32, i32) {
    %c0_i32 = arith.constant 0 : i32
    %c0_i32_0 = arith.constant 0 : i32
    %c0_i32_1 = arith.constant 0 : i32
    %c0_i32_2 = arith.constant 0 : i32
    return %c0_i32, %c0_i32_0, %c0_i32_1 : i32, i32, i32
  }
  func.func @transform_9(%arg0: i32) -> (i32, i32) {
    %c0_i32 = arith.constant 0 : i32
    %c0_i32_0 = arith.constant 0 : i32
    %c0_i32_1 = arith.constant 0 : i32
    return %c0_i32, %c0_i32_0 : i32, i32
  }
  func.func @transform_10(%arg0: i32) -> (i32, i32) {
    %c0_i32 = arith.constant 0 : i32
    %c0_i32_0 = arith.constant 0 : i32
    %c0_i32_1 = arith.constant 0 : i32
    return %c0_i32, %c0_i32_0 : i32, i32
  }
  func.func @transform_11(%arg0: i32) -> (i32, i32, i32) {
    %c0_i32 = arith.constant 0 : i32
    %c0_i32_0 = arith.constant 0 : i32
    %c0_i32_1 = arith.constant 0 : i32
    %c0_i32_2 = arith.constant 0 : i32
    return %c0_i32, %c0_i32_0, %c0_i32_1 : i32, i32, i32
  }
  func.func @transform_12(%arg0: i32) -> (i32, i32) {
    %c0_i32 = arith.constant 0 : i32
    %c0_i32_0 = arith.constant 0 : i32
    %c0_i32_1 = arith.constant 0 : i32
    return %c0_i32, %c0_i32_0 : i32, i32
  }
  func.func @transform_13(%arg0: i32) -> (i32, i32) {
    %c0_i32 = arith.constant 0 : i32
    %c0_i32_0 = arith.constant 0 : i32
    %c0_i32_1 = arith.constant 0 : i32
    return %c0_i32, %c0_i32_0 : i32, i32
  }
  func.func @transform_14(%arg0: i32) -> (i32, i32) {
    %c0_i32 = arith.constant 0 : i32
    %c0_i32_0 = arith.constant 0 : i32
    %c0_i32_1 = arith.constant 0 : i32
    return %c0_i32, %c0_i32_0 : i32, i32
  }
  func.func @transform_15(%arg0: i32) -> (i32, i32) {
    %c0_i32 = arith.constant 0 : i32
    %c0_i32_0 = arith.constant 0 : i32
    %c0_i32_1 = arith.constant 0 : i32
    return %c0_i32, %c0_i32_0 : i32, i32
  }
  func.func @transform_16(%arg0: i32) -> (i32, i32) {
    %c0_i32 = arith.constant 0 : i32
    %c0_i32_0 = arith.constant 0 : i32
    %c0_i32_1 = arith.constant 0 : i32
    return %c0_i32, %c0_i32_0 : i32, i32
  }
  func.func @transform_17(%arg0: i32) -> (i32, i32) {
    %c0_i32 = arith.constant 0 : i32
    %c0_i32_0 = arith.constant 0 : i32
    %c0_i32_1 = arith.constant 0 : i32
    return %c0_i32, %c0_i32_0 : i32, i32
  }
  func.func @transform_18(%arg0: i32) -> (i32, i32) {
    %c0_i32 = arith.constant 0 : i32
    %c0_i32_0 = arith.constant 0 : i32
    %c0_i32_1 = arith.constant 0 : i32
    return %c0_i32, %c0_i32_0 : i32, i32
  }
  func.func @transform_19(%arg0: i32) -> (i32, i32) {
    %c0_i32 = arith.constant 0 : i32
    %c0_i32_0 = arith.constant 0 : i32
    %c0_i32_1 = arith.constant 0 : i32
    return %c0_i32, %c0_i32_0 : i32, i32
  }
  func.func @transform_20(%arg0: i32) -> (i32, i32) {
    %c0_i32 = arith.constant 0 : i32
    %c0_i32_0 = arith.constant 0 : i32
    %c0_i32_1 = arith.constant 0 : i32
    return %c0_i32, %c0_i32_0 : i32, i32
  }
  func.func @transform_21(%arg0: i32) -> (i32, i32) {
    %c0_i32 = arith.constant 0 : i32
    %c0_i32_0 = arith.constant 0 : i32
    %c0_i32_1 = arith.constant 0 : i32
    return %c0_i32, %c0_i32_0 : i32, i32
  }
  func.func @transform_22(%arg0: i32) -> (i32, i32) {
    %c0_i32 = arith.constant 0 : i32
    %c0_i32_0 = arith.constant 0 : i32
    %c0_i32_1 = arith.constant 0 : i32
    return %c0_i32, %c0_i32_0 : i32, i32
  }
  func.func @transform_23(%arg0: i32) -> (i32, i32) {
    %c0_i32 = arith.constant 0 : i32
    %c0_i32_0 = arith.constant 0 : i32
    %c0_i32_1 = arith.constant 0 : i32
    return %c0_i32, %c0_i32_0 : i32, i32
  }
  func.func @transform_24(%arg0: i32) -> (i32, i32) {
    %c0_i32 = arith.constant 0 : i32
    %c0_i32_0 = arith.constant 0 : i32
    %c0_i32_1 = arith.constant 0 : i32
    return %c0_i32, %c0_i32_0 : i32, i32
  }
  func.func @transform_25(%arg0: i32) -> (i32, i32) {
    %c0_i32 = arith.constant 0 : i32
    %c0_i32_0 = arith.constant 0 : i32
    %c0_i32_1 = arith.constant 0 : i32
    return %c0_i32, %c0_i32_0 : i32, i32
  }
  func.func @transform_26(%arg0: i32) -> (i32, i32) {
    %c0_i32 = arith.constant 0 : i32
    %c0_i32_0 = arith.constant 0 : i32
    %c0_i32_1 = arith.constant 0 : i32
    return %c0_i32, %c0_i32_0 : i32, i32
  }
  func.func @transform_27(%arg0: i32) -> (i32, i32) {
    %c0_i32 = arith.constant 0 : i32
    %c0_i32_0 = arith.constant 0 : i32
    %c0_i32_1 = arith.constant 0 : i32
    return %c0_i32, %c0_i32_0 : i32, i32
  }
  func.func @transform_28(%arg0: i32) -> (i32, i32) {
    %c0_i32 = arith.constant 0 : i32
    %c0_i32_0 = arith.constant 0 : i32
    %c0_i32_1 = arith.constant 0 : i32
    return %c0_i32, %c0_i32_0 : i32, i32
  }
  func.func @transform_29(%arg0: i32) -> (i32, i32) {
    %c0_i32 = arith.constant 0 : i32
    %c0_i32_0 = arith.constant 0 : i32
    %c0_i32_1 = arith.constant 0 : i32
    return %c0_i32, %c0_i32_0 : i32, i32
  }
  func.func @transform_30(%arg0: i32) -> (i32, i32) {
    %c0_i32 = arith.constant 0 : i32
    %c0_i32_0 = arith.constant 0 : i32
    %c0_i32_1 = arith.constant 0 : i32
    return %c0_i32, %c0_i32_0 : i32, i32
  }
  func.func @transform_31(%arg0: i32) -> (i32, i32, i32) {
    %c0_i32 = arith.constant 0 : i32
    %c0_i32_0 = arith.constant 0 : i32
    %c0_i32_1 = arith.constant 0 : i32
    return %arg0, %c0_i32, %c0_i32_0 : i32, i32, i32
  }
}

</mosaic_0001>

<bundles_post_ra>
// kernel: tpu_custom_call.1
= control target key start
LH: loop header
LB: loop body
LE: loop exit
PB: predicated region body
PF: predicated region fallthrough
CT: control target
= control target key end

     0   :  { %s6073_s6 = smov 1   ;;  %s6074_s10 = smov 2   ;;  %s9310_s0 = inlined_call_operand.smem [shape: u32[32], index: -1, kind: input, shape index: {}] }
   0x1   :  { %s6184_s5 = sld [smem:[%s9310_s0]]   ;;  %s6075_s14 = smov 3  }
   0x2   :  { %s6189_s9 = sld [smem:[%s9310_s0 + %s6073_s6]]   ;;  %s6076_s18 = smov 4  }
   0x3   :  { %s6194_s13 = sld [smem:[%s9310_s0 + %s6074_s10]]   ;;  %s6077_s22 = smov 5  }
   0x4   :  { %s6199_s17 = sld [smem:[%s9310_s0 + %s6075_s14]]   ;;  %s6078_s26 = smov 6  }
   0x5   :  { %s6204_s21 = sld [smem:[%s9310_s0 + %s6076_s18]]   ;;  %s6079_s30 = smov 7  }
   0x6   :  { %s6209_s25 = sld [smem:[%s9310_s0 + %s6077_s22]]   ;;  %s6080_s4 = smov 8  }
   0x7   :  { %9567 = sst [smem:[#allocation10_spill]] %s6184_s5  ;;  %s6081_s10 = smov 9  }
   0x8   :  { %9568 = sst [smem:[#allocation11_spill]] %s6189_s9  ;;  %s6082_s15 = smov 10  }
   0x9   :  { %9569 = sst [smem:[#allocation12_spill]] %s6194_s13  ;;  %s6083_s20 = smov 11  }
   0xa   :  { %9570 = sst [smem:[#allocation13_spill]] %s6199_s17  ;;  %s6085_s1 = smov 13  }
   0xb   :  { %9571 = sst [smem:[#allocation14_spill]] %s6204_s21  ;;  %s6086_s7 = smov 14  }
   0xc   :  { %9572 = sst [smem:[#allocation15_spill]] %s6209_s25  ;;  %s6088_s22 = smov 16  }
   0xd   :  { %s6214_s29 = sld [smem:[%s9310_s0 + %s6078_s26]]   ;;  %s6084_s26 = smov 12  }
   0xe   :  { %s6219_s3 = sld [smem:[%s9310_s0 + %s6079_s30]]   ;;  %s6089_s28 = smov 17  }
   0xf   :  { %s6224_s8 = sld [smem:[%s9310_s0 + %s6080_s4]]  }
  0x10   :  { %s6229_s14 = sld [smem:[%s9310_s0 + %s6081_s10]]  }
  0x11   :  { %s6234_s19 = sld [smem:[%s9310_s0 + %s6082_s15]]   ;;  %s6087_s15 = smov 15  }
  0x12   :  { %s6239_s24 = sld [smem:[%s9310_s0 + %s6083_s20]]  }
  0x13   :  { %9573 = sst [smem:[#allocation16_spill]] %s6214_s29 }
  0x14   :  { %9574 = sst [smem:[#allocation17_spill]] %s6219_s3 }
  0x15   :  { %9575 = sst [smem:[#allocation18_spill]] %s6224_s8 }
  0x16   :  { %9576 = sst [smem:[#allocation19_spill]] %s6229_s14 }
  0x17   :  { %9577 = sst [smem:[#allocation20_spill]] %s6234_s19 }
  0x18   :  { %9578 = sst [smem:[#allocation21_spill]] %s6239_s24 }
  0x19   :  { %s6244_s30 = sld [smem:[%s9310_s0 + %s6084_s26]]  }
  0x1a   :  { %s6249_s6 = sld [smem:[%s9310_s0 + %s6085_s1]]  }
  0x1b   :  { %s6254_s12 = sld [smem:[%s9310_s0 + %s6086_s7]]   ;;  %s6090_s7 = smov 18  }
  0x1c   :  { %s6259_s20 = sld [smem:[%s9310_s0 + %s6087_s15]]   ;;  %s6091_s15 = smov 19  }
  0x1d   :  { %s6264_s27 = sld [smem:[%s9310_s0 + %s6088_s22]]   ;;  %s6092_s22 = smov 20  }
  0x1e   :  { %s6269_s4 = sld [smem:[%s9310_s0 + %s6089_s28]]   ;;  %s6093_s28 = smov 21  }
  0x1f   :  { %9579 = sst [smem:[#allocation22_spill]] %s6244_s30 }
  0x20   :  { %9580 = sst [smem:[#allocation23_spill]] %s6249_s6 }
  0x21   :  { %9581 = sst [smem:[#allocation24_spill]] %s6254_s12 }
  0x22   :  { %9582 = sst [smem:[#allocation25_spill]] %s6259_s20 }
  0x23   :  { %9583 = sst [smem:[#allocation26_spill]] %s6264_s27 }
  0x24   :  { %9584 = sst [smem:[#allocation27_spill]] %s6269_s4 }
  0x25   :  { %s6274_s21 = sld [smem:[%s9310_s0 + %s6090_s7]]   ;;  %s6094_s7 = smov 22  }
  0x26   :  { %s6279_s13 = sld [smem:[%s9310_s0 + %s6091_s15]]   ;;  %s6095_s15 = smov 23  }
  0x27   :  { %s6284_s27 = sld [smem:[%s9310_s0 + %s6092_s22]]   ;;  %s6096_s22 = smov 24  }
  0x28   :  { %s6289_s4 = sld [smem:[%s9310_s0 + %s6093_s28]]   ;;  %s6097_s28 = smov 25  }
  0x2b   :  { %9585 = sst [smem:[#allocation28_spill]] %s6274_s21 }
  0x2c   :  { %9586 = sst [smem:[#allocation29_spill]] %s6279_s13 }
  0x2d   :  { %9587 = sst [smem:[#allocation30_spill]] %s6284_s27 }
  0x2e   :  { %9588 = sst [smem:[#allocation31_spill]] %s6289_s4 }
  0x2f   :  { %s6294_s21 = sld [smem:[%s9310_s0 + %s6094_s7]]   ;;  %s6098_s7 = smov 26  }
  0x30   :  { %s6299_s13 = sld [smem:[%s9310_s0 + %s6095_s15]]   ;;  %s6099_s15 = smov 27  }
  0x31   :  { %s6304_s27 = sld [smem:[%s9310_s0 + %s6096_s22]]   ;;  %s6100_s22 = smov 28  }
  0x32   :  { %s6309_s4 = sld [smem:[%s9310_s0 + %s6097_s28]]   ;;  %s6101_s28 = smov 29  }
  0x35   :  { %9589 = sst [smem:[#allocation32_spill]] %s6294_s21 }
  0x36   :  { %9590 = sst [smem:[#allocation33_spill]] %s6299_s13 }
  0x37   :  { %9591 = sst [smem:[#allocation34_spill]] %s6304_s27 }
  0x38   :  { %9592 = sst [smem:[#allocation35_spill]] %s6309_s4 }
  0x39   :  { %s6314_s21 = sld [smem:[%s9310_s0 + %s6098_s7]]   ;;  %s6102_s7 = smov 30  }
  0x3a   :  { %s6319_s13 = sld [smem:[%s9310_s0 + %s6099_s15]]   ;;  %s6103_s15 = smov 31  }
  0x3b   :  { %s6324_s27 = sld [smem:[%s9310_s0 + %s6100_s22]]  }
  0x3c   :  { %s6329_s4 = sld [smem:[%s9310_s0 + %s6101_s28]]  }
  0x3f   :  { %9593 = sst [smem:[#allocation36_spill]] %s6314_s21 }
  0x40   :  { %9594 = sst [smem:[#allocation37_spill]] %s6319_s13 }
  0x41   :  { %s6334_s21 = sld [smem:[%s9310_s0 + %s6102_s7]]  }
  0x42   :  { %s6339_s13 = sld [smem:[%s9310_s0 + %s6103_s15]]  }
  0x43   :  { %68 = vsyncpa [#allocation8], 0 }
  0x44   :  { %70 = vsyncpa [#allocation8 + $0x1], 0  ;;  %s6341_s22 = smov 0   ;;  %s6343_s23 = smov 0  }
  0x45   :  { %s6345_s26 = smov 0   ;;  %s6347_s28 = smov 0  }
  0x46 LB: > { %s9595_s30 = sld [smem:[#allocation22_spill]]  ;;  %s6362_s0 = sadd.s32 4294967295, %s6071_s28   ;;  %s6063_s23 = sphi %s6343_s23, %s10126_s23   ;;  %s6059_s22 = sphi %s6341_s22, %s10125_s22   ;;  %s6071_s28 = sphi %s6347_s28, %s10122_s28   ;;  %s6067_s26 = sphi %s6345_s26, %s10124_s26  }
  0x47   : > { %s9596_s29 = sld [smem:[#allocation16_spill]]  ;;  %s5544_s1 = sadd.s32 4294967294, %s6071_s28  }
  0x48   : > { %s9597_s25 = sld [smem:[#allocation15_spill]]  ;;  %s6366_s2 = sadd.s32 1, %s6071_s28  }
  0x49   : > { %s9598_s24 = sld [smem:[#allocation21_spill]]  ;;  %s749_s7 = sadd.s32 1, %s6067_s26 }
  0x4a   : > { %s9599_s20 = sld [smem:[#allocation25_spill]]  ;;  %s746_s10 = ssub.s32 %s6071_s28, %s6366_s2 }
  0x4b   : > { %s9600_s19 = sld [smem:[#allocation20_spill]]  ;;  %p759_p0 = scmp.ne.s32.totalorder %s6067_s26, %s6063_s23 }
  0x4c   : > { %s9601_s17 = sld [smem:[#allocation13_spill]]  ;;  %p747_p1 = scmp.eq.s32.totalorder %s746_s10, 0 }
  0x4d   : > { %s9602_s14 = sld [smem:[#allocation19_spill]]  ;;  %p760_p2 = scmp.eq.s32.totalorder %s6362_s0, 1 }
  0x4e   : > { %s9603_s8 = sld [smem:[#allocation18_spill]]  ;;  %p765_p3 = scmp.ne.s32.totalorder %s6063_s23, %s6059_s22 }
  0x4f   : > { %s9604_s3 = sld [smem:[#allocation17_spill]]  ;;  %p766_p4 = scmp.eq.s32.totalorder %s5544_s1, 1 }
  0x50   : > { %9605 = sst [smem:[#allocation38_spill]] %s6059_s22  ;;  %p6379_p5 = por %p760_p2, %p759_p0 }
  0x51   : > { %9606 = sst [smem:[#allocation39_spill]] %s6067_s26  ;;  %p6383_p6 = por %p766_p4, %p765_p3 }
  0x52   : > { %9607 = sst [smem:[#allocation40_spill]] %s6071_s28  ;;  %p5547_p7 = scmp.ge.s32.totalorder %s6071_s28, 1 }
  0x53   : > { %9608 = sst [smem:[#allocation41_spill]] %s6366_s2  ;;  %p890_p8 = scmp.lt.s32.totalorder %s6071_s28, 3 }
  0x54   : > { %s6377_s11 = scalar_select %p747_p1, %s6067_s26, %s749_s7  }
  0x55   : > { %s9611_s16 = scalar_select %p6383_p6, 1, 0 }
  0x56   : > { %9609 = sst [smem:[#allocation42_spill]] %s6377_s11  ;;  %p891_p9 = pnand %p5547_p7, %p890_p8 }
  0x57   : > { %9612 = sst [smem:[#allocation43_spill]] %s9611_s16 }
  0x58   : > { %894 = sbr.rel (%p891_p9) target bundleno = 2737 (0xab1), region = 144 }
  0x5d   : > { %s9613_s5 = sld [smem:[#allocation10_spill]]  ;;  %p978_p10 = scmp.lt.s32.totalorder %s6362_s0, 1  ;;  %v992_v0 = vld [vmem:[%s9597_s25] sm:$0xff]  ;;  %vm1006_vm0 = vcmask 64512   ;;  %v6104_v1 = vmov 0.0   ;;  %vm9533_vm1 = vcmask 130048  }
  0x5e   : > { %5665 = vmatprep.mubr.msk.f32.mxu0 %vm1006_vm0, %v992_v0  ;;  %1094 = vst [vmem:[#allocation2] sm:$0xff] %v6104_v1  ;;  %3344 = vst [vmem:[#allocation5] sm:$0xff] %v6104_v1  ;;  %v993_v3 = vld [vmem:[%s9597_s25 + $0x8] sm:$0xff]  ;;  %s6105_s10 = smov 30   ;;  %s9363_s11 = smov 60   ;;  %v9323_v5 = vmov 0  }
  0x5f   : > { %s979_s18 = scalar_select %p978_p10, %s6362_s0, 1  ;;  %3347 = vst [vmem:[#allocation5 + $0x18] sm:$0xff] %v6104_v1  ;;  %4506 = vst [vmem:[#allocation6] sm:$0xff] %v6104_v1  ;;  %5888 = vset.pattern.permute.xlu0 %v9323_v5  ;;  %5889 = vset.pattern.permute.xlu1 %v9323_v5  ;;  %v994_v6 = vld [vmem:[%s9596_s29] sm:$0xff]  ;;  %vm1101_vm2 = vcmask 376048   ;;  %v5557_v8 = vld [vmem:[%s9604_s3 + $0xd0] sm:$0xff] }
  0x60   : > { %vm1212_vm3 = vcmask 622048   ;;  %v1090_v11 = vld [vmem:[%s9604_s3 + $0x40] sm:$0xff]  ;;  %vm1323_vm4 = vcmask 868048   ;;  %v995_v16 = vld [vmem:[%s9596_s29 + $0x8] sm:$0xff]  ;;  %s9614_s12 = sld [smem:[#allocation24_spill]]  ;;  %v5560_v17 = vld [vmem:[%s9603_s8 + $0x18] sm:$0xff] }
  0x61   : > { %s6397_s1 = sshll.u32 %s979_s18, 3  ;;  %s6107_s18 = smov 90   ;;  %5670 = vmatprep.mubr.msk.f32.mxu1 %vm1006_vm0, %v1090_v11  ;;  %v5559_v18 = vld [vmem:[%s9603_s8 + $0x10] sm:$0xff]  ;;  %v1093_v19 = vld [vmem:[%s9603_s8 + $0x8] sm:$0xff]  ;;  %v1092_v20 = vld [vmem:[%s9603_s8] sm:$0xff]  ;;  %v9378_v49 = vmov 1  }
  0x62   : > { %v5566_v21 = vld [vmem:[%s9603_s8 + $0x28] sm:$0xff]  ;;  %v5565_v22 = vld [vmem:[%s9603_s8 + $0x20] sm:$0xff]  ;;  %v5558_v29 = vld [vmem:[%s9604_s3 + $0xd8] sm:$0xff]  ;;  %v9365_v51 = vmov 2   ;;  %v9361_v52 = vmov 3   ;;  %v9376_v53 = vmov 4  }
  0x63   : > { %s981_s7 = scalar_lea.vmem %s9613_s5, %s6397_s1  ;;  %v1516_v23 = vld [vmem:[%s9595_s30] sm:$0xff]  ;;  %v1517_v24 = vld [vmem:[%s9595_s30 + $0x8] sm:$0xff]  ;;  %v5573_v48 = vld [vmem:[%s9598_s24 + $0x10] sm:$0xff]  ;;  %v9359_v54 = vmov 5   ;;  %v9349_v55 = vmov 6   ;;  %v9347_v56 = vmov 7  }
  0x64   : > { %v991_v2 = vld [vmem:[%s981_s7] sm:$0xff]  ;;  %s6109_s7 = smov 68   ;;  %v6425_v26 = vld [vmem:[%s9599_s20 + $0x8] sm:$0xff]  ;;  %v9345_v57 = vmov 8   ;;  %v9357_v58 = vmov 9   ;;  %v9343_v59 = vmov 10  }
  0x65   : > { %1098 = vrot.lane.b32.xlu0 %v991_v2, %s6105_s10  ;;  %v1424_v4 = vsel %vm9533_vm1, %v991_v2, 0.0  ;;  %5663 = vmatprep.subr.mxu0 %v991_v2  ;;  %s6110_s10 = smov 98   ;;  %v1429_v30 = vld [vmem:[%s9602_s14] sm:$0xff]  ;;  %v1091_v32 = vld [vmem:[%s9604_s3 + $0x48] sm:$0xff]  ;;  %v9341_v60 = vmov 11   ;;  %v9337_v61 = vmov 12  }
  0x66   : > { %1425 = vadd.xlane.f32.xlu1 %v1424_v4  ;;  %5664 = vmatpush3.msra.mxu0 %v991_v2  ;;  %v1971_v25 = vld [vmem:[%s9614_s12] sm:$0xff]  ;;  %v1430_v33 = vld [vmem:[%s9602_s14 + $0x8] sm:$0xff]  ;;  %v9339_v62 = vmov 13   ;;  %v9355_v63 = vmov 14   ;;  %v9335_v0 = vmov 15   ;;  %s9615_s9 = sld [smem:[#allocation11_spill]] }
  0x67   : > { %5666 = vmatmul.mubr.msk.f32.vlgmr.msra.gmra.mxu0 %vm1006_vm0, %v993_v3  ;;  %v5563_v34 = vld [vmem:[%s9604_s3 + $0x160] sm:$0xff]  ;;  %v5564_v36 = vld [vmem:[%s9604_s3 + $0x168] sm:$0xff]  ;;  %v9333_v3 = vmov 16   ;;  %s9616_s6 = sld [smem:[#allocation23_spill]]  ;;  %vm1981_vm5 = vcmask 1045504   ;;  %vm6129_vm6 = vmmov 0  }
  0x68   : > { %5675 = vmatprep.mubr.msk.f32.mxu0 %vm1006_vm0, %v5557_v8  ;;  %v1518_v37 = vld [vmem:[%s9598_s24] sm:$0xff]  ;;  %v1519_v46 = vld [vmem:[%s9598_s24 + $0x8] sm:$0xff]  ;;  %vm1977_vm7 = vcmask 48128   ;;  %vm2139_vm8 = vcmask 818176   ;;  %vm2150_vm9 = vcmask 670864   ;;  %s9382_s3 = smov 124  }
  0x69   : > { %1209 = vrot.lane.b32.xlu0 %v991_v2, %s9363_s11  ;;  %v5577_v47 = vld [vmem:[%s9598_s24 + $0x20] sm:$0xff]  ;;  %2705 = vst.msk [vmem:[#allocation4] sm:$0xff] %vm2139_vm8, %v6104_v1  ;;  %2140 = vst.msk [vmem:[#allocation3] sm:$0xff] %vm2139_vm8, %v6104_v1  ;;  %s9372_s11 = smov 94   ;;  %s9380_s5 = smov 120   ;;  %vm9538_vm14 = vcmask 1043456  }
  0x6a   : > { %v6451_v50 = vld [vmem:[%s9599_s20] sm:$0xff]  ;;  %2141 = vst.msk [vmem:[#allocation3 + $0x8] sm:$0xff] %vm2139_vm8, %v6104_v1  ;;  %s9407_s8 = smov 100   ;;  %s9677_s12 = sld [smem:[#allocation12_spill]]  ;;  %vm9534_vm15 = vcmask 31744   ;;  %vm1095_vm8 = vcmask 556032  }
  0x6b   : > { %s9678_s14 = smov 117   ;;  %s9683_s25 = smov 103  }
  0x6c   : > { %s9684_s29 = smov 104   ;;  %s9685_s30 = sld [smem:[#allocation32_spill]] }
  0x6d   : > { %s9686_s26 = smov 100   ;;  %s9692_s2 = smov 126  }
  0x6e   : > { %s9827_s16 = smov 63   ;;  %s9829_s22 = smov 61  }
  0x6f   : > { %s9835_s28 = smov 62  }
  0x70   : > { %s990_s20 = scalar_lea.vmem %s9677_s12, %s6397_s1  ;;  %s9687_s12 = smov 101  }
  0x77   : > { %1320 = vrot.lane.b32.xlu1 %v991_v2, %s6107_s18  ;;  %s6111_s18 = smov 38  }
  0x7b   : > { %998 = vperm.xlu1 %5889, %v994_v6  }
  0x7f   : > { %1222 = vperm.xlu1 %5889, %v5560_v17  }
  0x83   : > { %1111 = vperm.xlu1 %5889, %v1093_v19  }
  0x87   : > { %1333 = vperm.xlu1 %5889, %v5566_v21  }
  0x8b   : > { %1603 = vperm.xlu1 %5889, %v1516_v23   ;;  %v5578_v23 = vld [vmem:[%s9598_s24 + $0x28] sm:$0xff] }
  0x8f   : > { %1974 = vperm.xlu1 %5889, %v1971_v25  }
  0x93   : > { %2185 = vperm.xlu1 %5889, %v6425_v26  }
  0x97   : > { %5890 = vset.pattern.permute.xlu1 %v9378_v49 }
  0x98   : > { %2212 = vperm.xlu1 %5890, %v6425_v26  }
  0x9c   : > { %5891 = vset.pattern.permute.xlu1 %v9365_v51 }
  0x9d   : > { %2220 = vperm.xlu1 %5891, %v6451_v50  }
  0xa1   : > { %5893 = vset.pattern.permute.xlu1 %v9361_v52 }
  0xa2   : > { %2257 = vperm.xlu1 %5893, %v6425_v26  }
  0xa6   : > { %5894 = vset.pattern.permute.xlu1 %v9376_v53 }
  0xa7   : > { %2278 = vperm.xlu1 %5894, %v6451_v50  }
  0xab   : > { %5895 = vset.pattern.permute.xlu1 %v9359_v54 }
  0xac   : > { %2302 = vperm.xlu1 %5895, %v6425_v26  }
  0xb0   : > { %5896 = vset.pattern.permute.xlu1 %v9349_v55 }
  0xb1   : > { %2318 = vperm.xlu1 %5896, %v6451_v50  }
  0xb5   : > { %5897 = vset.pattern.permute.xlu1 %v9347_v56 }
  0xb6   : > { %2330 = vperm.xlu1 %5897, %v6451_v50  }
  0xba   : > { %2334 = vperm.xlu1 %5897, %v6425_v26  }
  0xbe   : > { %5898 = vset.pattern.permute.xlu1 %v9345_v57 }
  0xbf   : > { %2362 = vperm.xlu1 %5898, %v6425_v26  }
  0xc3   : > { %5899 = vset.pattern.permute.xlu1 %v9357_v58 }
  0xc4   : > { %2378 = vperm.xlu1 %5899, %v6451_v50  }
  0xc8   : > { %5901 = vset.pattern.permute.xlu1 %v9343_v59 }
  0xc9   : > { %2402 = vperm.xlu1 %5901, %v6425_v26  }
  0xcd   : > { %5902 = vset.pattern.permute.xlu1 %v9341_v60 }
  0xce   : > { %2418 = vperm.xlu1 %5902, %v6451_v50  }
  0xd2   : > { %5903 = vset.pattern.permute.xlu1 %v9337_v61 }
  0xd3   : > { %2430 = vperm.xlu1 %5903, %v6451_v50  }
  0xd7   : > { %v1099_v7 = vpop.permute.xlu0 %1098  ;;  %2434 = vperm.xlu1 %5903, %v6425_v26  }
  0xd8   : > { %1102 = vst.msk [vmem:[#allocation2] sm:$0xff] %vm1101_vm2, %v1099_v7  ;;  %vm4518_vm2 = vcmask 1043728  }
  0xdb   : > { %v1210_v9 = vpop.permute.xlu0 %1209  ;;  %5904 = vset.pattern.permute.xlu1 %v9339_v62 }
  0xdc   : > { %2462 = vperm.xlu1 %5904, %v6425_v26  }
  0xdf   : > { %v1103_v10 = vld [vmem:[#allocation2] sm:$0xff] }
  0xe0   : > { %1207 = vst [vmem:[#allocation2] sm:$0xff] %v6104_v1  ;;  %5905 = vset.pattern.permute.xlu1 %v9355_v63 }
  0xe1   : > { %1213 = vst.msk [vmem:[#allocation2] sm:$0xff] %vm1212_vm3, %v1210_v9  ;;  %2478 = vperm.xlu1 %5905, %v6451_v50   ;;  %v1432_v9 = vld [vmem:[%s9600_s19 + $0x8] sm:$0xff]  ;;  %vm4519_vm3 = vcmask 1047556  }
  0xe5   : > { %5907 = vset.pattern.permute.xlu1 %v9335_v0 }
  0xe6   : > { %2502 = vperm.xlu1 %5907, %v6425_v26  }
  0xe8   : > { %v1214_v12 = vld [vmem:[#allocation2] sm:$0xff] }
  0xe9   : > { %1226 = vrot.lane.b32.xlu0 %v1214_v12, %s6109_s7  ;;  %1318 = vst [vmem:[#allocation2] sm:$0xff] %v6104_v1  ;;  %s985_s7 = scalar_lea.vmem %s9615_s9, %s6397_s1  ;;  %s9675_s9 = smov 120  }
  0xea   : > { %5908 = vset.pattern.permute.xlu1 %v9333_v3  ;;  %s9688_s1 = smov 95  }
  0xeb   : > { %2518 = vperm.xlu1 %5908, %v6451_v50  }
  0xed   : > { %1115 = vrot.lane.b32.xlu0 %v1103_v10, %s6110_s10  ;;  %v9353_v10 = vmov 17   ;;  %s9619_s10 = sld [smem:[#allocation27_spill]] }
  0xef   : > { %v1426_v13 = vpop.xlane.xlu1 %1425  ;;  %5909 = vset.pattern.permute.xlu1 %v9353_v10 }
  0xf0   : > { %v1428_v27 = vmul.f32 0.0625, %v1426_v13  ;;  %2530 = vperm.xlu1 %5909, %v6451_v50  }
  0xf3   : > { %v1321_v14 = vpop.permute.xlu1 %1320 }
  0xf4   : > { %1324 = vst.msk [vmem:[#allocation2] sm:$0xff] %vm1323_vm4, %v1321_v14  ;;  %2534 = vperm.xlu1 %5909, %v6425_v26   ;;  %vm9537_vm4 = vcmask 277504  }
  0xf7   : > { %v999_v39 = vpop.permute.xlu1 %998 }
  0xf8   : > { %5910 = vset.pattern.permute.xlu1 %v9323_v5 }
  0xfb   : > { %v1325_v15 = vld [vmem:[#allocation2] sm:$0xff]  ;;  %v1223_v2 = vpop.permute.xlu1 %1222 }
  0xfc   : > { %1337 = vrot.lane.b32.xlu0 %v1325_v15, %s6111_s18  ;;  %s9628_s18 = sld [smem:[#allocation26_spill]] }
  0xff   : > { %v1112_v11 = vpop.permute.xlu1 %1111 }
 0x100   : > { %1003 = vperm.xlu0 %5888, %v995_v16   ;;  %v1431_v16 = vld [vmem:[%s9600_s19] sm:$0xff]  ;;  %s9681_s19 = smov 108  }
 0x104   : > { %1217 = vperm.xlu0 %5888, %v5559_v18  }
 0x108   : > { %1106 = vperm.xlu0 %5888, %v1092_v20  }
 0x10c   : > { %1328 = vperm.xlu0 %5888, %v5565_v22  }
 0x110   : > { %1608 = vperm.xlu0 %5888, %v1517_v24  }
 0x127   : > { %v5667_v38 = vpop.f32.mrf.mxu0 }
 0x129   : > { %v1079_v40 = vpop.f32.mrf.mxu0 }
 0x12a   : > { %v1080_v41 = vadd.f32 %v1079_v40, %v999_v39 }
 0x12c   : > { %v1088_v45 = vmax.f32 %v1080_v41, 0.0 }
 0x15b   : > { %v1227_v28 = vpop.permute.xlu0 %1226 }
 0x15c   : > { %5673 = vmatprep.subr.mxu0 %v1227_v28 }
 0x15d   : > { %5674 = vmatpush3.msra.mxu0 %v1227_v28 }
 0x15e   : > { %5676 = vmatmul.mubr.msk.f32.vlgmr.msra.gmra.mxu0 %vm1006_vm0, %v5558_v29  ;;  %5683 = vmatprep.subr.mxu0 %v1428_v27 }
 0x15f   : > { %v1116_v31 = vpop.permute.xlu0 %1115  ;;  %5684 = vmatpush3.msra.mxu0 %v1428_v27  ;;  %5685 = vmatprep.mubr.msk.f32.mxu0 %vm1006_vm0, %v1429_v30 }
 0x160   : > { %5668 = vmatprep.subr.mxu1 %v1116_v31 }
 0x161   : > { %5669 = vmatpush3.msra.mxu1 %v1116_v31  ;;  %v5585_v31 = vld [vmem:[%s9598_s24 + $0x40] sm:$0xff] }
 0x162   : > { %5671 = vmatmul.mubr.msk.f32.vlgmr.msra.gmra.mxu1 %vm1006_vm0, %v1091_v32  ;;  %5686 = vmatmul.mubr.msk.f32.vlgmr.msra.gmra.mxu0 %vm1006_vm0, %v1430_v33  ;;  %v5574_v32 = vld [vmem:[%s9598_s24 + $0x18] sm:$0xff]  ;;  %v5586_v33 = vld [vmem:[%s9598_s24 + $0x48] sm:$0xff] }
 0x163   : > { %5680 = vmatprep.mubr.msk.f32.mxu1 %vm1006_vm0, %v5563_v34  ;;  %5699 = vmatprep.mubr.msk.f32.mxu0 %vm9533_vm1, %v5573_v48  ;;  %v5581_v34 = vld [vmem:[%s9598_s24 + $0x30] sm:$0xff] }
 0x16e   : > { %v1338_v35 = vpop.permute.xlu0 %1337 }
 0x16f   : > { %5678 = vmatprep.subr.mxu1 %v1338_v35 }
 0x170   : > { %5679 = vmatpush3.msra.mxu1 %v1338_v35  ;;  %v1334_v35 = vpop.permute.xlu1 %1333 }
 0x171   : > { %5681 = vmatmul.mubr.msk.f32.vlgmr.msra.gmra.mxu1 %vm1006_vm0, %v5564_v36 }
 0x172   : > { %5692 = vmatprep.mubr.msk.f32.mxu1 %vm9533_vm1, %v1518_v37 }
 0x17b   : > { %v1004_v42 = vpop.permute.xlu0 %1003 }
 0x17c   : > { %v1085_v43 = vadd.f32 %v5667_v38, %v1004_v42 }
 0x17e   : > { %v1089_v44 = vmax.f32 %v1085_v43, 0.0  ;;  %v5582_v43 = vld [vmem:[%s9598_s24 + $0x38] sm:$0xff]  ;;  %s9682_s24 = smov 109  }
 0x17f   : > { %v1218_v4 = vpop.permute.xlu0 %1217 }
 0x180   : > { %5688 = vmatprep.subr.mxu1 %v1089_v44 }
 0x181   : > { %5689 = vmatpush3.msra.mxu1 %v1089_v44  ;;  %v1969_v44 = vld [vmem:[%s985_s7] sm:$0x3f]  ;;  %s9367_s7 = smov 18  }
 0x182   : > { %5690 = vmatprep.subr.mxu1 %v1088_v45 }
 0x183   : > { %5691 = vmatpush3.msra.mxu1 %v1088_v45  ;;  %v1107_v17 = vpop.permute.xlu0 %1106  ;;  %v1970_v45 = vld [vmem:[%s9616_s6] sm:$0xff]  ;;  %s9386_s6 = smov 117  }
 0x184   : > { %5693 = vmatmul.mubr.msk.f32.vlgmr.msra.gmra.mxu1 %vm9533_vm1, %v1519_v46  ;;  %v1604_v46 = vpop.permute.xlu1 %1603 }
 0x185   : > { %5706 = vmatprep.mubr.msk.f32.mxu1 %vm9533_vm1, %v5577_v47 }
 0x187   : > { %v1329_v38 = vpop.permute.xlu0 %1328 }
 0x21e   : > { %v5677_v6 = vpop.f32.mrf.mxu0 }
 0x21f   : > { %v1307_v7 = vadd.f32 %v5677_v6, %v1223_v2  ;;  %v6508_v2 = vpop.permute.xlu1 %1974 }
 0x220   : > { %v1301_v8 = vpop.f32.mrf.mxu0 }
 0x221   : > { %v1311_v12 = vmax.f32 %v1307_v7, 0.0  ;;  %v1302_v13 = vadd.f32 %v1301_v8, %v1218_v4  ;;  %v1609_v7 = vpop.permute.xlu0 %1608 }
 0x222   : > { %v5672_v14 = vpop.f32.mrf.mxu1  ;;  %v5687_v15 = vpop.f32.mrf.mxu0 }
 0x223   : > { %v1310_v18 = vmax.f32 %v1302_v13, 0.0  ;;  %v1196_v19 = vadd.f32 %v5672_v14, %v1112_v11  ;;  %v1511_v20 = vadd.f32 %v5687_v15, %v1432_v9  ;;  %5702 = vmatprep.subr.mxu1 %v1311_v12  ;;  %v2057_v9 = vld [vmem:[%s9601_s17 + $0x8] sm:$0xff]  ;;  %v6511_v13 = vpop.permute.xlu1 %2185 }
 0x224   : > { %v1190_v21 = vpop.f32.mrf.mxu1  ;;  %v1505_v22 = vpop.f32.mrf.mxu0  ;;  %5703 = vmatpush3.msra.mxu1 %v1311_v12  ;;  %9617 = vst [vmem:[#allocation44_spill] sm:$0xff] %v6511_v13 }
 0x225   : > { %v1200_v24 = vmax.f32 %v1196_v19, 0.0  ;;  %v1515_v25 = vmax.f32 %v1511_v20, 0.0  ;;  %v1191_v27 = vadd.f32 %v1190_v21, %v1107_v17  ;;  %v1506_v28 = vadd.f32 %v1505_v22, %v1431_v16  ;;  %5704 = vmatprep.subr.mxu1 %v1310_v18  ;;  %v2056_v16 = vld [vmem:[%s9601_s17] sm:$0xff]  ;;  %s9679_s17 = smov 111  }
 0x226   : > { %5705 = vmatpush3.msra.mxu1 %v1310_v18 }
 0x227   : > { %v1199_v29 = vmax.f32 %v1191_v27, 0.0  ;;  %v1514_v30 = vmax.f32 %v1506_v28, 0.0  ;;  %5695 = vmatprep.subr.mxu0 %v1200_v24  ;;  %5707 = vmatmul.mubr.msk.f32.vlgmr.msra.gmra.mxu1 %vm9533_vm1, %v5578_v23  ;;  %v6516_v22 = vpop.permute.xlu1 %2212  ;;  %v9331_v23 = vmov 18  }
 0x228   : > { %5716 = vmatprep.subr.mxu1 %v1515_v25  ;;  %5696 = vmatpush3.msra.mxu0 %v1200_v24  ;;  %9618 = vst [vmem:[#allocation45_spill] sm:$0xff] %v6516_v22 }
 0x229   : > { %5717 = vmatpush3.msra.mxu1 %v1515_v25  ;;  %5697 = vmatprep.subr.mxu0 %v1199_v29  ;;  %v9321_v25 = vmov 19  }
 0x22a   : > { %5718 = vmatprep.subr.mxu1 %v1514_v30  ;;  %5698 = vmatpush3.msra.mxu0 %v1199_v29 }
 0x22b   : > { %5719 = vmatpush3.msra.mxu1 %v1514_v30  ;;  %5720 = vmatprep.mubr.msk.f32.mxu1 %vm9533_vm1, %v5585_v31  ;;  %v6522_v24 = vpop.permute.xlu1 %2220  ;;  %v9327_v31 = vmov 20  }
 0x22c   : > { %5700 = vmatmul.mubr.msk.f32.vlgmr.msra.gmra.mxu0 %vm9533_vm1, %v5574_v32  ;;  %5721 = vmatmul.mubr.msk.f32.vlgmr.msra.gmra.mxu1 %vm9533_vm1, %v5586_v33 }
 0x22d   : > { %5713 = vmatprep.mubr.msk.f32.mxu0 %vm9533_vm1, %v5581_v34  ;;  %5728 = vmatprep.subr.mxu1 %v2057_v9 }
 0x22e   : > { %5729 = vmatpush3.msra.mxu1 %v2057_v9 }
 0x22f   : > { %5730 = vmatprep.subr.mxu1 %v2056_v16  ;;  %v6535_v33 = vpop.permute.xlu1 %2257 }
 0x230   : > { %5731 = vmatpush3.msra.mxu1 %v2056_v16  ;;  %9620 = vst [vmem:[#allocation46_spill] sm:$0xff] %v6535_v33  ;;  %v2690_v16 = vld [vmem:[%s9628_s18 + $0x8] sm:$0xff] }
 0x231   : > { %v5682_v36 = vpop.f32.mrf.mxu1 }
 0x232   : > { %v1418_v37 = vadd.f32 %v5682_v36, %v1334_v35  ;;  %v9329_v35 = vmov 21   ;;  %v6542_v36 = vld [vmem:[%s9619_s10] sm:$0xff]  ;;  %s9370_s10 = smov 127  }
 0x233   : > { %v1412_v39 = vpop.f32.mrf.mxu1 }
 0x234   : > { %v1422_v40 = vmax.f32 %v1418_v37, 0.0  ;;  %v1413_v41 = vadd.f32 %v1412_v39, %v1329_v38  ;;  %v6545_v37 = vpop.permute.xlu1 %2278  ;;  %v9351_v38 = vmov 22   ;;  %v9325_v39 = vmov 24  }
 0x235   : > { %9621 = vst [vmem:[#allocation47_spill] sm:$0xff] %v6545_v37  ;;  %v9668_v37 = vmov 5  }
 0x236   : > { %v1421_v42 = vmax.f32 %v1413_v41, 0.0  ;;  %5709 = vmatprep.subr.mxu0 %v1422_v40 }
 0x237   : > { %5710 = vmatpush3.msra.mxu0 %v1422_v40 }
 0x238   : > { %5711 = vmatprep.subr.mxu0 %v1421_v42  ;;  %v6552_v40 = vpop.permute.xlu1 %2302 }
 0x239   : > { %5712 = vmatpush3.msra.mxu0 %v1421_v42  ;;  %9622 = vst [vmem:[#allocation48_spill] sm:$0xff] %v6552_v40 }
 0x23a   : > { %5714 = vmatmul.mubr.msk.f32.vlgmr.msra.gmra.mxu0 %vm9533_vm1, %v5582_v43  ;;  %5723 = vmatprep.subr.mxu0 %v6104_v1  ;;  %v9319_v43 = vmov 23  }
 0x23b   : > { %5724 = vmatpush3.msk.msra.mxu0 %vm1981_vm5, %v1969_v44  ;;  %5725 = vmatprep.mubr.msk.f32.mxu0 %vm6129_vm6, %v6104_v1  ;;  %vm4522_vm5 = vcmask 273408   ;;  %vm4520_vm6 = vmor %vm4519_vm3, %vm4518_vm2 }
 0x23c   : > { %v6558_v41 = vpop.permute.xlu1 %2318 }
 0x23d   : > { %9623 = vst [vmem:[#allocation49_spill] sm:$0xff] %v6558_v41  ;;  %v9667_v41 = vmov 3  }
 0x23e   : > { %5726 = vmatmul.mubr.msk.f32.vlgmr.msra.gmra.mxu0 %vm1977_vm7, %v1970_v45  ;;  %vm9550_vm7 = vcmask 523264  }
 0x240   : > { %v6565_v42 = vpop.permute.xlu1 %2330 }
 0x244   : > { %v5694_v47 = vpop.f32.mrf.mxu1  ;;  %v6571_v44 = vpop.permute.xlu1 %2334 }
 0x245   : > { %v1612_v8 = vadd.f32 %v5694_v47, %v1609_v7 }
 0x246   : > { %v1592_v48 = vpop.f32.mrf.mxu1 }
 0x247   : > { %v1611_v14 = vadd.f32 %v1604_v46, %v1592_v48 }
 0x248   : > { %v6578_v45 = vpop.permute.xlu1 %2362 }
 0x249   : > { %9624 = vst [vmem:[#allocation50_spill] sm:$0xff] %v6578_v45 }
 0x24c   : > { %v6584_v46 = vpop.permute.xlu1 %2378 }
 0x24d   : > { %9625 = vst [vmem:[#allocation51_spill] sm:$0xff] %v6584_v46 }
 0x250   : > { %v6588_v47 = vpop.permute.xlu1 %2402 }
 0x251   : > { %9626 = vst [vmem:[#allocation52_spill] sm:$0xff] %v6588_v47 }
 0x254   : > { %v6593_v48 = vpop.permute.xlu1 %2418 }
 0x255   : > { %9627 = vst [vmem:[#allocation53_spill] sm:$0xff] %v6593_v48 }
 0x2e7   : > { %v5708_v4 = vpop.f32.mrf.mxu1 }
 0x2e9   : > { %v1774_v6 = vpop.f32.mrf.mxu1 }
 0x2ec   : > { %v5701_v11 = vpop.f32.mrf.mxu0  ;;  %v5722_v12 = vpop.f32.mrf.mxu1 }
 0x2ed   : > { %v1698_v15 = vadd.f32 %v5701_v11, %v1612_v8  ;;  %1962 = vperm.xlu0 %5888, %v5722_v12  }
 0x2ee   : > { %v1688_v17 = vpop.f32.mrf.mxu0  ;;  %v1946_v18 = vpop.f32.mrf.mxu1 }
 0x2ef   : > { %v1697_v19 = vadd.f32 %v1688_v17, %v1611_v14  ;;  %1957 = vperm.xlu1 %5910, %v1946_v18   ;;  %v1784_v20 = vadd.f32 %v5708_v4, %v1698_v15  ;;  %v6597_v4 = vpop.permute.xlu1 %2430  ;;  %v2689_v14 = vld [vmem:[%s9628_s18] sm:$0xff]  ;;  %s9680_s18 = smov 112  }
 0x2f1   : > { %5892 = vset.pattern.permute.xlu0 %v9365_v51  ;;  %v1783_v21 = vadd.f32 %v1774_v6, %v1697_v19 }
 0x2f2   : > { %2224 = vperm.xlu0 %5892, %v6425_v26  }
 0x2f3   : > { %5911 = vset.pattern.permute.xlu1 %v9331_v23  ;;  %v6600_v6 = vpop.permute.xlu1 %2434 }
 0x2f4   : > { %2562 = vperm.xlu1 %5911, %v6425_v26  }
 0x2f6   : > { %5900 = vset.pattern.permute.xlu0 %v9357_v58 }
 0x2f7   : > { %2382 = vperm.xlu0 %5900, %v6425_v26   ;;  %v6605_v7 = vpop.permute.xlu1 %2462 }
 0x2f8   : > { %5912 = vset.pattern.permute.xlu1 %v9321_v25  ;;  %9629 = vst [vmem:[#allocation54_spill] sm:$0xff] %v6605_v7 }
 0x2f9   : > { %2578 = vperm.xlu1 %5912, %v6451_v50  }
 0x2fa   : > { %v5715_v27 = vpop.f32.mrf.mxu0 }
 0x2fb   : > { %v6526_v28 = vadd.f32 %v5715_v27, %v1784_v20  ;;  %5906 = vset.pattern.permute.xlu0 %v9355_v63  ;;  %v6609_v8 = vpop.permute.xlu1 %2478 }
 0x2fc   : > { %2482 = vperm.xlu0 %5906, %v6425_v26   ;;  %v1860_v29 = vpop.f32.mrf.mxu0  ;;  %9630 = vst [vmem:[#allocation55_spill] sm:$0xff] %v6609_v8  ;;  %v9663_v8 = vmov 4  }
 0x2fd   : > { %v6530_v30 = vadd.f32 %v1860_v29, %v1783_v21  ;;  %5914 = vset.pattern.permute.xlu1 %v9327_v31 }
 0x2fe   : > { %v6533_v32 = vpop.f32.mrf.mxu0  ;;  %2602 = vperm.xlu1 %5914, %v6425_v26  }
 0x2ff   : > { %v6612_v9 = vpop.permute.xlu1 %2502 }
 0x300   : > { %5913 = vset.pattern.permute.xlu0 %v9321_v25  ;;  %v5727_v34 = vpop.f32.mrf.mxu0  ;;  %9631 = vst [vmem:[#allocation56_spill] sm:$0xff] %v6612_v9 }
 0x301   : > { %2582 = vperm.xlu0 %5913, %v6425_v26  }
 0x302   : > { %5915 = vset.pattern.permute.xlu1 %v9329_v35 }
 0x303   : > { %2618 = vperm.xlu1 %5915, %v6451_v50   ;;  %v6617_v11 = vpop.permute.xlu1 %2518 }
 0x304   : > { %9632 = vst [vmem:[#allocation57_spill] sm:$0xff] %v6617_v11 }
 0x305   : > { %5920 = vset.pattern.permute.xlu0 %v9337_v61 }
 0x306   : > { %2833 = vperm.xlu0 %5920, %v6542_v36  }
 0x307   : > { %5916 = vset.pattern.permute.xlu1 %v9351_v38  ;;  %v6621_v12 = vpop.permute.xlu1 %2530 }
 0x308   : > { %2630 = vperm.xlu1 %5916, %v6451_v50  }
 0x30a   : > { %5921 = vset.pattern.permute.xlu0 %v9325_v39 }
 0x30b   : > { %2678 = vperm.xlu0 %5921, %v6451_v50   ;;  %v6625_v15 = vpop.permute.xlu1 %2534 }
 0x30c   : > { %2634 = vperm.xlu1 %5916, %v6425_v26  }
 0x30f   : > { %5924 = vset.pattern.permute.xlu0 %v9351_v38 }
 0x310   : > { %2933 = vperm.xlu0 %5924, %v6542_v36   ;;  %5917 = vset.pattern.permute.xlu1 %v9365_v51 }
 0x311   : > { %2733 = vperm.xlu1 %5917, %v6542_v36  }
 0x314   : > { %5925 = vset.pattern.permute.xlu0 %v9361_v52 }
 0x315   : > { %2253 = vperm.xlu0 %5925, %v6451_v50   ;;  %5918 = vset.pattern.permute.xlu1 %v9347_v56 }
 0x316   : > { %2783 = vperm.xlu1 %5918, %v6542_v36  }
 0x319   : > { %2747 = vperm.xlu0 %5925, %v6542_v36  }
 0x31a   : > { %5919 = vset.pattern.permute.xlu1 %v9319_v43 }
 0x31b   : > { %2662 = vperm.xlu1 %5919, %v6425_v26  }
 0x31d   : > { %5928 = vset.pattern.permute.xlu0 %v9359_v54 }
 0x31e   : > { %2298 = vperm.xlu0 %5928, %v6451_v50  }
 0x31f   : > { %5922 = vset.pattern.permute.xlu1 %v9353_v10 }
 0x320   : > { %2883 = vperm.xlu1 %5922, %v6542_v36  }
 0x322   : > { %2767 = vperm.xlu0 %5928, %v6542_v36  }
 0x324   : > { %5923 = vset.pattern.permute.xlu1 %v9325_v39 }
 0x325   : > { %2682 = vperm.xlu1 %5923, %v6425_v26  }
 0x326   : > { %5930 = vset.pattern.permute.xlu0 %v9349_v55 }
 0x327   : > { %2322 = vperm.xlu0 %5930, %v6425_v26  }
 0x329   : > { %5926 = vset.pattern.permute.xlu1 %v9323_v5 }
 0x32a   : > { %2693 = vperm.xlu1 %5926, %v2689_v14  }
 0x32b   : > { %2777 = vperm.xlu0 %5930, %v6542_v36  }
 0x32e   : > { %2698 = vperm.xlu1 %5926, %v2690_v16  }
 0x32f   : > { %5931 = vset.pattern.permute.xlu0 %v9345_v57 }
 0x330   : > { %2358 = vperm.xlu0 %5931, %v6451_v50  }
 0x332   : > { %5927 = vset.pattern.permute.xlu1 %v9378_v49 }
 0x333   : > { %2727 = vperm.xlu1 %5927, %v6542_v36  }
 0x334   : > { %2797 = vperm.xlu0 %5931, %v6542_v36  }
 0x337   : > { %5929 = vset.pattern.permute.xlu1 %v9376_v53 }
 0x338   : > { %5932 = vset.pattern.permute.xlu0 %v9343_v59  ;;  %2757 = vperm.xlu1 %5929, %v6542_v36  }
 0x339   : > { %2398 = vperm.xlu0 %5932, %v6451_v50  }
 0x33c   : > { %5933 = vset.pattern.permute.xlu1 %v9357_v58 }
 0x33d   : > { %2817 = vperm.xlu0 %5932, %v6542_v36   ;;  %2807 = vperm.xlu1 %5933, %v6542_v36  }
 0x341   : > { %5934 = vset.pattern.permute.xlu0 %v9341_v60  ;;  %5937 = vset.pattern.permute.xlu1 %v9355_v63 }
 0x342   : > { %2422 = vperm.xlu0 %5934, %v6425_v26   ;;  %2857 = vperm.xlu1 %5937, %v6542_v36  }
 0x346   : > { %2827 = vperm.xlu0 %5934, %v6542_v36   ;;  %5941 = vset.pattern.permute.xlu1 %v9321_v25 }
 0x347   : > { %2907 = vperm.xlu1 %5941, %v6542_v36  }
 0x34a   : > { %5935 = vset.pattern.permute.xlu0 %v9339_v62 }
 0x34b   : > { %2458 = vperm.xlu0 %5935, %v6451_v50   ;;  %5945 = vset.pattern.permute.xlu1 %v9325_v39 }
 0x34c   : > { %2957 = vperm.xlu1 %5945, %v6542_v36  }
 0x34f   : > { %2847 = vperm.xlu0 %5935, %v6542_v36  }
 0x350   : > { %5947 = vset.pattern.permute.xlu1 %v9323_v5 }
 0x353   : > { %5936 = vset.pattern.permute.xlu0 %v9335_v0 }
 0x354   : > { %2498 = vperm.xlu0 %5936, %v6451_v50  }
 0x358   : > { %2867 = vperm.xlu0 %5936, %v6542_v36  }
 0x35c   : > { %5938 = vset.pattern.permute.xlu0 %v9333_v3 }
 0x35d   : > { %2522 = vperm.xlu0 %5938, %v6425_v26  }
 0x361   : > { %2877 = vperm.xlu0 %5938, %v6542_v36  }
 0x365   : > { %5939 = vset.pattern.permute.xlu0 %v9331_v23 }
 0x366   : > { %2558 = vperm.xlu0 %5939, %v6451_v50  }
 0x368   : > { %v1963_v17 = vpop.permute.xlu0 %1962 }
 0x369   : > { %v1966_v18 = vadd.f32 %v1963_v17, %v6526_v28 }
 0x36a   : > { %2897 = vperm.xlu0 %5939, %v6542_v36   ;;  %v1958_v19 = vpop.permute.xlu1 %1957 }
 0x36b   : > { %v1965_v20 = vadd.f32 %v1958_v19, %v6530_v30  ;;  %v1968_v29 = vmax.f32 %v1966_v18, 0.0  ;;  %v2052_v18 = vadd.f32 %v6533_v32, %v6508_v2 }
 0x36d   : > { %v1967_v21 = vmax.f32 %v1965_v20, 0.0  ;;  %v6635_v27 = vpop.permute.xlu0 %2224  ;;  %v2055_v19 = vmax.f32 %v2052_v18, 0.0 }
 0x36e   : > { %5940 = vset.pattern.permute.xlu0 %v9327_v31 }
 0x36f   : > { %2598 = vperm.xlu0 %5940, %v6451_v50   ;;  %5732 = vmatprep.mubr.msk.f32.mxu1 %vm9533_vm1, %v1967_v21  ;;  %v6741_v51 = vpop.permute.xlu1 %2562 }
 0x370   : > { %5733 = vmatmul.mubr.msk.f32.vlgmr.msra.gmra.mxu1 %vm9533_vm1, %v1968_v29  ;;  %9651 = vst [vmem:[#allocation76_spill] sm:$0xff] %v6741_v51 }
 0x372   : > { %v6643_v28 = vpop.permute.xlu0 %2382 }
 0x373   : > { %9633 = vst [vmem:[#allocation58_spill] sm:$0xff] %v6643_v28  ;;  %2917 = vperm.xlu0 %5940, %v6542_v36  }
 0x377   : > { %5942 = vset.pattern.permute.xlu0 %v9329_v35  ;;  %v6649_v30 = vpop.permute.xlu0 %2482 }
 0x378   : > { %9634 = vst [vmem:[#allocation59_spill] sm:$0xff] %v6649_v30  ;;  %2622 = vperm.xlu0 %5942, %v6425_v26  }
 0x37c   : > { %2927 = vperm.xlu0 %5942, %v6542_v36   ;;  %v6655_v34 = vpop.permute.xlu0 %2582 }
 0x37d   : > { %9635 = vst [vmem:[#allocation60_spill] sm:$0xff] %v6655_v34 }
 0x380   : > { %5943 = vset.pattern.permute.xlu0 %v9319_v43 }
 0x381   : > { %2658 = vperm.xlu0 %5943, %v6451_v50   ;;  %v6661_v14 = vpop.permute.xlu0 %2833 }
 0x385   : > { %2947 = vperm.xlu0 %5943, %v6542_v36  }
 0x386   : > { %v6666_v16 = vpop.permute.xlu0 %2678 }
 0x387   : > { %9636 = vst [vmem:[#allocation61_spill] sm:$0xff] %v6666_v16 }
 0x389   : > { %5944 = vset.pattern.permute.xlu0 %v9323_v5 }
 0x38a   : > { %2180 = vperm.xlu0 %5944, %v6451_v50  }
 0x38b   : > { %v2934_v17 = vpop.permute.xlu0 %2933 }
 0x38e   : > { %2716 = vperm.xlu0 %5944, %v6542_v36  }
 0x390   : > { %v6677_v20 = vpop.permute.xlu0 %2253 }
 0x391   : > { %9637 = vst [vmem:[#allocation62_spill] sm:$0xff] %v6677_v20 }
 0x392   : > { %2707 = vrot.lane.b32.xlu0 %v2055_v19, %s9367_s7  ;;  %s9374_s7 = smov 125  }
 0x394   : > { %v6680_v21 = vpop.permute.xlu0 %2747 }
 0x399   : > { %v6682_v29 = vpop.permute.xlu0 %2298 }
 0x39a   : > { %9638 = vst [vmem:[#allocation63_spill] sm:$0xff] %v6682_v29 }
 0x39d   : > { %v6684_v43 = vpop.permute.xlu0 %2767 }
 0x3a2   : > { %v6686_v25 = vpop.permute.xlu0 %2322 }
 0x3a3   : > { %9639 = vst [vmem:[#allocation64_spill] sm:$0xff] %v6686_v25 }
 0x3a6   : > { %v6688_v1 = vpop.permute.xlu0 %2777 }
 0x3ab   : > { %v6690_v5 = vpop.permute.xlu0 %2358 }
 0x3ac   : > { %9640 = vst [vmem:[#allocation65_spill] sm:$0xff] %v6690_v5 }
 0x3af   : > { %v6692_v2 = vpop.permute.xlu0 %2797 }
 0x3b4   : > { %v6694_v32 = vpop.permute.xlu0 %2398 }
 0x3b5   : > { %9641 = vst [vmem:[#allocation66_spill] sm:$0xff] %v6694_v32 }
 0x3b8   : > { %v6696_v36 = vpop.permute.xlu0 %2817 }
 0x3bd   : > { %v6698_v18 = vpop.permute.xlu0 %2422 }
 0x3be   : > { %9642 = vst [vmem:[#allocation67_spill] sm:$0xff] %v6698_v18 }
 0x3c1   : > { %v6700_v19 = vpop.permute.xlu0 %2827 }
 0x3c6   : > { %v6702_v39 = vpop.permute.xlu0 %2458 }
 0x3c7   : > { %9643 = vst [vmem:[#allocation68_spill] sm:$0xff] %v6702_v39 }
 0x3ca   : > { %v6704_v31 = vpop.permute.xlu0 %2847 }
 0x3cf   : > { %v6706_v35 = vpop.permute.xlu0 %2498 }
 0x3d0   : > { %9644 = vst [vmem:[#allocation69_spill] sm:$0xff] %v6706_v35 }
 0x3d3   : > { %v6708_v23 = vpop.permute.xlu0 %2867 }
 0x3d8   : > { %v6710_v3 = vpop.permute.xlu0 %2522 }
 0x3d9   : > { %9645 = vst [vmem:[#allocation70_spill] sm:$0xff] %v6710_v3 }
 0x3dc   : > { %v6712_v0 = vpop.permute.xlu0 %2877 }
 0x3e1   : > { %v6714_v61 = vpop.permute.xlu0 %2558 }
 0x3e2   : > { %9646 = vst [vmem:[#allocation71_spill] sm:$0xff] %v6714_v61 }
 0x3e5   : > { %v6716_v62 = vpop.permute.xlu0 %2897 }
 0x3ea   : > { %v6718_v60 = vpop.permute.xlu0 %2598 }
 0x3eb   : > { %9647 = vst [vmem:[#allocation72_spill] sm:$0xff] %v6718_v60  ;;  %v9658_v60 = vmov 1  }
 0x3ee   : > { %v6720_v59 = vpop.permute.xlu0 %2917 }
 0x3f3   : > { %v6722_v57 = vpop.permute.xlu0 %2622 }
 0x3f4   : > { %9648 = vst [vmem:[#allocation73_spill] sm:$0xff] %v6722_v57 }
 0x3f7   : > { %v6724_v56 = vpop.permute.xlu0 %2927 }
 0x3fc   : > { %v6726_v55 = vpop.permute.xlu0 %2658 }
 0x3fd   : > { %9649 = vst [vmem:[#allocation74_spill] sm:$0xff] %v6726_v55 }
 0x400   : > { %v6728_v38 = vpop.permute.xlu0 %2947 }
 0x405   : > { %v6730_v10 = vpop.permute.xlu0 %2180 }
 0x406   : > { %9650 = vst [vmem:[#allocation75_spill] sm:$0xff] %v6730_v10 }
 0x409   : > { %v6732_v63 = vpop.permute.xlu0 %2716 }
 0x40d   : > { %v2708_v58 = vpop.permute.xlu0 %2707 }
 0x40e   : > { %2710 = vst.msk [vmem:[#allocation4] sm:$0xff] %vm2150_vm9, %v2708_v58  ;;  %v6747_v58 = vpop.permute.xlu1 %2578 }
 0x40f   : > { %9652 = vst [vmem:[#allocation77_spill] sm:$0xff] %v6747_v58 }
 0x415   : > { %v6735_v54 = vld [vmem:[#allocation4] sm:$0xff] }
 0x416   : > { %2722 = vrot.lane.b32.xlu1 %v6735_v54, %s9370_s10  ;;  %v2936_v52 = vmul.f32 %v2934_v17, %v6735_v54  ;;  %s9653_s10 = sld [smem:[#allocation28_spill]]  ;;  %v6751_v17 = vpop.permute.xlu1 %2602 }
 0x417   : > { %9654 = vst [vmem:[#allocation78_spill] sm:$0xff] %v6751_v17 }
 0x418   : > { %2938 = vrot.lane.b32.xlu0 %v2936_v52, %s9372_s11  ;;  %s9384_s11 = smov 119  }
 0x41a   : > { %2742 = vrot.lane.b32.xlu1 %v6735_v54, %s9374_s7  ;;  %v6757_v52 = vpop.permute.xlu1 %2618  ;;  %s9392_s7 = smov 116  }
 0x41b   : > { %9655 = vst [vmem:[#allocation79_spill] sm:$0xff] %v6757_v52 }
 0x41c   : > { %v2962_v55 = vld [vmem:[%s9653_s10] sm:$0xff]  ;;  %s9399_s10 = smov 104  }
 0x41e   : > { %2752 = vrot.lane.b32.xlu1 %v6735_v54, %s9382_s3  ;;  %v6761_v49 = vpop.permute.xlu1 %2630  ;;  %s9657_s3 = smov 18  }
 0x41f   : > { %9656 = vst [vmem:[#allocation80_spill] sm:$0xff] %v6761_v49 }
 0x422   : > { %2762 = vrot.lane.b32.xlu1 %v6735_v54, %s9380_s5  ;;  %s9388_s5 = smov 112   ;;  %v6769_v52 = vpop.permute.xlu1 %2634 }
 0x426   : > { %2772 = vrot.lane.b32.xlu1 %v6735_v54, %s9384_s11  ;;  %s9390_s11 = smov 111   ;;  %v2734_v58 = vpop.permute.xlu1 %2733 }
 0x427   : > { %v2736_v39 = vmul.f32 %v2734_v58, %v6735_v54 }
 0x42a   : > { %2792 = vrot.lane.b32.xlu1 %v6735_v54, %s9386_s6  ;;  %s9394_s6 = smov 109  }
 0x42e   : > { %2802 = vrot.lane.b32.xlu1 %v6735_v54, %s9392_s7  ;;  %s9413_s7 = smov 103  }
 0x430   : > { %v5734_v53 = vpop.f32.mrf.mxu1 }
 0x432   : > { %2812 = vrot.lane.b32.xlu1 %v6735_v54, %s9388_s5  ;;  %v2130_v16 = vpop.f32.mrf.mxu1  ;;  %s9397_s5 = smov 108  }
 0x433   : > { %2144 = vrot.lane.b32.xlu0 %v2130_v16, %s9657_s3 }
 0x436   : > { %2822 = vrot.lane.b32.xlu1 %v6735_v54, %s9390_s11  ;;  %s9659_s11 = sld [smem:[#allocation34_spill]] }
 0x437   : > { %2965 = vperm.xlu0 %5944, %v2962_v55   ;;  %v2784_v55 = vpop.permute.xlu1 %2783 }
 0x438   : > { %v2786_v32 = vmul.f32 %v2784_v55, %v6735_v54 }
 0x43a   : > { %2842 = vrot.lane.b32.xlu1 %v6735_v54, %s9394_s6  ;;  %s9401_s6 = smov 101  }
 0x43b   : > { %5946 = vset.pattern.permute.xlu0 %v9658_v60  ;;  %v6781_v16 = vpop.permute.xlu1 %2662 }
 0x43c   : > { %2208 = vperm.xlu0 %5946, %v6451_v50   ;;  %9660 = vst [vmem:[#allocation81_spill] sm:$0xff] %v6781_v16  ;;  %v6794_v11 = vld [vmem:[%s9659_s11 + $0x8] sm:$0xff] }
 0x43e   : > { %2852 = vrot.lane.b32.xlu1 %v6735_v54, %s9397_s5  ;;  %s9403_s5 = smov 96  }
 0x43f   : > { %v2884_v50 = vpop.permute.xlu1 %2883 }
 0x440   : > { %3493 = vperm.xlu0 %5946, %v6794_v11   ;;  %v2886_v46 = vmul.f32 %v2884_v50, %v6735_v54 }
 0x442   : > { %2862 = vrot.lane.b32.xlu1 %v6735_v54, %s9399_s10  ;;  %s9405_s10 = smov 95  }
 0x443   : > { %v6789_v61 = vpop.permute.xlu1 %2682 }
 0x444   : > { %9661 = vst [vmem:[#allocation82_spill] sm:$0xff] %v6789_v61  ;;  %5949 = vset.pattern.permute.xlu0 %v9663_v8 }
 0x445   : > { %2282 = vperm.xlu0 %5949, %v6425_v26   ;;  %v2836_v26 = vmul.f32 %v6661_v14, %v6735_v54  ;;  %v6826_v14 = vld [vmem:[%s9659_s11] sm:$0xff] }
 0x446   : > { %2872 = vrot.lane.b32.xlu1 %v6735_v54, %s9413_s7  ;;  %s9420_s7 = smov 102  }
 0x447   : > { %v6799_v35 = vpop.permute.xlu1 %2693 }
 0x448   : > { %9662 = vst [vmem:[#allocation83_spill] sm:$0xff] %v6799_v35 }
 0x44a   : > { %2892 = vrot.lane.b32.xlu1 %v6735_v54, %s9401_s6  ;;  %s9409_s6 = smov 93  }
 0x44b   : > { %v6806_v48 = vpop.permute.xlu1 %2698 }
 0x44c   : > { %9664 = vst [vmem:[#allocation84_spill] sm:$0xff] %v6806_v48 }
 0x44e   : > { %2902 = vrot.lane.b32.xlu1 %v6735_v54, %s9407_s8  ;;  %s9426_s8 = smov 126  }
 0x44f   : > { %v2728_v35 = vpop.permute.xlu1 %2727 }
 0x452   : > { %2912 = vrot.lane.b32.xlu1 %v6735_v54, %s9403_s5  ;;  %s9411_s5 = smov 92  }
 0x453   : > { %v6814_v58 = vpop.permute.xlu1 %2757 }
 0x456   : > { %2922 = vrot.lane.b32.xlu1 %v6735_v54, %s9405_s10  ;;  %s9665_s10 = sld [smem:[#allocation31_spill]] }
 0x45a   : > { %2942 = vrot.lane.b32.xlu1 %v6735_v54, %s9409_s6  ;;  %s9424_s6 = smov 118  }
 0x45c   : > { %v3136_v55 = vld [vmem:[%s9665_s10] sm:$0xff] }
 0x45e   : > { %2952 = vrot.lane.b32.xlu1 %v6735_v54, %s9411_s5  ;;  %s9422_s5 = smov 110  }
 0x462   : > { %2738 = vrot.lane.b32.xlu1 %v2736_v39, %s9426_s8  ;;  %v6818_v39 = vpop.permute.xlu1 %2807  ;;  %s9674_s8 = smov 119  }
 0x466   : > { %2788 = vrot.lane.b32.xlu1 %v2786_v32, %s9424_s6  ;;  %v6822_v5 = vpop.permute.xlu1 %2857  ;;  %v3137_v32 = vld [vmem:[%s9665_s10 + $0x8] sm:$0xff]  ;;  %s9673_s6 = smov 125   ;;  %s9676_s10 = smov 116  }
 0x46a   : > { %2838 = vrot.lane.b32.xlu1 %v2836_v26, %s9422_s5  ;;  %v6828_v26 = vpop.permute.xlu1 %2907  ;;  %s9672_s5 = smov 124  }
 0x46e   : > { %2888 = vrot.lane.b32.xlu1 %v2886_v46, %s9420_s7  ;;  %v6831_v50 = vpop.permute.xlu1 %2957  ;;  %v9666_v46 = vmov 2   ;;  %s9671_s7 = smov 127  }
 0x472   : > { %2146 = vrot.lane.b32.xlu1 %v5734_v53, %s9657_s3  ;;  %s9670_s3 = sld [smem:[#allocation30_spill]] }
 0x476   : > { %3140 = vperm.xlu1 %5947, %v3136_v55  }
 0x47a   : > { %3145 = vperm.xlu1 %5947, %v3137_v32  }
 0x47e   : > { %3425 = vperm.xlu1 %5947, %v6826_v14  }
 0x482   : > { %5948 = vset.pattern.permute.xlu1 %v9658_v60 }
 0x483   : > { %3489 = vperm.xlu1 %5948, %v6826_v14  }
 0x487   : > { %5950 = vset.pattern.permute.xlu1 %v9666_v46 }
 0x488   : > { %v2723_v53 = vpop.permute.xlu1 %2722  ;;  %3505 = vperm.xlu1 %5950, %v6826_v14  }
 0x48a   : > { %v6843_v10 = vpop.permute.xlu0 %2938 }
 0x48c   : > { %v2743_v55 = vpop.permute.xlu1 %2742  ;;  %3509 = vperm.xlu1 %5950, %v6794_v11  }
 0x490   : > { %v2753_v32 = vpop.permute.xlu1 %2752  ;;  %5951 = vset.pattern.permute.xlu1 %v9667_v41 }
 0x491   : > { %3589 = vperm.xlu1 %5951, %v6794_v11  }
 0x494   : > { %v2763_v29 = vpop.permute.xlu1 %2762 }
 0x495   : > { %5952 = vset.pattern.permute.xlu1 %v9663_v8  ;;  %v9417_v8 = vlaneseq }
 0x496   : > { %3636 = vperm.xlu1 %5952, %v6826_v14  }
 0x497   : > { %v6851_v30 = vand.u32 127, %v9417_v8 }
 0x498   : > { %v2773_v60 = vpop.permute.xlu1 %2772 }
 0x499   : > { %9669 = vst [vmem:[#allocation85_spill] sm:$0xff] %v6851_v30  ;;  %v6856_v18 = vand.u32 7, %v6851_v30 }
 0x49a   : > { %5953 = vset.pattern.permute.xlu1 %v9668_v37 }
 0x49b   : > { %vm2192_vm10 = vcmp.ge.s32.totalorder %v6856_v18, 1  ;;  %vm2169_vm11 = vcmp.ge.s32.totalorder %v6856_v18, 2  ;;  %vm2240_vm12 = vcmp.lt.s32.totalorder %v6856_v18, 7  ;;  %vm2265_vm13 = vcmp.lt.s32.totalorder %v6856_v18, 6 }
 0x49c   : > { %v2793_v20 = vpop.permute.xlu1 %2792  ;;  %v2712_v8 = vsel %vm2169_vm11, %v6735_v54, 0.0  ;;  %v2745_v25 = vsel %vm2240_vm12, %v2743_v55, 0.0 }
 0x49d   : > { %v2719_v49 = vmul.f32 %v6732_v63, %v2712_v8  ;;  %v2750_v13 = vmul.f32 %v6680_v21, %v2745_v25  ;;  %v2775_v63 = vsel %vm2192_vm10, %v2773_v60, 0.0  ;;  %v2795_v25 = vsel %vm2240_vm12, %v2793_v20, 0.0 }
 0x4a0   : > { %v2803_v48 = vpop.permute.xlu1 %2802 }
 0x4a1   : > { %v2805_v21 = vsel %vm2265_vm13, %v2803_v48, 0.0 }
 0x4a4   : > { %v2813_v61 = vpop.permute.xlu1 %2812 }
 0x4a5   : > { %v2145_v16 = vpop.permute.xlu0 %2144  ;;  %v2815_v60 = vsel %vm2169_vm11, %v2813_v61, 0.0 }
 0x4a6   : > { %2151 = vst.msk [vmem:[#allocation3] sm:$0xff] %vm2150_vm9, %v2145_v16  ;;  %v2725_v16 = vsel %vm2192_vm10, %v2723_v53, 0.0  ;;  %v2755_v53 = vsel %vm2265_vm13, %v2753_v32, 0.0  ;;  %v2820_v20 = vmul.f32 %v6696_v36, %v2815_v60  ;;  %v3152_v60 = vld [vmem:[%s990_s20] sm:$0xff]  ;;  %s9689_s20 = smov 96  }
 0x4a7   : > { %v2730_v45 = vmul.f32 %v2728_v35, %v2725_v16  ;;  %v2765_v35 = vsel %vm2169_vm11, %v2763_v29, 0.0  ;;  %v2760_v16 = vmul.f32 %v6814_v58, %v2755_v53 }
 0x4a8   : > { %v2823_v57 = vpop.permute.xlu1 %2822  ;;  %v2770_v55 = vmul.f32 %v6684_v43, %v2765_v35 }
 0x4a9   : > { %v2731_v40 = vadd.f32 %v2730_v45, %v2719_v49  ;;  %v2780_v45 = vmul.f32 %v6688_v1, %v2775_v63  ;;  %v2825_v1 = vsel %vm2192_vm10, %v2823_v57, 0.0 }
 0x4aa   : > { %v2830_v35 = vmul.f32 %v6700_v19, %v2825_v1 }
 0x4ac   : > { %v2843_v17 = vpop.permute.xlu1 %2842 }
 0x4ad   : > { %v6982_v1 = vld [vmem:[#allocation3] sm:$0xff] }
 0x4b0   : > { %v2853_v34 = vpop.permute.xlu1 %2852 }
 0x4b4   : > { %v2863_v51 = vpop.permute.xlu1 %2862 }
 0x4b5   : > { %v2865_v57 = vsel %vm2169_vm11, %v2863_v51, 0.0 }
 0x4b8   : > { %v2873_v3 = vpop.permute.xlu1 %2872 }
 0x4bc   : > { %v6846_v46 = vpop.permute.xlu1 %2892 }
 0x4c0   : > { %v6848_v9 = vpop.permute.xlu1 %2902 }
 0x4c4   : > { %v6853_v7 = vpop.permute.xlu1 %2912 }
 0x4c8   : > { %v6858_v47 = vpop.permute.xlu1 %2922 }
 0x4cc   : > { %v6864_v28 = vpop.permute.xlu1 %2942 }
 0x4d0   : > { %v6870_v30 = vpop.permute.xlu1 %2952 }
 0x4d4   : > { %v2739_v33 = vpop.permute.xlu1 %2738 }
 0x4d5   : > { %v2741_v54 = vadd.f32 %v2739_v33, %v2731_v40 }
 0x4d7   : > { %v2751_v22 = vadd.f32 %v2750_v13, %v2741_v54  ;;  %v2800_v13 = vmul.f32 %v6692_v2, %v2795_v25  ;;  %v2845_v2 = vsel %vm2240_vm12, %v2843_v17, 0.0  ;;  %v2870_v17 = vmul.f32 %v6708_v23, %v2865_v57 }
 0x4d8   : > { %v2789_v8 = vpop.permute.xlu1 %2788  ;;  %v2905_v23 = vsel %vm2265_vm13, %v6848_v9, 0.0  ;;  %v2925_v9 = vsel %vm2192_vm10, %v6858_v47, 0.0  ;;  %v2955_v47 = vsel %vm2265_vm13, %v6870_v30, 0.0 }
 0x4d9   : > { %v2761_v49 = vadd.f32 %v2760_v16, %v2751_v22  ;;  %v2810_v22 = vmul.f32 %v6818_v39, %v2805_v21  ;;  %v2855_v39 = vsel %vm2265_vm13, %v2853_v34, 0.0  ;;  %v2850_v16 = vmul.f32 %v6704_v31, %v2845_v2 }
 0x4da   : > { %v2860_v36 = vmul.f32 %v6822_v5, %v2855_v39  ;;  %v2895_v5 = vsel %vm2240_vm12, %v6846_v46, 0.0  ;;  %v2915_v46 = vsel %vm2169_vm11, %v6853_v7, 0.0  ;;  %v2930_v7 = vmul.f32 %v6724_v56, %v2925_v9 }
 0x4db   : > { %v2771_v32 = vadd.f32 %v2770_v55, %v2761_v49  ;;  %v9702_v39 = vmov 17   ;;  %v9711_v9 = vmov 8  }
 0x4dc   : > { %v2839_v33 = vpop.permute.xlu1 %2838 }
 0x4dd   : > { %v2781_v40 = vadd.f32 %v2780_v45, %v2771_v32  ;;  %v2910_v32 = vmul.f32 %v6828_v26, %v2905_v23  ;;  %v2945_v26 = vsel %vm2240_vm12, %v6864_v28, 0.0  ;;  %v2966_v28 = vpop.permute.xlu0 %2965  ;;  %v9709_v23 = vmov 6  }
 0x4df   : > { %v2791_v29 = vadd.f32 %v2789_v8, %v2781_v40  ;;  %v2875_v8 = vsel %vm2192_vm10, %v2873_v3, 0.0  ;;  %v2972_v3 = vld [vmem:[%s9670_s3] sm:$0xff] }
 0x4e0   : > { %v2889_v58 = vpop.permute.xlu1 %2888  ;;  %v2880_v31 = vmul.f32 %v6712_v0, %v2875_v8  ;;  %5737 = vmatprep.mubr.msk.f32.mxu0 %vm1006_vm0, %v2972_v3  ;;  %v2900_v0 = vmul.f32 %v6716_v62, %v2895_v5  ;;  %v2920_v62 = vmul.f32 %v6720_v59, %v2915_v46  ;;  %v2950_v59 = vmul.f32 %v6728_v38, %v2945_v26 }
 0x4e1   : > { %v2801_v43 = vadd.f32 %v2800_v13, %v2791_v29  ;;  %v2960_v13 = vmul.f32 %v6831_v50, %v2955_v47  ;;  %v3161_v50 = vcombine.high %v3152_v60, %v3152_v60  ;;  %v7076_v8 = vpop.permute.xlu0 %2208  ;;  %v9712_v47 = vmov 10  }
 0x4e3   : > { %v2811_v53 = vadd.f32 %v2810_v22, %v2801_v43  ;;  %v6978_v22 = vld [vmem:[#allocation5] sm:$0xff]  ;;  %v3153_v43 = vld [vmem:[%s9685_s30] sm:$0xf]  ;;  %s9691_s30 = smov 92  }
 0x4e4   : > { %v2147_v54 = vpop.permute.xlu1 %2146 }
 0x4e5   : > { %v2821_v48 = vadd.f32 %v2820_v20, %v2811_v53  ;;  %2152 = vst.msk [vmem:[#allocation3 + $0x8] sm:$0xff] %vm2150_vm9, %v2147_v54  ;;  %v2337_v54 = vmul.f32 %v6565_v42, %v6982_v1  ;;  %v2537_v42 = vmul.f32 %v6621_v12, %v6982_v1  ;;  %v9699_v12 = vmov 14  }
 0x4e6   : > { %vm9536_vm9 = vcmask 1039360  }
 0x4e7   : > { %v2831_v61 = vadd.f32 %v2830_v35, %v2821_v48 }
 0x4e9   : > { %v2841_v63 = vadd.f32 %v2839_v33, %v2831_v61 }
 0x4eb   : > { %v2851_v19 = vadd.f32 %v2850_v16, %v2841_v63  ;;  %v9703_v63 = vmov 22  }
 0x4ec   : > { %v6909_v55 = vld [vmem:[#allocation3 + $0x8] sm:$0xff] }
 0x4ed   : > { %v2861_v49 = vadd.f32 %v2860_v36, %v2851_v19  ;;  %2201 = vrot.lane.b32.xlu1 %v6909_v55, %s9671_s7  ;;  %2271 = vrot.lane.b32.xlu0 %v6909_v55, %s9672_s5  ;;  %v2228_v20 = vmul.f32 %v6635_v27, %v6909_v55  ;;  %v2638_v53 = vmul.f32 %v6769_v52, %v6909_v55 }
 0x4ee   : > { %v2338_v27 = vmul.f32 %v6571_v44, %v6909_v55  ;;  %v2437_v52 = vmul.f32 %v6597_v4, %v6982_v1  ;;  %v9698_v4 = vmov 9   ;;  %v2438_v35 = vmul.f32 %v6600_v6, %v6909_v55 }
 0x4ef   : > { %v2871_v51 = vadd.f32 %v2870_v17, %v2861_v49  ;;  %v2538_v57 = vmul.f32 %v6625_v15, %v6909_v55  ;;  %v7085_v49 = vpop.permute.xlu0 %3493 }
 0x4f0   : > { %9707 = vst [vmem:[#allocation91_spill] sm:$0xff] %v7085_v49 }
 0x4f1   : > { %v2881_v34 = vadd.f32 %v2880_v31, %v2871_v51  ;;  %2246 = vrot.lane.b32.xlu1 %v6909_v55, %s9673_s6  ;;  %2311 = vrot.lane.b32.xlu0 %v6909_v55, %s9674_s8  ;;  %v7030_v44 = vpop.permute.xlu1 %3140  ;;  %v2227_v51 = vmul.f32 %v6522_v24, %v6982_v1 }
 0x4f3   : > { %v2891_v45 = vadd.f32 %v2889_v58, %v2881_v34  ;;  %v2973_v58 = vld [vmem:[%s9670_s3 + $0x8] sm:$0xff]  ;;  %s9690_s3 = smov 93   ;;  %v7094_v31 = vpop.permute.xlu0 %2282 }
 0x4f5   : > { %v2901_v25 = vadd.f32 %v2900_v0, %v2891_v45  ;;  %2291 = vrot.lane.b32.xlu1 %v6909_v55, %s9675_s9  ;;  %2371 = vrot.lane.b32.xlu0 %v6909_v55, %s9676_s10  ;;  %v7040_v48 = vpop.permute.xlu1 %3145 }
 0x4f7   : > { %v2911_v33 = vadd.f32 %v2910_v32, %v2901_v25  ;;  %v9710_v32 = vmov 7  }
 0x4f9   : > { %v2921_v40 = vadd.f32 %v2920_v62, %v2911_v33  ;;  %2351 = vrot.lane.b32.xlu1 %v6909_v55, %s9678_s14  ;;  %2411 = vrot.lane.b32.xlu0 %v6909_v55, %s9679_s17  ;;  %v7047_v2 = vpop.permute.xlu1 %3425 }
 0x4fa   : > { %9700 = vst [vmem:[#allocation86_spill] sm:$0xff] %v7047_v2 }
 0x4fb   : > { %v2931_v21 = vadd.f32 %v2930_v7, %v2921_v40 }
 0x4fd   : > { %2391 = vrot.lane.b32.xlu1 %v6909_v55, %s9680_s18  ;;  %2471 = vrot.lane.b32.xlu0 %v6909_v55, %s9681_s19  ;;  %v2941_v56 = vadd.f32 %v6843_v10, %v2931_v21 }
 0x4fe   : > { %v7055_v6 = vpop.permute.xlu1 %3489 }
 0x4ff   : > { %v2951_v29 = vadd.f32 %v2950_v59, %v2941_v56  ;;  %9701 = vst [vmem:[#allocation87_spill] sm:$0xff] %v7055_v6 }
 0x501   : > { %2451 = vrot.lane.b32.xlu1 %v6909_v55, %s9682_s24  ;;  %2511 = vrot.lane.b32.xlu0 %v6909_v55, %s9683_s25  ;;  %v2961_v38 = vadd.f32 %v2960_v13, %v2951_v29 }
 0x503   : > { %v2968_v30 = vadd.f32 %v2966_v28, %v2961_v38  ;;  %v7067_v36 = vpop.permute.xlu1 %3505  ;;  %v9713_v28 = vmov 11  }
 0x504   : > { %9704 = vst [vmem:[#allocation88_spill] sm:$0xff] %v7067_v36 }
 0x505   : > { %2491 = vrot.lane.b32.xlu1 %v6909_v55, %s9684_s29  ;;  %2571 = vrot.lane.b32.xlu0 %v6909_v55, %s9686_s26  ;;  %v2969_v10 = vmax.f32 %v2968_v30, 0.0 }
 0x507   : > { %5735 = vmatprep.subr.mxu0 %v2969_v10  ;;  %v7074_v19 = vpop.permute.xlu1 %3509 }
 0x508   : > { %5736 = vmatpush3.msra.mxu0 %v2969_v10  ;;  %9705 = vst [vmem:[#allocation89_spill] sm:$0xff] %v7074_v19 }
 0x509   : > { %2551 = vrot.lane.b32.xlu1 %v6909_v55, %s9687_s12  ;;  %2611 = vrot.lane.b32.xlu0 %v6909_v55, %s9688_s1 }
 0x50a   : > { %5738 = vmatmul.mubr.msk.f32.vlgmr.msra.gmra.mxu0 %vm1006_vm0, %v2973_v58  ;;  %5597 = vmatprep.subr.msk.mxu0 %vm9538_vm14, %v3161_v50  ;;  %vm4507_vm0 = vcmask 551936  }
 0x50b   : > { %5598 = vmatpush1.msk.msra.mxu0 %vm9538_vm14, %v3152_v60  ;;  %3235 = vmatprep.mubr.f32.mxu0 %v6978_v22  ;;  %4508 = vst.msk [vmem:[#allocation6 + $0x8] sm:$0xf] %vm4507_vm0, %v6978_v22  ;;  %vm9535_vm0 = vcmask 1022976   ;;  %vm9540_vm14 = vcmask 1031168  }
 0x50c   : > { %v7083_v17 = vpop.permute.xlu1 %3589 }
 0x50d   : > { %2591 = vrot.lane.b32.xlu1 %v6909_v55, %s9689_s20  ;;  %2199 = vrot.lane.b32.xlu0 %v6982_v1, %s9671_s7  ;;  %9706 = vst [vmem:[#allocation90_spill] sm:$0xff] %v7083_v17 }
 0x50e   : > { %5599 = vmatmul.mubr.msk.f32.vlgmr.msra.gmra.mxu0 %vm9534_vm15, %v3153_v43  ;;  %vm9541_vm15 = vcmask 908288  }
 0x50f   : > { %5293 = vmatprep.mubr.f32.mxu0 %v6978_v22 }
 0x511   : > { %2651 = vrot.lane.b32.xlu1 %v6909_v55, %s9690_s3  ;;  %2244 = vrot.lane.b32.xlu0 %v6982_v1, %s9673_s6 }
 0x515   : > { %2671 = vrot.lane.b32.xlu1 %v6909_v55, %s9691_s30  ;;  %2349 = vrot.lane.b32.xlu0 %v6982_v1, %s9678_s14  ;;  %s9693_s14 = smov 94  }
 0x519   : > { %2233 = vrot.lane.b32.xlu1 %v2228_v20, %s9692_s2  ;;  %2449 = vrot.lane.b32.xlu0 %v6982_v1, %s9682_s24  ;;  %v2175_v20 = vsel %vm2169_vm11, %v6909_v55, 0.0 }
 0x51d   : > { %2269 = vrot.lane.b32.xlu1 %v6982_v1, %s9672_s5  ;;  %2549 = vrot.lane.b32.xlu0 %v6982_v1, %s9687_s12  ;;  %s9694_s12 = smov 118  }
 0x521   : > { %2289 = vrot.lane.b32.xlu1 %v6982_v1, %s9675_s9  ;;  %2643 = vrot.lane.b32.xlu0 %v2638_v53, %s9693_s14  ;;  %s9695_s9 = smov 110   ;;  %v9714_v53 = vld [vmem:[#allocation45_spill] sm:$0xff] }
 0x525   : > { %2309 = vrot.lane.b32.xlu1 %v6982_v1, %s9674_s8  ;;  %2649 = vrot.lane.b32.xlu0 %v6982_v1, %s9690_s3  ;;  %s9696_s8 = sld [smem:[#allocation36_spill]] }
 0x529   : > { %2343 = vrot.lane.b32.xlu1 %v2338_v27, %s9694_s12  ;;  %2341 = vrot.lane.b32.xlu0 %v2337_v54, %s9694_s12  ;;  %s9697_s12 = smov 102   ;;  %v9715_v54 = vmov 13  }
 0x52b   : > { %v7051_v61 = vld [vmem:[%s9696_s8] sm:$0xf] }
 0x52c   : > { %v7062_v16 = vld [vmem:[%s9696_s8] sm:$0xf] }
 0x52d   : > { %2369 = vrot.lane.b32.xlu1 %v6982_v1, %s9676_s10  ;;  %2441 = vrot.lane.b32.xlu0 %v2437_v52, %s9695_s9  ;;  %v4614_v15 = vld [vmem:[%s9696_s8] sm:$0xf]  ;;  %s9802_s10 = sld [smem:[#allocation14_spill]] }
 0x52e   : > { %v4668_v5 = vld [vmem:[%s9696_s8] sm:$0xf] }
 0x52f   : > { %v7109_v45 = vld [vmem:[%s9696_s8] sm:$0xf] }
 0x530   : > { %v4752_v33 = vld [vmem:[%s9696_s8] sm:$0xf] }
 0x531   : > { %2389 = vrot.lane.b32.xlu1 %v6982_v1, %s9680_s18  ;;  %3640 = vperm.xlu0 %5949, %v6794_v11   ;;  %v4806_v59 = vld [vmem:[%s9696_s8] sm:$0xf] }
 0x532   : > { %v7160_v10 = vld [vmem:[%s9696_s8] sm:$0xf] }
 0x535   : > { %2409 = vrot.lane.b32.xlu1 %v6982_v1, %s9679_s17  ;;  %2541 = vrot.lane.b32.xlu0 %v2537_v42, %s9697_s12  ;;  %v9716_v42 = vmov 12  }
 0x536   : > { %5958 = vset.pattern.permute.xlu0 %v9698_v4 }
 0x539   : > { %2443 = vrot.lane.b32.xlu1 %v2438_v35, %s9695_s9  ;;  %3849 = vperm.xlu0 %5958, %v6794_v11  }
 0x53d   : > { %2469 = vrot.lane.b32.xlu1 %v6982_v1, %s9681_s19  ;;  %5964 = vset.pattern.permute.xlu0 %v9699_v12 }
 0x53e   : > { %4058 = vperm.xlu0 %5964, %v6794_v11  }
 0x541   : > { %2489 = vrot.lane.b32.xlu1 %v6982_v1, %s9684_s29  ;;  %s9736_s29 = sld [smem:[#allocation33_spill]] }
 0x542   : > { %5973 = vset.pattern.permute.xlu0 %v9702_v39 }
 0x543   : > { %4984 = vperm.xlu0 %5973, %v7051_v61  }
 0x545   : > { %2509 = vrot.lane.b32.xlu1 %v6982_v1, %s9683_s25  ;;  %s9724_s25 = sld [smem:[#allocation29_spill]] }
 0x547   : > { %5974 = vset.pattern.permute.xlu0 %v9703_v63 }
 0x548   : > { %5122 = vperm.xlu0 %5974, %v7062_v16  }
 0x549   : > { %2543 = vrot.lane.b32.xlu1 %v2538_v57, %s9697_s12  ;;  %v9717_v57 = vld [vmem:[#allocation44_spill] sm:$0xff]  ;;  %s9448_s12 = smov 34  }
 0x54c   : > { %4360 = vperm.xlu0 %5974, %v6826_v14  }
 0x54d   : > { %2569 = vrot.lane.b32.xlu1 %v6982_v1, %s9686_s26  ;;  %s9787_s26 = sld [smem:[#allocation37_spill]] }
 0x550   : > { %5976 = vset.pattern.permute.xlu0 %v9667_v41  ;;  %v7092_v41 = vpop.permute.xlu1 %3636 }
 0x551   : > { %2589 = vrot.lane.b32.xlu1 %v6982_v1, %s9689_s20  ;;  %3585 = vperm.xlu0 %5976, %v6826_v14   ;;  %9708 = vst [vmem:[#allocation92_spill] sm:$0xff] %v7092_v41 }
 0x555   : > { %2609 = vrot.lane.b32.xlu1 %v6982_v1, %s9688_s1  ;;  %4617 = vperm.xlu0 %5976, %v4614_v15   ;;  %v2189_v15 = vmul.f32 %v9717_v57, %v2175_v20  ;;  %v9719_v20 = vmov 15  }
 0x559   : > { %2669 = vrot.lane.b32.xlu1 %v6982_v1, %s9691_s30  ;;  %5978 = vset.pattern.permute.xlu0 %v9668_v37 }
 0x55a   : > { %3677 = vperm.xlu0 %5978, %v6826_v14  }
 0x55d   : > { %2231 = vrot.lane.b32.xlu1 %v2227_v51, %s9692_s2  ;;  %v4890_v51 = vld [vmem:[%s9696_s8] sm:$0xf] }
 0x55e   : > { %4671 = vperm.xlu0 %5978, %v4668_v5  }
 0x55f   : > { %v2202_v34 = vpop.permute.xlu1 %2201  ;;  %v7101_v3 = vpop.permute.xlu0 %2271 }
 0x560   : > { %v2206_v50 = vsel %vm2192_vm10, %v2202_v34, 0.0 }
 0x561   : > { %3681 = vperm.xlu1 %5953, %v6794_v11   ;;  %v2216_v27 = vmul.f32 %v9714_v53, %v2206_v50 }
 0x562   : > { %5980 = vset.pattern.permute.xlu0 %v9709_v23 }
 0x563   : > { %v2247_v37 = vpop.permute.xlu1 %2246  ;;  %3722 = vperm.xlu0 %5980, %v6794_v11   ;;  %v7106_v0 = vpop.permute.xlu0 %2311  ;;  %v2218_v5 = vadd.f32 %v2216_v27, %v2189_v15 }
 0x564   : > { %v2251_v55 = vsel %vm2240_vm12, %v2247_v37, 0.0 }
 0x565   : > { %5954 = vset.pattern.permute.xlu1 %v9709_v23 }
 0x566   : > { %3718 = vperm.xlu1 %5954, %v6826_v14  }
 0x567   : > { %v7113_v24 = vpop.permute.xlu1 %2291  ;;  %4698 = vperm.xlu0 %5980, %v7109_v45   ;;  %v7116_v46 = vpop.permute.xlu0 %2371 }
 0x568   : > { %v2296_v27 = vsel %vm2169_vm11, %v7113_v24, 0.0 }
 0x56a   : > { %5955 = vset.pattern.permute.xlu1 %v9710_v32 }
 0x56b   : > { %v7119_v25 = vpop.permute.xlu1 %2351  ;;  %5981 = vset.pattern.permute.xlu0 %v9711_v9  ;;  %3734 = vperm.xlu1 %5955, %v6826_v14   ;;  %v7123_v62 = vpop.permute.xlu0 %2411 }
 0x56c   : > { %3804 = vperm.xlu0 %5981, %v6826_v14  }
 0x56f   : > { %v7127_v7 = vpop.permute.xlu1 %2391  ;;  %3738 = vperm.xlu1 %5955, %v6794_v11   ;;  %v7130_v40 = vpop.permute.xlu0 %2471 }
 0x570   : > { %4755 = vperm.xlu0 %5981, %v4752_v33  }
 0x573   : > { %v7132_v26 = vpop.permute.xlu1 %2451  ;;  %5956 = vset.pattern.permute.xlu1 %v9711_v9  ;;  %v7135_v21 = vpop.permute.xlu0 %2511  ;;  %v9718_v9 = vld [vmem:[#allocation46_spill] sm:$0xff] }
 0x574   : > { %5982 = vset.pattern.permute.xlu0 %v9712_v47  ;;  %3808 = vperm.xlu1 %5956, %v6794_v11   ;;  %v2261_v33 = vmul.f32 %v9718_v9, %v2251_v55 }
 0x575   : > { %3886 = vperm.xlu0 %5982, %v6826_v14  }
 0x577   : > { %v7141_v56 = vpop.permute.xlu1 %2491  ;;  %v7143_v13 = vpop.permute.xlu0 %2571 }
 0x578   : > { %5957 = vset.pattern.permute.xlu1 %v9698_v4 }
 0x579   : > { %4809 = vperm.xlu0 %5982, %v4806_v59   ;;  %3845 = vperm.xlu1 %5957, %v6826_v14   ;;  %v2276_v59 = vsel %vm2265_vm13, %v7101_v3, 0.0  ;;  %v4944_v3 = vld [vmem:[%s9696_s8] sm:$0xf] }
 0x57a   : > { %v2286_v37 = vmul.f32 %v7094_v31, %v2276_v59  ;;  %v2316_v31 = vsel %vm2192_vm10, %v7106_v0, 0.0  ;;  %v2356_v0 = vsel %vm2240_vm12, %v7119_v25, 0.0 }
 0x57b   : > { %v7147_v29 = vpop.permute.xlu1 %2551  ;;  %v7149_v38 = vpop.permute.xlu0 %2611 }
 0x57d   : > { %5984 = vset.pattern.permute.xlu0 %v9713_v28  ;;  %5959 = vset.pattern.permute.xlu1 %v9712_v47 }
 0x57e   : > { %3931 = vperm.xlu0 %5984, %v6794_v11   ;;  %3890 = vperm.xlu1 %5959, %v6794_v11  }
 0x57f   : > { %v7155_v30 = vpop.permute.xlu1 %2591  ;;  %v7157_v60 = vpop.permute.xlu0 %2199 }
 0x582   : > { %4836 = vperm.xlu0 %5984, %v7160_v10   ;;  %5960 = vset.pattern.permute.xlu1 %v9713_v28 }
 0x583   : > { %v7166_v58 = vpop.permute.xlu1 %2651  ;;  %3927 = vperm.xlu1 %5960, %v6826_v14   ;;  %v7169_v43 = vpop.permute.xlu0 %2244 }
 0x586   : > { %5985 = vset.pattern.permute.xlu0 %v9715_v54 }
 0x587   : > { %v7176_v52 = vpop.permute.xlu1 %2671  ;;  %4013 = vperm.xlu0 %5985, %v6826_v14   ;;  %5961 = vset.pattern.permute.xlu1 %v9716_v42  ;;  %v7180_v35 = vpop.permute.xlu0 %2349 }
 0x588   : > { %3943 = vperm.xlu1 %5961, %v6826_v14  }
 0x58b   : > { %v2234_v34 = vpop.permute.xlu1 %2233  ;;  %4893 = vperm.xlu0 %5985, %v4890_v51   ;;  %v7187_v23 = vpop.permute.xlu0 %2449  ;;  %v9720_v51 = vld [vmem:[#allocation48_spill] sm:$0xff] }
 0x58c   : > { %v2238_v47 = vadd.f32 %v2234_v34, %v2218_v5  ;;  %3947 = vperm.xlu1 %5961, %v6794_v11   ;;  %v2306_v55 = vmul.f32 %v9720_v51, %v2296_v27  ;;  %v9721_v34 = vld [vmem:[#allocation64_spill] sm:$0xff]  ;;  %v9725_v27 = vld [vmem:[#allocation50_spill] sm:$0xff] }
 0x58d   : > { %v2326_v9 = vmul.f32 %v9721_v34, %v2316_v31 }
 0x58e   : > { %v2263_v28 = vadd.f32 %v2261_v33, %v2238_v47  ;;  %v9722_v33 = vmov 16   ;;  %v9723_v47 = vld [vmem:[#allocation80_spill] sm:$0xff] }
 0x58f   : > { %v7194_v50 = vpop.permute.xlu1 %2269  ;;  %5986 = vset.pattern.permute.xlu0 %v9719_v20  ;;  %v7198_v53 = vpop.permute.xlu0 %2549  ;;  %v2637_v59 = vmul.f32 %v9723_v47, %v6982_v1  ;;  %v2970_v47 = vld [vmem:[%s9724_s25] sm:$0xff] }
 0x590   : > { %4095 = vperm.xlu0 %5986, %v6826_v14   ;;  %5962 = vset.pattern.permute.xlu1 %v9715_v54  ;;  %v2288_v57 = vadd.f32 %v2286_v37, %v2263_v28 }
 0x591   : > { %4017 = vperm.xlu1 %5962, %v6794_v11   ;;  %5744 = vmatprep.mubr.msk.f32.mxu1 %vm9533_vm1, %v2970_v47 }
 0x592   : > { %v2308_v24 = vadd.f32 %v2306_v55, %v2288_v57  ;;  %v2376_v55 = vsel %vm2265_vm13, %v7116_v46, 0.0  ;;  %v5028_v46 = vld [vmem:[%s9696_s8] sm:$0xf] }
 0x593   : > { %v7207_v15 = vpop.permute.xlu1 %2289  ;;  %v7214_v54 = vpop.permute.xlu0 %2643 }
 0x594   : > { %4947 = vperm.xlu0 %5986, %v4944_v3   ;;  %v2328_v28 = vadd.f32 %v2326_v9, %v2308_v24  ;;  %v2366_v3 = vmul.f32 %v9725_v27, %v2356_v0  ;;  %v9726_v24 = vld [vmem:[#allocation58_spill] sm:$0xff]  ;;  %v9727_v9 = vmov 18  }
 0x595   : > { %5963 = vset.pattern.permute.xlu1 %v9699_v12  ;;  %v2386_v34 = vmul.f32 %v9726_v24, %v2376_v55  ;;  %v9730_v24 = vmov 21  }
 0x596   : > { %4054 = vperm.xlu1 %5963, %v6826_v14  }
 0x597   : > { %v7217_v5 = vpop.permute.xlu1 %2309  ;;  %v7230_v57 = vpop.permute.xlu0 %2649 }
 0x598   : > { %5988 = vset.pattern.permute.xlu0 %v9722_v33 }
 0x599   : > { %4140 = vperm.xlu0 %5988, %v6794_v11  }
 0x59a   : > { %2641 = vrot.lane.b32.xlu1 %v2637_v59, %s9693_s14 }
 0x59b   : > { %v2344_v37 = vpop.permute.xlu1 %2343  ;;  %5965 = vset.pattern.permute.xlu1 %v9719_v20  ;;  %v2396_v20 = vsel %vm2169_vm11, %v7127_v7, 0.0  ;;  %v7245_v0 = vpop.permute.xlu0 %2341  ;;  %v2416_v7 = vsel %vm2192_vm10, %v7123_v62, 0.0 }
 0x59c   : > { %v2348_v51 = vadd.f32 %v2344_v37, %v2328_v28  ;;  %v9728_v28 = vld [vmem:[#allocation52_spill] sm:$0xff] }
 0x59d   : > { %4974 = vperm.xlu0 %5988, %v7051_v61   ;;  %v2406_v37 = vmul.f32 %v9728_v28, %v2396_v20  ;;  %v9731_v20 = vld [vmem:[#allocation54_spill] sm:$0xff]  ;;  %v5082_v28 = vld [vmem:[%s9696_s8] sm:$0xf] }
 0x59e   : > { %v2368_v25 = vadd.f32 %v2366_v3, %v2348_v51  ;;  %4099 = vperm.xlu1 %5965, %v6794_v11   ;;  %v9729_v51 = vld [vmem:[#allocation67_spill] sm:$0xff] }
 0x59f   : > { %v7237_v31 = vpop.permute.xlu1 %2369  ;;  %v2426_v55 = vmul.f32 %v9729_v51, %v2416_v7  ;;  %v9733_v7 = vmov 20  }
 0x5a0   : > { %v2388_v59 = vadd.f32 %v2386_v34, %v2368_v25  ;;  %v7261_v25 = vpop.permute.xlu0 %2441 }
 0x5a1   : > { %5989 = vset.pattern.permute.xlu0 %v9727_v9 }
 0x5a2   : > { %4226 = vperm.xlu0 %5989, %v6794_v11   ;;  %5966 = vset.pattern.permute.xlu1 %v9722_v33  ;;  %v2408_v27 = vadd.f32 %v2406_v37, %v2388_v59  ;;  %v2456_v33 = vsel %vm2240_vm12, %v7132_v26, 0.0 }
 0x5a3   : > { %v7249_v61 = vpop.permute.xlu1 %2389  ;;  %4136 = vperm.xlu1 %5966, %v6826_v14   ;;  %v2466_v47 = vmul.f32 %v9731_v20, %v2456_v33 }
 0x5a4   : > { %v2428_v62 = vadd.f32 %v2426_v55, %v2408_v27  ;;  %v9734_v27 = vld [vmem:[#allocation59_spill] sm:$0xff]  ;;  %v2496_v55 = vsel %vm2169_vm11, %v7141_v56, 0.0  ;;  %v9738_v56 = vmov 2  }
 0x5a6   : > { %5031 = vperm.xlu0 %5989, %v5028_v46  }
 0x5a7   : > { %v7258_v3 = vpop.permute.xlu1 %2409  ;;  %5967 = vset.pattern.permute.xlu1 %v9702_v39  ;;  %v2476_v39 = vsel %vm2265_vm13, %v7130_v40, 0.0 }
 0x5a8   : > { %4152 = vperm.xlu1 %5967, %v6826_v14   ;;  %v2486_v51 = vmul.f32 %v9734_v27, %v2476_v39  ;;  %v9739_v39 = vld [vmem:[#allocation70_spill] sm:$0xff]  ;;  %v2556_v27 = vsel %vm2240_vm12, %v7147_v29, 0.0  ;;  %v9743_v29 = vmov 0  }
 0x5aa   : > { %5991 = vset.pattern.permute.xlu0 %v9730_v24 }
 0x5ab   : > { %v2444_v34 = vpop.permute.xlu1 %2443  ;;  %5112 = vperm.xlu0 %5991, %v7062_v16  }
 0x5ac   : > { %v2448_v59 = vadd.f32 %v2444_v34, %v2428_v62  ;;  %v7271_v46 = vpop.permute.xlu0 %3640  ;;  %4156 = vperm.xlu1 %5967, %v6794_v11   ;;  %v9735_v62 = vld [vmem:[#allocation56_spill] sm:$0xff] }
 0x5ad   : > { %9732 = vst [vmem:[#allocation45_spill] sm:$0xff] %v7271_v46  ;;  %v2506_v34 = vmul.f32 %v9735_v62, %v2496_v55  ;;  %v3154_v62 = vld [vmem:[%s9736_s29] sm:$0xf]  ;;  %s9458_s29 = smov 80  }
 0x5ae   : > { %v2468_v26 = vadd.f32 %v2466_v47, %v2448_v59  ;;  %v2516_v47 = vsel %vm2192_vm10, %v7135_v21, 0.0  ;;  %v2576_v21 = vsel %vm2265_vm13, %v7143_v13, 0.0  ;;  %v2616_v13 = vsel %vm2192_vm10, %v7149_v38, 0.0 }
 0x5af   : > { %v7278_v37 = vpop.permute.xlu1 %2469  ;;  %5992 = vset.pattern.permute.xlu0 %v9733_v7 }
 0x5b0   : > { %5085 = vperm.xlu0 %5992, %v5082_v28   ;;  %v7282_v16 = vpop.permute.xlu0 %2541  ;;  %5968 = vset.pattern.permute.xlu1 %v9727_v9  ;;  %v2488_v40 = vadd.f32 %v2486_v51, %v2468_v26  ;;  %v2526_v28 = vmul.f32 %v9739_v39, %v2516_v47  ;;  %v9740_v26 = vmov 24   ;;  %v2596_v39 = vsel %vm2169_vm11, %v7155_v30, 0.0  ;;  %v9746_v30 = vld [vmem:[#allocation73_spill] sm:$0xff] }
 0x5b1   : > { %4222 = vperm.xlu1 %5968, %v6826_v14  }
 0x5b2   : > { %v2508_v59 = vadd.f32 %v2506_v34, %v2488_v40  ;;  %v9742_v34 = vld [vmem:[#allocation76_spill] sm:$0xff] }
 0x5b3   : > { %v7289_v33 = vpop.permute.xlu1 %2489  ;;  %v2566_v47 = vmul.f32 %v9742_v34, %v2556_v27  ;;  %v9745_v27 = vld [vmem:[#allocation78_spill] sm:$0xff]  ;;  %v7328_v34 = vld [vmem:[%s9696_s8] sm:$0xf] }
 0x5b4   : > { %4303 = vperm.xlu0 %5992, %v6826_v14   ;;  %v7293_v20 = vpop.permute.xlu0 %3849  ;;  %v2528_v55 = vadd.f32 %v2526_v28, %v2508_v59 }
 0x5b5   : > { %9737 = vst [vmem:[#allocation44_spill] sm:$0xff] %v7293_v20  ;;  %5969 = vset.pattern.permute.xlu1 %v9738_v56  ;;  %v9744_v20 = vld [vmem:[#allocation60_spill] sm:$0xff] }
 0x5b6   : > { %v2586_v46 = vmul.f32 %v9744_v20, %v2576_v21  ;;  %4570 = vperm.xlu1 %5969, %v7328_v34   ;;  %v2626_v20 = vmul.f32 %v9746_v30, %v2616_v13  ;;  %v9749_v30 = vld [vmem:[#allocation82_spill] sm:$0xff] }
 0x5b7   : > { %v7299_v9 = vpop.permute.xlu1 %2509 }
 0x5b8   : > { %6001 = vset.pattern.permute.xlu0 %v9740_v26 }
 0x5b9   : > { %4475 = vperm.xlu0 %6001, %v6794_v11   ;;  %v7307_v51 = vpop.permute.xlu0 %4058 }
 0x5ba   : > { %9741 = vst [vmem:[#allocation46_spill] sm:$0xff] %v7307_v51  ;;  %5970 = vset.pattern.permute.xlu1 %v9710_v32  ;;  %v2174_v32 = vsel %vm2169_vm11, %v6982_v1, 0.0 }
 0x5bb   : > { %v2544_v40 = vpop.permute.xlu1 %2543  ;;  %4708 = vperm.xlu1 %5970, %v7109_v45  }
 0x5bc   : > { %v2548_v56 = vadd.f32 %v2544_v40, %v2528_v55  ;;  %v2606_v55 = vmul.f32 %v9745_v27, %v2596_v39  ;;  %v2676_v39 = vsel %vm2265_vm13, %v7176_v52, 0.0 }
 0x5bd   : > { %6002 = vset.pattern.permute.xlu0 %v9743_v29 }
 0x5be   : > { %v2568_v59 = vadd.f32 %v2566_v47, %v2548_v56  ;;  %3157 = vperm.xlu0 %6002, %v3154_v62   ;;  %v7319_v28 = vpop.permute.xlu0 %4984  ;;  %v2656_v62 = vsel %vm2240_vm12, %v7166_v58, 0.0  ;;  %v4530_v56 = vld [vmem:[%s9696_s8] sm:$0xf]  ;;  %v2205_v58 = vsel %vm2192_vm10, %v7157_v60, 0.0 }
 0x5bf   : > { %v7324_v51 = vpop.permute.xlu1 %2569  ;;  %5971 = vset.pattern.permute.xlu1 %v9716_v42  ;;  %v9750_v60 = vld [vmem:[#allocation75_spill] sm:$0xff] }
 0x5c0   : > { %v2588_v40 = vadd.f32 %v2586_v46, %v2568_v59  ;;  %v9747_v59 = vld [vmem:[#allocation81_spill] sm:$0xff]  ;;  %4846 = vperm.xlu1 %5971, %v7160_v10   ;;  %v9754_v10 = vld [vmem:[#allocation62_spill] sm:$0xff] }
 0x5c1   : > { %v2666_v13 = vmul.f32 %v9747_v59, %v2656_v62  ;;  %v2188_v62 = vmul.f32 %v9750_v60, %v2174_v32 }
 0x5c2   : > { %v2608_v21 = vadd.f32 %v2606_v55, %v2588_v40  ;;  %3430 = vperm.xlu0 %6002, %v6794_v11  }
 0x5c3   : > { %v7336_v47 = vpop.permute.xlu1 %2589  ;;  %v7338_v38 = vpop.permute.xlu0 %5122 }
 0x5c4   : > { %v2628_v46 = vadd.f32 %v2626_v20, %v2608_v21  ;;  %v2686_v20 = vmul.f32 %v9749_v30, %v2676_v39  ;;  %v2250_v39 = vsel %vm2240_vm12, %v7169_v43, 0.0  ;;  %v2295_v43 = vsel %vm2169_vm11, %v7207_v15, 0.0 }
 0x5c6   : > { %v2648_v27 = vadd.f32 %v7214_v54, %v2628_v46  ;;  %4533 = vperm.xlu0 %6002, %v4530_v56   ;;  %v2215_v54 = vmul.f32 %v7076_v8, %v2205_v58  ;;  %v9751_v56 = vld [vmem:[#allocation84_spill] sm:$0xff]  ;;  %v2275_v8 = vsel %vm2265_vm13, %v7194_v50, 0.0  ;;  %v2260_v58 = vmul.f32 %v9754_v10, %v2250_v39  ;;  %v9761_v10 = vld [vmem:[#allocation65_spill] sm:$0xff] }
 0x5c7   : > { %v7352_v55 = vpop.permute.xlu1 %2609  ;;  %v7354_v40 = vpop.permute.xlu0 %4360  ;;  %v2315_v50 = vsel %vm2192_vm10, %v7217_v5, 0.0  ;;  %v2355_v5 = vsel %vm2240_vm12, %v7180_v35, 0.0 }
 0x5c8   : > { %9748 = vst [vmem:[#allocation48_spill] sm:$0xff] %v7354_v40  ;;  %v2668_v52 = vadd.f32 %v2666_v13, %v2648_v27  ;;  %v2217_v1 = vadd.f32 %v2215_v54, %v2188_v62  ;;  %v9753_v27 = vmov 19  }
 0x5c9   : > { %5972 = vset.pattern.permute.xlu1 %v9753_v27 }
 0x5ca   : > { %v2688_v21 = vadd.f32 %v2686_v20, %v2668_v52  ;;  %4263 = vperm.xlu1 %5972, %v6826_v14   ;;  %v9755_v52 = vld [vmem:[#allocation47_spill] sm:$0xff]  ;;  %v9758_v14 = vld [vmem:[#allocation49_spill] sm:$0xff] }
 0x5cb   : > { %v7362_v45 = vpop.permute.xlu1 %2669  ;;  %v2285_v32 = vmul.f32 %v9755_v52, %v2275_v8 }
 0x5cc   : > { %v2702_v46 = vadd.f32 %v9751_v56, %v2688_v21  ;;  %v7367_v59 = vpop.permute.xlu0 %3585  ;;  %v9756_v21 = vld [vmem:[#allocation63_spill] sm:$0xff] }
 0x5cd   : > { %9752 = vst [vmem:[#allocation64_spill] sm:$0xff] %v7367_v59  ;;  %v2305_v60 = vmul.f32 %v9756_v21, %v2295_v43  ;;  %v4641_v43 = vld [vmem:[%s9696_s8] sm:$0xf] }
 0x5ce   : > { %v2704_v13 = vmax.f32 %v2702_v46, 0.0  ;;  %4267 = vperm.xlu1 %5972, %v6794_v11   ;;  %v2325_v46 = vmul.f32 %v9758_v14, %v2315_v50  ;;  %v2395_v50 = vsel %vm2169_vm11, %v7249_v61, 0.0  ;;  %v4779_v21 = vld [vmem:[%s9696_s8] sm:$0xf]  ;;  %v2415_v14 = vsel %vm2192_vm10, %v7258_v3, 0.0 }
 0x5cf   : > { %v2232_v42 = vpop.permute.xlu1 %2231  ;;  %v2455_v3 = vsel %vm2240_vm12, %v7187_v23, 0.0 }
 0x5d0   : > { %v2237_v30 = vadd.f32 %v2232_v42, %v2217_v1  ;;  %5740 = vmatprep.subr.mxu1 %v2704_v13  ;;  %v7377_v20 = vpop.permute.xlu0 %4617  ;;  %v9760_v42 = vmov 1  }
 0x5d1   : > { %5741 = vmatpush3.msra.mxu1 %v2704_v13 }
 0x5d2   : > { %v2262_v54 = vadd.f32 %v2260_v58, %v2237_v30  ;;  %5975 = vset.pattern.permute.xlu1 %v9703_v63  ;;  %v2365_v58 = vmul.f32 %v9761_v10, %v2355_v5 }
 0x5d3   : > { %4364 = vperm.xlu1 %5975, %v6794_v11   ;;  %v2375_v11 = vsel %vm2265_vm13, %v7237_v31, 0.0 }
 0x5d4   : > { %v2287_v62 = vadd.f32 %v2285_v32, %v2262_v54  ;;  %v9765_v54 = vmov 4  }
 0x5d5   : > { %v7389_v56 = vpop.permute.xlu0 %3677 }
 0x5d6   : > { %9757 = vst [vmem:[#allocation80_spill] sm:$0xff] %v7389_v56  ;;  %v2307_v39 = vadd.f32 %v2305_v60, %v2287_v62  ;;  %v9766_v60 = vld [vmem:[#allocation66_spill] sm:$0xff] }
 0x5d7   : > { %5977 = vset.pattern.permute.xlu1 %v9760_v42  ;;  %v2405_v31 = vmul.f32 %v9766_v60, %v2395_v50  ;;  %v9775_v50 = vld [vmem:[#allocation55_spill] sm:$0xff] }
 0x5d8   : > { %v2327_v15 = vadd.f32 %v2325_v46, %v2307_v39  ;;  %4560 = vperm.xlu1 %5977, %v7328_v34  }
 0x5d9   : > { %v7393_v1 = vpop.permute.xlu0 %4671 }
 0x5da   : > { %v2347_v13 = vadd.f32 %v7245_v0, %v2327_v15  ;;  %v9764_v0 = vld [vmem:[#allocation51_spill] sm:$0xff]  ;;  %v9769_v15 = vld [vmem:[#allocation53_spill] sm:$0xff] }
 0x5db   : > { %v2385_v52 = vmul.f32 %v9764_v0, %v2375_v11  ;;  %v2425_v61 = vmul.f32 %v9769_v15, %v2415_v14  ;;  %v9778_v14 = vld [vmem:[#allocation69_spill] sm:$0xff]  ;;  %v2515_v15 = vsel %vm2192_vm10, %v7299_v9, 0.0  ;;  %v2555_v9 = vsel %vm2240_vm12, %v7198_v53, 0.0 }
 0x5dc   : > { %v7400_v8 = vpop.permute.xlu1 %3681  ;;  %v2367_v63 = vadd.f32 %v2365_v58, %v2347_v13  ;;  %5979 = vset.pattern.permute.xlu1 %v9765_v54  ;;  %v4917_v13 = vld [vmem:[%s9696_s8] sm:$0xf]  ;;  %v9786_v53 = vld [vmem:[#allocation77_spill] sm:$0xff] }
 0x5dd   : > { %9759 = vst [vmem:[#allocation50_spill] sm:$0xff] %v7400_v8  ;;  %4644 = vperm.xlu1 %5979, %v4641_v43   ;;  %v9773_v43 = vld [vmem:[#allocation68_spill] sm:$0xff] }
 0x5de   : > { %v7404_v30 = vpop.permute.xlu0 %3722  ;;  %v2387_v34 = vadd.f32 %v2385_v52, %v2367_v63  ;;  %v2465_v0 = vmul.f32 %v9773_v43, %v2455_v3 }
 0x5df   : > { %9762 = vst [vmem:[#allocation58_spill] sm:$0xff] %v7404_v30 }
 0x5e0   : > { %v2407_v39 = vadd.f32 %v2405_v31, %v2387_v34 }
 0x5e1   : > { %v7411_v35 = vpop.permute.xlu1 %3718  ;;  %5983 = vset.pattern.permute.xlu1 %v9698_v4  ;;  %v5055_v4 = vld [vmem:[%s9696_s8] sm:$0xf] }
 0x5e2   : > { %9763 = vst [vmem:[#allocation52_spill] sm:$0xff] %v7411_v35  ;;  %v7414_v32 = vpop.permute.xlu0 %4698  ;;  %4782 = vperm.xlu1 %5983, %v4779_v21   ;;  %v2427_v10 = vadd.f32 %v2425_v61, %v2407_v39 }
 0x5e4   : > { %v2447_v63 = vadd.f32 %v7261_v25, %v2427_v10  ;;  %v2495_v25 = vsel %vm2169_vm11, %v7289_v33, 0.0 }
 0x5e5   : > { %v2505_v39 = vmul.f32 %v9778_v14, %v2495_v25  ;;  %v2575_v25 = vsel %vm2265_vm13, %v7324_v51, 0.0  ;;  %v9790_v51 = vld [vmem:[#allocation72_spill] sm:$0xff] }
 0x5e6   : > { %v7422_v62 = vpop.permute.xlu1 %3734  ;;  %5987 = vset.pattern.permute.xlu1 %v9699_v12  ;;  %v2475_v12 = vsel %vm2265_vm13, %v7278_v37, 0.0  ;;  %v2467_v54 = vadd.f32 %v2465_v0, %v2447_v63  ;;  %v5166_v37 = vld [vmem:[%s9696_s8] sm:$0xf]  ;;  %v2585_v14 = vmul.f32 %v9786_v53, %v2575_v25  ;;  %v9795_v53 = vld [vmem:[#allocation74_spill] sm:$0xff] }
 0x5e7   : > { %9767 = vst [vmem:[#allocation67_spill] sm:$0xff] %v7422_v62  ;;  %v7427_v46 = vpop.permute.xlu0 %3804  ;;  %4920 = vperm.xlu1 %5987, %v4917_v13   ;;  %v2485_v34 = vmul.f32 %v9775_v50, %v2475_v12  ;;  %v9780_v13 = vld [vmem:[#allocation57_spill] sm:$0xff]  ;;  %v5193_v0 = vld [vmem:[%s9696_s8] sm:$0xf]  ;;  %s9823_s8 = smov 80  }
 0x5e8   : > { %9768 = vst [vmem:[#allocation54_spill] sm:$0xff] %v7427_v46  ;;  %v2525_v10 = vmul.f32 %v9780_v13, %v2515_v15  ;;  %v6009_v15 = vld [vmem:[%s9659_s11] sm:$0xff] }
 0x5e9   : > { %v2487_v21 = vadd.f32 %v2485_v34, %v2467_v54  ;;  %v9784_v54 = vld [vmem:[#allocation71_spill] sm:$0xff] }
 0x5ea   : > { %v7431_v5 = vpop.permute.xlu1 %3738  ;;  %v2565_v50 = vmul.f32 %v9784_v54, %v2555_v9  ;;  %v5203_v54 = vld [vmem:[%s9787_s26] sm:$0xf]  ;;  %s9452_s26 = smov 64  }
 0x5eb   : > { %9770 = vst [vmem:[#allocation59_spill] sm:$0xff] %v7431_v5  ;;  %v7434_v42 = vpop.permute.xlu0 %4755  ;;  %5990 = vset.pattern.permute.xlu1 %v9753_v27  ;;  %v6008_v27 = vld [vmem:[%s9659_s11 + $0x8] sm:$0xff]  ;;  %v2507_v61 = vadd.f32 %v2505_v39, %v2487_v21  ;;  %s9826_s11 = smov 64  }
 0x5ec   : > { %5058 = vperm.xlu1 %5990, %v5055_v4  }
 0x5ed   : > { %v2527_v4 = vadd.f32 %v2525_v10, %v2507_v61 }
 0x5ef   : > { %v7440_v58 = vpop.permute.xlu1 %3808  ;;  %v2547_v12 = vadd.f32 %v7282_v16, %v2527_v4  ;;  %v2595_v16 = vsel %vm2169_vm11, %v7336_v47, 0.0  ;;  %v2615_v4 = vsel %vm2192_vm10, %v7352_v55, 0.0  ;;  %v2675_v55 = vsel %vm2265_vm13, %v7362_v45, 0.0  ;;  %v2971_v45 = vld [vmem:[%s9724_s25 + $0x8] sm:$0xff]  ;;  %s9484_s25 = smov 62  }
 0x5f0   : > { %9771 = vst [vmem:[#allocation56_spill] sm:$0xff] %v7440_v58  ;;  %v7443_v11 = vpop.permute.xlu0 %3886  ;;  %5993 = vset.pattern.permute.xlu1 %v9733_v7  ;;  %v9779_v7 = vmov 23   ;;  %v2605_v10 = vmul.f32 %v9790_v51, %v2595_v16 }
 0x5f1   : > { %9772 = vst [vmem:[#allocation70_spill] sm:$0xff] %v7443_v11  ;;  %4307 = vperm.xlu1 %5993, %v6008_v27  }
 0x5f4   : > { %v7451_v52 = vpop.permute.xlu1 %3845  ;;  %v7453_v23 = vpop.permute.xlu0 %4809 }
 0x5f5   : > { %9774 = vst [vmem:[#allocation76_spill] sm:$0xff] %v7451_v52  ;;  %5994 = vset.pattern.permute.xlu1 %v9779_v7 }
 0x5f6   : > { %5169 = vperm.xlu1 %5994, %v5166_v37   ;;  %v2567_v37 = vadd.f32 %v2565_v50, %v2547_v12  ;;  %v2655_v50 = vsel %vm2240_vm12, %v7230_v57, 0.0 }
 0x5f8   : > { %v2587_v13 = vadd.f32 %v2585_v14, %v2567_v37  ;;  %v2665_v14 = vmul.f32 %v9795_v53, %v2655_v50 }
 0x5f9   : > { %v7461_v60 = vpop.permute.xlu1 %3890  ;;  %v7463_v31 = vpop.permute.xlu0 %3931 }
 0x5fa   : > { %9776 = vst [vmem:[#allocation60_spill] sm:$0xff] %v7461_v60  ;;  %9777 = vst [vmem:[#allocation78_spill] sm:$0xff] %v7463_v31  ;;  %5995 = vset.pattern.permute.xlu1 %v9730_v24 }
 0x5fb   : > { %4348 = vperm.xlu1 %5995, %v6008_v27  }
 0x5fd   : > { %v7471_v33 = vpop.permute.xlu0 %4836 }
 0x5fe   : > { %v7474_v3 = vpop.permute.xlu1 %3927 }
 0x5ff   : > { %9781 = vst [vmem:[#allocation73_spill] sm:$0xff] %v7474_v3  ;;  %5996 = vset.pattern.permute.xlu1 %v9740_v26 }
 0x600   : > { %5196 = vperm.xlu1 %5996, %v5193_v0   ;;  %v9793_v0 = vld [vmem:[#allocation79_spill] sm:$0xff] }
 0x601   : > { %v2625_v12 = vmul.f32 %v9793_v0, %v2615_v4 }
 0x602   : > { %v7477_v63 = vpop.permute.xlu0 %4013 }
 0x603   : > { %9782 = vst [vmem:[#allocation81_spill] sm:$0xff] %v7477_v63  ;;  %v7482_v43 = vpop.permute.xlu1 %3943 }
 0x604   : > { %9783 = vst [vmem:[#allocation82_spill] sm:$0xff] %v7482_v43  ;;  %5997 = vset.pattern.permute.xlu1 %v9730_v24  ;;  %v2607_v24 = vadd.f32 %v2605_v10, %v2587_v13  ;;  %v9796_v13 = vld [vmem:[#allocation61_spill] sm:$0xff] }
 0x605   : > { %4344 = vperm.xlu1 %5997, %v6009_v15   ;;  %v2685_v51 = vmul.f32 %v9796_v13, %v2675_v55 }
 0x606   : > { %v7488_v34 = vpop.permute.xlu0 %4893  ;;  %v2627_v25 = vadd.f32 %v2625_v12, %v2607_v24  ;;  %v9798_v24 = vld [vmem:[#allocation83_spill] sm:$0xff] }
 0x607   : > { %v7493_v21 = vpop.permute.xlu1 %3947 }
 0x608   : > { %9785 = vst [vmem:[#allocation75_spill] sm:$0xff] %v7493_v21 }
 0x609   : > { %5998 = vset.pattern.permute.xlu1 %v9779_v7 }
 0x60a   : > { %4434 = vperm.xlu1 %5998, %v6008_v27  }
 0x60b   : > { %v7500_v39 = vpop.permute.xlu0 %4095 }
 0x60c   : > { %9788 = vst [vmem:[#allocation84_spill] sm:$0xff] %v7500_v39  ;;  %v7503_v61 = vpop.permute.xlu1 %4017 }
 0x60d   : > { %9789 = vst [vmem:[#allocation62_spill] sm:$0xff] %v7503_v61 }
 0x60e   : > { %5999 = vset.pattern.permute.xlu1 %v9743_v29 }
 0x60f   : > { %v7509_v9 = vpop.permute.xlu0 %4947  ;;  %5206 = vperm.xlu1 %5999, %v5203_v54  }
 0x610   : > { %9791 = vst [vmem:[#allocation47_spill] sm:$0xff] %v7509_v9 }
 0x611   : > { %v7512_v47 = vpop.permute.xlu1 %4054 }
 0x612   : > { %9792 = vst [vmem:[#allocation63_spill] sm:$0xff] %v7512_v47 }
 0x613   : > { %6000 = vset.pattern.permute.xlu1 %v9779_v7 }
 0x614   : > { %v7519_v37 = vpop.permute.xlu0 %4140  ;;  %4430 = vperm.xlu1 %6000, %v6009_v15  }
 0x615   : > { %9794 = vst [vmem:[#allocation49_spill] sm:$0xff] %v7519_v37  ;;  %v2642_v27 = vpop.permute.xlu1 %2641 }
 0x616   : > { %v2647_v16 = vadd.f32 %v2642_v27, %v2627_v25  ;;  %v7544_v25 = vpop.f32.mrf.mxu0 }
 0x618   : > { %v2667_v10 = vadd.f32 %v2665_v14, %v2647_v16  ;;  %v7527_v4 = vpop.permute.xlu0 %4974  ;;  %6003 = vset.pattern.permute.xlu1 %v9740_v26 }
 0x619   : > { %9797 = vst [vmem:[#allocation65_spill] sm:$0xff] %v7527_v4  ;;  %4471 = vperm.xlu1 %6003, %v6009_v15   ;;  %v7548_v15 = vpop.f32.mrf.mxu0 }
 0x61a   : > { %v2687_v57 = vadd.f32 %v2685_v51, %v2667_v10  ;;  %v3259_v10 = vld [vmem:[%s9802_s10 + $0x78] sm:$0xff] }
 0x61b   : > { %v3237_v55 = vpop.f32.mrf.mxu0 }
 0x61c   : > { %v2701_v0 = vadd.f32 %v9798_v24, %v2687_v57  ;;  %v3258_v57 = vld [vmem:[%s9802_s10 + $0x70] sm:$0xff]  ;;  %v3257_v24 = vld [vmem:[%s9802_s10 + $0x68] sm:$0xff] }
 0x61d   : > { %v7531_v12 = vpop.permute.xlu0 %4226  ;;  %6004 = vset.pattern.permute.xlu1 %v9743_v29 }
 0x61e   : > { %9799 = vst [vmem:[#allocation51_spill] sm:$0xff] %v7531_v12  ;;  %v2703_v18 = vmax.f32 %v2701_v0, 0.0  ;;  %v3256_v0 = vld [vmem:[%s9802_s10 + $0x60] sm:$0xff] }
 0x620   : > { %5742 = vmatprep.subr.mxu1 %v2703_v18 }
 0x621   : > { %5743 = vmatpush3.msra.mxu1 %v2703_v18  ;;  %v7535_v54 = vpop.permute.xlu0 %5031  ;;  %v3255_v18 = vld [vmem:[%s9802_s10 + $0x58] sm:$0xff] }
 0x622   : > { %9800 = vst [vmem:[#allocation66_spill] sm:$0xff] %v7535_v54  ;;  %5745 = vmatmul.mubr.msk.f32.vlgmr.msra.gmra.mxu1 %vm9533_vm1, %v2971_v45  ;;  %3283 = vmatprep.subr.mxu1 %v3259_v10  ;;  %v3254_v45 = vld [vmem:[%s9802_s10 + $0x50] sm:$0xff]  ;;  %v3245_v10 = vld [vmem:[%s9802_s10 + $0x8] sm:$0xff]  ;;  %vm9539_vm1 = vcmask 916480  }
 0x623   : > { %3331 = vmatprep.mubr.f32.mxu1 %v6978_v22  ;;  %v3239_v22 = vpop.f32.mrf.mxu0  ;;  %3284 = vmatpush1.msra.mxu1 %v3258_v57  ;;  %v3244_v57 = vld [vmem:[%s9802_s10] sm:$0xff] }
 0x624   : > { %3285 = vmatprep.subr.mxu1 %v3257_v24  ;;  %v7569_v24 = vpop.permute.xlu1 %4099 }
 0x625   : > { %3286 = vmatpush1.msra.mxu1 %v3256_v0  ;;  %9806 = vst [vmem:[#allocation57_spill] sm:$0xff] %v7569_v24 }
 0x626   : > { %v7540_v7 = vpop.permute.xlu0 %5112  ;;  %3287 = vmatprep.subr.mxu1 %v3255_v18 }
 0x627   : > { %9801 = vst [vmem:[#allocation53_spill] sm:$0xff] %v7540_v7  ;;  %3288 = vmatpush1.msra.mxu1 %v3254_v45 }
 0x628   : > { %v7571_v0 = vpop.permute.xlu1 %4136 }
 0x629   : > { %9807 = vst [vmem:[#allocation71_spill] sm:$0xff] %v7571_v0 }
 0x62b   : > { %v7542_v50 = vpop.permute.xlu0 %5085 }
 0x62c   : > { %9803 = vst [vmem:[#allocation68_spill] sm:$0xff] %v7542_v50  ;;  %v7573_v18 = vpop.permute.xlu1 %4152 }
 0x62d   : > { %9808 = vst [vmem:[#allocation77_spill] sm:$0xff] %v7573_v18 }
 0x62f   : > { %v7546_v26 = vpop.permute.xlu0 %4303 }
 0x630   : > { %9804 = vst [vmem:[#allocation55_spill] sm:$0xff] %v7546_v26 }
 0x634   : > { %v7550_v27 = vpop.permute.xlu0 %4475 }
 0x635   : > { %9805 = vst [vmem:[#allocation69_spill] sm:$0xff] %v7550_v27 }
 0x639   : > { %v3158_v29 = vpop.permute.xlu0 %3157 }
 0x63a   : > { %v3238_v53 = vadd.f32 %v3237_v55, %v3158_v29  ;;  %v3240_v14 = vadd.f32 %v3239_v22, %v3158_v29  ;;  %v3253_v55 = vld [vmem:[%s9802_s10 + $0x48] sm:$0xff]  ;;  %v3252_v22 = vld [vmem:[%s9802_s10 + $0x40] sm:$0xff]  ;;  %v3251_v29 = vld [vmem:[%s9802_s10 + $0x38] sm:$0xff] }
 0x63b   : > { %3289 = vmatprep.subr.mxu1 %v3253_v55  ;;  %v7577_v55 = vpop.permute.xlu1 %4156 }
 0x63c   : > { %v3242_v16 = vmax.f32 %v3238_v53, 0.0  ;;  %v3243_v13 = vmax.f32 %v3240_v14, 0.0  ;;  %3290 = vmatpush1.msra.mxu1 %v3252_v22  ;;  %v3250_v53 = vld [vmem:[%s9802_s10 + $0x30] sm:$0xff]  ;;  %v3249_v14 = vld [vmem:[%s9802_s10 + $0x28] sm:$0xff]  ;;  %9810 = vst [vmem:[#allocation79_spill] sm:$0xff] %v7577_v55 }
 0x63d   : > { %3291 = vmatprep.subr.mxu1 %v3251_v29  ;;  %v7575_v45 = vpop.permute.xlu0 %3430 }
 0x63e   : > { %v4511_v51 = vcombine.low %v3242_v16, %v3243_v13  ;;  %3292 = vmatpush1.msra.mxu1 %v3250_v53  ;;  %v3248_v16 = vld [vmem:[%s9802_s10 + $0x20] sm:$0xff]  ;;  %v3247_v13 = vld [vmem:[%s9802_s10 + $0x18] sm:$0xff]  ;;  %9809 = vst [vmem:[#allocation72_spill] sm:$0xff] %v7575_v45 }
 0x63f   : > { %3293 = vmatprep.subr.mxu1 %v3249_v14  ;;  %v7581_v29 = vpop.permute.xlu1 %4222 }
 0x640   : > { %4512 = vrot.lane.b32.xlu0 %v4511_v51, %s9448_s12  ;;  %3294 = vmatpush1.msra.mxu1 %v3248_v16  ;;  %v3246_v51 = vld [vmem:[%s9802_s10 + $0x10] sm:$0xff]  ;;  %9811 = vst [vmem:[#allocation74_spill] sm:$0xff] %v7581_v29  ;;  %s9813_s12 = smov 60   ;;  %s9824_s10 = smov 76  }
 0x641   : > { %3295 = vmatprep.subr.mxu1 %v3247_v13  ;;  %v7579_v22 = vpop.permute.xlu0 %4533 }
 0x642   : > { %3296 = vmatpush1.msra.mxu1 %v3246_v51 }
 0x643   : > { %3297 = vmatprep.subr.mxu1 %v3245_v10  ;;  %v7584_v13 = vpop.permute.xlu1 %4570 }
 0x644   : > { %3298 = vmatpush1.msra.mxu1 %v3244_v57 }
 0x647   : > { %v7588_v57 = vpop.permute.xlu1 %4708 }
 0x6b2   : > { %v4513_v53 = vpop.permute.xlu0 %4512 }
 0x6b3   : > { %v4514_v14 = vrot.slane %v4513_v53, 4 }
 0x6b5   : > { %v4515_v16 = vsel %vm9537_vm4, %v4514_v14, %v4513_v53  ;;  %4523 = vst.msk [vmem:[#allocation6 + $0x8] sm:$0xf] %vm4522_vm5, %v4514_v14  ;;  %v7592_v14 = vpop.permute.xlu1 %4846  ;;  %vm9543_vm5 = vcmask 1014784   ;;  %vm9544_vm4 = vcmask 785408  }
 0x6b6   : > { %4521 = vst.msk [vmem:[#allocation6] sm:$0xff] %vm4520_vm6, %v4515_v16 }
 0x6bc   : > { %v4652_v51 = vld [vmem:[#allocation6 + $0x8] sm:$0xf] }
 0x6bd   : > { %v4541_v10 = vld [vmem:[#allocation6 + $0x8] sm:$0xf]  ;;  %4660 = vrot.lane.b32.xlu1 %v4652_v51, %s9680_s18 }
 0x6be   : > { %4549 = vrot.lane.b32.xlu0 %v4541_v10, %s9671_s7  ;;  %v4790_v27 = vld [vmem:[#allocation6 + $0x8] sm:$0xf]  ;;  %v7598_v10 = vpop.permute.xlu1 %4263 }
 0x6bf   : > { %v4598_v12 = vld [vmem:[#allocation6 + $0x8] sm:$0xf]  ;;  %9812 = vst [vmem:[#allocation61_spill] sm:$0xff] %v7598_v10 }
 0x6c0   : > { %v4928_v37 = vld [vmem:[#allocation6 + $0x8] sm:$0xf] }
 0x6c1   : > { %4798 = vrot.lane.b32.xlu1 %v4790_v27, %s9689_s20  ;;  %v4625_v53 = vld [vmem:[#allocation6 + $0x8] sm:$0xf] }
 0x6c2   : > { %4606 = vrot.lane.b32.xlu0 %v4598_v12, %s9673_s6  ;;  %v5066_v16 = vld [vmem:[#allocation6 + $0x8] sm:$0xf]  ;;  %v7602_v61 = vpop.permute.xlu1 %4267 }
 0x6c3   : > { %v4679_v51 = vld [vmem:[#allocation6 + $0x8] sm:$0xf]  ;;  %9814 = vst [vmem:[#allocation83_spill] sm:$0xff] %v7602_v61 }
 0x6c4   : > { %v5177_v27 = vld [vmem:[#allocation6 + $0x8] sm:$0xf] }
 0x6c5   : > { %4936 = vrot.lane.b32.xlu1 %v4928_v37, %s9458_s29  ;;  %v4736_v12 = vld [vmem:[#allocation6 + $0x8] sm:$0xf]  ;;  %v7604_v37 = vld [vmem:[#allocation6] sm:$0xff]  ;;  %s9465_s29 = smov 77  }
 0x6c6   : > { %4633 = vrot.lane.b32.xlu0 %v4625_v53, %s9672_s5  ;;  %v4763_v24 = vld [vmem:[#allocation6 + $0x8] sm:$0xf] }
 0x6c7   : > { %v4817_v53 = vld [vmem:[#allocation6 + $0x8] sm:$0xf] }
 0x6c8   : > { %v5012_v61 = vld [vmem:[#allocation6 + $0x8] sm:$0xf] }
 0x6c9   : > { %5074 = vrot.lane.b32.xlu1 %v5066_v16, %s9452_s26  ;;  %v7612_v16 = vpop.permute.xlu1 %4364  ;;  %s9463_s26 = smov 79   ;;  %v4844_v26 = vld [vmem:[#allocation6 + $0x8] sm:$0xf] }
 0x6ca   : > { %4687 = vrot.lane.b32.xlu0 %v4679_v51, %s9679_s17  ;;  %9815 = vst [vmem:[#allocation93_spill] sm:$0xff] %v7612_v16  ;;  %v4874_v51 = vld [vmem:[#allocation6 + $0x8] sm:$0xf] }
 0x6cd   : > { %5185 = vrot.lane.b32.xlu1 %v5177_v27, %s9813_s12  ;;  %v4901_v27 = vld [vmem:[#allocation6 + $0x8] sm:$0xf] }
 0x6ce   : > { %4744 = vrot.lane.b32.xlu0 %v4736_v12, %s9682_s24  ;;  %v7617_v12 = vpop.permute.xlu1 %4560 }
 0x6d1   : > { %4545 = vrot.lane.b32.xlu1 %v7604_v37, %s9671_s7 }
 0x6d2   : > { %4771 = vrot.lane.b32.xlu0 %v4763_v24, %s9681_s19  ;;  %v4955_v24 = vld [vmem:[#allocation6 + $0x8] sm:$0xf] }
 0x6d5   : > { %4602 = vrot.lane.b32.xlu1 %v7604_v37, %s9673_s6 }
 0x6d6   : > { %4825 = vrot.lane.b32.xlu0 %v4817_v53, %s9688_s1  ;;  %v7625_v53 = vpop.permute.xlu1 %4644 }
 0x6d9   : > { %4629 = vrot.lane.b32.xlu1 %v7604_v37, %s9672_s5 }
 0x6da   : > { %4882 = vrot.lane.b32.xlu0 %v4874_v51, %s9690_s3  ;;  %v7633_v30 = vpop.permute.xlu1 %4782 }
 0x6dd   : > { %4683 = vrot.lane.b32.xlu1 %v7604_v37, %s9679_s17 }
 0x6de   : > { %4909 = vrot.lane.b32.xlu0 %v4901_v27, %s9691_s30  ;;  %v5039_v27 = vld [vmem:[#allocation6 + $0x8] sm:$0xf] }
 0x6e1   : > { %4740 = vrot.lane.b32.xlu1 %v7604_v37, %s9682_s24 }
 0x6e2   : > { %4963 = vrot.lane.b32.xlu0 %v4955_v24, %s9463_s26  ;;  %v5746_v51 = vpop.f32.mrf.mxu1  ;;  %s9467_s26 = smov 76  }
 0x6e3   : > { %v3133_v60 = vadd.f32 %v5746_v51, %v7544_v25 }
 0x6e4   : > { %v3127_v31 = vpop.f32.mrf.mxu1 }
 0x6e5   : > { %v3128_v58 = vadd.f32 %v3127_v31, %v7548_v15  ;;  %4767 = vrot.lane.b32.xlu1 %v7604_v37, %s9681_s19  ;;  %v3149_v8 = vadd.f32 %v7040_v48, %v3133_v60  ;;  %v5093_v31 = vld [vmem:[#allocation6 + $0x8] sm:$0xf]  ;;  %v7646_v48 = vpop.permute.xlu1 %4920  ;;  %v9820_v15 = vlaneseq }
 0x6e6   : > { %5020 = vrot.lane.b32.xlu0 %v5012_v61, %s9465_s29  ;;  %v7640_v61 = vld [vmem:[#allocation5] sm:$0xff]  ;;  %s9469_s29 = smov 63   ;;  %9817 = vst [vmem:[#allocation95_spill] sm:$0xff] %v7646_v48 }
 0x6e7   : > { %v3148_v24 = vadd.f32 %v7030_v44, %v3128_v58  ;;  %9816 = vst [vmem:[#allocation94_spill] sm:$0xff] %v7640_v61  ;;  %v3151_v44 = vmax.f32 %v3149_v8, 0.0  ;;  %v5150_v58 = vld [vmem:[#allocation6 + $0x8] sm:$0xf]  ;;  %v4576_v51 = vshrl.u32 %v9820_v15, 7  ;;  %3346 = vst.msk [vmem:[#allocation5 + $0x10] sm:$0xff] %vm1095_vm8, %v7640_v61 }
 0x6e8   : > { %3349 = vst.msk [vmem:[#allocation5 + $0x28] sm:$0xff] %vm1095_vm8, %v7640_v61 }
 0x6e9   : > { %v3150_v17 = vmax.f32 %v3148_v24, 0.0  ;;  %4821 = vrot.lane.b32.xlu1 %v7604_v37, %s9688_s1  ;;  %v7652_v8 = vpop.permute.xlu1 %5058 }
 0x6ea   : > { %5047 = vrot.lane.b32.xlu0 %v5039_v27, %s9467_s26  ;;  %s9471_s26 = smov 61   ;;  %9818 = vst [vmem:[#allocation96_spill] sm:$0xff] %v7652_v8 }
 0x6eb   : > { %5600 = vmatmul.mubr.msk.f32.vlgmr.msra.gmra.mxu1 %vm9550_vm7, %v3150_v17  ;;  %v6170_v17 = vmov 839922192  }
 0x6ec   : > { %3337 = vmatprep.mubr.f32.mxu1 %v7640_v61  ;;  %v4573_v60 = vunpack.c.l.s4 %v6170_v17 }
 0x6ed   : > { %4878 = vrot.lane.b32.xlu1 %v7604_v37, %s9690_s3  ;;  %v7663_v27 = vpop.permute.xlu1 %4307 }
 0x6ee   : > { %5101 = vrot.lane.b32.xlu0 %v5093_v31, %s9469_s29  ;;  %s9819_s29 = smov 79   ;;  %v4574_v25 = vunpack.c.0.s8 %v4573_v60  ;;  %9822 = vst [vmem:[#allocation97_spill] sm:$0xff] %v7663_v27  ;;  %v5120_v31 = vld [vmem:[#allocation6 + $0x8] sm:$0xf]  ;;  %v7677_v60 = vcombine.high %v7604_v37, %v7604_v37 }
 0x6ef   : > { %5601 = vmatmul.mubr.msk.f32.gmra.mxu1 %vm9550_vm7, %v3151_v44 }
 0x6f0   : > { %v4577_v24 = vsub.s32 %v4574_v25, %v4576_v51 }
 0x6f1   : > { %4905 = vrot.lane.b32.xlu1 %v7604_v37, %s9691_s30  ;;  %v7670_v17 = vpop.permute.xlu1 %5169 }
 0x6f2   : > { %5158 = vrot.lane.b32.xlu0 %v5150_v58, %s9471_s26  ;;  %s9821_s26 = smov 77   ;;  %v5130_v44 = vrot.slane %v7338_v38, %v4577_v24  ;;  %9825 = vst [vmem:[#allocation98_spill] sm:$0xff] %v7670_v17  ;;  %v4578_v25 = vrot.slane %v7584_v13, %v4577_v24  ;;  %v4716_v13 = vrot.slane %v7588_v57, %v4577_v24  ;;  %v4982_v57 = vld [vmem:[#allocation6 + $0x8] sm:$0xf] }
 0x6f3   : > { %v4854_v49 = vrot.slane %v7592_v14, %v4577_v24 }
 0x6f4   : > { %v5133_v58 = vmul.f32 %v5130_v44, %v5120_v31  ;;  %v7691_v15 = vmul.f32 %v4578_v25, %v7604_v37  ;;  %v4568_v31 = vld [vmem:[#allocation6 + $0x8] sm:$0xf]  ;;  %v5132_v14 = vmul.f32 %v5130_v44, %v7604_v37 }
 0x6f5   : > { %4959 = vrot.lane.b32.xlu1 %v7604_v37, %s9819_s29  ;;  %v7683_v38 = vpop.permute.xlu1 %4348 }
 0x6f6   : > { %4656 = vrot.lane.b32.xlu0 %v7604_v37, %s9680_s18  ;;  %9828 = vst [vmem:[#allocation99_spill] sm:$0xff] %v7683_v38  ;;  %v4706_v38 = vld [vmem:[#allocation6 + $0x8] sm:$0xf]  ;;  %v4584_v63 = vcombine.high %v7691_v15, %v7691_v15 }
 0x6f7   : > { %v4719_v45 = vmul.f32 %v4716_v13, %v4706_v38 }
 0x6f9   : > { %5016 = vrot.lane.b32.xlu1 %v7604_v37, %s9821_s26  ;;  %v7693_v51 = vpop.permute.xlu1 %5196 }
 0x6fa   : > { %4794 = vrot.lane.b32.xlu0 %v7604_v37, %s9689_s20  ;;  %9830 = vst [vmem:[#allocation100_spill] sm:$0xff] %v7693_v51 }
 0x6fd   : > { %5043 = vrot.lane.b32.xlu1 %v7604_v37, %s9824_s10  ;;  %v7703_v27 = vpop.permute.xlu1 %4344 }
 0x6fe   : > { %4932 = vrot.lane.b32.xlu0 %v7604_v37, %s9823_s8  ;;  %9831 = vst [vmem:[#allocation101_spill] sm:$0xff] %v7703_v27 }
 0x701   : > { %5141 = vrot.lane.b32.xlu1 %v5133_v58, %s9484_s25  ;;  %v4581_v58 = vmul.f32 %v4578_v25, %v4568_v31  ;;  %v4857_v25 = vmul.f32 %v4854_v49, %v4844_v26  ;;  %v7709_v31 = vpop.permute.xlu1 %4434  ;;  %s9523_s25 = smov 78   ;;  %v4718_v26 = vmul.f32 %v4716_v13, %v7604_v37  ;;  %v4856_v13 = vmul.f32 %v4854_v49, %v7604_v37 }
 0x702   : > { %5070 = vrot.lane.b32.xlu0 %v7604_v37, %s9826_s11  ;;  %9832 = vst [vmem:[#allocation102_spill] sm:$0xff] %v7709_v31 }
 0x703   : > { %v4722_v46 = vcombine.high %v4718_v26, %v4718_v26  ;;  %v4860_v56 = vcombine.high %v4856_v13, %v4856_v13 }
 0x705   : > { %4547 = vrot.lane.b32.xlu1 %v7677_v60, %s9671_s7 }
 0x706   : > { %5097 = vrot.lane.b32.xlu0 %v7604_v37, %s9827_s16 }
 0x709   : > { %4604 = vrot.lane.b32.xlu1 %v7677_v60, %s9673_s6 }
 0x70a   : > { %5154 = vrot.lane.b32.xlu0 %v7604_v37, %s9829_s22 }
 0x70d   : > { %4585 = vrot.lane.b32.xlu1 %v7691_v15, %s9692_s2 }
 0x70e   : > { %5181 = vrot.lane.b32.xlu0 %v7604_v37, %s9813_s12 }
 0x711   : > { %4631 = vrot.lane.b32.xlu1 %v7677_v60, %s9672_s5 }
 0x712   : > { %4589 = vrot.lane.b32.xlu0 %v4581_v58, %s9692_s2  ;;  %v4992_v58 = vrot.slane %v7319_v28, %v4577_v24  ;;  %v5136_v28 = vcombine.high %v5132_v14, %v5132_v14 }
 0x714   : > { %v4995_v38 = vmul.f32 %v4992_v58, %v4982_v57  ;;  %v4994_v31 = vmul.f32 %v4992_v58, %v7604_v37 }
 0x715   : > { %4658 = vrot.lane.b32.xlu1 %v7677_v60, %s9680_s18 }
 0x716   : > { %4727 = vrot.lane.b32.xlu0 %v4719_v45, %s9695_s9  ;;  %v7718_v45 = vpop.permute.xlu1 %5206  ;;  %v4998_v15 = vcombine.high %v4994_v31, %v4994_v31 }
 0x717   : > { %9833 = vst [vmem:[#allocation103_spill] sm:$0xff] %v7718_v45 }
 0x719   : > { %4685 = vrot.lane.b32.xlu1 %v7677_v60, %s9679_s17 }
 0x71a   : > { %4865 = vrot.lane.b32.xlu0 %v4857_v25, %s9693_s14  ;;  %v7725_v24 = vpop.permute.xlu1 %4430 }
 0x71b   : > { %9834 = vst [vmem:[#allocation104_spill] sm:$0xff] %v7725_v24 }
 0x71d   : > { %4742 = vrot.lane.b32.xlu1 %v7677_v60, %s9682_s24 }
 0x71e   : > { %5003 = vrot.lane.b32.xlu0 %v4995_v38, %s9523_s25  ;;  %v7732_v25 = vpop.permute.xlu1 %4471 }
 0x71f   : > { %9836 = vst [vmem:[#allocation105_spill] sm:$0xff] %v7732_v25 }
 0x721   : > { %4723 = vrot.lane.b32.xlu1 %v4718_v26, %s9695_s9 }
 0x722   : > { %5183 = vrot.lane.b32.xlu0 %v7677_v60, %s9813_s12 }
 0x725   : > { %4769 = vrot.lane.b32.xlu1 %v7677_v60, %s9681_s19 }
 0x726   : > { %5139 = vrot.lane.b32.xlu0 %v5136_v28, %s9835_s28 }
 0x729   : > { %4796 = vrot.lane.b32.xlu1 %v7677_v60, %s9689_s20 }
 0x72d   : > { %4823 = vrot.lane.b32.xlu1 %v7677_v60, %s9688_s1 }
 0x72f   : > { %v7736_v44 = vpop.permute.xlu1 %4660 }
 0x730   : > { %v7774_v0 = vpop.permute.xlu0 %4549 }
 0x731   : > { %4880 = vrot.lane.b32.xlu1 %v7677_v60, %s9690_s3 }
 0x733   : > { %v7741_v57 = vpop.permute.xlu1 %4798 }
 0x734   : > { %v7782_v39 = vpop.permute.xlu0 %4606 }
 0x735   : > { %4861 = vrot.lane.b32.xlu1 %v4856_v13, %s9693_s14 }
 0x737   : > { %v7744_v38 = vpop.permute.xlu1 %4936 }
 0x738   : > { %v7791_v11 = vpop.permute.xlu0 %4633 }
 0x739   : > { %4907 = vrot.lane.b32.xlu1 %v7677_v60, %s9691_s30 }
 0x73b   : > { %v7748_v28 = vpop.permute.xlu1 %5074 }
 0x73c   : > { %9837 = vst [vmem:[#allocation106_spill] sm:$0xff] %v7748_v28  ;;  %v7797_v35 = vpop.permute.xlu0 %4687 }
 0x73d   : > { %4934 = vrot.lane.b32.xlu1 %v7677_v60, %s9823_s8 }
 0x73f   : > { %v7752_v25 = vpop.permute.xlu1 %5185 }
 0x740   : > { %9838 = vst [vmem:[#allocation107_spill] sm:$0xff] %v7752_v25  ;;  %v7804_v59 = vpop.permute.xlu0 %4744 }
 0x741   : > { %4961 = vrot.lane.b32.xlu1 %v7677_v60, %s9819_s29 }
 0x743   : > { %v7756_v49 = vpop.permute.xlu1 %4545 }
 0x744   : > { %v7809_v26 = vpop.permute.xlu0 %4771 }
 0x745   : > { %5018 = vrot.lane.b32.xlu1 %v7677_v60, %s9821_s26 }
 0x747   : > { %v7760_v24 = vpop.permute.xlu1 %4602 }
 0x748   : > { %v7813_v6 = vpop.permute.xlu0 %4825 }
 0x749   : > { %4999 = vrot.lane.b32.xlu1 %v4994_v31, %s9523_s25 }
 0x74b   : > { %v7764_v27 = vpop.permute.xlu1 %4629 }
 0x74c   : > { %v7817_v40 = vpop.permute.xlu0 %4882 }
 0x74d   : > { %5045 = vrot.lane.b32.xlu1 %v7677_v60, %s9824_s10 }
 0x74f   : > { %v7768_v10 = vpop.permute.xlu1 %4683 }
 0x750   : > { %v7823_v55 = vpop.permute.xlu0 %4909 }
 0x751   : > { %5072 = vrot.lane.b32.xlu1 %v7677_v60, %s9826_s11 }
 0x753   : > { %v7772_v29 = vpop.permute.xlu1 %4740 }
 0x754   : > { %v7827_v16 = vpop.permute.xlu0 %4963 }
 0x755   : > { %5099 = vrot.lane.b32.xlu1 %v7677_v60, %s9827_s16  ;;  %9842 = vst [vmem:[#allocation111_spill] sm:$0xff] %v7827_v16 }
 0x757   : > { %v7778_v58 = vpop.permute.xlu1 %4767 }
 0x758   : > { %v7833_v19 = vpop.permute.xlu0 %5020 }
 0x759   : > { %5156 = vrot.lane.b32.xlu1 %v7677_v60, %s9829_s22  ;;  %9843 = vst [vmem:[#allocation112_spill] sm:$0xff] %v7833_v19  ;;  %v9851_v19 = vld [vmem:[#allocation85_spill] sm:$0xff] }
 0x75b   : > { %v7784_v47 = vpop.permute.xlu1 %4821 }
 0x75c   : > { %v7837_v43 = vpop.permute.xlu0 %5047 }
 0x75d   : > { %5137 = vrot.lane.b32.xlu1 %v5132_v14, %s9835_s28  ;;  %9844 = vst [vmem:[#allocation113_spill] sm:$0xff] %v7837_v43 }
 0x75f   : > { %v7789_v3 = vpop.permute.xlu1 %4878 }
 0x760   : > { %v7843_v45 = vpop.permute.xlu0 %5101 }
 0x761   : > { %4587 = vrot.lane.b32.xlu1 %v4584_v63, %s9692_s2  ;;  %9845 = vst [vmem:[#allocation114_spill] sm:$0xff] %v7843_v45 }
 0x763   : > { %v7794_v52 = vpop.permute.xlu1 %4905 }
 0x764   : > { %v7847_v17 = vpop.permute.xlu0 %5158 }
 0x765   : > { %4725 = vrot.lane.b32.xlu1 %v4722_v46, %s9695_s9  ;;  %9846 = vst [vmem:[#allocation115_spill] sm:$0xff] %v7847_v17 }
 0x767   : > { %v7799_v41 = vpop.permute.xlu1 %4959 }
 0x768   : > { %v4657_v25 = vpop.permute.xlu0 %4656 }
 0x769   : > { %4863 = vrot.lane.b32.xlu1 %v4860_v56, %s9693_s14 }
 0x76b   : > { %v7802_v14 = vpop.permute.xlu1 %5016 }
 0x76c   : > { %9839 = vst [vmem:[#allocation108_spill] sm:$0xff] %v7802_v14  ;;  %v7858_v54 = vpop.permute.xlu0 %4794 }
 0x76d   : > { %5001 = vrot.lane.b32.xlu1 %v4998_v15, %s9523_s25  ;;  %s9848_s25 = smov 34  }
 0x76f   : > { %v7807_v63 = vpop.permute.xlu1 %5043 }
 0x770   : > { %9840 = vst [vmem:[#allocation109_spill] sm:$0xff] %v7807_v63  ;;  %v7867_v63 = vpop.permute.xlu0 %4932 }
 0x773   : > { %v7811_v2 = vpop.permute.xlu1 %5141 }
 0x774   : > { %9841 = vst [vmem:[#allocation110_spill] sm:$0xff] %v7811_v2 }
 0x777   : > { %v4548_v46 = vpop.permute.xlu1 %4547 }
 0x77b   : > { %v7815_v13 = vpop.permute.xlu1 %4604 }
 0x77f   : > { %v7819_v56 = vpop.permute.xlu1 %4585 }
 0x783   : > { %v7821_v31 = vpop.permute.xlu1 %4631 }
 0x787   : > { %v7825_v15 = vpop.permute.xlu1 %4658 }
 0x78b   : > { %v7829_v21 = vpop.permute.xlu1 %4685 }
 0x78f   : > { %v7831_v5 = vpop.permute.xlu1 %4742 }
 0x793   : > { %v7835_v18 = vpop.permute.xlu1 %4723 }
 0x797   : > { %v7839_v62 = vpop.permute.xlu1 %4769 }
 0x79b   : > { %v7841_v36 = vpop.permute.xlu1 %4796 }
 0x79f   : > { %v7845_v51 = vpop.permute.xlu1 %4823 }
 0x7a3   : > { %v7849_v2 = vpop.permute.xlu1 %4880 }
 0x7a7   : > { %v7851_v7 = vpop.permute.xlu1 %4861 }
 0x7a8   : > { %9847 = vst [vmem:[#allocation116_spill] sm:$0xff] %v7851_v7 }
 0x7ab   : > { %v3333_v50 = vpop.f32.mrf.mxu1  ;;  %v7855_v8 = vpop.permute.xlu1 %4907 }
 0x7ac   : > { %3354 = vrot.lane.b32.xlu1 %v3333_v50, %s9848_s25  ;;  %v7871_v50 = vpop.permute.xlu0 %5070 }
 0x7ad   : > { %v3335_v45 = vpop.f32.mrf.mxu1  ;;  %9849 = vst [vmem:[#allocation117_spill] sm:$0xff] %v7871_v50 }
 0x7ae   : > { %3356 = vrot.lane.b32.xlu0 %v3335_v45, %s9848_s25  ;;  %v3378_v45 = vadd.s32 128, %v9851_v19 }
 0x7af   : > { %v3339_v17 = vpop.f32.mrf.mxu1  ;;  %v7861_v28 = vpop.permute.xlu1 %4934 }
 0x7b0   : > { %3358 = vrot.lane.b32.xlu1 %v3339_v17, %s9848_s25  ;;  %v7878_v48 = vpop.permute.xlu0 %5097  ;;  %v7881_v17 = vand.u32 15, %v9851_v19  ;;  %v4551_v19 = vsel %vm9536_vm9, %v7756_v49, %v4548_v46 }
 0x7b1   : > { %v3341_v43 = vpop.f32.mrf.mxu1  ;;  %9852 = vst [vmem:[#allocation85_spill] sm:$0xff] %v7878_v48 }
 0x7b2   : > { %3360 = vrot.lane.b32.xlu0 %v3341_v43, %s9848_s25  ;;  %v7883_v43 = vand.u32 15, %v3378_v45  ;;  %vm3407_vm10 = vcmp.ge.s32.totalorder %v7881_v17, 2  ;;  %vm3447_vm12 = vcmp.ge.s32.totalorder %v7881_v17, 1  ;;  %v4552_v45 = vsel %vm9536_vm9, %v4548_v46, %v7774_v0  ;;  %s9895_s25 = smov 78  }
 0x7b3   : > { %v7865_v61 = vpop.permute.xlu1 %4961  ;;  %vm3551_vm2 = vcmp.lt.s32.totalorder %v7881_v17, 15  ;;  %v4608_v0 = vsel %vm9535_vm0, %v7760_v24, %v7815_v13  ;;  %v4609_v46 = vsel %vm9535_vm0, %v7815_v13, %v7782_v39  ;;  %vm3602_vm6 = vcmp.lt.s32.totalorder %v7881_v17, 14 }
 0x7b4   : > { %v7887_v16 = vpop.permute.xlu0 %5154  ;;  %vm3408_vm11 = vcmp.ge.s32.totalorder %v7883_v43, 2  ;;  %vm3448_vm13 = vcmp.ge.s32.totalorder %v7883_v43, 1  ;;  %vm3552_vm3 = vcmp.lt.s32.totalorder %v7883_v43, 15  ;;  %vm3603_vm8 = vcmp.lt.s32.totalorder %v7883_v43, 14 }
 0x7b5   : > { %9853 = vst [vmem:[#allocation119_spill] sm:$0xff] %v7887_v16  ;;  %v4555_v16 = vsel %vm3447_vm12, %v4551_v19, 0.0  ;;  %v4556_v48 = vsel %vm3448_vm13, %v4552_v45, 0.0  ;;  %v4529_v49 = vsel %vm3408_vm11, %v7677_v60, 0.0  ;;  %v4612_v39 = vsel %vm3551_vm2, %v4608_v0, 0.0 }
 0x7b6   : > { %v4564_v45 = vmul.f32 %v7617_v12, %v4556_v48  ;;  %vm9542_vm0 = vcmask 891904   ;;  %vm3831_vm9 = vcmask 883712   ;;  %v4663_v48 = vsel %vm9539_vm1, %v7825_v15, %v7736_v44 }
 0x7b7   : > { %v7869_v4 = vpop.permute.xlu1 %5018  ;;  %v4620_v0 = vmul.f32 %v7377_v20, %v4612_v39  ;;  %v4690_v44 = vsel %vm9541_vm15, %v7829_v21, %v7797_v35  ;;  %v4746_v35 = vsel %vm9542_vm0, %v7772_v29, %v7831_v5 }
 0x7b8   : > { %v7919_v19 = vpop.permute.xlu0 %5181  ;;  %v4750_v29 = vsel %vm3551_vm2, %v4746_v35, 0.0 }
 0x7bb   : > { %v7873_v9 = vpop.permute.xlu1 %4999 }
 0x7bc   : > { %9850 = vst [vmem:[#allocation118_spill] sm:$0xff] %v7873_v9 }
 0x7bf   : > { %v7876_v14 = vpop.permute.xlu1 %5045 }
 0x7c3   : > { %v7885_v7 = vpop.permute.xlu1 %5072 }
 0x7c7   : > { %v7891_v9 = vpop.permute.xlu1 %5099 }
 0x7c8   : > { %9854 = vst [vmem:[#allocation120_spill] sm:$0xff] %v7891_v9  ;;  %v4528_v9 = vsel %vm3407_vm10, %v7604_v37, 0.0  ;;  %v4563_v37 = vmul.f32 %v7617_v12, %v4555_v16  ;;  %v4613_v16 = vsel %vm3552_vm3, %v4609_v46, 0.0  ;;  %v4662_v12 = vsel %vm9539_vm1, %v4657_v25, %v7825_v15  ;;  %v4590_v46 = vpop.permute.xlu0 %4589 }
 0x7c9   : > { %v4536_v60 = vmul.f32 %v7579_v22, %v4528_v9  ;;  %v4635_v9 = vsel %vm9543_vm5, %v7764_v27, %v7821_v31  ;;  %v4621_v27 = vmul.f32 %v7377_v20, %v4613_v16  ;;  %v4689_v25 = vsel %vm9541_vm15, %v7768_v10, %v7829_v21 }
 0x7ca   : > { %vm9547_vm1 = vcmask 777216   ;;  %v4747_v21 = vsel %vm9542_vm0, %v7831_v5, %v7804_v59  ;;  %vm9545_vm15 = vcmask 900096   ;;  %vm9557_vm0 = vcmask 752640  }
 0x7cb   : > { %v7903_v50 = vpop.permute.xlu1 %5156  ;;  %v4565_v13 = vadd.f32 %v4563_v37, %v4536_v60  ;;  %v4667_v37 = vsel %vm3408_vm11, %v4663_v48, 0.0  ;;  %v4751_v59 = vsel %vm3552_vm3, %v4747_v21, 0.0 }
 0x7cc   : > { %9855 = vst [vmem:[#allocation121_spill] sm:$0xff] %v7903_v50  ;;  %v4537_v50 = vmul.f32 %v7579_v22, %v4529_v49  ;;  %v4636_v22 = vsel %vm9543_vm5, %v7821_v31, %v7791_v11  ;;  %v4639_v11 = vsel %vm3602_vm6, %v4635_v9, 0.0  ;;  %vm9556_vm5 = vcmask 654336  }
 0x7cd   : > { %v4640_v31 = vsel %vm3603_vm8, %v4636_v22, 0.0  ;;  %v4647_v10 = vmul.f32 %v7625_v53, %v4639_v11 }
 0x7ce   : > { %v4566_v49 = vadd.f32 %v4564_v45, %v4537_v50  ;;  %v4666_v50 = vsel %vm3407_vm10, %v4662_v12, 0.0  ;;  %v4648_v39 = vmul.f32 %v7625_v53, %v4640_v31  ;;  %v4675_v53 = vmul.f32 %v7393_v1, %v4667_v37 }
 0x7cf   : > { %v7927_v24 = vpop.permute.xlu1 %5137  ;;  %v4674_v22 = vmul.f32 %v7393_v1, %v4666_v50  ;;  %v4774_v1 = vsel %vm3831_vm9, %v7839_v62, %v7809_v26  ;;  %v4828_v50 = vsel %vm9547_vm1, %v7845_v51, %v7813_v6 }
 0x7d0   : > { %9856 = vst [vmem:[#allocation122_spill] sm:$0xff] %v7927_v24 }
 0x7d3   : > { %v4588_v24 = vpop.permute.xlu1 %4587 }
 0x7d4   : > { %v4591_v20 = vsel %vm9540_vm14, %v7819_v56, %v4588_v24  ;;  %v4592_v15 = vsel %vm9540_vm14, %v4588_v24, %v4590_v46  ;;  %v4693_v56 = vsel %vm3447_vm12, %v4689_v25, 0.0  ;;  %v4694_v24 = vsel %vm3448_vm13, %v4690_v44, 0.0 }
 0x7d5   : > { %v4595_v45 = vadd.f32 %v4591_v20, %v4565_v13  ;;  %v4596_v60 = vadd.f32 %v4592_v15, %v4566_v49  ;;  %vm9546_vm14 = vcmask 760832   ;;  %v4701_v48 = vmul.f32 %v7414_v32, %v4693_v56 }
 0x7d6   : > { %v4702_v13 = vmul.f32 %v7414_v32, %v4694_v24  ;;  %v4773_v49 = vsel %vm3831_vm9, %v7778_v58, %v7839_v62  ;;  %v4758_v32 = vmul.f32 %v7434_v42, %v4750_v29  ;;  %v4759_v25 = vmul.f32 %v7434_v42, %v4751_v59  ;;  %v4728_v58 = vpop.permute.xlu0 %4727 }
 0x7d7   : > { %v4622_v16 = vadd.f32 %v4620_v0, %v4595_v45  ;;  %v4623_v9 = vadd.f32 %v4621_v27, %v4596_v60  ;;  %v4800_v0 = vsel %vm9544_vm4, %v7858_v54, %v7841_v36  ;;  %v4801_v27 = vsel %vm9544_vm4, %v7841_v36, %v7741_v57  ;;  %v4726_v46 = vpop.permute.xlu1 %4725 }
 0x7d8   : > { %v4777_v62 = vsel %vm3602_vm6, %v4773_v49, 0.0  ;;  %v4778_v54 = vsel %vm3603_vm8, %v4774_v1, 0.0  ;;  %v4804_v36 = vsel %vm3407_vm10, %v4800_v0, 0.0  ;;  %v4805_v57 = vsel %vm3408_vm11, %v4801_v27, 0.0  ;;  %v9857_v49 = vld [vmem:[#allocation111_spill] sm:$0xff]  ;;  %v9858_v1 = vld [vmem:[#allocation116_spill] sm:$0xff] }
 0x7d9   : > { %v4649_v5 = vadd.f32 %v4647_v10, %v4622_v16  ;;  %v4650_v12 = vadd.f32 %v4648_v39, %v4623_v9  ;;  %v4729_v42 = vsel %vm9545_vm15, %v7835_v18, %v4726_v46  ;;  %v4730_v20 = vsel %vm9545_vm15, %v4726_v46, %v4728_v58  ;;  %v9861_v58 = vld [vmem:[#allocation112_spill] sm:$0xff] }
 0x7da   : > { %v4827_v15 = vsel %vm9547_vm1, %v7784_v47, %v7845_v51  ;;  %v4884_v60 = vsel %vm9546_vm14, %v7789_v3, %v7849_v2  ;;  %v4885_v18 = vsel %vm9546_vm14, %v7849_v2, %v7817_v40  ;;  %vm9548_vm4 = vcmask 646144  }
 0x7db   : > { %v4676_v11 = vadd.f32 %v4674_v22, %v4649_v5  ;;  %v4677_v31 = vadd.f32 %v4675_v53, %v4650_v12  ;;  %vm9549_vm15 = vcmask 629760   ;;  %v4785_v10 = vmul.f32 %v7633_v30, %v4777_v62  ;;  %v4864_v22 = vpop.permute.xlu1 %4863 }
 0x7dc   : > { %v4786_v47 = vmul.f32 %v7633_v30, %v4778_v54  ;;  %v4812_v6 = vmul.f32 %v7453_v23, %v4804_v36  ;;  %v4813_v51 = vmul.f32 %v7453_v23, %v4805_v57  ;;  %v4831_v21 = vsel %vm3447_vm12, %v4827_v15, 0.0  ;;  %v9862_v57 = vld [vmem:[#allocation47_spill] sm:$0xff] }
 0x7dd   : > { %v4703_v26 = vadd.f32 %v4701_v48, %v4676_v11  ;;  %v4704_v44 = vadd.f32 %v4702_v13, %v4677_v31  ;;  %v4832_v3 = vsel %vm3448_vm13, %v4828_v50, 0.0  ;;  %v4888_v2 = vsel %vm3551_vm2, %v4884_v60, 0.0  ;;  %v9859_v31 = vld [vmem:[#allocation95_spill] sm:$0xff]  ;;  %v9863_v60 = vld [vmem:[#allocation65_spill] sm:$0xff] }
 0x7de   : > { %v4889_v40 = vsel %vm3552_vm3, %v4885_v18, 0.0  ;;  %v4911_v24 = vsel %vm9557_vm0, %v7794_v52, %v7855_v8  ;;  %v4912_v23 = vsel %vm9557_vm0, %v7855_v8, %v7823_v55  ;;  %vm9551_vm14 = vcmask 621568   ;;  %v4866_v8 = vpop.permute.xlu0 %4865 }
 0x7df   : > { %v4733_v37 = vadd.f32 %v4729_v42, %v4703_v26  ;;  %v4734_v45 = vadd.f32 %v4730_v20, %v4704_v44  ;;  %vm9559_vm1 = vcmask 769024   ;;  %v4839_v16 = vmul.f32 %v7471_v33, %v4831_v21 }
 0x7e0   : > { %v4840_v9 = vmul.f32 %v7471_v33, %v4832_v3  ;;  %v4896_v59 = vmul.f32 %v7488_v34, %v4888_v2  ;;  %v4897_v5 = vmul.f32 %v7488_v34, %v4889_v40  ;;  %v4938_v52 = vsel %vm9556_vm5, %v7867_v63, %v7861_v28  ;;  %v9867_v3 = vld [vmem:[#allocation106_spill] sm:$0xff]  ;;  %v5002_v40 = vpop.permute.xlu1 %5001 }
 0x7e1   : > { %v4760_v39 = vadd.f32 %v4758_v32, %v4733_v37  ;;  %v4761_v35 = vadd.f32 %v4759_v25, %v4734_v45  ;;  %v4939_v55 = vsel %vm9556_vm5, %v7861_v28, %v7744_v38  ;;  %v4915_v12 = vsel %vm3602_vm6, %v4911_v24, 0.0  ;;  %v9860_v25 = vld [vmem:[#allocation108_spill] sm:$0xff]  ;;  %v9868_v24 = vld [vmem:[#allocation66_spill] sm:$0xff] }
 0x7e2   : > { %v4916_v33 = vsel %vm3603_vm8, %v4912_v23, 0.0  ;;  %v4965_v34 = vsel %vm9548_vm4, %v7799_v41, %v7865_v61  ;;  %v4966_v63 = vsel %vm9548_vm4, %v7865_v61, %v9857_v49  ;;  %v4867_v38 = vsel %vm9559_vm1, %v9858_v1, %v4864_v22  ;;  %v5004_v15 = vpop.permute.xlu0 %5003 }
 0x7e3   : > { %v4787_v56 = vadd.f32 %v4785_v10, %v4760_v39  ;;  %v4788_v30 = vadd.f32 %v4786_v47, %v4761_v35  ;;  %v4868_v28 = vsel %vm9559_vm1, %v4864_v22, %v4866_v8  ;;  %v4942_v0 = vsel %vm3407_vm10, %v4938_v52, 0.0  ;;  %v9864_v47 = vld [vmem:[#allocation109_spill] sm:$0xff]  ;;  %v9870_v8 = vld [vmem:[#allocation120_spill] sm:$0xff] }
 0x7e4   : > { %v4943_v27 = vsel %vm3408_vm11, %v4939_v55, 0.0  ;;  %v4923_v32 = vmul.f32 %v9859_v31, %v4915_v12  ;;  %v4924_v41 = vmul.f32 %v9859_v31, %v4916_v33  ;;  %v5022_v61 = vsel %vm9549_vm15, %v9860_v25, %v7869_v4  ;;  %v9865_v35 = vld [vmem:[#allocation113_spill] sm:$0xff]  ;;  %v9876_v25 = vld [vmem:[#allocation119_spill] sm:$0xff] }
 0x7e5   : > { %v4814_v53 = vadd.f32 %v4812_v6, %v4787_v56  ;;  %v4815_v29 = vadd.f32 %v4813_v51, %v4788_v30  ;;  %v5023_v62 = vsel %vm9549_vm15, %v7869_v4, %v9861_v58  ;;  %v4969_v54 = vsel %vm3447_vm12, %v4965_v34, 0.0  ;;  %v9866_v51 = vld [vmem:[#allocation117_spill] sm:$0xff]  ;;  %v9877_v58 = vld [vmem:[#allocation115_spill] sm:$0xff] }
 0x7e6   : > { %v4970_v26 = vsel %vm3448_vm13, %v4966_v63, 0.0  ;;  %v4950_v42 = vmul.f32 %v9862_v57, %v4942_v0  ;;  %v4951_v20 = vmul.f32 %v9862_v57, %v4943_v27  ;;  %vm9558_vm4 = vcmask 637952   ;;  %v5184_v55 = vpop.permute.xlu0 %5183  ;;  %v9871_v12 = vld [vmem:[#allocation85_spill] sm:$0xff]  ;;  %v9873_v63 = vld [vmem:[#allocation96_spill] sm:$0xff] }
 0x7e7   : > { %v4841_v48 = vadd.f32 %v4839_v16, %v4814_v53  ;;  %v4842_v13 = vadd.f32 %v4840_v9, %v4815_v29  ;;  %v5026_v50 = vsel %vm3551_vm2, %v5022_v61, 0.0  ;;  %v5027_v4 = vsel %vm3552_vm3, %v5023_v62, 0.0  ;;  %v9874_v27 = vld [vmem:[#allocation68_spill] sm:$0xff] }
 0x7e8   : > { %v4977_v18 = vmul.f32 %v9863_v60, %v4969_v54  ;;  %v4978_v10 = vmul.f32 %v9863_v60, %v4970_v26  ;;  %v5049_v39 = vsel %vm9551_vm14, %v9864_v47, %v7876_v14  ;;  %v5050_v6 = vsel %vm9551_vm14, %v7876_v14, %v9865_v35 }
 0x7e9   : > { %v4871_v46 = vadd.f32 %v4867_v38, %v4841_v48  ;;  %v4872_v11 = vadd.f32 %v4868_v28, %v4842_v13  ;;  %v5076_v21 = vsel %vm9550_vm7, %v9866_v51, %v7885_v7  ;;  %v5077_v2 = vsel %vm9550_vm7, %v7885_v7, %v9867_v3  ;;  %v9872_v48 = vld [vmem:[#allocation114_spill] sm:$0xff] }
 0x7ea   : > { %v5034_v23 = vmul.f32 %v9868_v24, %v5026_v50  ;;  %v5035_v16 = vmul.f32 %v9868_v24, %v5027_v4  ;;  %vm9552_vm15 = vcmask 515072   ;;  %v5053_v9 = vsel %vm3602_vm6, %v5049_v39, 0.0  ;;  %v9880_v39 = vld [vmem:[#allocation110_spill] sm:$0xff] }
 0x7eb   : > { %v4898_v44 = vadd.f32 %v4896_v59, %v4871_v46  ;;  %v4899_v36 = vadd.f32 %v4897_v5, %v4872_v11  ;;  %v5054_v14 = vsel %vm3603_vm8, %v5050_v6, 0.0  ;;  %v5080_v29 = vsel %vm3407_vm10, %v5076_v21, 0.0  ;;  %v9869_v59 = vld [vmem:[#allocation118_spill] sm:$0xff] }
 0x7ec   : > { %v5081_v7 = vsel %vm3408_vm11, %v5077_v2, 0.0  ;;  %v5005_v5 = vsel %vm9558_vm4, %v9869_v59, %v5002_v40  ;;  %v5006_v52 = vsel %vm9558_vm4, %v5002_v40, %v5004_v15  ;;  %v5103_v33 = vsel %vm9552_vm15, %v9871_v12, %v9870_v8  ;;  %v9881_v6 = vld [vmem:[#allocation122_spill] sm:$0xff] }
 0x7ed   : > { %v4925_v37 = vadd.f32 %v4923_v32, %v4898_v44  ;;  %v4926_v45 = vadd.f32 %v4924_v41, %v4899_v36  ;;  %v5104_v13 = vsel %vm9552_vm15, %v9870_v8, %v9872_v48  ;;  %vm9553_vm7 = vcmask 490496   ;;  %v9875_v41 = vld [vmem:[#allocation121_spill] sm:$0xff]  ;;  %v9878_v36 = vld [vmem:[#allocation107_spill] sm:$0xff]  ;;  %v9882_v21 = vld [vmem:[#allocation98_spill] sm:$0xff] }
 0x7ee   : > { %vm9555_vm14 = vcmask 498688   ;;  %v5061_v1 = vmul.f32 %v9873_v63, %v5053_v9  ;;  %v5062_v38 = vmul.f32 %v9873_v63, %v5054_v14  ;;  %v5088_v46 = vmul.f32 %v9874_v27, %v5080_v29 }
 0x7ef   : > { %v4952_v56 = vadd.f32 %v4950_v42, %v4925_v37  ;;  %v4953_v30 = vadd.f32 %v4951_v20, %v4926_v45  ;;  %v5089_v11 = vmul.f32 %v9874_v27, %v5081_v7  ;;  %v5107_v31 = vsel %vm3447_vm12, %v5103_v33, 0.0  ;;  %v5140_v42 = vpop.permute.xlu0 %5139  ;;  %v9879_v20 = vld [vmem:[#allocation53_spill] sm:$0xff] }
 0x7f0   : > { %v5108_v32 = vsel %vm3448_vm13, %v5104_v13, 0.0  ;;  %v5160_v61 = vsel %vm9555_vm14, %v9876_v25, %v9875_v41  ;;  %v5161_v62 = vsel %vm9555_vm14, %v9875_v41, %v9877_v58  ;;  %v5187_v44 = vsel %vm9553_vm7, %v7919_v19, %v5184_v55  ;;  %v9894_v27 = vld [vmem:[#allocation77_spill] sm:$0xff] }
 0x7f1   : > { %v4979_v22 = vadd.f32 %v4977_v18, %v4952_v56  ;;  %v4980_v53 = vadd.f32 %v4978_v10, %v4953_v30  ;;  %v5188_v57 = vsel %vm9553_vm7, %v5184_v55, %v9878_v36  ;;  %vm9554_vm15 = vcmask 506880   ;;  %v9883_v30 = vld [vmem:[#allocation100_spill] sm:$0xff] }
 0x7f2   : > { %v5115_v15 = vmul.f32 %v9879_v20, %v5107_v31  ;;  %v5116_v50 = vmul.f32 %v9879_v20, %v5108_v32  ;;  %v5164_v45 = vsel %vm3551_vm2, %v5160_v61, 0.0  ;;  %v5165_v60 = vsel %vm3552_vm3, %v5161_v62, 0.0 }
 0x7f3   : > { %v5009_v34 = vadd.f32 %v5005_v5, %v4979_v22  ;;  %v5010_v49 = vadd.f32 %v5006_v52, %v4980_v53  ;;  %v5191_v19 = vsel %vm3602_vm6, %v5187_v44, 0.0  ;;  %v5192_v47 = vsel %vm3603_vm8, %v5188_v57, 0.0  ;;  %v9884_v53 = vld [vmem:[#allocation103_spill] sm:$0xff] }
 0x7f4   : > { %v5144_v35 = vsel %vm9554_vm15, %v5140_v42, %v9880_v39  ;;  %v5143_v51 = vsel %vm9554_vm15, %v9881_v6, %v5140_v42  ;;  %v5172_v3 = vmul.f32 %v9882_v21, %v5164_v45  ;;  %v5173_v2 = vmul.f32 %v9882_v21, %v5165_v60 }
 0x7f5   : > { %v5036_v28 = vadd.f32 %v5034_v23, %v5009_v34  ;;  %v5037_v0 = vadd.f32 %v5035_v16, %v5010_v49  ;;  %v5199_v24 = vmul.f32 %v9883_v30, %v5191_v19  ;;  %v5200_v23 = vmul.f32 %v9883_v30, %v5192_v47  ;;  %v9891_v34 = vld [vmem:[#allocation88_spill] sm:$0xff] }
 0x7f6   : > { %vm9885_vm7 = vcmask 1043456   ;;  %vm3371_vm14 = vcmask 1047824   ;;  %vm9887_vm5 = vcmask 277504  }
 0x7f7   : > { %v5063_v54 = vadd.f32 %v5061_v1, %v5036_v28  ;;  %v5064_v26 = vadd.f32 %v5062_v38, %v5037_v0  ;;  %vm9886_vm15 = vmmov %vm9885_vm7  ;;  %v9892_v1 = vld [vmem:[#allocation67_spill] sm:$0xff]  ;;  %v9893_v28 = vld [vmem:[#allocation82_spill] sm:$0xff] }
 0x7f8   : > { %vm9888_vm0 = vmmov %vm9887_vm5 }
 0x7f9   : > { %v5090_v4 = vadd.f32 %v5088_v46, %v5063_v54  ;;  %v5091_v37 = vadd.f32 %v5089_v11, %v5064_v26  ;;  %vm9889_vm4 = vmmov %vm9888_vm0 }
 0x7fa   : > { %vm9890_vm1 = vmmov %vm9888_vm0 }
 0x7fb   : > { %v5117_v18 = vadd.f32 %v5115_v15, %v5090_v4  ;;  %v5118_v10 = vadd.f32 %v5116_v50, %v5091_v37 }
 0x7fd   : > { %v5147_v40 = vadd.f32 %v5143_v51, %v5117_v18  ;;  %v5148_v56 = vadd.f32 %v5144_v35, %v5118_v10 }
 0x7ff   : > { %v5175_v16 = vadd.f32 %v5173_v2, %v5148_v56  ;;  %v5174_v9 = vadd.f32 %v5172_v3, %v5147_v40 }
 0x801   : > { %v5202_v14 = vadd.f32 %v5200_v23, %v5175_v16  ;;  %v5201_v22 = vadd.f32 %v5199_v24, %v5174_v9  ;;  %v9902_v23 = vld [vmem:[#allocation89_spill] sm:$0xff] }
 0x803   : > { %v5210_v29 = vadd.f32 %v9884_v53, %v5202_v14  ;;  %v5209_v7 = vadd.f32 %v9884_v53, %v5201_v22 }
 0x805   : > { %v5212_v59 = vmax.f32 %v5210_v29, 0.0  ;;  %v5211_v5 = vmax.f32 %v5209_v7, 0.0 }
 0x807   : > { %5602 = vmatprep.subr.msk.mxu0 %vm9885_vm7, %v5212_v59  ;;  %v9906_v59 = vld [vmem:[#allocation59_spill] sm:$0xff]  ;;  %vm9940_vm7 = vcmask 1014784  }
 0x808   : > { %5603 = vmatpush1.msk.msra.mxu0 %vm9886_vm15, %v5211_v5  ;;  %vm9937_vm15 = vcmask 1022976  }
 0x81e   : > { %v3355_v52 = vpop.permute.xlu1 %3354 }
 0x81f   : > { %3372 = vst.msk [vmem:[#allocation5] sm:$0xff] %vm3371_vm14, %v3355_v52 }
 0x820   : > { %v3357_v55 = vpop.permute.xlu0 %3356 }
 0x821   : > { %v8157_v8 = vsel %vm9887_vm5, %v3355_v52, %v3357_v55  ;;  %3374 = vst.msk [vmem:[#allocation5 + $0x10] sm:$0xff] %vm9888_vm0, %v3357_v55  ;;  %vm9941_vm0 = vmmov %vm9940_vm7  ;;  %vm9942_vm5 = vcmask 916480  }
 0x822   : > { %v3359_v12 = vpop.permute.xlu1 %3358  ;;  %v3513_v19 = vmul.f32 %v9891_v34, %v8157_v8  ;;  %v3742_v35 = vmul.f32 %v9892_v1, %v8157_v8  ;;  %v3951_v21 = vmul.f32 %v9893_v28, %v8157_v8  ;;  %v4160_v40 = vmul.f32 %v9894_v27, %v8157_v8 }
 0x823   : > { %3375 = vst.msk [vmem:[#allocation5 + $0x18] sm:$0xff] %vm3371_vm14, %v3359_v12 }
 0x824   : > { %v3361_v33 = vpop.permute.xlu0 %3360 }
 0x825   : > { %v8161_v48 = vsel %vm9889_vm4, %v3359_v12, %v3361_v33  ;;  %3377 = vst.msk [vmem:[#allocation5 + $0x28] sm:$0xff] %vm9890_vm1, %v3361_v33  ;;  %vm9932_vm1 = vcmask 1039360   ;;  %vm9938_vm4 = vmmov %vm9937_vm15 }
 0x826   : > { %v8164_v13 = vld [vmem:[#allocation5] sm:$0xff]  ;;  %3376 = vst [vmem:[#allocation5 + $0x20] sm:$0xff] %v8161_v48  ;;  %vm9933_vm14 = vmmov %vm9932_vm1 }
 0x827   : > { %3559 = vrot.lane.b32.xlu0 %v8164_v13, %s9673_s6  ;;  %3463 = vrot.lane.b32.xlu1 %v8164_v13, %s9671_s7  ;;  %v3512_v49 = vmul.f32 %v9891_v34, %v8164_v13  ;;  %v3741_v38 = vmul.f32 %v9892_v1, %v8164_v13  ;;  %v3950_v0 = vmul.f32 %v9893_v28, %v8164_v13 }
 0x828   : > { %v8192_v63 = vld [vmem:[#allocation5 + $0x10] sm:$0xff]  ;;  %v4159_v46 = vmul.f32 %v9894_v27, %v8164_v13 }
 0x829   : > { %v3514_v31 = vmul.f32 %v9891_v34, %v8192_v63  ;;  %v3743_v58 = vmul.f32 %v9892_v1, %v8192_v63  ;;  %v3952_v42 = vmul.f32 %v9893_v28, %v8192_v63  ;;  %v4161_v60 = vmul.f32 %v9894_v27, %v8192_v63  ;;  %v9909_v1 = vld [vmem:[#allocation75_spill] sm:$0xff] }
 0x82a   : > { %v8277_v11 = vld [vmem:[#allocation5 + $0x18] sm:$0xff] }
 0x82b   : > { %3778 = vrot.lane.b32.xlu0 %v8164_v13, %s9682_s24  ;;  %3610 = vrot.lane.b32.xlu1 %v8164_v13, %s9672_s5  ;;  %v3515_v16 = vmul.f32 %v9902_v23, %v8277_v11  ;;  %v3744_v5 = vmul.f32 %v9906_v59, %v8277_v11 }
 0x82c   : > { %v8392_v56 = vld [vmem:[#allocation5 + $0x28] sm:$0xff] }
 0x82f   : > { %3987 = vrot.lane.b32.xlu0 %v8164_v13, %s9690_s3  ;;  %3651 = vrot.lane.b32.xlu1 %v8164_v13, %s9680_s18 }
 0x833   : > { %4196 = vrot.lane.b32.xlu0 %v8164_v13, %s9821_s26  ;;  %3692 = vrot.lane.b32.xlu1 %v8164_v13, %s9679_s17 }
 0x837   : > { %4318 = vrot.lane.b32.xlu0 %v8164_v13, %s9827_s16  ;;  %3819 = vrot.lane.b32.xlu1 %v8164_v13, %s9681_s19 }
 0x83b   : > { %3860 = vrot.lane.b32.xlu1 %v8164_v13, %s9689_s20  ;;  %3524 = vrot.lane.b32.xlu0 %v3512_v49, %s9692_s2 }
 0x83f   : > { %3901 = vrot.lane.b32.xlu1 %v8164_v13, %s9688_s1  ;;  %3563 = vrot.lane.b32.xlu0 %v8192_v63, %s9673_s6 }
 0x843   : > { %4028 = vrot.lane.b32.xlu1 %v8164_v13, %s9691_s30  ;;  %3655 = vrot.lane.b32.xlu0 %v8192_v63, %s9680_s18 }
 0x847   : > { %4069 = vrot.lane.b32.xlu1 %v8164_v13, %s9823_s8  ;;  %3753 = vrot.lane.b32.xlu0 %v3741_v38, %s9695_s9  ;;  %v3953_v38 = vmul.f32 %v9909_v1, %v8277_v11 }
 0x84b   : > { %4110 = vrot.lane.b32.xlu1 %v8164_v13, %s9819_s29  ;;  %3782 = vrot.lane.b32.xlu0 %v8192_v63, %s9682_s24 }
 0x84f   : > { %4237 = vrot.lane.b32.xlu1 %v8164_v13, %s9824_s10  ;;  %3864 = vrot.lane.b32.xlu0 %v8192_v63, %s9689_s20 }
 0x853   : > { %4278 = vrot.lane.b32.xlu1 %v8164_v13, %s9826_s11  ;;  %3962 = vrot.lane.b32.xlu0 %v3950_v0, %s9693_s14 }
 0x857   : > { %3467 = vrot.lane.b32.xlu1 %v8192_v63, %s9671_s7  ;;  %3991 = vrot.lane.b32.xlu0 %v8192_v63, %s9690_s3 }
 0x85b   : > { %3614 = vrot.lane.b32.xlu1 %v8192_v63, %s9672_s5  ;;  %4073 = vrot.lane.b32.xlu0 %v8192_v63, %s9823_s8 }
 0x85f   : > { %3696 = vrot.lane.b32.xlu1 %v8192_v63, %s9679_s17  ;;  %4171 = vrot.lane.b32.xlu0 %v4159_v46, %s9895_s25 }
 0x863   : > { %3823 = vrot.lane.b32.xlu1 %v8192_v63, %s9681_s19  ;;  %4200 = vrot.lane.b32.xlu0 %v8192_v63, %s9821_s26 }
 0x867   : > { %3905 = vrot.lane.b32.xlu1 %v8192_v63, %s9688_s1  ;;  %4241 = vrot.lane.b32.xlu0 %v8192_v63, %s9824_s10 }
 0x86b   : > { %4032 = vrot.lane.b32.xlu1 %v8192_v63, %s9691_s30  ;;  %3465 = vrot.lane.b32.xlu0 %v8157_v8, %s9671_s7 }
 0x86f   : > { %4114 = vrot.lane.b32.xlu1 %v8192_v63, %s9819_s29  ;;  %3612 = vrot.lane.b32.xlu0 %v8157_v8, %s9672_s5 }
 0x873   : > { %4282 = vrot.lane.b32.xlu1 %v8192_v63, %s9826_s11  ;;  %3694 = vrot.lane.b32.xlu0 %v8157_v8, %s9679_s17 }
 0x877   : > { %4322 = vrot.lane.b32.xlu1 %v8192_v63, %s9827_s16  ;;  %3821 = vrot.lane.b32.xlu0 %v8157_v8, %s9681_s19 }
 0x87b   : > { %3561 = vrot.lane.b32.xlu1 %v8157_v8, %s9673_s6  ;;  %3903 = vrot.lane.b32.xlu0 %v8157_v8, %s9688_s1 }
 0x87f   : > { %3653 = vrot.lane.b32.xlu1 %v8157_v8, %s9680_s18  ;;  %4030 = vrot.lane.b32.xlu0 %v8157_v8, %s9691_s30 }
 0x883   : > { %3780 = vrot.lane.b32.xlu1 %v8157_v8, %s9682_s24  ;;  %4112 = vrot.lane.b32.xlu0 %v8157_v8, %s9819_s29 }
 0x887   : > { %3862 = vrot.lane.b32.xlu1 %v8157_v8, %s9689_s20  ;;  %4239 = vrot.lane.b32.xlu0 %v8157_v8, %s9824_s10 }
 0x88b   : > { %3989 = vrot.lane.b32.xlu1 %v8157_v8, %s9690_s3  ;;  %4320 = vrot.lane.b32.xlu0 %v8157_v8, %s9827_s16 }
 0x88f   : > { %4071 = vrot.lane.b32.xlu1 %v8157_v8, %s9823_s8  ;;  %3469 = vrot.lane.b32.xlu0 %v8277_v11, %s9671_s7 }
 0x893   : > { %4198 = vrot.lane.b32.xlu1 %v8157_v8, %s9821_s26  ;;  %3528 = vrot.lane.b32.xlu0 %v3514_v31, %s9692_s2 }
 0x897   : > { %4280 = vrot.lane.b32.xlu1 %v8157_v8, %s9826_s11  ;;  %3616 = vrot.lane.b32.xlu0 %v8277_v11, %s9672_s5 }
 0x899   : > { %v8292_v32 = vpop.permute.xlu0 %3559  ;;  %v8294_v41 = vpop.permute.xlu1 %3463 }
 0x89b   : > { %3565 = vrot.lane.b32.xlu1 %v8277_v11, %s9673_s6  ;;  %3698 = vrot.lane.b32.xlu0 %v8277_v11, %s9679_s17 }
 0x89d   : > { %v8300_v25 = vpop.permute.xlu0 %3778  ;;  %v8302_v61 = vpop.permute.xlu1 %3610 }
 0x89f   : > { %3657 = vrot.lane.b32.xlu1 %v8277_v11, %s9680_s18  ;;  %3757 = vrot.lane.b32.xlu0 %v3743_v58, %s9695_s9 }
 0x8a1   : > { %v8309_v62 = vpop.permute.xlu0 %3987  ;;  %v8311_v54 = vpop.permute.xlu1 %3651 }
 0x8a3   : > { %3784 = vrot.lane.b32.xlu1 %v8277_v11, %s9682_s24  ;;  %3825 = vrot.lane.b32.xlu0 %v8277_v11, %s9681_s19 }
 0x8a5   : > { %v8317_v26 = vpop.permute.xlu0 %4196  ;;  %v8319_v44 = vpop.permute.xlu1 %3692 }
 0x8a6   : > { %9896 = vst [vmem:[#allocation111_spill] sm:$0xff] %v8317_v26 }
 0x8a7   : > { %3866 = vrot.lane.b32.xlu1 %v8277_v11, %s9689_s20  ;;  %3907 = vrot.lane.b32.xlu0 %v8277_v11, %s9688_s1 }
 0x8a9   : > { %v8325_v36 = vpop.permute.xlu0 %4318  ;;  %v8327_v57 = vpop.permute.xlu1 %3819 }
 0x8aa   : > { %9897 = vst [vmem:[#allocation116_spill] sm:$0xff] %v8325_v36 }
 0x8ab   : > { %3993 = vrot.lane.b32.xlu1 %v8277_v11, %s9690_s3  ;;  %3966 = vrot.lane.b32.xlu0 %v3952_v42, %s9693_s14  ;;  %v9912_v42 = vld [vmem:[#allocation93_spill] sm:$0xff] }
 0x8ad   : > { %v8334_v20 = vpop.permute.xlu0 %3524  ;;  %v8336_v15 = vpop.permute.xlu1 %3860 }
 0x8af   : > { %4075 = vrot.lane.b32.xlu1 %v8277_v11, %s9823_s8  ;;  %4034 = vrot.lane.b32.xlu0 %v8277_v11, %s9691_s30 }
 0x8b1   : > { %v8342_v50 = vpop.permute.xlu0 %3563  ;;  %v8344_v4 = vpop.permute.xlu1 %3901 }
 0x8b3   : > { %4202 = vrot.lane.b32.xlu1 %v8277_v11, %s9821_s26  ;;  %4116 = vrot.lane.b32.xlu0 %v8277_v11, %s9819_s29 }
 0x8b5   : > { %v8350_v37 = vpop.permute.xlu0 %3655  ;;  %v8352_v45 = vpop.permute.xlu1 %4028 }
 0x8b7   : > { %4243 = vrot.lane.b32.xlu1 %v8277_v11, %s9824_s10  ;;  %4175 = vrot.lane.b32.xlu0 %v4161_v60, %s9895_s25  ;;  %v4370_v60 = vmul.f32 %v9912_v42, %v8277_v11 }
 0x8b9   : > { %v8359_v18 = vpop.permute.xlu0 %3753  ;;  %v8361_v10 = vpop.permute.xlu1 %4069 }
 0x8bb   : > { %3526 = vrot.lane.b32.xlu1 %v3513_v19, %s9692_s2  ;;  %4284 = vrot.lane.b32.xlu0 %v8277_v11, %s9826_s11  ;;  %v9913_v19 = vld [vmem:[#allocation79_spill] sm:$0xff] }
 0x8bd   : > { %v8368_v47 = vpop.permute.xlu0 %3782  ;;  %v8370_v39 = vpop.permute.xlu1 %4110 }
 0x8be   : > { %9898 = vst [vmem:[#allocation95_spill] sm:$0xff] %v8370_v39  ;;  %v3746_v39 = vmul.f32 %v9906_v59, %v8392_v56 }
 0x8bf   : > { %3755 = vrot.lane.b32.xlu1 %v3742_v35, %s9695_s9  ;;  %4324 = vrot.lane.b32.xlu0 %v8277_v11, %s9827_s16  ;;  %v4162_v35 = vmul.f32 %v9913_v19, %v8277_v11 }
 0x8c1   : > { %v8377_v6 = vpop.permute.xlu0 %3864  ;;  %v8379_v51 = vpop.permute.xlu1 %4237 }
 0x8c2   : > { %9899 = vst [vmem:[#allocation108_spill] sm:$0xff] %v8379_v51  ;;  %v9931_v51 = vld [vmem:[#allocation48_spill] sm:$0xff] }
 0x8c3   : > { %3964 = vrot.lane.b32.xlu1 %v3951_v21, %s9693_s14  ;;  %4410 = vrot.lane.b32.xlu0 %v8277_v11, %s9829_s22 }
 0x8c5   : > { %v8386_v3 = vpop.permute.xlu0 %3962  ;;  %v8388_v2 = vpop.permute.xlu1 %4278 }
 0x8c6   : > { %9900 = vst [vmem:[#allocation112_spill] sm:$0xff] %v8386_v3  ;;  %9901 = vst [vmem:[#allocation47_spill] sm:$0xff] %v8388_v2 }
 0x8c7   : > { %4173 = vrot.lane.b32.xlu1 %v4160_v40, %s9895_s25  ;;  %3473 = vrot.lane.b32.xlu0 %v8392_v56, %s9671_s7 }
 0x8c9   : > { %v8397_v30 = vpop.permute.xlu0 %3991  ;;  %v8399_v24 = vpop.permute.xlu1 %3467 }
 0x8cb   : > { %3620 = vrot.lane.b32.xlu0 %v8392_v56, %s9672_s5  ;;  %3530 = vrot.lane.b32.xlu1 %v3515_v16, %s9692_s2 }
 0x8cd   : > { %v8406_v9 = vpop.permute.xlu0 %4073  ;;  %v8408_v14 = vpop.permute.xlu1 %3614 }
 0x8ce   : > { %9903 = vst [vmem:[#allocation65_spill] sm:$0xff] %v8406_v9 }
 0x8cf   : > { %3702 = vrot.lane.b32.xlu0 %v8392_v56, %s9679_s17  ;;  %3569 = vrot.lane.b32.xlu1 %v8392_v56, %s9673_s6 }
 0x8d1   : > { %v8414_v22 = vpop.permute.xlu0 %4171  ;;  %v8416_v53 = vpop.permute.xlu1 %3696 }
 0x8d2   : > { %9904 = vst [vmem:[#allocation109_spill] sm:$0xff] %v8414_v22 }
 0x8d3   : > { %3829 = vrot.lane.b32.xlu0 %v8392_v56, %s9681_s19  ;;  %3661 = vrot.lane.b32.xlu1 %v8392_v56, %s9680_s18 }
 0x8d5   : > { %v8422_v29 = vpop.permute.xlu0 %4200  ;;  %v8424_v7 = vpop.permute.xlu1 %3823 }
 0x8d6   : > { %9905 = vst [vmem:[#allocation113_spill] sm:$0xff] %v8422_v29 }
 0x8d7   : > { %3911 = vrot.lane.b32.xlu0 %v8392_v56, %s9688_s1  ;;  %3759 = vrot.lane.b32.xlu1 %v3744_v5, %s9695_s9 }
 0x8d9   : > { %v8431_v52 = vpop.permute.xlu0 %4241  ;;  %v8433_v55 = vpop.permute.xlu1 %3905 }
 0x8da   : > { %9907 = vst [vmem:[#allocation117_spill] sm:$0xff] %v8431_v52 }
 0x8db   : > { %4038 = vrot.lane.b32.xlu0 %v8392_v56, %s9691_s30  ;;  %3788 = vrot.lane.b32.xlu1 %v8392_v56, %s9682_s24 }
 0x8dd   : > { %v8439_v12 = vpop.permute.xlu0 %3465  ;;  %v8441_v33 = vpop.permute.xlu1 %4032 }
 0x8de   : > { %v3477_v3 = vsel %vm9933_vm14, %v8439_v12, %v8399_v24  ;;  %v3418_v24 = vsel %vm3408_vm11, %v8157_v8, 0.0  ;;  %vm9944_vm14 = vcmask 908288  }
 0x8df   : > { %4120 = vrot.lane.b32.xlu0 %v8392_v56, %s9819_s29  ;;  %3870 = vrot.lane.b32.xlu1 %v8392_v56, %s9689_s20 }
 0x8e1   : > { %v8447_v34 = vpop.permute.xlu0 %3612  ;;  %v8449_v49 = vpop.permute.xlu1 %4114 }
 0x8e2   : > { %9908 = vst [vmem:[#allocation106_spill] sm:$0xff] %v8449_v49 }
 0x8e3   : > { %4247 = vrot.lane.b32.xlu0 %v8392_v56, %s9824_s10  ;;  %3968 = vrot.lane.b32.xlu1 %v3953_v38, %s9693_s14 }
 0x8e5   : > { %v8456_v28 = vpop.permute.xlu0 %3694  ;;  %v8458_v0 = vpop.permute.xlu1 %4282 }
 0x8e6   : > { %9910 = vst [vmem:[#allocation66_spill] sm:$0xff] %v8458_v0 }
 0x8e7   : > { %4288 = vrot.lane.b32.xlu0 %v8392_v56, %s9826_s11  ;;  %3997 = vrot.lane.b32.xlu1 %v8392_v56, %s9690_s3 }
 0x8e9   : > { %v8464_v27 = vpop.permute.xlu0 %3821  ;;  %v8466_v46 = vpop.permute.xlu1 %4322 }
 0x8ea   : > { %9911 = vst [vmem:[#allocation118_spill] sm:$0xff] %v8466_v46 }
 0x8eb   : > { %4328 = vrot.lane.b32.xlu0 %v8392_v56, %s9827_s16  ;;  %4079 = vrot.lane.b32.xlu1 %v8392_v56, %s9823_s8 }
 0x8ed   : > { %v8472_v31 = vpop.permute.xlu0 %3903  ;;  %v8474_v58 = vpop.permute.xlu1 %3561 }
 0x8ef   : > { %4385 = vrot.lane.b32.xlu0 %v4370_v60, %s9835_s28  ;;  %4177 = vrot.lane.b32.xlu1 %v4162_v35, %s9895_s25 }
 0x8f1   : > { %v8482_v21 = vpop.permute.xlu0 %4030  ;;  %v8484_v40 = vpop.permute.xlu1 %3653 }
 0x8f3   : > { %3567 = vrot.lane.b32.xlu0 %v8161_v48, %s9673_s6  ;;  %4206 = vrot.lane.b32.xlu1 %v8392_v56, %s9821_s26 }
 0x8f5   : > { %v8490_v16 = vpop.permute.xlu0 %4112  ;;  %v8492_v5 = vpop.permute.xlu1 %3780 }
 0x8f6   : > { %9914 = vst [vmem:[#allocation120_spill] sm:$0xff] %v8490_v16  ;;  %v9939_v16 = vld [vmem:[#allocation86_spill] sm:$0xff] }
 0x8f7   : > { %3659 = vrot.lane.b32.xlu0 %v8161_v48, %s9680_s18  ;;  %4414 = vrot.lane.b32.xlu1 %v8392_v56, %s9829_s22  ;;  %v3434_v9 = vmul.f32 %v9939_v16, %v3418_v24 }
 0x8f9   : > { %v8498_v38 = vpop.permute.xlu0 %4239  ;;  %v8500_v60 = vpop.permute.xlu1 %3862 }
 0x8fa   : > { %9915 = vst [vmem:[#allocation85_spill] sm:$0xff] %v8498_v38  ;;  %v3517_v38 = vmul.f32 %v9902_v23, %v8392_v56 }
 0x8fb   : > { %3786 = vrot.lane.b32.xlu0 %v8161_v48, %s9682_s24  ;;  %3471 = vrot.lane.b32.xlu1 %v8161_v48, %s9671_s7 }
 0x8fd   : > { %v8506_v35 = vpop.permute.xlu0 %4320  ;;  %v8508_v22 = vpop.permute.xlu1 %3989 }
 0x8fe   : > { %9916 = vst [vmem:[#allocation114_spill] sm:$0xff] %v8506_v35 }
 0x8ff   : > { %3868 = vrot.lane.b32.xlu0 %v8161_v48, %s9689_s20  ;;  %3618 = vrot.lane.b32.xlu1 %v8161_v48, %s9672_s5  ;;  %s9963_s5 = sld [smem:[#allocation35_spill]] }
 0x901   : > { %v8514_v46 = vpop.permute.xlu0 %3469  ;;  %v8516_v36 = vpop.permute.xlu1 %4071 }
 0x902   : > { %9917 = vst [vmem:[#allocation96_spill] sm:$0xff] %v8514_v46 }
 0x903   : > { %3995 = vrot.lane.b32.xlu0 %v8161_v48, %s9690_s3  ;;  %3700 = vrot.lane.b32.xlu1 %v8161_v48, %s9679_s17  ;;  %s975_s17 = sand.u32 1, %s6063_s23  }
 0x905   : > { %v8522_v0 = vpop.permute.xlu0 %3528  ;;  %v8524_v35 = vpop.permute.xlu1 %4198 }
 0x906   : > { %9918 = vst [vmem:[#allocation68_spill] sm:$0xff] %v8524_v35 }
 0x907   : > { %4077 = vrot.lane.b32.xlu0 %v8161_v48, %s9823_s8  ;;  %3827 = vrot.lane.b32.xlu1 %v8161_v48, %s9681_s19  ;;  %s5548_s19 = sshll.u32 %s975_s17, 5 }
 0x908   : > { %s977_s24 = scalar_lea.vmem [#allocation7], %s5548_s19 }
 0x909   : > { %v8530_v2 = vpop.permute.xlu0 %3616  ;;  %v8532_v46 = vpop.permute.xlu1 %4280  ;;  %s5427_s6 = sshll.u32 %s977_s24, 4  ;;  %s9269_s6 = int_to_ptr.vmem [resolvable:$true] %s5427_s6 }
 0x90a   : > { %9919 = vst [vmem:[#allocation121_spill] sm:$0xff] %v8530_v2  ;;  %9920 = vst [vmem:[#allocation119_spill] sm:$0xff] %v8532_v46  ;;  %v3516_v46 = vmul.f32 %v9902_v23, %v8161_v48 }
 0x90b   : > { %4204 = vrot.lane.b32.xlu0 %v8161_v48, %s9821_s26  ;;  %3909 = vrot.lane.b32.xlu1 %v8161_v48, %s9688_s1 }
 0x90d   : > { %v8538_v52 = vpop.permute.xlu0 %3698  ;;  %v8540_v29 = vpop.permute.xlu1 %3565 }
 0x90e   : > { %9921 = vst [vmem:[#allocation115_spill] sm:$0xff] %v8538_v52  ;;  %9922 = vst [vmem:[#allocation107_spill] sm:$0xff] %v8540_v29 }
 0x90f   : > { %4245 = vrot.lane.b32.xlu0 %v8161_v48, %s9824_s10  ;;  %4036 = vrot.lane.b32.xlu1 %v8161_v48, %s9691_s30 }
 0x911   : > { %v8546_v26 = vpop.permute.xlu0 %3757  ;;  %v8548_v2 = vpop.permute.xlu1 %3657 }
 0x912   : > { %9923 = vst [vmem:[#allocation53_spill] sm:$0xff] %v8548_v2 }
 0x913   : > { %3532 = vrot.lane.b32.xlu0 %v3516_v46, %s9692_s2  ;;  %4118 = vrot.lane.b32.xlu1 %v8161_v48, %s9819_s29  ;;  %v3745_v46 = vmul.f32 %v9906_v59, %v8161_v48 }
 0x915   : > { %v8555_v52 = vpop.permute.xlu0 %3825  ;;  %v8557_v29 = vpop.permute.xlu1 %3784 }
 0x916   : > { %9924 = vst [vmem:[#allocation110_spill] sm:$0xff] %v8555_v52  ;;  %9925 = vst [vmem:[#allocation122_spill] sm:$0xff] %v8557_v29 }
 0x917   : > { %4408 = vrot.lane.b32.xlu0 %v8192_v63, %s9829_s22  ;;  %4286 = vrot.lane.b32.xlu1 %v8161_v48, %s9826_s11  ;;  %s6011_s11 = scalar_lea.vmem %s9269_s6, 512 }
 0x918   : > { %p6012_p11 = scmp.ne.s32.totalorder %s9269_s6, %s6011_s11 }
 0x919   : > { %v8563_v35 = vpop.permute.xlu0 %3907  ;;  %v8565_v2 = vpop.permute.xlu1 %3866 }
 0x91a   : > { %9926 = vst [vmem:[#allocation98_spill] sm:$0xff] %v8563_v35  ;;  %9927 = vst [vmem:[#allocation100_spill] sm:$0xff] %v8565_v2  ;;  %p6013_p12 = pnand %p6012_p11, %p6379_p5 }
 0x91b   : > { %3761 = vrot.lane.b32.xlu0 %v3745_v46, %s9695_s9  ;;  %4326 = vrot.lane.b32.xlu1 %v8161_v48, %s9827_s16  ;;  %v4369_v46 = vmul.f32 %v9931_v51, %v8192_v63 }
 0x91c   : > { %p6014_p13 = pneg %p6013_p12 }
 0x91d   : > { %v8572_v52 = vpop.permute.xlu0 %3966  ;;  %v8574_v29 = vpop.permute.xlu1 %3993 }
 0x91e   : > { %9928 = vst [vmem:[#allocation103_spill] sm:$0xff] %v8574_v29  ;;  %v3476_v29 = vsel %vm9932_vm1, %v8294_v41, %v8439_v12  ;;  %v3954_v41 = vmul.f32 %v9909_v1, %v8161_v48  ;;  %vm9943_vm1 = vmmov %vm9942_vm5 }
 0x91f   : > { %4455 = vrot.lane.b32.xlu0 %v8392_v56, %s9813_s12  ;;  %4412 = vrot.lane.b32.xlu1 %v8161_v48, %s9829_s22 }
 0x921   : > { %v8580_v35 = vpop.permute.xlu0 %4034  ;;  %v8582_v2 = vpop.permute.xlu1 %4075 }
 0x922   : > { %9929 = vst [vmem:[#allocation88_spill] sm:$0xff] %v8580_v35  ;;  %9930 = vst [vmem:[#allocation67_spill] sm:$0xff] %v8582_v2  ;;  %v3484_v2 = vsel %vm3447_vm12, %v3476_v29, 0.0  ;;  %v3485_v35 = vsel %vm3448_vm13, %v3477_v3, 0.0  ;;  %v3417_v3 = vsel %vm3407_vm10, %v8164_v13, 0.0  ;;  %v9936_v29 = vld [vmem:[#allocation87_spill] sm:$0xff] }
 0x923   : > { %4383 = vrot.lane.b32.xlu0 %v4369_v46, %s9835_s28  ;;  %3534 = vrot.lane.b32.xlu1 %v3517_v38, %s9692_s2  ;;  %v3496_v12 = vmul.f32 %v9936_v29, %v3484_v2  ;;  %v3497_v38 = vmul.f32 %v9936_v29, %v3485_v35  ;;  %v3572_v46 = vsel %vm9937_vm15, %v8292_v32, %v8474_v58  ;;  %vm9945_vm15 = vmmov %vm9944_vm14  ;;  %s9274_s2 = scalar_lea.sflag [#allocation8], %s975_s17 }
 0x924   : > { %v3623_v2 = vsel %vm9940_vm7, %v8302_v61, %v8447_v34  ;;  %v3624_v32 = vsel %vm9941_vm0, %v8447_v34, %v8408_v14  ;;  %v3433_v35 = vmul.f32 %v9939_v16, %v3417_v3  ;;  %v3955_v61 = vmul.f32 %v9909_v1, %v8392_v56 }
 0x925   : > { %v8600_v49 = vpop.permute.xlu0 %4116  ;;  %v8602_v23 = vpop.permute.xlu1 %4202  ;;  %v4367_v14 = vmul.f32 %v9931_v51, %v8164_v13  ;;  %v3664_v34 = vsel %vm9942_vm5, %v8311_v54, %v8484_v40  ;;  %v3665_v16 = vsel %vm9943_vm1, %v8484_v40, %v8350_v37  ;;  %v3501_v24 = vadd.f32 %v3497_v38, %v3434_v9  ;;  %v9946_v37 = vld [vmem:[#allocation64_spill] sm:$0xff] }
 0x926   : > { %9934 = vst [vmem:[#allocation82_spill] sm:$0xff] %v8600_v49  ;;  %9935 = vst [vmem:[#allocation77_spill] sm:$0xff] %v8602_v23  ;;  %v3573_v23 = vsel %vm9938_vm4, %v8474_v58, %v8342_v50  ;;  %v4163_v50 = vmul.f32 %v9913_v19, %v8161_v48  ;;  %v3580_v58 = vsel %vm3551_vm2, %v3572_v46, 0.0  ;;  %v3705_v1 = vsel %vm9944_vm14, %v8319_v44, %v8456_v28 }
 0x927   : > { %3970 = vrot.lane.b32.xlu0 %v3954_v41, %s9693_s14  ;;  %4406 = vrot.lane.b32.xlu1 %v8157_v8, %s9829_s22  ;;  %v3581_v59 = vsel %vm3552_vm3, %v3573_v23, 0.0  ;;  %v3500_v23 = vadd.f32 %v3496_v12, %v3433_v35  ;;  %v3706_v54 = vsel %vm9945_vm15, %v8456_v28, %v8416_v53  ;;  %v3592_v40 = vmul.f32 %v9946_v37, %v3580_v58 }
 0x928   : > { %v3593_v9 = vmul.f32 %v9946_v37, %v3581_v59  ;;  %vm9947_vm4 = vcmask 1031168   ;;  %v3672_v44 = vsel %vm3407_vm10, %v3664_v34, 0.0  ;;  %v3673_v46 = vsel %vm3408_vm11, %v3665_v16, 0.0 }
 0x929   : > { %v8623_v41 = vpop.permute.xlu0 %4175  ;;  %v8625_v49 = vpop.permute.xlu1 %4243  ;;  %vm9948_vm7 = vmmov %vm9947_vm4  ;;  %v3714_v58 = vsel %vm3448_vm13, %v3706_v54, 0.0  ;;  %v3832_v59 = vsel %vm3831_vm9, %v8327_v57, %v8464_v27  ;;  %vm9951_vm0 = vcmask 891904   ;;  %vm9952_vm5 = vcmask 900096  }
 0x92a   : > { %vm9953_vm1 = vmmov %vm9951_vm0  ;;  %vm9956_vm14 = vcmask 785408   ;;  %vm9957_vm15 = vcmask 769024  }
 0x92b   : > { %4451 = vrot.lane.b32.xlu0 %v8277_v11, %s9813_s12  ;;  %3763 = vrot.lane.b32.xlu1 %v3746_v39, %s9695_s9  ;;  %v3631_v11 = vsel %vm3602_vm6, %v3623_v2, 0.0  ;;  %v3632_v39 = vsel %vm3603_vm8, %v3624_v32, 0.0  ;;  %v9949_v2 = vld [vmem:[#allocation92_spill] sm:$0xff]  ;;  %v3792_v57 = vsel %vm9953_vm1, %v8492_v5, %v8368_v47  ;;  %vm9964_vm1 = vcmask 637952  }
 0x92c   : > { %v3643_v32 = vmul.f32 %v9949_v2, %v3631_v11  ;;  %v3644_v35 = vmul.f32 %v9949_v2, %v3632_v39 }
 0x92d   : > { %v8666_v3 = vpop.permute.xlu0 %4284  ;;  %v3527_v29 = vpop.permute.xlu1 %3526 }
 0x92e   : > { %v3537_v12 = vsel %vm9947_vm4, %v8334_v20, %v3527_v29  ;;  %v3538_v38 = vsel %vm9948_vm7, %v3527_v29, %v8522_v0  ;;  %v3713_v20 = vsel %vm3447_vm12, %v3705_v1, 0.0  ;;  %v4164_v0 = vmul.f32 %v9913_v19, %v8392_v56  ;;  %v9954_v29 = vld [vmem:[#allocation52_spill] sm:$0xff]  ;;  %vm9958_vm4 = vmmov %vm9956_vm14 }
 0x92f   : > { %v3545_v53 = vadd.f32 %v3537_v12, %v3500_v23  ;;  %v3546_v28 = vadd.f32 %v3538_v38, %v3501_v24  ;;  %4179 = vrot.lane.b32.xlu0 %v4163_v50, %s9895_s25  ;;  %3972 = vrot.lane.b32.xlu1 %v3955_v61, %s9693_s14  ;;  %v9950_v23 = vld [vmem:[#allocation80_spill] sm:$0xff]  ;;  %v3791_v19 = vsel %vm9951_vm0, %v8300_v25, %v8492_v5  ;;  %v3840_v5 = vsel %vm3602_vm6, %v3832_v59, 0.0 }
 0x930   : > { %v3684_v24 = vmul.f32 %v9950_v23, %v3672_v44  ;;  %v3685_v11 = vmul.f32 %v9950_v23, %v3673_v46  ;;  %v3725_v37 = vmul.f32 %v9954_v29, %v3713_v20  ;;  %v4372_v25 = vmul.f32 %v9912_v42, %v8392_v56 }
 0x931   : > { %v3596_v50 = vadd.f32 %v3592_v40, %v3545_v53  ;;  %v3597_v34 = vadd.f32 %v3593_v9, %v3546_v28  ;;  %v8691_v61 = vpop.permute.xlu0 %4324  ;;  %v3756_v16 = vpop.permute.xlu1 %3755  ;;  %v3833_v40 = vsel %vm3831_vm9, %v8464_v27, %v8424_v7  ;;  %v3726_v47 = vmul.f32 %v9954_v29, %v3714_v58 }
 0x932   : > { %v3767_v39 = vsel %vm9952_vm5, %v3756_v16, %v8546_v26  ;;  %v4371_v26 = vmul.f32 %v9912_v42, %v8161_v48  ;;  %v3799_v7 = vsel %vm3551_vm2, %v3791_v19, 0.0  ;;  %v3800_v56 = vsel %vm3552_vm3, %v3792_v57, 0.0  ;;  %v4486_v19 = vld [vmem:[%s9963_s5] sm:$0xff]  ;;  %v9968_v57 = vld [vmem:[#allocation70_spill] sm:$0xff] }
 0x933   : > { %v3647_v1 = vadd.f32 %v3643_v32, %v3596_v50  ;;  %v3648_v54 = vadd.f32 %v3644_v35, %v3597_v34  ;;  %4379 = vrot.lane.b32.xlu0 %v4367_v14, %s9835_s28  ;;  %4181 = vrot.lane.b32.xlu1 %v4164_v0, %s9895_s25  ;;  %v3873_v27 = vsel %vm9956_vm14, %v8336_v15, %v8500_v60  ;;  %v3841_v44 = vsel %vm3603_vm8, %v3833_v40, 0.0  ;;  %v9959_v15 = vld [vmem:[#allocation76_spill] sm:$0xff]  ;;  %v9969_v40 = vld [vmem:[#allocation73_spill] sm:$0xff] }
 0x934   : > { %v3874_v46 = vsel %vm9958_vm4, %v8500_v60, %v8377_v6  ;;  %v3852_v2 = vmul.f32 %v9959_v15, %v3840_v5  ;;  %vm9960_vm7 = vcmask 777216   ;;  %v3766_v6 = vsel %vm9952_vm5, %v8359_v18, %v3756_v16  ;;  %v9962_v60 = vld [vmem:[#allocation54_spill] sm:$0xff] }
 0x935   : > { %v3688_v14 = vadd.f32 %v3684_v24, %v3647_v1  ;;  %v3689_v9 = vadd.f32 %v3685_v11, %v3648_v54  ;;  %v8716_v12 = vpop.permute.xlu0 %4410  ;;  %v8718_v38 = vpop.permute.xlu1 %3964  ;;  %vm9961_vm0 = vmmov %vm9960_vm7  ;;  %v3811_v35 = vmul.f32 %v9962_v60, %v3799_v7  ;;  %v3812_v20 = vmul.f32 %v9962_v60, %v3800_v56  ;;  %v9974_v7 = vld [vmem:[#allocation120_spill] sm:$0xff]  ;;  %v9975_v56 = vld [vmem:[#allocation95_spill] sm:$0xff] }
 0x936   : > { %9955 = vst [vmem:[#allocation89_spill] sm:$0xff] %v8716_v12  ;;  %v8730_v42 = vsel %vm9957_vm15, %v8718_v38, %v8572_v52  ;;  %v3914_v52 = vsel %vm9960_vm7, %v8344_v4, %v8472_v31  ;;  %v3915_v32 = vsel %vm9961_vm0, %v8472_v31, %v8433_v55  ;;  %v3853_v4 = vmul.f32 %v9959_v15, %v3841_v44  ;;  %v9977_v15 = vld [vmem:[#allocation106_spill] sm:$0xff] }
 0x937   : > { %v3729_v53 = vadd.f32 %v3725_v37, %v3688_v14  ;;  %v3730_v28 = vadd.f32 %v3726_v47, %v3689_v9  ;;  %4449 = vrot.lane.b32.xlu0 %v8192_v63, %s9813_s12  ;;  %4389 = vrot.lane.b32.xlu1 %v4372_v25, %s9835_s28  ;;  %v3881_v50 = vsel %vm3407_vm10, %v3873_v27, 0.0  ;;  %v3882_v55 = vsel %vm3408_vm11, %v3874_v46, 0.0  ;;  %v9972_v9 = vld [vmem:[#allocation65_spill] sm:$0xff] }
 0x938   : > { %v3922_v31 = vsel %vm3447_vm12, %v3914_v52, 0.0  ;;  %v3923_v34 = vsel %vm3448_vm13, %v3915_v32, 0.0  ;;  %vm9965_vm14 = vcmask 752640   ;;  %vm9966_vm15 = vcmask 760832   ;;  %v9980_v32 = vld [vmem:[#allocation112_spill] sm:$0xff] }
 0x939   : > { %v3774_v63 = vadd.f32 %v3766_v6, %v3729_v53  ;;  %v3775_v0 = vadd.f32 %v3767_v39, %v3730_v28  ;;  %v8751_v58 = vpop.permute.xlu0 %3473  ;;  %v8753_v59 = vpop.permute.xlu1 %4173  ;;  %v4041_v24 = vsel %vm9965_vm14, %v8352_v45, %v8482_v21  ;;  %vm9967_vm4 = vmmov %vm9966_vm15  ;;  %v4368_v39 = vmul.f32 %v9931_v51, %v8157_v8 }
 0x93a   : > { %v8763_v18 = vsel %vm9964_vm1, %v8753_v59, %v8623_v41  ;;  %v4000_v41 = vsel %vm9966_vm15, %v8309_v62, %v8508_v22  ;;  %v4001_v11 = vsel %vm9967_vm4, %v8508_v22, %v8397_v30  ;;  %v3893_v1 = vmul.f32 %v9968_v57, %v3881_v50  ;;  %vm9970_vm7 = vmmov %vm9965_vm14  ;;  %v4487_v50 = vld [vmem:[%s9963_s5 + $0x8] sm:$0xff] }
 0x93b   : > { %v3815_v16 = vadd.f32 %v3811_v35, %v3774_v63  ;;  %v3816_v23 = vadd.f32 %v3812_v20, %v3775_v0  ;;  %4387 = vrot.lane.b32.xlu0 %v4371_v26, %s9835_s28  ;;  %4453 = vrot.lane.b32.xlu1 %v8161_v48, %s9813_s12  ;;  %v3894_v48 = vmul.f32 %v9968_v57, %v3882_v55  ;;  %v4008_v51 = vsel %vm3551_vm2, %v4000_v41, 0.0  ;;  %v9982_v0 = vld [vmem:[#allocation63_spill] sm:$0xff]  ;;  %v9984_v41 = vld [vmem:[#allocation108_spill] sm:$0xff] }
 0x93c   : > { %v3934_v62 = vmul.f32 %v9969_v40, %v3922_v31  ;;  %v3935_v25 = vmul.f32 %v9969_v40, %v3923_v34  ;;  %v4042_v30 = vsel %vm9970_vm7, %v8482_v21, %v8441_v33  ;;  %v4009_v22 = vsel %vm3552_vm3, %v4001_v11, 0.0 }
 0x93d   : > { %v3856_v54 = vadd.f32 %v3852_v2, %v3815_v16  ;;  %v3857_v29 = vadd.f32 %v3853_v4, %v3816_v23  ;;  %v8786_v37 = vpop.permute.xlu0 %3620  ;;  %v8788_v45 = vpop.permute.xlu1 %3530  ;;  %v4049_v5 = vsel %vm3602_vm6, %v4041_v24, 0.0  ;;  %vm9971_vm0 = vcmask 654336   ;;  %v9979_v2 = vld [vmem:[#allocation81_spill] sm:$0xff] }
 0x93e   : > { %v4082_v14 = vsel %vm9971_vm0, %v8361_v10, %v8516_v36  ;;  %vm9973_vm5 = vmmov %vm9971_vm0  ;;  %v4050_v21 = vsel %vm3603_vm8, %v4042_v30, 0.0  ;;  %vm9976_vm1 = vcmask 646144   ;;  %v4021_v52 = vmul.f32 %v9979_v2, %v4009_v22  ;;  %v9983_v24 = vld [vmem:[#allocation85_spill] sm:$0xff]  ;;  %v9992_v30 = vld [vmem:[#allocation71_spill] sm:$0xff] }
 0x93f   : > { %v3897_v26 = vadd.f32 %v3893_v1, %v3856_v54  ;;  %v3898_v47 = vadd.f32 %v3894_v48, %v3857_v29  ;;  %4490 = vperm.xlu0 %6002, %v4486_v19   ;;  %4381 = vrot.lane.b32.xlu1 %v4368_v39, %s9835_s28  ;;  %v4083_v33 = vsel %vm9973_vm5, %v8516_v36, %v9972_v9  ;;  %vm9978_vm14 = vmmov %vm9976_vm1  ;;  %vm9981_vm15 = vcmask 769024   ;;  %v9986_v19 = vld [vmem:[#allocation84_spill] sm:$0xff]  ;;  %v9988_v48 = vld [vmem:[#allocation111_spill] sm:$0xff] }
 0x940   : > { %v4123_v27 = vsel %vm9976_vm1, %v9975_v56, %v9974_v7  ;;  %v4124_v10 = vsel %vm9978_vm14, %v9974_v7, %v9977_v15  ;;  %v4020_v36 = vmul.f32 %v9979_v2, %v4008_v51  ;;  %v3975_v6 = vsel %vm9981_vm15, %v9980_v32, %v8718_v38  ;;  %v9987_v1 = vld [vmem:[#allocation68_spill] sm:$0xff]  ;;  %v9990_v29 = vld [vmem:[#allocation113_spill] sm:$0xff]  ;;  %v9998_v15 = vld [vmem:[#allocation66_spill] sm:$0xff] }
 0x941   : > { %v3938_v44 = vadd.f32 %v3934_v62, %v3897_v26  ;;  %v3939_v46 = vadd.f32 %v3935_v25, %v3898_v47  ;;  %v8813_v53 = vpop.permute.xlu0 %3702  ;;  %v8815_v28 = vpop.permute.xlu1 %3569  ;;  %v4090_v60 = vsel %vm3407_vm10, %v4082_v14, 0.0  ;;  %v4091_v35 = vsel %vm3408_vm11, %v4083_v33, 0.0  ;;  %v9993_v26 = vld [vmem:[#allocation117_spill] sm:$0xff]  ;;  %v10000_v32 = vld [vmem:[#allocation114_spill] sm:$0xff] }
 0x942   : > { %v4061_v4 = vmul.f32 %v9982_v0, %v4049_v5  ;;  %v4062_v55 = vmul.f32 %v9982_v0, %v4050_v21  ;;  %v4131_v38 = vsel %vm3447_vm12, %v4123_v27, 0.0  ;;  %vm9985_vm4 = vcmask 621568   ;;  %v9995_v27 = vld [vmem:[#allocation119_spill] sm:$0xff] }
 0x943   : > { %v3983_v20 = vadd.f32 %v3975_v6, %v3938_v44  ;;  %v3984_v63 = vadd.f32 %v8730_v42, %v3939_v46  ;;  %4404 = vrot.lane.b32.xlu1 %v8164_v13, %s9829_s22  ;;  %v4132_v42 = vsel %vm3448_vm13, %v4124_v10, 0.0  ;;  %v4250_v11 = vsel %vm9985_vm4, %v9984_v41, %v9983_v24  ;;  %vm9994_vm5 = vmmov %vm9985_vm4  ;;  %v9996_v44 = vld [vmem:[#allocation47_spill] sm:$0xff]  ;;  %v10001_v6 = vld [vmem:[#allocation116_spill] sm:$0xff]  ;;  %s5614_s22 = sshll.u32 %s6362_s0, 9  ;;  %s6173_s0 = smov [#allocation7]  }
 0x944   : > { %v4102_v39 = vmul.f32 %v9986_v19, %v4090_v60  ;;  %v4103_v57 = vmul.f32 %v9986_v19, %v4091_v35  ;;  %vm9989_vm7 = vcmask 629760   ;;  %v4143_v51 = vmul.f32 %v9992_v30, %v4131_v38  ;;  %v10003_v35 = vld [vmem:[#allocation118_spill] sm:$0xff]  ;;  %s9272_s28 = scalar_lea.hbm %s6339_s13, %s5614_s22  ;;  %s6015_s16 = sshll.u32 %s6173_s0, 4  ;;  %s6016_s16 = int_to_ptr.vmem [resolvable:$false] %s6015_s16 }
 0x945   : > { %v4024_v31 = vadd.f32 %v4020_v36, %v3983_v20  ;;  %v4025_v34 = vadd.f32 %v4021_v52, %v3984_v63  ;;  %v8837_v16 = vpop.permute.xlu0 %3829  ;;  %v8839_v23 = vpop.permute.xlu1 %3661  ;;  %v4209_v54 = vsel %vm9989_vm7, %v9988_v48, %v9987_v1  ;;  %vm9991_vm0 = vmmov %vm9989_vm7  ;;  %v4144_v22 = vmul.f32 %v9992_v30, %v4132_v42  ;;  %v10005_v63 = vld [vmem:[#allocation109_spill] sm:$0xff]  ;;  %v10009_v48 = vld [vmem:[#allocation55_spill] sm:$0xff]  ;;  %s6017_s18 = scalar_lea.vmem %s6016_s16, 1024  ;;  %p6018_p0 = scmp.lt.s32.totalorder %s9269_s6, %s6016_s16 }
 0x946   : > { %v4210_v40 = vsel %vm9991_vm0, %v9987_v1, %v9990_v29  ;;  %v4251_v47 = vsel %vm9994_vm5, %v9983_v24, %v9993_v26  ;;  %v4258_v21 = vsel %vm3602_vm6, %v4250_v11, 0.0  ;;  %v4217_v7 = vsel %vm3551_vm2, %v4209_v54, 0.0  ;;  %v10008_v42 = vld [vmem:[#allocation61_spill] sm:$0xff]  ;;  %v5389_v1 = vld [vmem:[%s6334_s21] sm:$0xff]  ;;  %p6019_p1 = scmp.lt.s32.totalorder %s6017_s18, %s6011_s11 }
 0x947   : > { %v4065_v62 = vadd.f32 %v4061_v4, %v4024_v31  ;;  %v4066_v25 = vadd.f32 %v4062_v55, %v4025_v34  ;;  %4495 = vperm.xlu1 %6004, %v4487_v50   ;;  %v4218_v56 = vsel %vm3552_vm3, %v4210_v40, 0.0  ;;  %vm9997_vm1 = vcmask 523264   ;;  %v10007_v4 = vld [vmem:[#allocation74_spill] sm:$0xff] }
 0x948   : > { %v4290_v46 = vsel %vm9997_vm1, %v9996_v44, %v9995_v27  ;;  %vm9999_vm14 = vmmov %vm9997_vm1  ;;  %v4259_v52 = vsel %vm3603_vm8, %v4251_v47, 0.0  ;;  %vm10002_vm15 = vcmask 515072   ;;  %vm10006_vm7 = vcmask 637952   ;;  %p6020_p2 = por %p6019_p1, %p6018_p0 }
 0x949   : > { %v4106_v5 = vadd.f32 %v4102_v39, %v4065_v62  ;;  %v4107_v14 = vadd.f32 %v4103_v57, %v4066_v25  ;;  %v8859_v9 = vpop.permute.xlu0 %3911  ;;  %v8861_v33 = vpop.permute.xlu1 %3759  ;;  %v4291_v10 = vsel %vm9999_vm14, %v9995_v27, %v9998_v15  ;;  %v4331_v60 = vsel %vm10002_vm15, %v10001_v6, %v10000_v32  ;;  %vm10004_vm4 = vmmov %vm10002_vm15 }
 0x94a   : > { %v4332_v20 = vsel %vm10004_vm4, %v10000_v32, %v10003_v35  ;;  %v4184_v0 = vsel %vm10006_vm7, %v10005_v63, %v8753_v59  ;;  %v4229_v50 = vmul.f32 %v10007_v4, %v4217_v7  ;;  %v4270_v24 = vmul.f32 %v10008_v42, %v4258_v21  ;;  %v5216_v21 = vld [vmem:[%s6329_s4 + $0x8] sm:$0xff]  ;;  %p6021_p3 = pnand %p6020_p2, %p6014_p13 }
 0x94b   : > { %v4147_v2 = vadd.f32 %v4143_v51, %v4106_v5  ;;  %v4148_v36 = vadd.f32 %v4144_v22, %v4107_v14  ;;  %4447 = vrot.lane.b32.xlu1 %v8157_v8, %s9813_s12  ;;  %v4230_v8 = vmul.f32 %v10007_v4, %v4218_v56  ;;  %v4298_v41 = vsel %vm3407_vm10, %v4290_v46, 0.0  ;;  %v5215_v51 = vld [vmem:[%s6329_s4] sm:$0xff]  ;;  %v10010_v22 = vld [vmem:[#allocation101_spill] sm:$0xff]  ;;  %v10012_v14 = vld [vmem:[#allocation94_spill] sm:$0xff] }
 0x94c   : > { %v4299_v59 = vsel %vm3408_vm11, %v4291_v10, 0.0  ;;  %v4271_v11 = vmul.f32 %v10008_v42, %v4259_v52  ;;  %v4339_v19 = vsel %vm3447_vm12, %v4331_v60, 0.0  ;;  %v4340_v57 = vsel %vm3448_vm13, %v4332_v20, 0.0  ;;  %v5390_v7 = vld [vmem:[%s6334_s21 + $0x8] sm:$0xff] }
 0x94d   : > { %v4192_v55 = vadd.f32 %v4184_v0, %v4147_v2  ;;  %v4193_v38 = vadd.f32 %v8763_v18, %v4148_v36  ;;  %v8891_v31 = vpop.permute.xlu0 %4038  ;;  %v8893_v34 = vpop.permute.xlu1 %3788  ;;  %v4310_v54 = vmul.f32 %v10009_v48, %v4298_v41  ;;  %v4311_v29 = vmul.f32 %v10009_v48, %v4299_v59  ;;  %v10022_v48 = vld [vmem:[#allocation91_spill] sm:$0xff] }
 0x94e   : > { %v4351_v26 = vmul.f32 %v10010_v22, %v4339_v19  ;;  %vm10011_vm0 = vcmask 31744   ;;  %vm10019_vm1 = vcmask 1039360   ;;  %v3405_v19 = vld [vmem:[#allocation5 + $0x18] sm:$0xff]  ;;  %vm10021_vm14 = vcmask 1022976  }
 0x94f   : > { %v4233_v39 = vadd.f32 %v4229_v50, %v4192_v55  ;;  %v4234_v18 = vadd.f32 %v4230_v8, %v4193_v38  ;;  %4445 = vrot.lane.b32.xlu1 %v8164_v13, %s9813_s12  ;;  %5604 = vmatmul.mubr.msk.f32.vlgmr.msra.gmra.mxu0 %vm10011_vm0, %v5215_v51  ;;  %v4352_v13 = vmul.f32 %v10010_v22, %v4340_v57  ;;  %vm10015_vm5 = vmmov %vm10011_vm0  ;;  %v10020_v57 = vld [vmem:[#allocation107_spill] sm:$0xff]  ;;  %vm10024_vm15 = vcmask 1014784   ;;  %v10025_v22 = vld [vmem:[#allocation72_spill] sm:$0xff] }
 0x950   : > { %5299 = vmatprep.mubr.f32.mxu0 %v10012_v14  ;;  %vm10027_vm4 = vcmask 916480   ;;  %vm10028_vm7 = vcmask 1031168   ;;  %vm10031_vm0 = vcmask 908288  }
 0x951   : > { %v4274_v40 = vadd.f32 %v4270_v24, %v4233_v39  ;;  %v4275_v62 = vadd.f32 %v4271_v11, %v4234_v18  ;;  %v8910_v25 = vpop.permute.xlu0 %4120  ;;  %v8912_v30 = vpop.permute.xlu1 %3870  ;;  %v10018_v24 = vld [vmem:[#allocation96_spill] sm:$0xff]  ;;  %v3419_v18 = vsel %vm3407_vm10, %v3405_v19, 0.0 }
 0x953   : > { %5393 = vperm.xlu1 %6004, %v5389_v1   ;;  %v4314_v47 = vadd.f32 %v4310_v54, %v4274_v40  ;;  %v4315_v5 = vadd.f32 %v4311_v29, %v4275_v62  ;;  %5605 = vmatmul.mubr.msk.f32.gmra.mxu0 %vm10015_vm5, %v5216_v21  ;;  %v10023_v62 = vld [vmem:[#allocation121_spill] sm:$0xff]  ;;  %vm10035_vm5 = vcmask 891904  }
 0x954   : > { %5376 = vmatprep.mubr.f32.mxu0 %v10012_v14  ;;  %v10032_v14 = vld [vmem:[#allocation45_spill] sm:$0xff] }
 0x955   : > { %v8921_v56 = vpop.permute.xlu0 %4247  ;;  %v8923_v27 = vpop.permute.xlu1 %3968  ;;  %v8925_v44 = vadd.f32 %v4351_v26, %v4314_v47  ;;  %v8927_v46 = vadd.f32 %v4352_v13, %v4315_v5  ;;  %v3435_v26 = vmul.f32 %v10025_v22, %v3419_v18  ;;  %v10026_v47 = vld [vmem:[#allocation53_spill] sm:$0xff]  ;;  %v10030_v18 = vld [vmem:[#allocation115_spill] sm:$0xff] }
 0x957   : > { %10013 = vst [vmem:[#allocation59_spill] sm:$0xff] %v8925_v44  ;;  %10014 = vst [vmem:[#allocation75_spill] sm:$0xff] %v8927_v46  ;;  %5398 = vperm.xlu1 %6004, %v5390_v7  }
 0x959   : > { %v8931_v15 = vpop.permute.xlu0 %4288  ;;  %v8933_v10 = vpop.permute.xlu1 %3997 }
 0x95d   : > { %v8935_v2 = vpop.permute.xlu0 %4328  ;;  %v8937_v36 = vpop.permute.xlu1 %4079 }
 0x961   : > { %v8939_v52 = vpop.permute.xlu0 %4385  ;;  %v8941_v32 = vpop.permute.xlu1 %4177 }
 0x962   : > { %10016 = vst [vmem:[#allocation93_spill] sm:$0xff] %v8939_v52 }
 0x965   : > { %v3568_v6 = vpop.permute.xlu0 %3567  ;;  %v8943_v60 = vpop.permute.xlu1 %4206 }
 0x966   : > { %v3574_v1 = vsel %vm10021_vm14, %v10020_v57, %v3568_v6  ;;  %vm10040_vm14 = vcmask 785408  }
 0x967   : > { %v3582_v13 = vsel %vm3551_vm2, %v3574_v1, 0.0 }
 0x969   : > { %v8945_v35 = vpop.permute.xlu0 %3659  ;;  %v8947_v20 = vpop.permute.xlu1 %4414 }
 0x96a   : > { %10017 = vst [vmem:[#allocation79_spill] sm:$0xff] %v8947_v20  ;;  %v3666_v5 = vsel %vm10027_vm4, %v10026_v47, %v8945_v35  ;;  %v10036_v20 = vld [vmem:[#allocation50_spill] sm:$0xff]  ;;  %vm10043_vm4 = vcmask 900096  }
 0x96b   : > { %v3674_v47 = vsel %vm3407_vm10, %v3666_v5, 0.0 }
 0x96d   : > { %v8949_v63 = vpop.permute.xlu0 %3786  ;;  %v3472_v0 = vpop.permute.xlu1 %3471 }
 0x96e   : > { %v3478_v41 = vsel %vm10019_vm1, %v10018_v24, %v3472_v0 }
 0x96f   : > { %v3486_v39 = vsel %vm3447_vm12, %v3478_v41, 0.0 }
 0x970   : > { %v3498_v54 = vmul.f32 %v10022_v48, %v3486_v39  ;;  %v10029_v39 = vld [vmem:[#allocation90_spill] sm:$0xff] }
 0x971   : > { %v8951_v4 = vpop.permute.xlu0 %3868  ;;  %v3619_v50 = vpop.permute.xlu1 %3618  ;;  %v3594_v57 = vmul.f32 %v10029_v39, %v3582_v13 }
 0x972   : > { %v3625_v51 = vsel %vm10024_vm15, %v10023_v62, %v3619_v50  ;;  %v3502_v7 = vadd.f32 %v3498_v54, %v3435_v26  ;;  %vm10041_vm15 = vcmask 1022976  }
 0x973   : > { %v3633_v41 = vsel %vm3602_vm6, %v3625_v51, 0.0  ;;  %v10034_v51 = vld [vmem:[#allocation122_spill] sm:$0xff] }
 0x974   : > { %v3645_v54 = vmul.f32 %v10032_v14, %v3633_v41 }
 0x975   : > { %v8953_v8 = vpop.permute.xlu0 %3995  ;;  %v8955_v55 = vpop.permute.xlu1 %3700 }
 0x976   : > { %v3707_v1 = vsel %vm10031_vm0, %v10030_v18, %v8955_v55  ;;  %v3686_v18 = vmul.f32 %v10036_v20, %v3674_v47  ;;  %vm10046_vm0 = vcmask 777216  }
 0x977   : > { %v3715_v13 = vsel %vm3447_vm12, %v3707_v1, 0.0 }
 0x979   : > { %v8957_v38 = vpop.permute.xlu0 %4077  ;;  %v8959_v42 = vpop.permute.xlu1 %3827 }
 0x97d   : > { %v8963_v59 = vpop.permute.xlu0 %4204  ;;  %v8965_v11 = vpop.permute.xlu1 %3909 }
 0x981   : > { %v8974_v29 = vpop.permute.xlu0 %4245  ;;  %v8976_v40 = vpop.permute.xlu1 %4036 }
 0x985   : > { %v3533_v21 = vpop.permute.xlu0 %3532  ;;  %v8986_v24 = vpop.permute.xlu1 %4118 }
 0x986   : > { %v3539_v19 = vsel %vm10028_vm7, %v8788_v45, %v3533_v21  ;;  %v3793_v45 = vsel %vm10035_vm5, %v10034_v51, %v8949_v63  ;;  %vm10044_vm7 = vcmask 1014784   ;;  %vm10049_vm5 = vcmask 916480  }
 0x987   : > { %v3547_v62 = vadd.f32 %v3539_v19, %v3502_v7  ;;  %v3479_v7 = vsel %vm10019_vm1, %v3472_v0, %v8751_v58  ;;  %v3406_v19 = vld [vmem:[#allocation5 + $0x20] sm:$0xff]  ;;  %v3801_v41 = vsel %vm3551_vm2, %v3793_v45, 0.0  ;;  %v3575_v45 = vsel %vm10041_vm15, %v3568_v6, %v8815_v28 }
 0x988   : > { %v3487_v47 = vsel %vm3448_vm13, %v3479_v7, 0.0  ;;  %v10039_v58 = vld [vmem:[#allocation100_spill] sm:$0xff]  ;;  %vm10053_vm1 = vcmask 760832   ;;  %vm10055_vm15 = vcmask 1031168  }
 0x989   : > { %v3598_v26 = vadd.f32 %v3594_v57, %v3547_v62  ;;  %v8999_v44 = vpop.permute.xlu0 %4408  ;;  %v9001_v46 = vpop.permute.xlu1 %4286  ;;  %v10037_v57 = vld [vmem:[#allocation58_spill] sm:$0xff]  ;;  %v3875_v0 = vsel %vm10040_vm14, %v10039_v58, %v8951_v4  ;;  %vm10054_vm14 = vcmask 908288  }
 0x98a   : > { %10033 = vst [vmem:[#allocation48_spill] sm:$0xff] %v8999_v44  ;;  %v3727_v62 = vmul.f32 %v10037_v57, %v3715_v13  ;;  %v10038_v44 = vld [vmem:[#allocation110_spill] sm:$0xff] }
 0x98b   : > { %v3649_v5 = vadd.f32 %v3645_v54, %v3598_v26  ;;  %v3834_v52 = vsel %vm3831_vm9, %v10038_v44, %v8959_v42  ;;  %v3420_v26 = vsel %vm3408_vm11, %v3406_v19, 0.0  ;;  %v10042_v44 = vld [vmem:[#allocation56_spill] sm:$0xff] }
 0x98c   : > { %v3813_v13 = vmul.f32 %v10042_v44, %v3801_v41  ;;  %v3436_v41 = vmul.f32 %v10025_v22, %v3420_v26  ;;  %v10052_v22 = vld [vmem:[#allocation103_spill] sm:$0xff] }
 0x98d   : > { %v9017_v51 = vpop.permute.xlu0 %3761  ;;  %v3690_v12 = vadd.f32 %v3686_v18, %v3649_v5  ;;  %v9019_v1 = vpop.permute.xlu1 %4326  ;;  %v3842_v18 = vsel %vm3602_vm6, %v3834_v52, 0.0  ;;  %v3499_v5 = vmul.f32 %v10022_v48, %v3487_v47  ;;  %v3883_v52 = vsel %vm3407_vm10, %v3875_v0, 0.0 }
 0x98e   : > { %v3768_v7 = vsel %vm10043_vm4, %v8861_v33, %v9017_v51  ;;  %v3583_v33 = vsel %vm3552_vm3, %v3575_v45, 0.0  ;;  %v4002_v26 = vsel %vm10053_vm1, %v10052_v22, %v8953_v8  ;;  %vm10058_vm4 = vcmask 752640  }
 0x98f   : > { %v3731_v54 = vadd.f32 %v3727_v62, %v3690_v12  ;;  %v3626_v12 = vsel %vm10044_vm7, %v3619_v50, %v8786_v37  ;;  %v10045_v62 = vld [vmem:[#allocation98_spill] sm:$0xff]  ;;  %v3667_v37 = vsel %vm10049_vm5, %v8945_v35, %v8839_v23  ;;  %v10050_v50 = vld [vmem:[#allocation44_spill] sm:$0xff]  ;;  %v3595_v35 = vmul.f32 %v10029_v39, %v3583_v33 }
 0x990   : > { %v3916_v19 = vsel %vm10046_vm0, %v10045_v62, %v8965_v11  ;;  %v3854_v48 = vmul.f32 %v10050_v50, %v3842_v18  ;;  %v10051_v62 = vld [vmem:[#allocation60_spill] sm:$0xff]  ;;  %v3708_v18 = vsel %vm10054_vm14, %v8955_v55, %v8813_v53  ;;  %vm10059_vm7 = vcmask 891904   ;;  %v10060_v55 = vld [vmem:[#allocation67_spill] sm:$0xff] }
 0x991   : > { %v3776_v58 = vadd.f32 %v3768_v7, %v3731_v54  ;;  %v9042_v28 = vpop.permute.xlu0 %4455  ;;  %v9044_v6 = vpop.permute.xlu1 %4412  ;;  %v3634_v54 = vsel %vm3603_vm8, %v3626_v12, 0.0  ;;  %v3924_v7 = vsel %vm3447_vm12, %v3916_v19, 0.0  ;;  %v3895_v0 = vmul.f32 %v10051_v62, %v3883_v52  ;;  %v10056_v19 = vld [vmem:[#allocation78_spill] sm:$0xff]  ;;  %v10057_v52 = vld [vmem:[#allocation88_spill] sm:$0xff] }
 0x992   : > { %10047 = vst [vmem:[#allocation87_spill] sm:$0xff] %v9042_v28  ;;  %10048 = vst [vmem:[#allocation86_spill] sm:$0xff] %v9044_v6  ;;  %v3503_v6 = vadd.f32 %v3499_v5, %v3436_v41  ;;  %v3794_v39 = vsel %vm10059_vm7, %v8949_v63, %v8893_v34  ;;  %v3646_v41 = vmul.f32 %v10032_v14, %v3634_v54  ;;  %v4010_v33 = vsel %vm3551_vm2, %v4002_v26, 0.0  ;;  %v10063_v63 = vld [vmem:[#allocation62_spill] sm:$0xff] }
 0x993   : > { %v3817_v47 = vadd.f32 %v3813_v13, %v3776_v58  ;;  %v3675_v13 = vsel %vm3408_vm11, %v3667_v37, 0.0  ;;  %v3936_v58 = vmul.f32 %v10056_v19, %v3924_v7  ;;  %v3716_v53 = vsel %vm3448_vm13, %v3708_v18, 0.0  ;;  %v10064_v26 = vld [vmem:[#allocation82_spill] sm:$0xff] }
 0x994   : > { %vm10061_vm0 = vcmask 654336   ;;  %v3687_v22 = vmul.f32 %v10036_v20, %v3675_v13  ;;  %vm10062_vm5 = vcmask 769024   ;;  %v4022_v54 = vmul.f32 %v10063_v63, %v4010_v33 }
 0x995   : > { %v3858_v45 = vadd.f32 %v3854_v48, %v3817_v47  ;;  %v9063_v28 = vpop.permute.xlu0 %4383  ;;  %v3535_v23 = vpop.permute.xlu1 %3534  ;;  %v4043_v48 = vsel %vm10058_vm4, %v10057_v52, %v8976_v40  ;;  %vm10065_vm1 = vcmask 646144   ;;  %v3802_v18 = vsel %vm3552_vm3, %v3794_v39, 0.0 }
 0x996   : > { %v3540_v12 = vsel %vm10055_vm15, %v3533_v21, %v3535_v23  ;;  %v4084_v21 = vsel %vm10061_vm0, %v10060_v55, %v8957_v38  ;;  %v4051_v34 = vsel %vm3602_vm6, %v4043_v48, 0.0  ;;  %vm10066_vm14 = vcmask 785408  }
 0x997   : > { %v3548_v47 = vadd.f32 %v3540_v12, %v3503_v6  ;;  %v3899_v5 = vadd.f32 %v3895_v0, %v3858_v45  ;;  %v4125_v45 = vsel %vm10065_vm1, %v10064_v26, %v8986_v24  ;;  %v3876_v20 = vsel %vm10066_vm14, %v8951_v4, %v8912_v30  ;;  %v10068_v30 = vld [vmem:[#allocation57_spill] sm:$0xff] }
 0x998   : > { %v3728_v13 = vmul.f32 %v10037_v57, %v3716_v53  ;;  %v3835_v12 = vsel %vm3831_vm9, %v8959_v42, %v8837_v16  ;;  %v3814_v53 = vmul.f32 %v10042_v44, %v3802_v18  ;;  %v3884_v55 = vsel %vm3408_vm11, %v3876_v20, 0.0  ;;  %v10072_v44 = vld [vmem:[#allocation77_spill] sm:$0xff] }
 0x999   : > { %v3599_v37 = vadd.f32 %v3595_v35, %v3548_v47  ;;  %v3971_v7 = vpop.permute.xlu0 %3970  ;;  %v3940_v6 = vadd.f32 %v3936_v58, %v3899_v5  ;;  %v9087_v0 = vpop.permute.xlu1 %4406  ;;  %v10067_v58 = vld [vmem:[#allocation46_spill] sm:$0xff]  ;;  %v3843_v16 = vsel %vm3603_vm8, %v3835_v12, 0.0  ;;  %vm10069_vm9 = vcmask 900096  }
 0x99a   : > { %v3977_v14 = vsel %vm10062_vm5, %v8923_v27, %v3971_v7  ;;  %v4092_v27 = vsel %vm3407_vm10, %v4084_v21, 0.0  ;;  %v4063_v52 = vmul.f32 %v10067_v58, %v4051_v34  ;;  %vm10070_vm15 = vcmask 777216  }
 0x99b   : > { %v3650_v23 = vadd.f32 %v3646_v41, %v3599_v37  ;;  %v3985_v35 = vadd.f32 %v3977_v14, %v3940_v6  ;;  %v4133_v41 = vsel %vm3447_vm12, %v4125_v45, 0.0  ;;  %v4104_v4 = vmul.f32 %v10068_v30, %v4092_v27  ;;  %v10071_v37 = vld [vmem:[#allocation49_spill] sm:$0xff] }
 0x99c   : > { %v3917_v21 = vsel %vm10070_vm15, %v8965_v11, %v8859_v9  ;;  %v4145_v6 = vmul.f32 %v10071_v37, %v4133_v41  ;;  %vm10073_vm4 = vcmask 629760   ;;  %v3855_v45 = vmul.f32 %v10050_v50, %v3843_v16 }
 0x99d   : > { %v4026_v48 = vadd.f32 %v4022_v54, %v3985_v35  ;;  %v9110_v47 = vpop.permute.xlu0 %4451  ;;  %v3691_v5 = vadd.f32 %v3687_v22, %v3650_v23  ;;  %v3764_v39 = vpop.permute.xlu1 %3763  ;;  %v4211_v54 = vsel %vm10073_vm4, %v10072_v44, %v8963_v59  ;;  %v3925_v18 = vsel %vm3448_vm13, %v3917_v21, 0.0 }
 0x99e   : > { %v3769_v42 = vsel %vm10069_vm9, %v9017_v51, %v3764_v39  ;;  %v3896_v51 = vmul.f32 %v10051_v62, %v3884_v55  ;;  %vm10074_vm7 = vcmask 760832   ;;  %v4219_v11 = vsel %vm3551_vm2, %v4211_v54, 0.0 }
 0x99f   : > { %v4067_v57 = vadd.f32 %v4063_v52, %v4026_v48  ;;  %v3732_v33 = vadd.f32 %v3728_v13, %v3691_v5  ;;  %v4003_v9 = vsel %vm10074_vm7, %v8953_v8, %v8933_v10  ;;  %vm10075_vm0 = vcmask 637952   ;;  %v10078_v48 = vld [vmem:[#allocation51_spill] sm:$0xff] }
 0x9a0   : > { %vm10076_vm5 = vcmask 621568   ;;  %v3937_v12 = vmul.f32 %v10056_v19, %v3925_v18  ;;  %vm10077_vm1 = vcmask 752640   ;;  %v4011_v8 = vsel %vm3552_vm3, %v4003_v9, 0.0 }
 0x9a1   : > { %v3777_v22 = vadd.f32 %v3769_v42, %v3732_v33  ;;  %v4108_v34 = vadd.f32 %v4104_v4, %v4067_v57  ;;  %v3973_v14 = vpop.permute.xlu1 %3972  ;;  %v4180_v26 = vpop.permute.xlu0 %4179  ;;  %v4252_v50 = vsel %vm10076_vm5, %v8625_v49, %v8974_v29  ;;  %v4044_v52 = vsel %vm10077_vm1, %v8976_v40, %v8891_v31 }
 0x9a2   : > { %v4186_v13 = vsel %vm10075_vm0, %v8941_v32, %v4180_v26  ;;  %v4231_v5 = vmul.f32 %v10078_v48, %v4219_v11  ;;  %vm10079_vm14 = vcmask 654336   ;;  %v4260_v32 = vsel %vm3602_vm6, %v4252_v50, 0.0 }
 0x9a3   : > { %v3818_v23 = vadd.f32 %v3814_v53, %v3777_v22  ;;  %v4149_v35 = vadd.f32 %v4145_v6, %v4108_v34  ;;  %v4085_v49 = vsel %vm10079_vm14, %v8957_v38, %v8937_v36  ;;  %v4052_v41 = vsel %vm3603_vm8, %v4044_v52, 0.0  ;;  %v10083_v53 = vld [vmem:[#allocation83_spill] sm:$0xff]  ;;  %v10086_v34 = vld [vmem:[#allocation97_spill] sm:$0xff] }
 0x9a4   : > { %vm10080_vm9 = vcmask 523264   ;;  %vm10081_vm15 = vcmask 769024   ;;  %v4023_v57 = vmul.f32 %v10063_v63, %v4011_v8  ;;  %vm10082_vm4 = vcmask 646144  }
 0x9a5   : > { %v3859_v20 = vadd.f32 %v3855_v45, %v3818_v23  ;;  %v4194_v27 = vadd.f32 %v4186_v13, %v4149_v35  ;;  %v4182_v62 = vpop.permute.xlu1 %4181  ;;  %v9150_v39 = vpop.permute.xlu0 %4379  ;;  %v4292_v31 = vsel %vm10080_vm9, %v8666_v3, %v9001_v46  ;;  %v3978_v4 = vsel %vm10081_vm15, %v3971_v7, %v3973_v14 }
 0x9a6   : > { %v4126_v36 = vsel %vm10082_vm4, %v8986_v24, %v8910_v25  ;;  %v4093_v33 = vsel %vm3408_vm11, %v4085_v49, 0.0  ;;  %v4272_v55 = vmul.f32 %v10083_v53, %v4260_v32  ;;  %v4064_v42 = vmul.f32 %v10067_v58, %v4052_v41 }
 0x9a7   : > { %v3900_v10 = vadd.f32 %v3896_v51, %v3859_v20  ;;  %v4235_v40 = vadd.f32 %v4231_v5, %v4194_v27  ;;  %v4300_v3 = vsel %vm3407_vm10, %v4292_v31, 0.0  ;;  %v4134_v7 = vsel %vm3448_vm13, %v4126_v36, 0.0  ;;  %vm10087_vm10 = vmmov %vm10076_vm5  ;;  %v10102_v36 = vld [vmem:[#allocation102_spill] sm:$0xff] }
 0x9a8   : > { %vm10084_vm7 = vcmask 515072   ;;  %v4105_v6 = vmul.f32 %v10068_v30, %v4093_v33  ;;  %vm10085_vm0 = vcmask 629760   ;;  %v4312_v14 = vmul.f32 %v10086_v34, %v4300_v3  ;;  %vm10088_vm5 = vmmov %vm10080_vm9  ;;  %v10104_v3 = vld [vmem:[#allocation69_spill] sm:$0xff] }
 0x9a9   : > { %v3941_v19 = vadd.f32 %v3937_v12, %v3900_v10  ;;  %v4390_v16 = vpop.permute.xlu1 %4389  ;;  %v4333_v25 = vsel %vm10084_vm7, %v8691_v61, %v9019_v1  ;;  %v4276_v24 = vadd.f32 %v4272_v55, %v4235_v40  ;;  %v9178_v63 = vpop.permute.xlu0 %4449  ;;  %v4212_v58 = vsel %vm10085_vm0, %v8963_v59, %v8943_v60  ;;  %v10100_v40 = vld [vmem:[#allocation87_spill] sm:$0xff] }
 0x9aa   : > { %v4253_v44 = vsel %vm10087_vm10, %v8974_v29, %v8921_v56  ;;  %v4146_v54 = vmul.f32 %v10071_v37, %v4134_v7  ;;  %v4341_v61 = vsel %vm3447_vm12, %v4333_v25, 0.0  ;;  %v4220_v30 = vsel %vm3552_vm3, %v4212_v58, 0.0  ;;  %v10089_v56 = vld [vmem:[#allocation99_spill] sm:$0xff]  ;;  %vm10091_vm12 = vmmov %vm10084_vm7 }
 0x9ab   : > { %v3986_v38 = vadd.f32 %v3978_v4, %v3941_v19  ;;  %v4316_v23 = vadd.f32 %v4312_v14, %v4276_v24  ;;  %v4293_v60 = vsel %vm10088_vm5, %v9001_v46, %v8931_v15  ;;  %v4261_v51 = vsel %vm3603_vm8, %v4253_v44, 0.0  ;;  %v10092_v46 = vld [vmem:[#allocation86_spill] sm:$0xff]  ;;  %v10093_v15 = vld [vmem:[#allocation89_spill] sm:$0xff] }
 0x9ac   : > { %v4353_v29 = vmul.f32 %v10089_v56, %v4341_v61  ;;  %vm10090_vm1 = vcmask 637952   ;;  %v4232_v9 = vmul.f32 %v10078_v48, %v4220_v30  ;;  %v4334_v11 = vsel %vm10091_vm12, %v9019_v1, %v8935_v2  ;;  %v10098_v48 = vld [vmem:[#allocation79_spill] sm:$0xff] }
 0x9ad   : > { %v4027_v21 = vadd.f32 %v4023_v57, %v3986_v38  ;;  %v4454_v35 = vpop.permute.xlu1 %4453  ;;  %v4187_v37 = vsel %vm10090_vm1, %v4180_v26, %v4182_v62  ;;  %v4388_v18 = vpop.permute.xlu0 %4387  ;;  %v4301_v13 = vsel %vm3408_vm11, %v4293_v60, 0.0  ;;  %vm10094_vm14 = vcmask 498688   ;;  %v10095_v26 = vld [vmem:[#allocation93_spill] sm:$0xff] }
 0x9ae   : > { %v4419_v50 = vsel %vm10094_vm14, %v10093_v15, %v10092_v46  ;;  %v4357_v27 = vadd.f32 %v4353_v29, %v4316_v23  ;;  %v4273_v12 = vmul.f32 %v10083_v53, %v4261_v51  ;;  %vm10096_vm9 = vcmask 506880   ;;  %vm10099_vm11 = vmmov %vm10094_vm14  ;;  %v10109_v23 = vld [vmem:[#allocation75_spill] sm:$0xff] }
 0x9af   : > { %v4068_v22 = vadd.f32 %v4064_v42, %v4027_v21  ;;  %v4394_v62 = vsel %vm10096_vm9, %v10095_v26, %v4388_v18  ;;  %v4342_v10 = vsel %vm3448_vm13, %v4334_v11, 0.0  ;;  %vm10097_vm15 = vcmask 490496   ;;  %vm10103_vm4 = vmmov %vm10096_vm9 }
 0x9b0   : > { %v4460_v2 = vsel %vm10097_vm15, %v9110_v47, %v4454_v35  ;;  %v4313_v8 = vmul.f32 %v10086_v34, %v4301_v13  ;;  %v4420_v5 = vsel %vm10099_vm11, %v10092_v46, %v10098_v48  ;;  %v4427_v49 = vsel %vm3551_vm2, %v4419_v50, 0.0  ;;  %vm10101_vm13 = vmmov %vm10097_vm15  ;;  %v10113_v13 = vld [vmem:[#allocation105_spill] sm:$0xff]  ;;  %v10114_v50 = vld [vmem:[#allocation59_spill] sm:$0xff] }
 0x9b1   : > { %v4109_v45 = vadd.f32 %v4105_v6, %v4068_v22  ;;  %v4382_v1 = vpop.permute.xlu1 %4381  ;;  %v4402_v19 = vadd.f32 %v4394_v62, %v4357_v27  ;;  %v4354_v41 = vmul.f32 %v10089_v56, %v4342_v10  ;;  %v4461_v4 = vsel %vm10101_vm13, %v4454_v35, %v10100_v40  ;;  %v10105_v6 = vld [vmem:[#allocation48_spill] sm:$0xff]  ;;  %vm10106_vm7 = vmmov %vm10099_vm11 }
 0x9b2   : > { %v4468_v47 = vsel %vm3602_vm6, %v4460_v2, 0.0  ;;  %v4428_v57 = vsel %vm3552_vm3, %v4420_v5, 0.0  ;;  %v4439_v38 = vmul.f32 %v10102_v36, %v4427_v49  ;;  %v4395_v53 = vsel %vm10103_vm4, %v4388_v18, %v4390_v16  ;;  %vm10107_vm0 = vmmov %vm10103_vm4  ;;  %v10110_v56 = vld [vmem:[#allocation104_spill] sm:$0xff]  ;;  %v10117_v5 = vld [vmem:[#allocation94_spill] sm:$0xff] }
 0x9b3   : > { %v4150_v59 = vadd.f32 %v4146_v54, %v4109_v45  ;;  %v4469_v42 = vsel %vm3603_vm8, %v4461_v4, 0.0  ;;  %v4480_v21 = vmul.f32 %v10104_v3, %v4468_v47  ;;  %v4440_v25 = vmul.f32 %v10102_v36, %v4428_v57  ;;  %vm10108_vm10 = vmmov %vm10106_vm7  ;;  %v5213_v48 = vld [vmem:[%s6324_s27] sm:$0xff]  ;;  %v5214_v49 = vld [vmem:[%s6324_s27 + $0x8] sm:$0xff] }
 0x9b4   : > { %v4443_v55 = vadd.f32 %v4439_v38, %v4402_v19  ;;  %v4418_v58 = vsel %vm10106_vm7, %v9087_v0, %v10105_v6  ;;  %v4481_v34 = vmul.f32 %v10104_v3, %v4469_v42  ;;  %v4393_v16 = vsel %vm10107_vm0, %v4382_v1, %v9063_v28  ;;  %vm10111_vm5 = vmmov %vm10101_vm13 }
 0x9b5   : > { %v4195_v20 = vadd.f32 %v4187_v37, %v4150_v59  ;;  %v4405_v7 = vpop.permute.xlu1 %4404  ;;  %v4426_v45 = vsel %vm3552_vm3, %v4418_v58, 0.0  ;;  %v4401_v35 = vadd.f32 %v4393_v16, %v10109_v23  ;;  %vm10112_vm1 = vmmov %vm10107_vm0  ;;  %vm10116_vm3 = vcmask 130048  }
 0x9b6   : > { %v4484_v14 = vadd.f32 %v4480_v21, %v4443_v55  ;;  %v4417_v54 = vsel %vm10108_vm10, %v4405_v7, %v9087_v0  ;;  %v4438_v29 = vmul.f32 %v10110_v56, %v4426_v45  ;;  %v4392_v0 = vsel %vm10112_vm1, %v9150_v39, %v4382_v1 }
 0x9b7   : > { %v4236_v52 = vadd.f32 %v4232_v9, %v4195_v20  ;;  %v4425_v59 = vsel %vm3551_vm2, %v4417_v54, 0.0  ;;  %v4400_v27 = vadd.f32 %v4392_v0, %v10114_v50  ;;  %vm10115_vm2 = vmmov %vm10111_vm5 }
 0x9b8   : > { %v4442_v11 = vadd.f32 %v4438_v29, %v4401_v35  ;;  %v4437_v20 = vmul.f32 %v10110_v56, %v4425_v59 }
 0x9b9   : > { %v4277_v32 = vadd.f32 %v4273_v12, %v4236_v52 }
 0x9ba   : > { %v4491_v39 = vpop.permute.xlu0 %4490  ;;  %v4441_v52 = vadd.f32 %v4437_v20, %v4400_v27 }
 0x9bb   : > { %v4317_v31 = vadd.f32 %v4313_v8, %v4277_v32 }
 0x9bd   : > { %v4358_v33 = vadd.f32 %v4354_v41, %v4317_v31 }
 0x9bf   : > { %v4403_v24 = vadd.f32 %v4395_v53, %v4358_v33 }
 0x9c1   : > { %v4444_v22 = vadd.f32 %v4440_v25, %v4403_v24 }
 0x9c2   : > { %v4496_v44 = vpop.permute.xlu1 %4495 }
 0x9c3   : > { %v4485_v61 = vadd.f32 %v4481_v34, %v4444_v22  ;;  %v4500_v30 = vadd.f32 %v4496_v44, %v4484_v14 }
 0x9c5   : > { %v4501_v60 = vadd.f32 %v4496_v44, %v4485_v61  ;;  %v4504_v18 = vmax.f32 %v4500_v30, 0.0 }
 0x9c6   : > { %v4448_v51 = vpop.permute.xlu1 %4447 }
 0x9c7   : > { %v4505_v28 = vmax.f32 %v4501_v60, 0.0  ;;  %v4459_v37 = vsel %vm10111_vm5, %v4448_v51, %v9178_v63 }
 0x9c8   : > { %v4467_v9 = vsel %vm3603_vm8, %v4459_v37, 0.0  ;;  %vm10118_vm8 = vmmov %vm10116_vm3 }
 0x9c9   : > { %v4479_v46 = vmul.f32 %v10113_v13, %v4467_v9  ;;  %5340 = vmatprep.subr.mxu0 %v4505_v28 }
 0x9ca   : > { %v4446_v15 = vpop.permute.xlu1 %4445  ;;  %5341 = vmatpush1.msra.mxu0 %v4504_v18 }
 0x9cb   : > { %v4483_v12 = vadd.f32 %v4479_v46, %v4442_v11  ;;  %v4458_v63 = vsel %vm10115_vm2, %v4446_v15, %v4448_v51 }
 0x9cc   : > { %v4466_v43 = vsel %vm3602_vm6, %v4458_v63, 0.0 }
 0x9cd   : > { %v4478_v26 = vmul.f32 %v10113_v13, %v4466_v43  ;;  %v4499_v62 = vadd.f32 %v4491_v39, %v4483_v12 }
 0x9ce   : > { %v5394_v31 = vpop.permute.xlu1 %5393 }
 0x9cf   : > { %v4482_v10 = vadd.f32 %v4478_v26, %v4441_v52  ;;  %v4503_v2 = vmax.f32 %v4499_v62, 0.0 }
 0x9d1   : > { %v4498_v1 = vadd.f32 %v4491_v39, %v4482_v10  ;;  %5342 = vmatprep.subr.mxu0 %v4503_v2 }
 0x9d2   : > { %v5399_v42 = vpop.permute.xlu1 %5398 }
 0x9d3   : > { %v4502_v8 = vmax.f32 %v4498_v1, 0.0 }
 0x9d5   : > { %5343 = vmatpush1.msra.mxu0 %v4502_v8 }
 0x9d6   : > { %5606 = vmatmul.mubr.msk.f32.vlgmr.msra.gmra.mxu0 %vm10116_vm3, %v5213_v48 }
 0x9d7   : > { %5382 = vmatprep.mubr.f32.mxu0 %v10117_v5 }
 0x9da   : > { %5607 = vmatmul.mubr.msk.f32.gmra.mxu0 %vm10118_vm8, %v5214_v49 }
 0xa0f   : > { %v5295_v17 = vpop.f32.mrf.mxu0 }
 0xa11   : > { %v5297_v32 = vpop.f32.mrf.mxu0 }
 0xa13   : > { %v5301_v19 = vpop.f32.mrf.mxu0 }
 0xa15   : > { %v5303_v41 = vpop.f32.mrf.mxu0 }
 0xa96   : > { %v5378_v40 = vpop.f32.mrf.mxu0 }
 0xa97   : > { %v5379_v4 = vadd.f32 %v5378_v40, %v5295_v17 }
 0xa98   : > { %v5380_v47 = vpop.f32.mrf.mxu0 }
 0xa99   : > { %v5401_v57 = vadd.f32 %v5394_v31, %v5379_v4  ;;  %v5381_v36 = vadd.f32 %v5380_v47, %v5297_v32 }
 0xa9a   : > { %v5384_v38 = vpop.f32.mrf.mxu0 }
 0xa9b   : > { %v5405_v33 = vmax.f32 %v5401_v57, 0.0  ;;  %v5402_v53 = vadd.f32 %v5394_v31, %v5381_v36  ;;  %v5385_v55 = vadd.f32 %v5384_v38, %v5301_v19 }
 0xa9c   : > { %v5386_v3 = vpop.f32.mrf.mxu0 }
 0xa9d   : > { %5409 = vst [vmem:[%s977_s24] sm:$0xff] %v5405_v33  ;;  %v5406_v21 = vmax.f32 %v5402_v53, 0.0  ;;  %v5403_v7 = vadd.f32 %v5399_v42, %v5385_v55  ;;  %v5387_v25 = vadd.f32 %v5386_v3, %v5303_v41 }
 0xa9f   : > { %5410 = vst [vmem:[%s977_s24 + $0x8] sm:$0xff] %v5406_v21  ;;  %v5407_v24 = vmax.f32 %v5403_v7, 0.0  ;;  %v5404_v6 = vadd.f32 %v5399_v42, %v5387_v25 }
 0xaa1   : > { %5411 = vst [vmem:[%s977_s24 + $0x10] sm:$0xff] %v5407_v24  ;;  %v5408_v58 = vmax.f32 %v5404_v6, 0.0 }
 0xaa3   : > { %5412 = vst [vmem:[%s977_s24 + $0x18] sm:$0xff] %v5408_v58 }
 0xaa4   : > { %6024 = shalt.err (!%p6021_p3)
}
 0xaa5   : > { %s6025_s7 = scalar_lea.hbm %s9272_s28, 512  ;;  %s6029_s3 = scalar_lea.hbm %s6339_s13, 1024 }
 0xaa6   : > { %p6026_p4 = scmp.ne.s32.totalorder %s9272_s28, %s6025_s7  ;;  %p6030_p9 = scmp.lt.s32.totalorder %s9272_s28, %s6339_s13 }
 0xaa7   : > { %p6031_p10 = scmp.lt.s32.totalorder %s6029_s3, %s6025_s7 }
 0xaa8   : > { %p6027_p7 = pnand %p6026_p4, %p6379_p5 }
 0xaa9   : > { %p6032_p11 = por %p6031_p10, %p6030_p9 }
 0xaaa   : > { %p6028_p8 = pneg %p6027_p7 }
 0xaac   : > { %p6033_p12 = pnand %p6032_p11, %p6028_p8 }
 0xaae   : > { %6036 = shalt.err (!%p6033_p12)
}
 0xaaf   : > { %s6174_s1 = smov 256   ;;  %s6175_s20 = smov 16  }
 0xab0   : > { %5747 = dma.vmem_to_hbm [thread:$0]  (%p6379_p5), %s9269_s6, 512, %s9272_s28, %s9274_s2, %s6174_s1, %s6174_s1, %s6175_s20  }
 0xab1 PF: > { %s10119_s30 = sld [smem:[#allocation40_spill]] }
 0xab2   : > { %s10120_s14 = sld [smem:[#allocation38_spill]] }
 0xab7   : > { %p5753_p13 = scmp.ge.s32.totalorder %s10119_s30, 2 }
 0xab8   : > { %s5442_s8 = sand.u32 1, %s10120_s14  }
 0xab9   : > { %p5750_p0 = pnand %p5753_p13, %p6383_p6  ;;  %s5443_s10 = scalar_lea.sflag [#allocation8], %s5442_s8 }
 0xabb   : > { %p5751_p1 = pneg %p5750_p0 }
 0xabd   : > { %6054 = dma.done.wait (%p5751_p1), %s5443_s10, 512  }
 0xabe   : > { %6056 = vsyncadd (%p5751_p1), %s5443_s10, 4294966784  ;;  %s10122_s28 = sld [smem:[#allocation41_spill]]  ;;  %s10125_s22 = smov %s6063_s23 }
 0xabf   : > { %s10123_s12 = sld [smem:[#allocation39_spill]] }
 0xac0   : > { %s10124_s26 = sld [smem:[#allocation42_spill]] }
 0xac4   : > { %p73_p2 = scmp.ge.s32.totalorder %s10122_s28, 4  }
 0xac5   : > { %s10126_s23 = smov %s10123_s12 }
 0xac6   :  { %75 = sbr.rel (!%p73_p2) target bundleno = 70 (0x46), region = 224 }
 0xacb   :  { %5448 = vsyncpa [#allocation8], 1 }
 0xacc   :  { %5450 = vsyncpa [#allocation8 + $0x1], 1 }

</bundles_post_ra>
